<compile_context>
chip_gen: v7x
topology: tpu7x:2x2x1
jax: 0.10.0
libtpu: 0.0.40
codegen_flags: <defaults>
</compile_context>

<pallas_src>
import jax
import jax.numpy as jnp
from jax import lax
from jax.experimental import pallas as pl
from jax.experimental.pallas import tpu as pltpu


# ---------------------------------------------------------------------------
# In-kernel helpers (operate on VMEM refs / values only)
# ---------------------------------------------------------------------------
def _fill_padded(pad_ref, parts, mode):
    """Write a spatially 1-padded image into pad_ref (H+2, W+2, Cp).

    parts: list of (value (H, W, c_i), channel_offset) -- writing several
    parts at different channel offsets fuses the channel concat (the concat
    tensor never exists).
    mode: "zero" (Conv2d padding=1) or "reflect" (ReflectionPad2d(1)).
    """
    Hp, Wp, Cp = pad_ref.shape
    H, W = Hp - 2, Wp - 2
    if mode == "zero":
        pad_ref[...] = jnp.zeros((Hp, Wp, Cp), pad_ref.dtype)
    # Interior.
    for val, c0 in parts:
        c = val.shape[-1]
        pad_ref[1:H + 1, 1:W + 1, c0:c0 + c] = val
    if mode == "reflect":
        # Padded row 0 <- unpadded row 1 (pad row 2); row H+1 <- pad row H-1.
        pad_ref[0:1, 1:W + 1, :] = pad_ref[2:3, 1:W + 1, :]
        pad_ref[H + 1:Hp, 1:W + 1, :] = pad_ref[H - 1:H, 1:W + 1, :]
        # Columns (covers corners): col 0 <- padded col 2; col W+1 <- col W-1.
        pad_ref[:, 0:1, :] = pad_ref[:, 2:3, :]
        pad_ref[:, W + 1:Wp, :] = pad_ref[:, W - 1:W, :]


def _conv3x3_im2col(pad_ref, cols_ref, w_packed):
    """3x3 conv as ONE matmul over an in-VMEM im2col.

    cols[:, (dh*3+dw)*Cin + ci] = pad[dh+h, dw+w, ci]; then a single
    (H*W, 9*Cin) x (9*Cin, Cout) dot with f32 accumulation.
    """
    Hp, Wp, Cin = pad_ref.shape
    H, W = Hp - 2, Wp - 2
    xp = pad_ref[...]
    for dh in range(3):
        for dw in range(3):
            k = dh * 3 + dw
            cols_ref[:, k * Cin:(k + 1) * Cin] = (
                xp[dh:dh + H, dw:dw + W, :].reshape(H * W, Cin))
    return jnp.dot(cols_ref[...], w_packed,
                   preferred_element_type=jnp.float32)


def _instance_norm(xv):
    """InstanceNorm2d(affine=False), eps=1e-5, biased variance.

    Two-pass (mean, then centered sum of squares) in f32 for robustness;
    rsqrt goes to the EUP.  xv: (H*W, C).
    """
    m = xv.shape[0]
    mean = jnp.sum(xv, axis=0, keepdims=True) * (1.0 / m)
    xc = xv - mean
    var = jnp.sum(xc * xc, axis=0, keepdims=True) * (1.0 / m)
    return xc * lax.rsqrt(var + 1e-5)


# ---------------------------------------------------------------------------
# Fused kernel: up_conv + concat + ConvBlock(conv1 + IN + ReLU, conv2 + IN)
# ---------------------------------------------------------------------------
def _transform_up_kernel(x_ref, y_ref, w_up_ref, b_up_ref, w1_ref, w2_ref,
                         o_ref, pad_ref, cols_ref):
    x = x_ref[0]                        # (H, W, C)   f32
    y = y_ref[0]                        # (H, W, 2C)  f32
    H, W, C = x.shape

    # --- up_conv: Conv2d(2C -> C, 3x3, stride 1, zero pad 1) + bias + ReLU --
    _fill_padded(pad_ref, [(y, 0)], "zero")
    y_up = _conv3x3_im2col(pad_ref, cols_ref, w_up_ref[...])        # (HW, C)
    y_up = jnp.maximum(y_up + b_up_ref[...], 0.0).reshape(H, W, C)

    # --- ConvBlock conv1: ReflectionPad(1) + Conv2d(2C -> 2C) + IN + ReLU ---
    # concat([x, y_up], channel) is fused: the two halves are written at
    # channel offsets 0 and C of the padded scratch.
    _fill_padded(pad_ref, [(x, 0), (y_up, C)], "reflect")
    h1 = _conv3x3_im2col(pad_ref, cols_ref, w1_ref[...])            # (HW, 2C)
    # Conv bias is a per-channel constant -> cancelled exactly by the
    # following InstanceNorm(affine=False); skipping it saves a VPU pass.
    h1 = jnp.maximum(_instance_norm(h1), 0.0).reshape(H, W, 2 * C)

    # --- ConvBlock conv2: ReflectionPad(1) + Conv2d(2C -> out) + IN ---------
    _fill_padded(pad_ref, [(h1, 0)], "reflect")
    h2 = _conv3x3_im2col(pad_ref, cols_ref, w2_ref[...])            # (HW, out)
    h2 = _instance_norm(h2)

    # Output written at the real out_f width (no 128 padding, no wrapper slice).
    o_ref[0] = h2.reshape(H, W, o_ref.shape[-1]).astype(o_ref.dtype)


def transform_up_forward(x, y, params):
    """x: (N, C, H, W), y: (N, 2C, H, W) NCHW (like the PyTorch module).
    Returns (N, out_features, H, W) f32."""
    N, C, H, W = x.shape
    C2 = y.shape[1]
    out_f = params["w2"].shape[-1]
    assert C2 == 2 * C and H >= 2 and W >= 2

    # NCHW -> NHWC once (tiny); all kernel compute is channels-last.
    x_nhwc = jnp.transpose(x, (0, 2, 3, 1)).astype(jnp.float32)
    y_nhwc = jnp.transpose(y, (0, 2, 3, 1)).astype(jnp.float32)

    # Pack each HWIO (3, 3, Cin, Cout) weight ONCE into the im2col layout
    # (9*Cin, Cout): K row index = (dh*3 + dw)*Cin + ci matches the in-kernel
    # tap order.  No padding of K or Cout to 128.
    w_up = params["w_up"].reshape(9 * C2, C).astype(jnp.float32)
    w1 = params["w1"].reshape(9 * C2, C2).astype(jnp.float32)
    w2 = params["w2"].reshape(9 * C2, out_f).astype(jnp.float32)
    b_up = params["b_up"].astype(jnp.float32)                       # (1, C)

    # All three convs in this module take Cin == 2C, so one padded-image
    # scratch and one im2col scratch serve the whole fused chain.
    out_nhwc = pl.pallas_call(
        _transform_up_kernel,
        out_shape=jax.ShapeDtypeStruct((N, H, W, out_f), jnp.float32),
        grid=(N,),
        in_specs=[
            pl.BlockSpec((1, H, W, C), lambda n: (n, 0, 0, 0)),
            pl.BlockSpec((1, H, W, C2), lambda n: (n, 0, 0, 0)),
            pl.BlockSpec((9 * C2, C), lambda n: (0, 0)),
            pl.BlockSpec((1, C), lambda n: (0, 0)),
            pl.BlockSpec((9 * C2, C2), lambda n: (0, 0)),
            pl.BlockSpec((9 * C2, out_f), lambda n: (0, 0)),
        ],
        out_specs=pl.BlockSpec((1, H, W, out_f), lambda n: (n, 0, 0, 0)),
        scratch_shapes=[
            pltpu.VMEM((H + 2, W + 2, C2), jnp.float32),   # padded image
            pltpu.VMEM((H * W, 9 * C2), jnp.float32),      # K-packed im2col
        ],
        compiler_params=pltpu.CompilerParams(
            dimension_semantics=("parallel",),
        ),
    )(x_nhwc, y_nhwc, w_up, b_up, w1, w2)

    return jnp.transpose(out_nhwc, (0, 3, 1, 2))


# ---------------------------------------------------------------------------
# Deterministic parameter init (shapes mirror transform_up_layer.__init__)
# ---------------------------------------------------------------------------
def init_params(key, in_features, out_features):
    c = in_features
    k = jax.random.split(key, 6)
    scale = 0.1
    return {
        # up_conv: Conv2d(2C, C, 3, 1, 1)        (HWIO weight layout)
        "w_up": scale * jax.random.normal(k[0], (3, 3, 2 * c, c), jnp.float32),
        "b_up": scale * jax.random.normal(k[1], (1, c), jnp.float32),
        # ConvBlock conv1: Conv2d(2C, 2C, 3)
        "w1": scale * jax.random.normal(k[2], (3, 3, 2 * c, 2 * c), jnp.float32),
        "b1": scale * jax.random.normal(k[3], (1, 2 * c), jnp.float32),
        # ConvBlock conv2: Conv2d(2C, out_features, 3)
        "w2": scale * jax.random.normal(k[4], (3, 3, 2 * c, out_features),
                                        jnp.float32),
        "b2": scale * jax.random.normal(k[5], (1, out_features), jnp.float32),
    }


# ---------------------------------------------------------------------------
# Pure-JAX/XLA reference of the PyTorch forward pass (for validation).
# Note: it applies b1/b2 -- the kernel skips them because they cancel under
# InstanceNorm(affine=False); the comparison confirms the cancellation.
# ---------------------------------------------------------------------------
def reference_forward(x, y, params):
    def conv3x3(img, w_hwio, b, padding):
        out = lax.conv_general_dilated(
            img, w_hwio, window_strides=(1, 1), padding=padding,
            dimension_numbers=("NCHW", "HWIO", "NCHW"),
            precision=lax.Precision.HIGHEST)
        return out + b.reshape(1, -1, 1, 1)

    def inorm(z):
        m = jnp.mean(z, axis=(2, 3), keepdims=True)
        v = jnp.mean(jnp.square(z - m), axis=(2, 3), keepdims=True)
        return (z - m) * lax.rsqrt(v + 1e-5)

    y_up = jax.nn.relu(conv3x3(y, params["w_up"], params["b_up"][0], "SAME"))
    cat = jnp.concatenate([x, y_up], axis=1)
    cat_p = jnp.pad(cat, ((0, 0), (0, 0), (1, 1), (1, 1)), mode="reflect")
    h1 = jax.nn.relu(inorm(conv3x3(cat_p, params["w1"], params["b1"][0],
                                   "VALID")))
    h1_p = jnp.pad(h1, ((0, 0), (0, 0), (1, 1), (1, 1)), mode="reflect")
    return inorm(conv3x3(h1_p, params["w2"], params["b2"][0], "VALID"))


if __name__ == "__main__":
    in_features = 4
    out_features = 8
    N, H, W = 2, 16, 16

    key = jax.random.PRNGKey(0)
    kx, ky, kp = jax.random.split(key, 3)

    # Inputs in NCHW like the PyTorch module.
    x = jax.random.normal(kx, (N, in_features, H, W), jnp.float32)
    y = jax.random.normal(ky, (N, 2 * in_features, H, W), jnp.float32)
    params = init_params(kp, in_features, out_features)

    out = jax.jit(transform_up_forward)(x, y, params)
    out = jax.block_until_ready(out)

    assert out.shape == (N, out_features, H, W), out.shape
    assert bool(jnp.all(jnp.isfinite(out)))

    # Validate against the pure-JAX reference (generous tolerance: the kernel
    # is f32 end-to-end; slack covers MXU matmul precision differences).
    ref = reference_forward(x, y, params)
    max_err = float(jnp.max(jnp.abs(out - ref)))
    assert max_err < 5e-2, f"max abs error vs reference: {max_err}"

    print("KERNEL_OK")
</pallas_src>

<mosaic_0001>
module attributes {stable_mosaic.version = 11 : i64} {
  func.func @_transform_up_kernel(%arg0: i32, %arg1: memref<1x16x16x4xf32, #tpu.memory_space<vmem>>, %arg2: memref<1x16x16x8xf32, #tpu.memory_space<vmem>>, %arg3: memref<72x4xf32, #tpu.memory_space<vmem>>, %arg4: memref<1x4xf32, #tpu.memory_space<vmem>>, %arg5: memref<72x8xf32, #tpu.memory_space<vmem>>, %arg6: memref<72x8xf32, #tpu.memory_space<vmem>>, %arg7: memref<1x16x16x8xf32, #tpu.memory_space<vmem>>, %arg8: memref<18x18x8xf32, #tpu.memory_space<vmem>>, %arg9: memref<256x72xf32, #tpu.memory_space<vmem>>) attributes {dimension_semantics = [#tpu.dimension_semantics<parallel>], iteration_bounds = array<i64: 2>, scalar_prefetch = 0 : i64, scratch_operands = 2 : i64, tpu.core_type = #tpu.core_type<tc>, window_params = [{transform_indices = @transform_0, window_bounds = array<i64: 1, 16, 16, 4>}, {transform_indices = @transform_1, window_bounds = array<i64: 1, 16, 16, 8>}, {pipeline_mode = #tpu.pipeline_mode<synchronous>, transform_indices = @transform_2, window_bounds = array<i64: 72, 4>}, {pipeline_mode = #tpu.pipeline_mode<synchronous>, transform_indices = @transform_3, window_bounds = array<i64: 1, 4>}, {pipeline_mode = #tpu.pipeline_mode<synchronous>, transform_indices = @transform_4, window_bounds = array<i64: 72, 8>}, {pipeline_mode = #tpu.pipeline_mode<synchronous>, transform_indices = @transform_5, window_bounds = array<i64: 72, 8>}, {transform_indices = @transform_6, window_bounds = array<i64: 1, 16, 16, 8>}]} {
    %c0 = arith.constant 0 : index
    %c0_0 = arith.constant 0 : index
    %c0_1 = arith.constant 0 : index
    %c0_2 = arith.constant 0 : index
    %0 = vector.load %arg1[%c0, %c0_0, %c0_1, %c0_2] : memref<1x16x16x4xf32, #tpu.memory_space<vmem>>, vector<1x16x16x4xf32>
    %1 = vector.shape_cast %0 : vector<1x16x16x4xf32> to vector<16x16x4xf32>
    %c0_3 = arith.constant 0 : index
    %c0_4 = arith.constant 0 : index
    %c0_5 = arith.constant 0 : index
    %c0_6 = arith.constant 0 : index
    %2 = vector.load %arg2[%c0_3, %c0_4, %c0_5, %c0_6] : memref<1x16x16x8xf32, #tpu.memory_space<vmem>>, vector<1x16x16x8xf32>
    %3 = vector.shape_cast %2 : vector<1x16x16x8xf32> to vector<16x16x8xf32>
    %cst = arith.constant 0.000000e+00 : f32
    %4 = vector.broadcast %cst : f32 to vector<18x18x8xf32>
    %c0_7 = arith.constant 0 : index
    %c0_8 = arith.constant 0 : index
    %c0_9 = arith.constant 0 : index
    %5 = vector.load %arg8[%c0_7, %c0_8, %c0_9] : memref<18x18x8xf32, #tpu.memory_space<vmem>>, vector<18x18x8xf32>
    tpu.vector_store %arg8[%c0_7, %c0_8, %c0_9], %4 {strides = array<i32>} : memref<18x18x8xf32, #tpu.memory_space<vmem>>, vector<18x18x8xf32>,
    %c1 = arith.constant 1 : index
    %c1_10 = arith.constant 1 : index
    %c0_11 = arith.constant 0 : index
    %6 = vector.load %arg8[%c1, %c1_10, %c0_11] : memref<18x18x8xf32, #tpu.memory_space<vmem>>, vector<16x16x8xf32>
    tpu.vector_store %arg8[%c1, %c1_10, %c0_11], %3 {strides = array<i32>} : memref<18x18x8xf32, #tpu.memory_space<vmem>>, vector<16x16x8xf32>,
    %c0_12 = arith.constant 0 : index
    %c0_13 = arith.constant 0 : index
    %7 = vector.load %arg3[%c0_12, %c0_13] : memref<72x4xf32, #tpu.memory_space<vmem>>, vector<72x4xf32>
    %c0_14 = arith.constant 0 : index
    %c0_15 = arith.constant 0 : index
    %c0_16 = arith.constant 0 : index
    %8 = vector.load %arg8[%c0_14, %c0_15, %c0_16] : memref<18x18x8xf32, #tpu.memory_space<vmem>>, vector<18x18x8xf32>
    %9 = vector.extract_strided_slice %8 {offsets = [0, 0, 0], sizes = [16, 16, 8], strides = [1, 1, 1]} : vector<18x18x8xf32> to vector<16x16x8xf32>
    %10 = vector.shape_cast %9 : vector<16x16x8xf32> to vector<256x8xf32>
    %c0_17 = arith.constant 0 : index
    %c0_18 = arith.constant 0 : index
    %11 = vector.load %arg9[%c0_17, %c0_18] : memref<256x72xf32, #tpu.memory_space<vmem>>, vector<256x8xf32>
    tpu.vector_store %arg9[%c0_17, %c0_18], %10 {strides = array<i32>} : memref<256x72xf32, #tpu.memory_space<vmem>>, vector<256x8xf32>,
    %12 = vector.extract_strided_slice %8 {offsets = [0, 1, 0], sizes = [16, 16, 8], strides = [1, 1, 1]} : vector<18x18x8xf32> to vector<16x16x8xf32>
    %13 = vector.shape_cast %12 : vector<16x16x8xf32> to vector<256x8xf32>
    %c0_19 = arith.constant 0 : index
    %c8 = arith.constant 8 : index
    %14 = vector.load %arg9[%c0_19, %c8] : memref<256x72xf32, #tpu.memory_space<vmem>>, vector<256x8xf32>
    tpu.vector_store %arg9[%c0_19, %c8], %13 {strides = array<i32>} : memref<256x72xf32, #tpu.memory_space<vmem>>, vector<256x8xf32>,
    %15 = vector.extract_strided_slice %8 {offsets = [0, 2, 0], sizes = [16, 16, 8], strides = [1, 1, 1]} : vector<18x18x8xf32> to vector<16x16x8xf32>
    %16 = vector.shape_cast %15 : vector<16x16x8xf32> to vector<256x8xf32>
    %c0_20 = arith.constant 0 : index
    %c16 = arith.constant 16 : index
    %17 = vector.load %arg9[%c0_20, %c16] : memref<256x72xf32, #tpu.memory_space<vmem>>, vector<256x8xf32>
    tpu.vector_store %arg9[%c0_20, %c16], %16 {strides = array<i32>} : memref<256x72xf32, #tpu.memory_space<vmem>>, vector<256x8xf32>,
    %18 = vector.extract_strided_slice %8 {offsets = [1, 0, 0], sizes = [16, 16, 8], strides = [1, 1, 1]} : vector<18x18x8xf32> to vector<16x16x8xf32>
    %19 = vector.shape_cast %18 : vector<16x16x8xf32> to vector<256x8xf32>
    %c0_21 = arith.constant 0 : index
    %c24 = arith.constant 24 : index
    %20 = vector.load %arg9[%c0_21, %c24] : memref<256x72xf32, #tpu.memory_space<vmem>>, vector<256x8xf32>
    tpu.vector_store %arg9[%c0_21, %c24], %19 {strides = array<i32>} : memref<256x72xf32, #tpu.memory_space<vmem>>, vector<256x8xf32>,
    %21 = vector.extract_strided_slice %8 {offsets = [1, 1, 0], sizes = [16, 16, 8], strides = [1, 1, 1]} : vector<18x18x8xf32> to vector<16x16x8xf32>
    %22 = vector.shape_cast %21 : vector<16x16x8xf32> to vector<256x8xf32>
    %c0_22 = arith.constant 0 : index
    %c32 = arith.constant 32 : index
    %23 = vector.load %arg9[%c0_22, %c32] : memref<256x72xf32, #tpu.memory_space<vmem>>, vector<256x8xf32>
    tpu.vector_store %arg9[%c0_22, %c32], %22 {strides = array<i32>} : memref<256x72xf32, #tpu.memory_space<vmem>>, vector<256x8xf32>,
    %24 = vector.extract_strided_slice %8 {offsets = [1, 2, 0], sizes = [16, 16, 8], strides = [1, 1, 1]} : vector<18x18x8xf32> to vector<16x16x8xf32>
    %25 = vector.shape_cast %24 : vector<16x16x8xf32> to vector<256x8xf32>
    %c0_23 = arith.constant 0 : index
    %c40 = arith.constant 40 : index
    %26 = vector.load %arg9[%c0_23, %c40] : memref<256x72xf32, #tpu.memory_space<vmem>>, vector<256x8xf32>
    tpu.vector_store %arg9[%c0_23, %c40], %25 {strides = array<i32>} : memref<256x72xf32, #tpu.memory_space<vmem>>, vector<256x8xf32>,
    %27 = vector.extract_strided_slice %8 {offsets = [2, 0, 0], sizes = [16, 16, 8], strides = [1, 1, 1]} : vector<18x18x8xf32> to vector<16x16x8xf32>
    %28 = vector.shape_cast %27 : vector<16x16x8xf32> to vector<256x8xf32>
    %c0_24 = arith.constant 0 : index
    %c48 = arith.constant 48 : index
    %29 = vector.load %arg9[%c0_24, %c48] : memref<256x72xf32, #tpu.memory_space<vmem>>, vector<256x8xf32>
    tpu.vector_store %arg9[%c0_24, %c48], %28 {strides = array<i32>} : memref<256x72xf32, #tpu.memory_space<vmem>>, vector<256x8xf32>,
    %30 = vector.extract_strided_slice %8 {offsets = [2, 1, 0], sizes = [16, 16, 8], strides = [1, 1, 1]} : vector<18x18x8xf32> to vector<16x16x8xf32>
    %31 = vector.shape_cast %30 : vector<16x16x8xf32> to vector<256x8xf32>
    %c0_25 = arith.constant 0 : index
    %c56 = arith.constant 56 : index
    %32 = vector.load %arg9[%c0_25, %c56] : memref<256x72xf32, #tpu.memory_space<vmem>>, vector<256x8xf32>
    tpu.vector_store %arg9[%c0_25, %c56], %31 {strides = array<i32>} : memref<256x72xf32, #tpu.memory_space<vmem>>, vector<256x8xf32>,
    %33 = vector.extract_strided_slice %8 {offsets = [2, 2, 0], sizes = [16, 16, 8], strides = [1, 1, 1]} : vector<18x18x8xf32> to vector<16x16x8xf32>
    %34 = vector.shape_cast %33 : vector<16x16x8xf32> to vector<256x8xf32>
    %c0_26 = arith.constant 0 : index
    %c64 = arith.constant 64 : index
    %35 = vector.load %arg9[%c0_26, %c64] : memref<256x72xf32, #tpu.memory_space<vmem>>, vector<256x8xf32>
    tpu.vector_store %arg9[%c0_26, %c64], %34 {strides = array<i32>} : memref<256x72xf32, #tpu.memory_space<vmem>>, vector<256x8xf32>,
    %c0_27 = arith.constant 0 : index
    %c0_28 = arith.constant 0 : index
    %36 = vector.load %arg9[%c0_27, %c0_28] : memref<256x72xf32, #tpu.memory_space<vmem>>, vector<256x72xf32>
    %cst_29 = arith.constant dense<0.000000e+00> : vector<256x4xf32>
    %37 = tpu.matmul %36, %7, %cst_29 {dimension_numbers = #tpu.dot_dimension_numbers<[1], [0], [0], [1], [0, 0, 1, 1], [], []>} : vector<256x72xf32>, vector<72x4xf32>, vector<256x4xf32> -> vector<256x4xf32>
    %c0_30 = arith.constant 0 : index
    %c0_31 = arith.constant 0 : index
    %38 = vector.load %arg4[%c0_30, %c0_31] : memref<1x4xf32, #tpu.memory_space<vmem>>, vector<1x4xf32>
    %39 = vector.broadcast %38 : vector<1x4xf32> to vector<256x4xf32>
    %40 = arith.addf %37, %39 : vector<256x4xf32>
    %cst_32 = arith.constant 0.000000e+00 : f32
    %41 = vector.broadcast %cst_32 : f32 to vector<256x4xf32>
    %42 = arith.maximumf %40, %41 : vector<256x4xf32>
    %43 = vector.shape_cast %42 : vector<256x4xf32> to vector<16x16x4xf32>
    %c1_33 = arith.constant 1 : index
    %c1_34 = arith.constant 1 : index
    %c0_35 = arith.constant 0 : index
    %44 = vector.load %arg8[%c1_33, %c1_34, %c0_35] : memref<18x18x8xf32, #tpu.memory_space<vmem>>, vector<16x16x4xf32>
    tpu.vector_store %arg8[%c1_33, %c1_34, %c0_35], %1 {strides = array<i32>} : memref<18x18x8xf32, #tpu.memory_space<vmem>>, vector<16x16x4xf32>,
    %c1_36 = arith.constant 1 : index
    %c1_37 = arith.constant 1 : index
    %c4 = arith.constant 4 : index
    %45 = vector.load %arg8[%c1_36, %c1_37, %c4] : memref<18x18x8xf32, #tpu.memory_space<vmem>>, vector<16x16x4xf32>
    tpu.vector_store %arg8[%c1_36, %c1_37, %c4], %43 {strides = array<i32>} : memref<18x18x8xf32, #tpu.memory_space<vmem>>, vector<16x16x4xf32>,
    %c2 = arith.constant 2 : index
    %c1_38 = arith.constant 1 : index
    %c0_39 = arith.constant 0 : index
    %46 = vector.load %arg8[%c2, %c1_38, %c0_39] : memref<18x18x8xf32, #tpu.memory_space<vmem>>, vector<1x16x8xf32>
    %c0_40 = arith.constant 0 : index
    %c1_41 = arith.constant 1 : index
    %c0_42 = arith.constant 0 : index
    %47 = vector.load %arg8[%c0_40, %c1_41, %c0_42] : memref<18x18x8xf32, #tpu.memory_space<vmem>>, vector<1x16x8xf32>
    tpu.vector_store %arg8[%c0_40, %c1_41, %c0_42], %46 {strides = array<i32>} : memref<18x18x8xf32, #tpu.memory_space<vmem>>, vector<1x16x8xf32>,
    %c15 = arith.constant 15 : index
    %c1_43 = arith.constant 1 : index
    %c0_44 = arith.constant 0 : index
    %48 = vector.load %arg8[%c15, %c1_43, %c0_44] : memref<18x18x8xf32, #tpu.memory_space<vmem>>, vector<1x16x8xf32>
    %c17 = arith.constant 17 : index
    %c1_45 = arith.constant 1 : index
    %c0_46 = arith.constant 0 : index
    %49 = vector.load %arg8[%c17, %c1_45, %c0_46] : memref<18x18x8xf32, #tpu.memory_space<vmem>>, vector<1x16x8xf32>
    tpu.vector_store %arg8[%c17, %c1_45, %c0_46], %48 {strides = array<i32>} : memref<18x18x8xf32, #tpu.memory_space<vmem>>, vector<1x16x8xf32>,
    %c0_47 = arith.constant 0 : index
    %c2_48 = arith.constant 2 : index
    %c0_49 = arith.constant 0 : index
    %50 = vector.load %arg8[%c0_47, %c2_48, %c0_49] : memref<18x18x8xf32, #tpu.memory_space<vmem>>, vector<18x1x8xf32>
    %c0_50 = arith.constant 0 : index
    %c0_51 = arith.constant 0 : index
    %c0_52 = arith.constant 0 : index
    %51 = vector.load %arg8[%c0_50, %c0_51, %c0_52] : memref<18x18x8xf32, #tpu.memory_space<vmem>>, vector<18x1x8xf32>
    tpu.vector_store %arg8[%c0_50, %c0_51, %c0_52], %50 {strides = array<i32>} : memref<18x18x8xf32, #tpu.memory_space<vmem>>, vector<18x1x8xf32>,
    %c0_53 = arith.constant 0 : index
    %c15_54 = arith.constant 15 : index
    %c0_55 = arith.constant 0 : index
    %52 = vector.load %arg8[%c0_53, %c15_54, %c0_55] : memref<18x18x8xf32, #tpu.memory_space<vmem>>, vector<18x1x8xf32>
    %c0_56 = arith.constant 0 : index
    %c17_57 = arith.constant 17 : index
    %c0_58 = arith.constant 0 : index
    %53 = vector.load %arg8[%c0_56, %c17_57, %c0_58] : memref<18x18x8xf32, #tpu.memory_space<vmem>>, vector<18x1x8xf32>
    tpu.vector_store %arg8[%c0_56, %c17_57, %c0_58], %52 {strides = array<i32>} : memref<18x18x8xf32, #tpu.memory_space<vmem>>, vector<18x1x8xf32>,
    %c0_59 = arith.constant 0 : index
    %c0_60 = arith.constant 0 : index
    %54 = vector.load %arg5[%c0_59, %c0_60] : memref<72x8xf32, #tpu.memory_space<vmem>>, vector<72x8xf32>
    %c0_61 = arith.constant 0 : index
    %c0_62 = arith.constant 0 : index
    %c0_63 = arith.constant 0 : index
    %55 = vector.load %arg8[%c0_61, %c0_62, %c0_63] : memref<18x18x8xf32, #tpu.memory_space<vmem>>, vector<18x18x8xf32>
    %56 = vector.extract_strided_slice %55 {offsets = [0, 0, 0], sizes = [16, 16, 8], strides = [1, 1, 1]} : vector<18x18x8xf32> to vector<16x16x8xf32>
    %57 = vector.shape_cast %56 : vector<16x16x8xf32> to vector<256x8xf32>
    %c0_64 = arith.constant 0 : index
    %c0_65 = arith.constant 0 : index
    %58 = vector.load %arg9[%c0_64, %c0_65] : memref<256x72xf32, #tpu.memory_space<vmem>>, vector<256x8xf32>
    tpu.vector_store %arg9[%c0_64, %c0_65], %57 {strides = array<i32>} : memref<256x72xf32, #tpu.memory_space<vmem>>, vector<256x8xf32>,
    %59 = vector.extract_strided_slice %55 {offsets = [0, 1, 0], sizes = [16, 16, 8], strides = [1, 1, 1]} : vector<18x18x8xf32> to vector<16x16x8xf32>
    %60 = vector.shape_cast %59 : vector<16x16x8xf32> to vector<256x8xf32>
    %c0_66 = arith.constant 0 : index
    %c8_67 = arith.constant 8 : index
    %61 = vector.load %arg9[%c0_66, %c8_67] : memref<256x72xf32, #tpu.memory_space<vmem>>, vector<256x8xf32>
    tpu.vector_store %arg9[%c0_66, %c8_67], %60 {strides = array<i32>} : memref<256x72xf32, #tpu.memory_space<vmem>>, vector<256x8xf32>,
    %62 = vector.extract_strided_slice %55 {offsets = [0, 2, 0], sizes = [16, 16, 8], strides = [1, 1, 1]} : vector<18x18x8xf32> to vector<16x16x8xf32>
    %63 = vector.shape_cast %62 : vector<16x16x8xf32> to vector<256x8xf32>
    %c0_68 = arith.constant 0 : index
    %c16_69 = arith.constant 16 : index
    %64 = vector.load %arg9[%c0_68, %c16_69] : memref<256x72xf32, #tpu.memory_space<vmem>>, vector<256x8xf32>
    tpu.vector_store %arg9[%c0_68, %c16_69], %63 {strides = array<i32>} : memref<256x72xf32, #tpu.memory_space<vmem>>, vector<256x8xf32>,
    %65 = vector.extract_strided_slice %55 {offsets = [1, 0, 0], sizes = [16, 16, 8], strides = [1, 1, 1]} : vector<18x18x8xf32> to vector<16x16x8xf32>
    %66 = vector.shape_cast %65 : vector<16x16x8xf32> to vector<256x8xf32>
    %c0_70 = arith.constant 0 : index
    %c24_71 = arith.constant 24 : index
    %67 = vector.load %arg9[%c0_70, %c24_71] : memref<256x72xf32, #tpu.memory_space<vmem>>, vector<256x8xf32>
    tpu.vector_store %arg9[%c0_70, %c24_71], %66 {strides = array<i32>} : memref<256x72xf32, #tpu.memory_space<vmem>>, vector<256x8xf32>,
    %68 = vector.extract_strided_slice %55 {offsets = [1, 1, 0], sizes = [16, 16, 8], strides = [1, 1, 1]} : vector<18x18x8xf32> to vector<16x16x8xf32>
    %69 = vector.shape_cast %68 : vector<16x16x8xf32> to vector<256x8xf32>
    %c0_72 = arith.constant 0 : index
    %c32_73 = arith.constant 32 : index
    %70 = vector.load %arg9[%c0_72, %c32_73] : memref<256x72xf32, #tpu.memory_space<vmem>>, vector<256x8xf32>
    tpu.vector_store %arg9[%c0_72, %c32_73], %69 {strides = array<i32>} : memref<256x72xf32, #tpu.memory_space<vmem>>, vector<256x8xf32>,
    %71 = vector.extract_strided_slice %55 {offsets = [1, 2, 0], sizes = [16, 16, 8], strides = [1, 1, 1]} : vector<18x18x8xf32> to vector<16x16x8xf32>
    %72 = vector.shape_cast %71 : vector<16x16x8xf32> to vector<256x8xf32>
    %c0_74 = arith.constant 0 : index
    %c40_75 = arith.constant 40 : index
    %73 = vector.load %arg9[%c0_74, %c40_75] : memref<256x72xf32, #tpu.memory_space<vmem>>, vector<256x8xf32>
    tpu.vector_store %arg9[%c0_74, %c40_75], %72 {strides = array<i32>} : memref<256x72xf32, #tpu.memory_space<vmem>>, vector<256x8xf32>,
    %74 = vector.extract_strided_slice %55 {offsets = [2, 0, 0], sizes = [16, 16, 8], strides = [1, 1, 1]} : vector<18x18x8xf32> to vector<16x16x8xf32>
    %75 = vector.shape_cast %74 : vector<16x16x8xf32> to vector<256x8xf32>
    %c0_76 = arith.constant 0 : index
    %c48_77 = arith.constant 48 : index
    %76 = vector.load %arg9[%c0_76, %c48_77] : memref<256x72xf32, #tpu.memory_space<vmem>>, vector<256x8xf32>
    tpu.vector_store %arg9[%c0_76, %c48_77], %75 {strides = array<i32>} : memref<256x72xf32, #tpu.memory_space<vmem>>, vector<256x8xf32>,
    %77 = vector.extract_strided_slice %55 {offsets = [2, 1, 0], sizes = [16, 16, 8], strides = [1, 1, 1]} : vector<18x18x8xf32> to vector<16x16x8xf32>
    %78 = vector.shape_cast %77 : vector<16x16x8xf32> to vector<256x8xf32>
    %c0_78 = arith.constant 0 : index
    %c56_79 = arith.constant 56 : index
    %79 = vector.load %arg9[%c0_78, %c56_79] : memref<256x72xf32, #tpu.memory_space<vmem>>, vector<256x8xf32>
    tpu.vector_store %arg9[%c0_78, %c56_79], %78 {strides = array<i32>} : memref<256x72xf32, #tpu.memory_space<vmem>>, vector<256x8xf32>,
    %80 = vector.extract_strided_slice %55 {offsets = [2, 2, 0], sizes = [16, 16, 8], strides = [1, 1, 1]} : vector<18x18x8xf32> to vector<16x16x8xf32>
    %81 = vector.shape_cast %80 : vector<16x16x8xf32> to vector<256x8xf32>
    %c0_80 = arith.constant 0 : index
    %c64_81 = arith.constant 64 : index
    %82 = vector.load %arg9[%c0_80, %c64_81] : memref<256x72xf32, #tpu.memory_space<vmem>>, vector<256x8xf32>
    tpu.vector_store %arg9[%c0_80, %c64_81], %81 {strides = array<i32>} : memref<256x72xf32, #tpu.memory_space<vmem>>, vector<256x8xf32>,
    %c0_82 = arith.constant 0 : index
    %c0_83 = arith.constant 0 : index
    %83 = vector.load %arg9[%c0_82, %c0_83] : memref<256x72xf32, #tpu.memory_space<vmem>>, vector<256x72xf32>
    %cst_84 = arith.constant dense<0.000000e+00> : vector<256x8xf32>
    %84 = tpu.matmul %83, %54, %cst_84 {dimension_numbers = #tpu.dot_dimension_numbers<[1], [0], [0], [1], [0, 0, 1, 1], [], []>} : vector<256x72xf32>, vector<72x8xf32>, vector<256x8xf32> -> vector<256x8xf32>
    %cst_85 = arith.constant dense<0.000000e+00> : vector<8xf32>
    %85 = vector.multi_reduction <add>, %84, %cst_85 [0] : vector<256x8xf32> to vector<8xf32>
    %86 = vector.shape_cast %85 : vector<8xf32> to vector<1x8xf32>
    %cst_86 = arith.constant 3.906250e-03 : f32
    %87 = vector.broadcast %cst_86 : f32 to vector<1x8xf32>
    %88 = arith.mulf %86, %87 : vector<1x8xf32>
    %89 = vector.broadcast %88 : vector<1x8xf32> to vector<256x8xf32>
    %90 = arith.subf %84, %89 : vector<256x8xf32>
    %91 = arith.mulf %90, %90 : vector<256x8xf32>
    %cst_87 = arith.constant dense<0.000000e+00> : vector<8xf32>
    %92 = vector.multi_reduction <add>, %91, %cst_87 [0] : vector<256x8xf32> to vector<8xf32>
    %93 = vector.shape_cast %92 : vector<8xf32> to vector<1x8xf32>
    %cst_88 = arith.constant 3.906250e-03 : f32
    %94 = vector.broadcast %cst_88 : f32 to vector<1x8xf32>
    %95 = arith.mulf %93, %94 : vector<1x8xf32>
    %cst_89 = arith.constant 9.99999974E-6 : f32
    %96 = vector.broadcast %cst_89 : f32 to vector<1x8xf32>
    %97 = arith.addf %95, %96 : vector<1x8xf32>
    %98 = math.rsqrt %97 : vector<1x8xf32>
    %99 = vector.broadcast %98 : vector<1x8xf32> to vector<256x8xf32>
    %100 = arith.mulf %90, %99 : vector<256x8xf32>
    %cst_90 = arith.constant 0.000000e+00 : f32
    %101 = vector.broadcast %cst_90 : f32 to vector<256x8xf32>
    %102 = arith.maximumf %100, %101 : vector<256x8xf32>
    %103 = vector.shape_cast %102 : vector<256x8xf32> to vector<16x16x8xf32>
    %c1_91 = arith.constant 1 : index
    %c1_92 = arith.constant 1 : index
    %c0_93 = arith.constant 0 : index
    %104 = vector.load %arg8[%c1_91, %c1_92, %c0_93] : memref<18x18x8xf32, #tpu.memory_space<vmem>>, vector<16x16x8xf32>
    tpu.vector_store %arg8[%c1_91, %c1_92, %c0_93], %103 {strides = array<i32>} : memref<18x18x8xf32, #tpu.memory_space<vmem>>, vector<16x16x8xf32>,
    %c2_94 = arith.constant 2 : index
    %c1_95 = arith.constant 1 : index
    %c0_96 = arith.constant 0 : index
    %105 = vector.load %arg8[%c2_94, %c1_95, %c0_96] : memref<18x18x8xf32, #tpu.memory_space<vmem>>, vector<1x16x8xf32>
    %c0_97 = arith.constant 0 : index
    %c1_98 = arith.constant 1 : index
    %c0_99 = arith.constant 0 : index
    %106 = vector.load %arg8[%c0_97, %c1_98, %c0_99] : memref<18x18x8xf32, #tpu.memory_space<vmem>>, vector<1x16x8xf32>
    tpu.vector_store %arg8[%c0_97, %c1_98, %c0_99], %105 {strides = array<i32>} : memref<18x18x8xf32, #tpu.memory_space<vmem>>, vector<1x16x8xf32>,
    %c15_100 = arith.constant 15 : index
    %c1_101 = arith.constant 1 : index
    %c0_102 = arith.constant 0 : index
    %107 = vector.load %arg8[%c15_100, %c1_101, %c0_102] : memref<18x18x8xf32, #tpu.memory_space<vmem>>, vector<1x16x8xf32>
    %c17_103 = arith.constant 17 : index
    %c1_104 = arith.constant 1 : index
    %c0_105 = arith.constant 0 : index
    %108 = vector.load %arg8[%c17_103, %c1_104, %c0_105] : memref<18x18x8xf32, #tpu.memory_space<vmem>>, vector<1x16x8xf32>
    tpu.vector_store %arg8[%c17_103, %c1_104, %c0_105], %107 {strides = array<i32>} : memref<18x18x8xf32, #tpu.memory_space<vmem>>, vector<1x16x8xf32>,
    %c0_106 = arith.constant 0 : index
    %c2_107 = arith.constant 2 : index
    %c0_108 = arith.constant 0 : index
    %109 = vector.load %arg8[%c0_106, %c2_107, %c0_108] : memref<18x18x8xf32, #tpu.memory_space<vmem>>, vector<18x1x8xf32>
    %c0_109 = arith.constant 0 : index
    %c0_110 = arith.constant 0 : index
    %c0_111 = arith.constant 0 : index
    %110 = vector.load %arg8[%c0_109, %c0_110, %c0_111] : memref<18x18x8xf32, #tpu.memory_space<vmem>>, vector<18x1x8xf32>
    tpu.vector_store %arg8[%c0_109, %c0_110, %c0_111], %109 {strides = array<i32>} : memref<18x18x8xf32, #tpu.memory_space<vmem>>, vector<18x1x8xf32>,
    %c0_112 = arith.constant 0 : index
    %c15_113 = arith.constant 15 : index
    %c0_114 = arith.constant 0 : index
    %111 = vector.load %arg8[%c0_112, %c15_113, %c0_114] : memref<18x18x8xf32, #tpu.memory_space<vmem>>, vector<18x1x8xf32>
    %c0_115 = arith.constant 0 : index
    %c17_116 = arith.constant 17 : index
    %c0_117 = arith.constant 0 : index
    %112 = vector.load %arg8[%c0_115, %c17_116, %c0_117] : memref<18x18x8xf32, #tpu.memory_space<vmem>>, vector<18x1x8xf32>
    tpu.vector_store %arg8[%c0_115, %c17_116, %c0_117], %111 {strides = array<i32>} : memref<18x18x8xf32, #tpu.memory_space<vmem>>, vector<18x1x8xf32>,
    %c0_118 = arith.constant 0 : index
    %c0_119 = arith.constant 0 : index
    %113 = vector.load %arg6[%c0_118, %c0_119] : memref<72x8xf32, #tpu.memory_space<vmem>>, vector<72x8xf32>
    %c0_120 = arith.constant 0 : index
    %c0_121 = arith.constant 0 : index
    %c0_122 = arith.constant 0 : index
    %114 = vector.load %arg8[%c0_120, %c0_121, %c0_122] : memref<18x18x8xf32, #tpu.memory_space<vmem>>, vector<18x18x8xf32>
    %115 = vector.extract_strided_slice %114 {offsets = [0, 0, 0], sizes = [16, 16, 8], strides = [1, 1, 1]} : vector<18x18x8xf32> to vector<16x16x8xf32>
    %116 = vector.shape_cast %115 : vector<16x16x8xf32> to vector<256x8xf32>
    %c0_123 = arith.constant 0 : index
    %c0_124 = arith.constant 0 : index
    %117 = vector.load %arg9[%c0_123, %c0_124] : memref<256x72xf32, #tpu.memory_space<vmem>>, vector<256x8xf32>
    tpu.vector_store %arg9[%c0_123, %c0_124], %116 {strides = array<i32>} : memref<256x72xf32, #tpu.memory_space<vmem>>, vector<256x8xf32>,
    %118 = vector.extract_strided_slice %114 {offsets = [0, 1, 0], sizes = [16, 16, 8], strides = [1, 1, 1]} : vector<18x18x8xf32> to vector<16x16x8xf32>
    %119 = vector.shape_cast %118 : vector<16x16x8xf32> to vector<256x8xf32>
    %c0_125 = arith.constant 0 : index
    %c8_126 = arith.constant 8 : index
    %120 = vector.load %arg9[%c0_125, %c8_126] : memref<256x72xf32, #tpu.memory_space<vmem>>, vector<256x8xf32>
    tpu.vector_store %arg9[%c0_125, %c8_126], %119 {strides = array<i32>} : memref<256x72xf32, #tpu.memory_space<vmem>>, vector<256x8xf32>,
    %121 = vector.extract_strided_slice %114 {offsets = [0, 2, 0], sizes = [16, 16, 8], strides = [1, 1, 1]} : vector<18x18x8xf32> to vector<16x16x8xf32>
    %122 = vector.shape_cast %121 : vector<16x16x8xf32> to vector<256x8xf32>
    %c0_127 = arith.constant 0 : index
    %c16_128 = arith.constant 16 : index
    %123 = vector.load %arg9[%c0_127, %c16_128] : memref<256x72xf32, #tpu.memory_space<vmem>>, vector<256x8xf32>
    tpu.vector_store %arg9[%c0_127, %c16_128], %122 {strides = array<i32>} : memref<256x72xf32, #tpu.memory_space<vmem>>, vector<256x8xf32>,
    %124 = vector.extract_strided_slice %114 {offsets = [1, 0, 0], sizes = [16, 16, 8], strides = [1, 1, 1]} : vector<18x18x8xf32> to vector<16x16x8xf32>
    %125 = vector.shape_cast %124 : vector<16x16x8xf32> to vector<256x8xf32>
    %c0_129 = arith.constant 0 : index
    %c24_130 = arith.constant 24 : index
    %126 = vector.load %arg9[%c0_129, %c24_130] : memref<256x72xf32, #tpu.memory_space<vmem>>, vector<256x8xf32>
    tpu.vector_store %arg9[%c0_129, %c24_130], %125 {strides = array<i32>} : memref<256x72xf32, #tpu.memory_space<vmem>>, vector<256x8xf32>,
    %127 = vector.extract_strided_slice %114 {offsets = [1, 1, 0], sizes = [16, 16, 8], strides = [1, 1, 1]} : vector<18x18x8xf32> to vector<16x16x8xf32>
    %128 = vector.shape_cast %127 : vector<16x16x8xf32> to vector<256x8xf32>
    %c0_131 = arith.constant 0 : index
    %c32_132 = arith.constant 32 : index
    %129 = vector.load %arg9[%c0_131, %c32_132] : memref<256x72xf32, #tpu.memory_space<vmem>>, vector<256x8xf32>
    tpu.vector_store %arg9[%c0_131, %c32_132], %128 {strides = array<i32>} : memref<256x72xf32, #tpu.memory_space<vmem>>, vector<256x8xf32>,
    %130 = vector.extract_strided_slice %114 {offsets = [1, 2, 0], sizes = [16, 16, 8], strides = [1, 1, 1]} : vector<18x18x8xf32> to vector<16x16x8xf32>
    %131 = vector.shape_cast %130 : vector<16x16x8xf32> to vector<256x8xf32>
    %c0_133 = arith.constant 0 : index
    %c40_134 = arith.constant 40 : index
    %132 = vector.load %arg9[%c0_133, %c40_134] : memref<256x72xf32, #tpu.memory_space<vmem>>, vector<256x8xf32>
    tpu.vector_store %arg9[%c0_133, %c40_134], %131 {strides = array<i32>} : memref<256x72xf32, #tpu.memory_space<vmem>>, vector<256x8xf32>,
    %133 = vector.extract_strided_slice %114 {offsets = [2, 0, 0], sizes = [16, 16, 8], strides = [1, 1, 1]} : vector<18x18x8xf32> to vector<16x16x8xf32>
    %134 = vector.shape_cast %133 : vector<16x16x8xf32> to vector<256x8xf32>
    %c0_135 = arith.constant 0 : index
    %c48_136 = arith.constant 48 : index
    %135 = vector.load %arg9[%c0_135, %c48_136] : memref<256x72xf32, #tpu.memory_space<vmem>>, vector<256x8xf32>
    tpu.vector_store %arg9[%c0_135, %c48_136], %134 {strides = array<i32>} : memref<256x72xf32, #tpu.memory_space<vmem>>, vector<256x8xf32>,
    %136 = vector.extract_strided_slice %114 {offsets = [2, 1, 0], sizes = [16, 16, 8], strides = [1, 1, 1]} : vector<18x18x8xf32> to vector<16x16x8xf32>
    %137 = vector.shape_cast %136 : vector<16x16x8xf32> to vector<256x8xf32>
    %c0_137 = arith.constant 0 : index
    %c56_138 = arith.constant 56 : index
    %138 = vector.load %arg9[%c0_137, %c56_138] : memref<256x72xf32, #tpu.memory_space<vmem>>, vector<256x8xf32>
    tpu.vector_store %arg9[%c0_137, %c56_138], %137 {strides = array<i32>} : memref<256x72xf32, #tpu.memory_space<vmem>>, vector<256x8xf32>,
    %139 = vector.extract_strided_slice %114 {offsets = [2, 2, 0], sizes = [16, 16, 8], strides = [1, 1, 1]} : vector<18x18x8xf32> to vector<16x16x8xf32>
    %140 = vector.shape_cast %139 : vector<16x16x8xf32> to vector<256x8xf32>
    %c0_139 = arith.constant 0 : index
    %c64_140 = arith.constant 64 : index
    %141 = vector.load %arg9[%c0_139, %c64_140] : memref<256x72xf32, #tpu.memory_space<vmem>>, vector<256x8xf32>
    tpu.vector_store %arg9[%c0_139, %c64_140], %140 {strides = array<i32>} : memref<256x72xf32, #tpu.memory_space<vmem>>, vector<256x8xf32>,
    %c0_141 = arith.constant 0 : index
    %c0_142 = arith.constant 0 : index
    %142 = vector.load %arg9[%c0_141, %c0_142] : memref<256x72xf32, #tpu.memory_space<vmem>>, vector<256x72xf32>
    %cst_143 = arith.constant dense<0.000000e+00> : vector<256x8xf32>
    %143 = tpu.matmul %142, %113, %cst_143 {dimension_numbers = #tpu.dot_dimension_numbers<[1], [0], [0], [1], [0, 0, 1, 1], [], []>} : vector<256x72xf32>, vector<72x8xf32>, vector<256x8xf32> -> vector<256x8xf32>
    %cst_144 = arith.constant dense<0.000000e+00> : vector<8xf32>
    %144 = vector.multi_reduction <add>, %143, %cst_144 [0] : vector<256x8xf32> to vector<8xf32>
    %145 = vector.shape_cast %144 : vector<8xf32> to vector<1x8xf32>
    %cst_145 = arith.constant 3.906250e-03 : f32
    %146 = vector.broadcast %cst_145 : f32 to vector<1x8xf32>
    %147 = arith.mulf %145, %146 : vector<1x8xf32>
    %148 = vector.broadcast %147 : vector<1x8xf32> to vector<256x8xf32>
    %149 = arith.subf %143, %148 : vector<256x8xf32>
    %150 = arith.mulf %149, %149 : vector<256x8xf32>
    %cst_146 = arith.constant dense<0.000000e+00> : vector<8xf32>
    %151 = vector.multi_reduction <add>, %150, %cst_146 [0] : vector<256x8xf32> to vector<8xf32>
    %152 = vector.shape_cast %151 : vector<8xf32> to vector<1x8xf32>
    %cst_147 = arith.constant 3.906250e-03 : f32
    %153 = vector.broadcast %cst_147 : f32 to vector<1x8xf32>
    %154 = arith.mulf %152, %153 : vector<1x8xf32>
    %cst_148 = arith.constant 9.99999974E-6 : f32
    %155 = vector.broadcast %cst_148 : f32 to vector<1x8xf32>
    %156 = arith.addf %154, %155 : vector<1x8xf32>
    %157 = math.rsqrt %156 : vector<1x8xf32>
    %158 = vector.broadcast %157 : vector<1x8xf32> to vector<256x8xf32>
    %159 = arith.mulf %149, %158 : vector<256x8xf32>
    %160 = vector.shape_cast %159 : vector<256x8xf32> to vector<16x16x8xf32>
    %c0_149 = arith.constant 0 : index
    %c0_150 = arith.constant 0 : index
    %c0_151 = arith.constant 0 : index
    %c0_152 = arith.constant 0 : index
    %161 = vector.load %arg7[%c0_149, %c0_150, %c0_151, %c0_152] : memref<1x16x16x8xf32, #tpu.memory_space<vmem>>, vector<1x16x16x8xf32>
    %162 = vector.shape_cast %161 : vector<1x16x16x8xf32> to vector<16x16x8xf32>
    %163 = vector.shape_cast %160 : vector<16x16x8xf32> to vector<1x16x16x8xf32>
    tpu.vector_store %arg7[%c0_149, %c0_150, %c0_151, %c0_152], %163 {strides = array<i32>} : memref<1x16x16x8xf32, #tpu.memory_space<vmem>>, vector<1x16x16x8xf32>,
    return
  }
  func.func @transform_0(%arg0: i32) -> (i32, i32, i32, i32) {
    %c0_i32 = arith.constant 0 : i32
    %c0_i32_0 = arith.constant 0 : i32
    %c0_i32_1 = arith.constant 0 : i32
    %c0_i32_2 = arith.constant 0 : i32
    return %arg0, %c0_i32, %c0_i32_0, %c0_i32_1 : i32, i32, i32, i32
  }
  func.func @transform_1(%arg0: i32) -> (i32, i32, i32, i32) {
    %c0_i32 = arith.constant 0 : i32
    %c0_i32_0 = arith.constant 0 : i32
    %c0_i32_1 = arith.constant 0 : i32
    %c0_i32_2 = arith.constant 0 : i32
    return %arg0, %c0_i32, %c0_i32_0, %c0_i32_1 : i32, i32, i32, i32
  }
  func.func @transform_2(%arg0: i32) -> (i32, i32) {
    %c0_i32 = arith.constant 0 : i32
    %c0_i32_0 = arith.constant 0 : i32
    %c0_i32_1 = arith.constant 0 : i32
    return %c0_i32, %c0_i32_0 : i32, i32
  }
  func.func @transform_3(%arg0: i32) -> (i32, i32) {
    %c0_i32 = arith.constant 0 : i32
    %c0_i32_0 = arith.constant 0 : i32
    %c0_i32_1 = arith.constant 0 : i32
    return %c0_i32, %c0_i32_0 : i32, i32
  }
  func.func @transform_4(%arg0: i32) -> (i32, i32) {
    %c0_i32 = arith.constant 0 : i32
    %c0_i32_0 = arith.constant 0 : i32
    %c0_i32_1 = arith.constant 0 : i32
    return %c0_i32, %c0_i32_0 : i32, i32
  }
  func.func @transform_5(%arg0: i32) -> (i32, i32) {
    %c0_i32 = arith.constant 0 : i32
    %c0_i32_0 = arith.constant 0 : i32
    %c0_i32_1 = arith.constant 0 : i32
    return %c0_i32, %c0_i32_0 : i32, i32
  }
  func.func @transform_6(%arg0: i32) -> (i32, i32, i32, i32) {
    %c0_i32 = arith.constant 0 : i32
    %c0_i32_0 = arith.constant 0 : i32
    %c0_i32_1 = arith.constant 0 : i32
    %c0_i32_2 = arith.constant 0 : i32
    return %arg0, %c0_i32, %c0_i32_0, %c0_i32_1 : i32, i32, i32, i32
  }
}

</mosaic_0001>

<bundles_post_ra>
// kernel: transform_up_forward.1
= control target key start
LH: loop header
LB: loop body
LE: loop exit
PB: predicated region body
PF: predicated region fallthrough
CT: control target
= control target key end

     0   :  { %s7167_s21 = smov 0   ;;  %s11737_s0 = inlined_call_operand.vmem [shape: f32[2,16,16,4], index: 0, kind: input, shape index: {}]   ;;  %s11738_s1 = inlined_call_operand.vmem [shape: f32[2,16,16,8], index: 1, kind: input, shape index: {}]   ;;  %s11739_s2 = inlined_call_operand.vmem [shape: f32[72,4], index: 2, kind: input, shape index: {}]   ;;  %s11740_s3 = inlined_call_operand.vmem [shape: f32[1,4], index: 3, kind: input, shape index: {}]   ;;  %s11741_s4 = inlined_call_operand.vmem [shape: f32[72,8], index: 4, kind: input, shape index: {}]   ;;  %s11742_s5 = inlined_call_operand.vmem [shape: f32[72,8], index: 5, kind: input, shape index: {}]   ;;  %s11743_s6 = inlined_call_operand.vmem [shape: f32[2,16,16,8], index: 6, kind: output, shape index: {}]  }
   0x1 LB: > { %s6590_s22 = sadd.s32 4294967295, %s7120_s21   ;;  %p6594_p0 = scmp.ge.s32.totalorder %s7120_s21, 1  ;;  %s7120_s21 = sphi %s7167_s21, %s16_s21  }
   0x2   : > { %p222_p1 = scmp.lt.s32.totalorder %s7120_s21, 3 }
   0x4   : > { %p223_p2 = pnand %p6594_p0, %p222_p1 }
   0x6   : > { %226 = sbr.rel (%p223_p2) target bundleno = 2954 (0xb8a), region = 44 }
   0xd   : > { %vm336_vm0 = vcmask 64512   ;;  %vm339_vm1 = vcmask 58368   ;;  %p7177_p3 = scmp.lt.s32.totalorder %s6590_s22, 1  ;;  %v7122_v0 = vmov 0.0   ;;  %vm568_vm2 = vcmask 1046528   ;;  %s7123_s28 = smov 8  }
   0xe   : > { %337 = vst.msk [vmem:[#allocation2] sm:$0xff] %vm336_vm0, %v7122_v0  ;;  %338 = vst.msk [vmem:[#allocation2 + $0x8] sm:$0xff] %vm336_vm0, %v7122_v0  ;;  %vm778_vm3 = vcmask 1045504   ;;  %s7124_s29 = smov 16   ;;  %vm745_vm4 = vcmask 130112   ;;  %s7125_s30 = smov 24  }
   0xf   : > { %341 = vst.msk [vmem:[#allocation2 + $0x18] sm:$0xff] %vm336_vm0, %v7122_v0  ;;  %342 = vst.msk [vmem:[#allocation2 + $0x20] sm:$0xff] %vm336_vm0, %v7122_v0  ;;  %s12058_s22 = smov (!%p7177_p3, %s6590_s22), 1  ;;  %vm955_vm5 = vcmask 195712   ;;  %s7126_s7 = smov 32   ;;  %vm1086_vm6 = vcmask 261312  }
  0x10   : > { %344 = vst.msk [vmem:[#allocation2 + $0x30] sm:$0xff] %vm336_vm0, %v7122_v0  ;;  %345 = vst.msk [vmem:[#allocation2 + $0x38] sm:$0xff] %vm336_vm0, %v7122_v0  ;;  %s7239_s24 = sshll.u32 %s12058_s22, 8  ;;  %s7127_s8 = smov 40   ;;  %vm1221_vm7 = vcmask 326912   ;;  %vm1355_vm8 = vcmask 392512  }
  0x11   : > { %347 = vst.msk [vmem:[#allocation2 + $0x48] sm:$0xff] %vm336_vm0, %v7122_v0  ;;  %348 = vst.msk [vmem:[#allocation2 + $0x50] sm:$0xff] %vm336_vm0, %v7122_v0  ;;  %s7245_s27 = scalar_lea.vmem %s11738_s1, %s7239_s24  ;;  %s7128_s22 = smov 48   ;;  %vm1486_vm9 = vcmask 458112   ;;  %vm1621_vm10 = vcmask 523712   ;;  %vm1755_vm11 = vcmask 589312  }
  0x12   : > { %350 = vst.msk [vmem:[#allocation2 + $0x60] sm:$0xff] %vm336_vm0, %v7122_v0  ;;  %351 = vst.msk [vmem:[#allocation2 + $0x68] sm:$0xff] %vm336_vm0, %v7122_v0  ;;  %v304_v1 = vld [vmem:[%s7245_s27] sm:$0xff]  ;;  %v305_v2 = vld [vmem:[%s7245_s27 + $0x8] sm:$0xff]  ;;  %s7129_s9 = smov 56   ;;  %s7130_s12 = smov 64  }
  0x13   : > { %353 = vst.msk [vmem:[#allocation2 + $0x78] sm:$0xff] %vm336_vm0, %v7122_v0  ;;  %354 = vst.msk [vmem:[#allocation2 + $0x80] sm:$0xff] %vm336_vm0, %v7122_v0  ;;  %v306_v3 = vld [vmem:[%s7245_s27 + $0x10] sm:$0xff]  ;;  %v307_v4 = vld [vmem:[%s7245_s27 + $0x18] sm:$0xff]  ;;  %vm1827_vm12 = vcmask 588800   ;;  %s8575_s15 = scalar_lea.vmem %s11737_s0, %s7239_s24  ;;  %vm2181_vm13 = vcmask 31744  }
  0x14   : > { %356 = vst.msk [vmem:[#allocation2 + $0x90] sm:$0xff] %vm336_vm0, %v7122_v0  ;;  %357 = vst.msk [vmem:[#allocation2 + $0x98] sm:$0xff] %vm336_vm0, %v7122_v0  ;;  %v308_v5 = vld [vmem:[%s7245_s27 + $0x20] sm:$0xff]  ;;  %v309_v6 = vld [vmem:[%s7245_s27 + $0x28] sm:$0xff]  ;;  %s7131_s18 = smov 4   ;;  %vm2342_vm14 = vcmask 64544  }
  0x15   : > { %359 = vst.msk [vmem:[#allocation2 + $0xa8] sm:$0xff] %vm336_vm0, %v7122_v0  ;;  %360 = vst.msk [vmem:[#allocation2 + $0xb0] sm:$0xff] %vm336_vm0, %v7122_v0  ;;  %v7256_v7 = vld [vmem:[#allocation2] sm:$0xff]  ;;  %v7258_v8 = vld [vmem:[#allocation2 + $0x8] sm:$0xff]  ;;  %vm2404_vm15 = vcmask 57344  }
  0x16   : > { %362 = vst.msk [vmem:[#allocation2 + $0xc0] sm:$0xff] %vm336_vm0, %v7122_v0  ;;  %363 = vst.msk [vmem:[#allocation2 + $0xc8] sm:$0xff] %vm336_vm0, %v7122_v0  ;;  %v569_v10 = vrot.slane %v7256_v7, 1  ;;  %v570_v11 = vrot.slane %v7258_v8, 1  ;;  %v310_v13 = vld [vmem:[%s7245_s27 + $0x30] sm:$0xff]  ;;  %v311_v14 = vld [vmem:[%s7245_s27 + $0x38] sm:$0xff] }
  0x17   : > { %365 = vst.msk [vmem:[#allocation2 + $0xd8] sm:$0xff] %vm336_vm0, %v7122_v0  ;;  %366 = vst.msk [vmem:[#allocation2 + $0xe0] sm:$0xff] %vm336_vm0, %v7122_v0  ;;  %v312_v15 = vld [vmem:[%s7245_s27 + $0x40] sm:$0xff]  ;;  %v313_v16 = vld [vmem:[%s7245_s27 + $0x48] sm:$0xff] }
  0x18   : > { %368 = vst.msk [vmem:[#allocation2 + $0xf0] sm:$0xff] %vm336_vm0, %v7122_v0  ;;  %369 = vst.msk [vmem:[#allocation2 + $0xf8] sm:$0xff] %vm336_vm0, %v7122_v0  ;;  %v314_v17 = vld [vmem:[%s7245_s27 + $0x50] sm:$0xff]  ;;  %v315_v18 = vld [vmem:[%s7245_s27 + $0x58] sm:$0xff]  ;;  %v571_v19 = vsel %vm568_vm2, %v569_v10, %v570_v11 }
  0x19   : > { %371 = vst.msk [vmem:[#allocation2 + $0x108] sm:$0xff] %vm336_vm0, %v7122_v0  ;;  %372 = vst.msk [vmem:[#allocation2 + $0x110] sm:$0xff] %vm336_vm0, %v7122_v0  ;;  %v316_v20 = vld [vmem:[%s7245_s27 + $0x60] sm:$0xff]  ;;  %v317_v21 = vld [vmem:[%s7245_s27 + $0x68] sm:$0xff]  ;;  %649 = vrot.lane.b32.xlu0 %v571_v19, %s7123_s28 }
  0x1a   : > { %374 = vst.msk [vmem:[#allocation2 + $0x120] sm:$0xff] %vm336_vm0, %v7122_v0  ;;  %375 = vst.msk [vmem:[#allocation2 + $0x128] sm:$0xff] %vm336_vm0, %v7122_v0  ;;  %v318_v22 = vld [vmem:[%s7245_s27 + $0x70] sm:$0xff]  ;;  %v319_v23 = vld [vmem:[%s7245_s27 + $0x78] sm:$0xff] }
  0x1b   : > { %377 = vst.msk [vmem:[#allocation2 + $0x138] sm:$0xff] %vm336_vm0, %v7122_v0  ;;  %378 = vst.msk [vmem:[#allocation2 + $0x140] sm:$0xff] %vm336_vm0, %v7122_v0  ;;  %v320_v24 = vld [vmem:[%s7245_s27 + $0x80] sm:$0xff]  ;;  %v321_v25 = vld [vmem:[%s7245_s27 + $0x88] sm:$0xff] }
  0x1c   : > { %380 = vst.msk [vmem:[#allocation2 + $0x150] sm:$0xff] %vm336_vm0, %v7122_v0  ;;  %381 = vst.msk [vmem:[#allocation2 + $0x158] sm:$0xff] %vm336_vm0, %v7122_v0  ;;  %v322_v27 = vld [vmem:[%s7245_s27 + $0x90] sm:$0xff]  ;;  %v323_v28 = vld [vmem:[%s7245_s27 + $0x98] sm:$0xff] }
  0x1d   : > { %383 = vst.msk [vmem:[#allocation2 + $0x168] sm:$0xff] %vm336_vm0, %v7122_v0  ;;  %384 = vst.msk [vmem:[#allocation2 + $0x170] sm:$0xff] %vm336_vm0, %v7122_v0  ;;  %v324_v29 = vld [vmem:[%s7245_s27 + $0xa0] sm:$0xff]  ;;  %v329_v19 = vld [vmem:[%s7245_s27 + $0xc8] sm:$0xff] }
  0x1e   : > { %386 = vst.msk [vmem:[#allocation2 + $0x180] sm:$0xff] %vm336_vm0, %v7122_v0  ;;  %387 = vst.msk [vmem:[#allocation2 + $0x188] sm:$0xff] %vm336_vm0, %v7122_v0 }
  0x1f   : > { %389 = vst.msk [vmem:[#allocation2 + $0x198] sm:$0xff] %vm336_vm0, %v7122_v0  ;;  %390 = vst.msk [vmem:[#allocation2 + $0x1a0] sm:$0xff] %vm336_vm0, %v7122_v0 }
  0x20   : > { %340 = vst.msk [vmem:[#allocation2 + $0x10] sm:$0x3] %vm339_vm1, %v7122_v0  ;;  %343 = vst.msk [vmem:[#allocation2 + $0x28] sm:$0x3] %vm339_vm1, %v7122_v0 }
  0x21   : > { %346 = vst.msk [vmem:[#allocation2 + $0x40] sm:$0x3] %vm339_vm1, %v7122_v0  ;;  %349 = vst.msk [vmem:[#allocation2 + $0x58] sm:$0x3] %vm339_vm1, %v7122_v0 }
  0x22   : > { %352 = vst.msk [vmem:[#allocation2 + $0x70] sm:$0x3] %vm339_vm1, %v7122_v0  ;;  %355 = vst.msk [vmem:[#allocation2 + $0x88] sm:$0x3] %vm339_vm1, %v7122_v0 }
  0x23   : > { %358 = vst.msk [vmem:[#allocation2 + $0xa0] sm:$0x3] %vm339_vm1, %v7122_v0  ;;  %361 = vst.msk [vmem:[#allocation2 + $0xb8] sm:$0x3] %vm339_vm1, %v7122_v0 }
  0x24   : > { %364 = vst.msk [vmem:[#allocation2 + $0xd0] sm:$0x3] %vm339_vm1, %v7122_v0  ;;  %367 = vst.msk [vmem:[#allocation2 + $0xe8] sm:$0x3] %vm339_vm1, %v7122_v0 }
  0x25   : > { %370 = vst.msk [vmem:[#allocation2 + $0x100] sm:$0x3] %vm339_vm1, %v7122_v0  ;;  %373 = vst.msk [vmem:[#allocation2 + $0x118] sm:$0x3] %vm339_vm1, %v7122_v0 }
  0x26   : > { %376 = vst.msk [vmem:[#allocation2 + $0x130] sm:$0x3] %vm339_vm1, %v7122_v0  ;;  %379 = vst.msk [vmem:[#allocation2 + $0x148] sm:$0x3] %vm339_vm1, %v7122_v0 }
  0x27   : > { %382 = vst.msk [vmem:[#allocation2 + $0x160] sm:$0x3] %vm339_vm1, %v7122_v0  ;;  %385 = vst.msk [vmem:[#allocation2 + $0x178] sm:$0x3] %vm339_vm1, %v7122_v0  ;;  %v7260_v9 = vld [vmem:[#allocation2 + $0x10] sm:$0x3] }
  0x28   : > { %388 = vst.msk [vmem:[#allocation2 + $0x190] sm:$0x3] %vm339_vm1, %v7122_v0  ;;  %391 = vst.msk [vmem:[#allocation2 + $0x1a8] sm:$0x3] %vm339_vm1, %v7122_v0  ;;  %v572_v12 = vrot.slane %v7260_v9, 1 }
  0x29   : > { %393 = vst.msk [vmem:[#allocation2 + $0x19] sm:$0xff] %vm336_vm0, %v304_v1  ;;  %394 = vst.msk [vmem:[#allocation2 + $0x21] sm:$0xff] %vm336_vm0, %v305_v2 }
  0x2a   : > { %395 = vst.msk [vmem:[#allocation2 + $0x31] sm:$0xff] %vm336_vm0, %v306_v3  ;;  %396 = vst.msk [vmem:[#allocation2 + $0x39] sm:$0xff] %vm336_vm0, %v307_v4  ;;  %v573_v26 = vsel %vm568_vm2, %v570_v11, %v572_v12 }
  0x2b   : > { %397 = vst.msk [vmem:[#allocation2 + $0x49] sm:$0xff] %vm336_vm0, %v308_v5  ;;  %398 = vst.msk [vmem:[#allocation2 + $0x51] sm:$0xff] %vm336_vm0, %v309_v6  ;;  %651 = vrot.lane.b32.xlu0 %v573_v26, %s7123_s28  ;;  %v325_v6 = vld [vmem:[%s7245_s27 + $0xa8] sm:$0xff] }
  0x2c   : > { %488 = vst.msk [vmem:[#allocation3] sm:$0xff] %vm336_vm0, %v7256_v7  ;;  %489 = vst.msk [vmem:[#allocation3 + $0x8] sm:$0xff] %vm336_vm0, %v7258_v8 }
  0x2d   : > { %399 = vst.msk [vmem:[#allocation2 + $0x61] sm:$0xff] %vm336_vm0, %v310_v13  ;;  %400 = vst.msk [vmem:[#allocation2 + $0x69] sm:$0xff] %vm336_vm0, %v311_v14  ;;  %v326_v14 = vld [vmem:[%s7245_s27 + $0xb0] sm:$0xff] }
  0x2e   : > { %401 = vst.msk [vmem:[#allocation2 + $0x79] sm:$0xff] %vm336_vm0, %v312_v15  ;;  %402 = vst.msk [vmem:[#allocation2 + $0x81] sm:$0xff] %vm336_vm0, %v313_v16  ;;  %v327_v15 = vld [vmem:[%s7245_s27 + $0xb8] sm:$0xff]  ;;  %v328_v16 = vld [vmem:[%s7245_s27 + $0xc0] sm:$0xff] }
  0x2f   : > { %403 = vst.msk [vmem:[#allocation2 + $0x91] sm:$0xff] %vm336_vm0, %v314_v17  ;;  %404 = vst.msk [vmem:[#allocation2 + $0x99] sm:$0xff] %vm336_vm0, %v315_v18 }
  0x30   : > { %405 = vst.msk [vmem:[#allocation2 + $0xa9] sm:$0xff] %vm336_vm0, %v316_v20  ;;  %406 = vst.msk [vmem:[#allocation2 + $0xb1] sm:$0xff] %vm336_vm0, %v317_v21  ;;  %v7302_v30 = vld [vmem:[#allocation2 + $0x18] sm:$0xff]  ;;  %v7304_v31 = vld [vmem:[#allocation2 + $0x20] sm:$0xff] }
  0x31   : > { %407 = vst.msk [vmem:[#allocation2 + $0xc1] sm:$0xff] %vm336_vm0, %v318_v22  ;;  %408 = vst.msk [vmem:[#allocation2 + $0xc9] sm:$0xff] %vm336_vm0, %v319_v23  ;;  %v7306_v32 = vld [vmem:[#allocation2 + $0x30] sm:$0xff]  ;;  %v574_v33 = vrot.slane %v7302_v30, 1  ;;  %v575_v34 = vrot.slane %v7304_v31, 1  ;;  %v7317_v35 = vld [vmem:[#allocation2 + $0x38] sm:$0xff] }
  0x32   : > { %409 = vst.msk [vmem:[#allocation2 + $0xd9] sm:$0xff] %vm336_vm0, %v320_v24  ;;  %410 = vst.msk [vmem:[#allocation2 + $0xe1] sm:$0xff] %vm336_vm0, %v321_v25  ;;  %v579_v36 = vrot.slane %v7306_v32, 1  ;;  %v7322_v37 = vld [vmem:[#allocation2 + $0x28] sm:$0x3]  ;;  %v580_v38 = vrot.slane %v7317_v35, 1 }
  0x33   : > { %411 = vst.msk [vmem:[#allocation2 + $0xf1] sm:$0xff] %vm336_vm0, %v322_v27  ;;  %412 = vst.msk [vmem:[#allocation2 + $0xf9] sm:$0xff] %vm336_vm0, %v323_v28  ;;  %v577_v39 = vrot.slane %v7322_v37, 1  ;;  %v7329_v40 = vld [vmem:[#allocation2 + $0x48] sm:$0xff]  ;;  %v7331_v41 = vld [vmem:[#allocation2 + $0x50] sm:$0xff]  ;;  %v7336_v43 = vsel %vm568_vm2, %v574_v33, %v575_v34 }
  0x34   : > { %413 = vst.msk [vmem:[#allocation2 + $0x109] sm:$0xff] %vm336_vm0, %v324_v29  ;;  %490 = vst.msk [vmem:[#allocation3 + $0x10] sm:$0xff] %vm336_vm0, %v7302_v30  ;;  %v7333_v42 = vld [vmem:[#allocation2 + $0x40] sm:$0x3]  ;;  %v584_v44 = vrot.slane %v7329_v40, 1  ;;  %v585_v45 = vrot.slane %v7331_v41, 1  ;;  %653 = vrot.lane.b32.xlu1 %v7336_v43, %s7123_s28  ;;  %v7353_v49 = vsel %vm568_vm2, %v579_v36, %v580_v38 }
  0x35   : > { %491 = vst.msk [vmem:[#allocation3 + $0x18] sm:$0xff] %vm336_vm0, %v7304_v31  ;;  %492 = vst.msk [vmem:[#allocation3 + $0x20] sm:$0xff] %vm336_vm0, %v7306_v32  ;;  %v7344_v46 = vld [vmem:[#allocation2 + $0x60] sm:$0xff]  ;;  %v7346_v47 = vld [vmem:[#allocation2 + $0x68] sm:$0xff]  ;;  %v7366_v52 = vsel %vm568_vm2, %v575_v34, %v577_v39  ;;  %v582_v53 = vrot.slane %v7333_v42, 1  ;;  %657 = vrot.lane.b32.xlu0 %v7353_v49, %s7123_s28 }
  0x36   : > { %493 = vst.msk [vmem:[#allocation3 + $0x28] sm:$0xff] %vm336_vm0, %v7317_v35  ;;  %494 = vst.msk [vmem:[#allocation3 + $0x30] sm:$0xff] %vm336_vm0, %v7329_v40  ;;  %v7348_v48 = vld [vmem:[#allocation2 + $0x78] sm:$0xff]  ;;  %v7359_v50 = vld [vmem:[#allocation2 + $0x80] sm:$0xff]  ;;  %v7388_v58 = vsel %vm568_vm2, %v584_v44, %v585_v45  ;;  %v589_v59 = vrot.slane %v7344_v46, 1  ;;  %v590_v60 = vrot.slane %v7346_v47, 1 }
  0x37   : > { %495 = vst.msk [vmem:[#allocation3 + $0x38] sm:$0xff] %vm336_vm0, %v7331_v41  ;;  %496 = vst.msk [vmem:[#allocation3 + $0x40] sm:$0xff] %vm336_vm0, %v7344_v46  ;;  %v7363_v51 = vld [vmem:[#allocation2 + $0x90] sm:$0xff]  ;;  %v7371_v54 = vld [vmem:[#allocation2 + $0x98] sm:$0xff]  ;;  %v7405_v0 = vsel %vm568_vm2, %v580_v38, %v582_v53  ;;  %v594_v11 = vrot.slane %v7348_v48, 1  ;;  %v595_v12 = vrot.slane %v7359_v50, 1 }
  0x38   : > { %497 = vst.msk [vmem:[#allocation3 + $0x48] sm:$0xff] %vm336_vm0, %v7346_v47  ;;  %498 = vst.msk [vmem:[#allocation3 + $0x50] sm:$0xff] %vm336_vm0, %v7348_v48  ;;  %v7375_v55 = vld [vmem:[#allocation2 + $0xa8] sm:$0xff]  ;;  %v7379_v56 = vld [vmem:[#allocation2 + $0x58] sm:$0x3]  ;;  %655 = vrot.lane.b32.xlu1 %v7366_v52, %s7123_s28  ;;  %v7428_v10 = vsel %vm568_vm2, %v589_v59, %v590_v60  ;;  %v599_v26 = vrot.slane %v7363_v51, 1 }
  0x39   : > { %499 = vst.msk [vmem:[#allocation3 + $0x58] sm:$0xff] %vm336_vm0, %v7359_v50  ;;  %500 = vst.msk [vmem:[#allocation3 + $0x60] sm:$0xff] %vm336_vm0, %v7363_v51  ;;  %v7383_v57 = vld [vmem:[#allocation2 + $0xb0] sm:$0xff]  ;;  %v7394_v61 = vld [vmem:[#allocation2 + $0xc0] sm:$0xff]  ;;  %v587_v1 = vrot.slane %v7379_v56, 1  ;;  %661 = vrot.lane.b32.xlu0 %v7388_v58, %s7123_s28  ;;  %v7464_v25 = vsel %vm568_vm2, %v594_v11, %v595_v12  ;;  %v600_v27 = vrot.slane %v7371_v54, 1 }
  0x3a   : > { %501 = vst.msk [vmem:[#allocation3 + $0x68] sm:$0xff] %vm336_vm0, %v7371_v54  ;;  %502 = vst.msk [vmem:[#allocation3 + $0x70] sm:$0xff] %vm336_vm0, %v7375_v55  ;;  %v7398_v62 = vld [vmem:[#allocation2 + $0xc8] sm:$0xff]  ;;  %v7402_v63 = vld [vmem:[#allocation2 + $0xd8] sm:$0xff]  ;;  %v604_v38 = vrot.slane %v7375_v55, 1  ;;  %v605_v39 = vrot.slane %v7383_v57, 1 }
  0x3b   : > { %11893 = vst [vmem:[#allocation4_spill] sm:$0xff] %v7388_v58  ;;  %503 = vst.msk [vmem:[#allocation3 + $0x78] sm:$0xff] %vm336_vm0, %v7383_v57  ;;  %v7410_v2 = vld [vmem:[#allocation2 + $0xe0] sm:$0xff]  ;;  %v7414_v3 = vld [vmem:[#allocation2 + $0xf0] sm:$0xff]  ;;  %v7445_v17 = vsel %vm568_vm2, %v585_v45, %v587_v1  ;;  %v7483_v36 = vsel %vm568_vm2, %v599_v26, %v600_v27  ;;  %v614_v26 = vrot.slane %v7402_v63, 1 }
  0x3c   : > { %504 = vst.msk [vmem:[#allocation3 + $0x80] sm:$0xff] %vm336_vm0, %v7394_v61  ;;  %11894 = vst [vmem:[#allocation5_spill] sm:$0xff] %v7405_v0  ;;  %v7418_v4 = vld [vmem:[#allocation2 + $0x70] sm:$0x3]  ;;  %v7422_v5 = vld [vmem:[#allocation2 + $0xf8] sm:$0xff]  ;;  %659 = vrot.lane.b32.xlu1 %v7405_v0, %s7123_s28  ;;  %v780_v0 = vrot.slane %v7258_v8, 2 }
  0x3d   : > { %505 = vst.msk [vmem:[#allocation3 + $0x88] sm:$0xff] %vm336_vm0, %v7398_v62  ;;  %506 = vst.msk [vmem:[#allocation3 + $0x90] sm:$0xff] %vm336_vm0, %v7402_v63  ;;  %v7435_v13 = vld [vmem:[#allocation2 + $0x108] sm:$0xff]  ;;  %v592_v18 = vrot.slane %v7418_v4, 1  ;;  %v330_v20 = vld [vmem:[%s7245_s27 + $0xd0] sm:$0xff]  ;;  %665 = vrot.lane.b32.xlu0 %v7428_v10, %s7123_s28  ;;  %v785_v8 = vrot.slane %v7304_v31, 2 }
  0x3e   : > { %507 = vst.msk [vmem:[#allocation3 + $0x98] sm:$0xff] %vm336_vm0, %v7410_v2  ;;  %508 = vst.msk [vmem:[#allocation3 + $0xa0] sm:$0xff] %vm336_vm0, %v7414_v3  ;;  %v331_v21 = vld [vmem:[%s7245_s27 + $0xd8] sm:$0xff]  ;;  %v7456_v22 = vld [vmem:[#allocation2 + $0x88] sm:$0x3] }
  0x3f   : > { %11895 = vst [vmem:[#allocation6_spill] sm:$0xff] %v7428_v10  ;;  %509 = vst.msk [vmem:[#allocation3 + $0xa8] sm:$0xff] %vm336_vm0, %v7422_v5  ;;  %v332_v23 = vld [vmem:[%s7245_s27 + $0xe0] sm:$0xff]  ;;  %v333_v24 = vld [vmem:[%s7245_s27 + $0xe8] sm:$0xff]  ;;  %v7473_v28 = vsel %vm568_vm2, %v590_v60, %v592_v18  ;;  %v597_v29 = vrot.slane %v7456_v22, 1  ;;  %v610_v18 = vrot.slane %v7398_v62, 1 }
  0x40   : > { %414 = vst.msk [vmem:[#allocation2 + $0x111] sm:$0xff] %vm336_vm0, %v325_v6  ;;  %510 = vst.msk [vmem:[#allocation3 + $0xb0] sm:$0xff] %vm336_vm0, %v7435_v13  ;;  %663 = vrot.lane.b32.xlu1 %v7445_v17, %s7123_s28  ;;  %v7478_v33 = vld [vmem:[#allocation2 + $0xa0] sm:$0x3]  ;;  %v7513_v11 = vld [vmem:[#allocation2 + $0xb8] sm:$0x3] }
  0x41   : > { %11896 = vst [vmem:[#allocation7_spill] sm:$0xff] %v7445_v17  ;;  %415 = vst.msk [vmem:[#allocation2 + $0x121] sm:$0xff] %vm336_vm0, %v326_v14  ;;  %669 = vrot.lane.b32.xlu0 %v7464_v25, %s7123_s28  ;;  %v7498_v59 = vsel %vm568_vm2, %v595_v12, %v597_v29  ;;  %v602_v60 = vrot.slane %v7478_v33, 1  ;;  %v615_v29 = vrot.slane %v7410_v2, 1  ;;  %v335_v58 = vld [vmem:[%s7245_s27 + $0xf8] sm:$0xff] }
  0x42   : > { %416 = vst.msk [vmem:[#allocation2 + $0x129] sm:$0xff] %vm336_vm0, %v327_v15  ;;  %417 = vst.msk [vmem:[#allocation2 + $0x139] sm:$0xff] %vm336_vm0, %v328_v16  ;;  %v7524_v15 = vsel %vm568_vm2, %v604_v38, %v605_v39  ;;  %v609_v16 = vrot.slane %v7394_v61, 1 }
  0x43   : > { %418 = vst.msk [vmem:[#allocation2 + $0x141] sm:$0xff] %vm336_vm0, %v329_v19  ;;  %419 = vst.msk [vmem:[#allocation2 + $0x151] sm:$0xff] %vm336_vm0, %v330_v20  ;;  %v7539_v20 = vsel %vm568_vm2, %v600_v27, %v602_v60  ;;  %v7559_v60 = vld [vmem:[#allocation2 + $0xe8] sm:$0x3] }
  0x44   : > { %420 = vst.msk [vmem:[#allocation2 + $0x159] sm:$0xff] %vm336_vm0, %v331_v21  ;;  %11897 = vst [vmem:[#allocation8_spill] sm:$0xff] %v7464_v25  ;;  %667 = vrot.lane.b32.xlu1 %v7473_v28, %s7123_s28  ;;  %v607_v21 = vrot.slane %v7513_v11, 1 }
  0x45   : > { %421 = vst.msk [vmem:[#allocation2 + $0x169] sm:$0xff] %vm336_vm0, %v332_v23  ;;  %422 = vst.msk [vmem:[#allocation2 + $0x171] sm:$0xff] %vm336_vm0, %v333_v24  ;;  %673 = vrot.lane.b32.xlu0 %v7483_v36, %s7123_s28  ;;  %v7544_v23 = vld [vmem:[#allocation2 + $0xd0] sm:$0x3]  ;;  %v7547_v24 = vsel %vm568_vm2, %v609_v16, %v610_v18  ;;  %v7562_v16 = vsel %vm568_vm2, %v614_v26, %v615_v29 }
  0x46   : > { %11898 = vst [vmem:[#allocation9_spill] sm:$0xff] %v7473_v28  ;;  %11899 = vst [vmem:[#allocation10_spill] sm:$0xff] %v7483_v36  ;;  %v7554_v27 = vsel %vm568_vm2, %v605_v39, %v607_v21  ;;  %v612_v38 = vrot.slane %v7544_v23, 1  ;;  %v617_v21 = vrot.slane %v7559_v60, 1 }
  0x47   : > { %v7480_v34 = vld [vmem:[#allocation2 + $0x110] sm:$0xff]  ;;  %11903 = vst [vmem:[#allocation14_spill] sm:$0xff] %v7498_v59  ;;  %11908 = vst [vmem:[#allocation19_spill] sm:$0xff] %v7524_v15 }
  0x48   : > { %511 = vst.msk [vmem:[#allocation3 + $0xb8] sm:$0xff] %vm336_vm0, %v7480_v34  ;;  %v7491_v44 = vld [vmem:[#allocation2 + $0x120] sm:$0xff]  ;;  %671 = vrot.lane.b32.xlu1 %v7498_v59, %s7123_s28  ;;  %11910 = vst [vmem:[#allocation21_spill] sm:$0xff] %v7539_v20  ;;  %v620_v59 = vrot.slane %v7422_v5, 1  ;;  %v7569_v39 = vsel %vm568_vm2, %v610_v18, %v612_v38  ;;  %v625_v36 = vrot.slane %v7480_v34, 1  ;;  %v7584_v18 = vsel %vm568_vm2, %v615_v29, %v617_v21 }
  0x49   : > { %11900 = vst [vmem:[#allocation11_spill] sm:$0xff] %v7491_v44  ;;  %v7493_v45 = vld [vmem:[#allocation2 + $0x128] sm:$0xff]  ;;  %v7495_v53 = vld [vmem:[#allocation2 + $0x138] sm:$0xff]  ;;  %512 = vst.msk [vmem:[#allocation3 + $0xc0] sm:$0xff] %vm336_vm0, %v7491_v44  ;;  %677 = vrot.lane.b32.xlu0 %v7524_v15, %s7123_s28  ;;  %v619_v15 = vrot.slane %v7414_v3, 1 }
  0x4a   : > { %11901 = vst [vmem:[#allocation12_spill] sm:$0xff] %v7493_v45  ;;  %11902 = vst [vmem:[#allocation13_spill] sm:$0xff] %v7495_v53  ;;  %v7505_v1 = vld [vmem:[#allocation2 + $0x140] sm:$0xff]  ;;  %v7509_v6 = vld [vmem:[#allocation2 + $0x150] sm:$0xff]  ;;  %v630_v28 = vrot.slane %v7493_v45, 1 }
  0x4b   : > { %513 = vst.msk [vmem:[#allocation3 + $0xc8] sm:$0xff] %vm336_vm0, %v7493_v45  ;;  %11904 = vst [vmem:[#allocation15_spill] sm:$0xff] %v7505_v1  ;;  %v7517_v12 = vld [vmem:[#allocation2 + $0x158] sm:$0xff]  ;;  %v7577_v26 = vsel %vm568_vm2, %v619_v15, %v620_v59  ;;  %v635_v25 = vrot.slane %v7505_v1, 1 }
  0x4c   : > { %514 = vst.msk [vmem:[#allocation3 + $0xd0] sm:$0xff] %vm336_vm0, %v7495_v53  ;;  %11905 = vst [vmem:[#allocation16_spill] sm:$0xff] %v7509_v6  ;;  %v7521_v14 = vld [vmem:[#allocation2 + $0x168] sm:$0xff]  ;;  %v7530_v19 = vld [vmem:[#allocation2 + $0x170] sm:$0xff]  ;;  %675 = vrot.lane.b32.xlu1 %v7539_v20, %s7123_s28  ;;  %v624_v20 = vrot.slane %v7435_v13, 1  ;;  %v640_v17 = vrot.slane %v7517_v12, 1 }
  0x4d   : > { %515 = vst.msk [vmem:[#allocation3 + $0xd8] sm:$0xff] %vm336_vm0, %v7505_v1  ;;  %11906 = vst [vmem:[#allocation17_spill] sm:$0xff] %v7517_v12  ;;  %681 = vrot.lane.b32.xlu0 %v7547_v24, %s7123_s28  ;;  %v644_v10 = vrot.slane %v7521_v14, 1 }
  0x4e   : > { %516 = vst.msk [vmem:[#allocation3 + $0xe0] sm:$0xff] %vm336_vm0, %v7509_v6  ;;  %11907 = vst [vmem:[#allocation18_spill] sm:$0xff] %v7521_v14  ;;  %v7592_v15 = vsel %vm568_vm2, %v624_v20, %v625_v36 }
  0x4f   : > { %517 = vst.msk [vmem:[#allocation3 + $0xe8] sm:$0xff] %vm336_vm0, %v7517_v12  ;;  %11909 = vst [vmem:[#allocation20_spill] sm:$0xff] %v7530_v19 }
  0x50   : > { %518 = vst.msk [vmem:[#allocation3 + $0xf0] sm:$0xff] %vm336_vm0, %v7521_v14  ;;  %519 = vst.msk [vmem:[#allocation3 + $0xf8] sm:$0xff] %vm336_vm0, %v7530_v19  ;;  %679 = vrot.lane.b32.xlu1 %v7554_v27, %s7123_s28 }
  0x51   : > { %11911 = vst [vmem:[#allocation22_spill] sm:$0xff] %v7547_v24  ;;  %11912 = vst [vmem:[#allocation23_spill] sm:$0xff] %v7554_v27  ;;  %685 = vrot.lane.b32.xlu0 %v7562_v16, %s7123_s28  ;;  %v7574_v24 = vld [vmem:[#allocation2 + $0x100] sm:$0x3]  ;;  %v629_v27 = vrot.slane %v7491_v44, 1 }
  0x52   : > { %11913 = vst [vmem:[#allocation24_spill] sm:$0xff] %v7562_v16  ;;  %11914 = vst [vmem:[#allocation25_spill] sm:$0xff] %v7569_v39  ;;  %v622_v38 = vrot.slane %v7574_v24, 1  ;;  %v7589_v16 = vld [vmem:[#allocation2 + $0x118] sm:$0x3] }
  0x53   : > { %11915 = vst [vmem:[#allocation26_spill] sm:$0xff] %v7577_v26  ;;  %11916 = vst [vmem:[#allocation27_spill] sm:$0xff] %v7584_v18  ;;  %v627_v21 = vrot.slane %v7589_v16, 1  ;;  %v7607_v20 = vsel %vm568_vm2, %v629_v27, %v630_v28 }
  0x54   : > { %683 = vrot.lane.b32.xlu1 %v7569_v39, %s7123_s28  ;;  %11917 = vst [vmem:[#allocation28_spill] sm:$0xff] %v7592_v15  ;;  %v7599_v29 = vsel %vm568_vm2, %v620_v59, %v622_v38  ;;  %11919 = vst [vmem:[#allocation30_spill] sm:$0xff] %v7607_v20  ;;  %v634_v39 = vrot.slane %v7495_v53, 1 }
  0x55   : > { %689 = vrot.lane.b32.xlu0 %v7577_v26, %s7123_s28  ;;  %11918 = vst [vmem:[#allocation29_spill] sm:$0xff] %v7599_v29  ;;  %v7604_v26 = vld [vmem:[#allocation2 + $0x130] sm:$0x3]  ;;  %v7614_v59 = vsel %vm568_vm2, %v625_v36, %v627_v21  ;;  %424 = vst.msk [vmem:[#allocation2 + $0x189] sm:$0xff] %vm336_vm0, %v335_v58  ;;  %v782_v58 = vrot.slane %v7260_v9, 2 }
  0x56   : > { %11920 = vst [vmem:[#allocation31_spill] sm:$0xff] %v7614_v59  ;;  %v632_v38 = vrot.slane %v7604_v26, 1  ;;  %v7622_v27 = vsel %vm568_vm2, %v634_v39, %v635_v25 }
  0x57   : > { %11921 = vst [vmem:[#allocation32_spill] sm:$0xff] %v7622_v27 }
  0x58   : > { %687 = vrot.lane.b32.xlu1 %v7584_v18, %s7123_s28  ;;  %v639_v18 = vrot.slane %v7509_v6, 1  ;;  %v7629_v36 = vsel %vm568_vm2, %v630_v28, %v632_v38 }
  0x59   : > { %693 = vrot.lane.b32.xlu0 %v7592_v15, %s7123_s28  ;;  %v7619_v15 = vld [vmem:[#allocation2 + $0x148] sm:$0x3] }
  0x5a   : > { %v637_v21 = vrot.slane %v7619_v15, 1  ;;  %v7639_v39 = vsel %vm568_vm2, %v639_v18, %v640_v17 }
  0x5b   : > { %11922 = vst [vmem:[#allocation33_spill] sm:$0xff] %v7639_v39 }
  0x5c   : > { %691 = vrot.lane.b32.xlu1 %v7599_v29, %s7123_s28  ;;  %v334_v29 = vld [vmem:[%s7245_s27 + $0xf0] sm:$0xff]  ;;  %v7646_v28 = vsel %vm568_vm2, %v635_v25, %v637_v21 }
  0x5d   : > { %697 = vrot.lane.b32.xlu0 %v7607_v20, %s7123_s28  ;;  %v7635_v20 = vld [vmem:[#allocation2 + $0x160] sm:$0x3]  ;;  %423 = vst.msk [vmem:[#allocation2 + $0x181] sm:$0xff] %vm336_vm0, %v334_v29  ;;  %11923 = vst [vmem:[#allocation34_spill] sm:$0xff] %v7646_v28  ;;  %v779_v29 = vrot.slane %v7256_v7, 2  ;;  %v784_v7 = vrot.slane %v7302_v30, 2 }
  0x5e   : > { %v642_v38 = vrot.slane %v7635_v20, 1 }
  0x60   : > { %695 = vrot.lane.b32.xlu1 %v7614_v59, %s7123_s28  ;;  %v645_v59 = vrot.slane %v7530_v19, 1  ;;  %v7663_v25 = vsel %vm568_vm2, %v640_v17, %v642_v38  ;;  %v7679_v17 = vsel %vm778_vm3, %v784_v7, %v785_v8  ;;  %v789_v38 = vrot.slane %v7306_v32, 2 }
  0x61   : > { %701 = vrot.lane.b32.xlu0 %v7622_v27, %s7123_s28  ;;  %v7651_v27 = vld [vmem:[#allocation2 + $0x178] sm:$0x3]  ;;  %11925 = vst [vmem:[#allocation36_spill] sm:$0xff] %v7663_v25 }
  0x62   : > { %v7654_v18 = vsel %vm568_vm2, %v644_v10, %v645_v59  ;;  %v647_v21 = vrot.slane %v7651_v27, 1  ;;  %v781_v10 = vsel %vm778_vm3, %v779_v29, %v780_v0  ;;  %v790_v29 = vrot.slane %v7317_v35, 2 }
  0x63   : > { %11924 = vst [vmem:[#allocation35_spill] sm:$0xff] %v7654_v18 }
  0x64   : > { %699 = vrot.lane.b32.xlu1 %v7629_v36, %s7123_s28  ;;  %v7690_v9 = vsel %vm778_vm3, %v789_v38, %v790_v29  ;;  %v804_v38 = vrot.slane %v7348_v48, 2 }
  0x65   : > { %705 = vrot.lane.b32.xlu0 %v7639_v39, %s7123_s28 }
  0x68   : > { %703 = vrot.lane.b32.xlu1 %v7646_v28, %s7123_s28  ;;  %v7674_v28 = vsel %vm568_vm2, %v645_v59, %v647_v21  ;;  %v787_v59 = vrot.slane %v7322_v37, 2  ;;  %v794_v21 = vrot.slane %v7329_v40, 2 }
  0x69   : > { %709 = vrot.lane.b32.xlu0 %v7654_v18, %s7123_s28  ;;  %11926 = vst [vmem:[#allocation37_spill] sm:$0xff] %v7674_v28 }
  0x6a   : > { %v7696_v7 = vsel %vm778_vm3, %v785_v8, %v787_v59  ;;  %v797_v8 = vrot.slane %v7379_v56, 2  ;;  %v805_v59 = vrot.slane %v7359_v50, 2 }
  0x6c   : > { %707 = vrot.lane.b32.xlu1 %v7663_v25, %s7123_s28  ;;  %v783_v25 = vsel %vm778_vm3, %v780_v0, %v782_v58  ;;  %v799_v0 = vrot.slane %v7344_v46, 2  ;;  %v800_v58 = vrot.slane %v7346_v47, 2  ;;  %v7728_v56 = vsel %vm778_vm3, %v804_v38, %v805_v59 }
  0x6d   : > { %859 = vrot.lane.b32.xlu0 %v781_v10, %s7124_s29  ;;  %v795_v10 = vrot.slane %v7331_v41, 2  ;;  %11929 = vst [vmem:[#allocation40_spill] sm:$0xff] %v7728_v56  ;;  %v815_v38 = vrot.slane %v7383_v57, 2 }
  0x6f   : > { %v7702_v37 = vsel %vm778_vm3, %v794_v21, %v795_v10  ;;  %v7722_v21 = vsel %vm778_vm3, %v795_v10, %v797_v8  ;;  %v807_v10 = vrot.slane %v7456_v22, 2  ;;  %v814_v8 = vrot.slane %v7375_v55, 2 }
  0x70   : > { %711 = vrot.lane.b32.xlu1 %v7674_v28, %s7123_s28  ;;  %v792_v28 = vrot.slane %v7333_v42, 2  ;;  %v7715_v42 = vsel %vm778_vm3, %v799_v0, %v800_v58  ;;  %11928 = vst [vmem:[#allocation39_spill] sm:$0xff] %v7722_v21  ;;  %v810_v0 = vrot.slane %v7371_v54, 2 }
  0x71   : > { %863 = vrot.lane.b32.xlu0 %v7679_v17, %s7124_s29  ;;  %v7754_v22 = vsel %vm778_vm3, %v814_v8, %v815_v38  ;;  %v825_v8 = vrot.slane %v7410_v2, 2 }
  0x72   : > { %11931 = vst [vmem:[#allocation42_spill] sm:$0xff] %v7754_v22 }
  0x74   : > { %861 = vrot.lane.b32.xlu1 %v783_v25, %s7124_s29  ;;  %v7709_v25 = vsel %vm778_vm3, %v790_v29, %v792_v28  ;;  %v802_v28 = vrot.slane %v7418_v4, 2  ;;  %v809_v29 = vrot.slane %v7363_v51, 2 }
  0x75   : > { %867 = vrot.lane.b32.xlu0 %v7690_v9, %s7124_s29  ;;  %11927 = vst [vmem:[#allocation38_spill] sm:$0xff] %v7709_v25 }
  0x76   : > { %v7741_v4 = vsel %vm778_vm3, %v809_v29, %v810_v0  ;;  %v820_v29 = vrot.slane %v7398_v62, 2 }
  0x77   : > { %11930 = vst [vmem:[#allocation41_spill] sm:$0xff] %v7741_v4 }
  0x78   : > { %865 = vrot.lane.b32.xlu1 %v7696_v7, %s7124_s29 }
  0x79   : > { %871 = vrot.lane.b32.xlu0 %v7702_v37, %s7124_s29 }
  0x7c   : > { %869 = vrot.lane.b32.xlu1 %v7709_v25, %s7124_s29  ;;  %v7735_v25 = vsel %vm778_vm3, %v800_v58, %v802_v28  ;;  %v812_v58 = vrot.slane %v7478_v33, 2  ;;  %v819_v28 = vrot.slane %v7394_v61, 2 }
  0x7d   : > { %875 = vrot.lane.b32.xlu0 %v7715_v42, %s7124_s29 }
  0x7e   : > { %v7767_v33 = vsel %vm778_vm3, %v819_v28, %v820_v29  ;;  %v830_v28 = vrot.slane %v7422_v5, 2 }
  0x7f   : > { %11932 = vst [vmem:[#allocation43_spill] sm:$0xff] %v7767_v33 }
  0x80   : > { %873 = vrot.lane.b32.xlu1 %v7722_v21, %s7124_s29  ;;  %v7748_v21 = vsel %vm778_vm3, %v805_v59, %v807_v10  ;;  %v817_v59 = vrot.slane %v7513_v11, 2  ;;  %v824_v10 = vrot.slane %v7402_v63, 2 }
  0x81   : > { %879 = vrot.lane.b32.xlu0 %v7728_v56, %s7124_s29  ;;  %v7761_v56 = vsel %vm778_vm3, %v810_v0, %v812_v58  ;;  %v822_v0 = vrot.slane %v7544_v23, 2  ;;  %v829_v58 = vrot.slane %v7414_v3, 2 }
  0x82   : > { %v7780_v11 = vsel %vm778_vm3, %v824_v10, %v825_v8  ;;  %v835_v10 = vrot.slane %v7480_v34, 2 }
  0x83   : > { %11933 = vst [vmem:[#allocation44_spill] sm:$0xff] %v7780_v11  ;;  %v7793_v23 = vsel %vm778_vm3, %v829_v58, %v830_v28  ;;  %v840_v58 = vrot.slane %v7493_v45, 2 }
  0x84   : > { %877 = vrot.lane.b32.xlu1 %v7735_v25, %s7124_s29  ;;  %11934 = vst [vmem:[#allocation45_spill] sm:$0xff] %v7793_v23 }
  0x85   : > { %883 = vrot.lane.b32.xlu0 %v7741_v4, %s7124_s29  ;;  %v7774_v4 = vsel %vm778_vm3, %v815_v38, %v817_v59  ;;  %v827_v38 = vrot.slane %v7559_v60, 2  ;;  %v834_v59 = vrot.slane %v7435_v13, 2 }
  0x87   : > { %v7806_v60 = vsel %vm778_vm3, %v834_v59, %v835_v10  ;;  %v845_v59 = vrot.slane %v7505_v1, 2 }
  0x88   : > { %881 = vrot.lane.b32.xlu1 %v7748_v21, %s7124_s29  ;;  %11935 = vst [vmem:[#allocation46_spill] sm:$0xff] %v7806_v60 }
  0x89   : > { %887 = vrot.lane.b32.xlu0 %v7754_v22, %s7124_s29  ;;  %v7787_v22 = vsel %vm778_vm3, %v820_v29, %v822_v0  ;;  %v832_v29 = vrot.slane %v7574_v24, 2  ;;  %v839_v0 = vrot.slane %v7491_v44, 2 }
  0x8b   : > { %v7819_v24 = vsel %vm778_vm3, %v839_v0, %v840_v58  ;;  %v850_v0 = vrot.slane %v7517_v12, 2 }
  0x8c   : > { %885 = vrot.lane.b32.xlu1 %v7761_v56, %s7124_s29  ;;  %11937 = vst [vmem:[#allocation48_spill] sm:$0xff] %v7819_v24 }
  0x8d   : > { %891 = vrot.lane.b32.xlu0 %v7767_v33, %s7124_s29  ;;  %v7800_v33 = vsel %vm778_vm3, %v825_v8, %v827_v38  ;;  %v837_v8 = vrot.slane %v7589_v16, 2  ;;  %v844_v38 = vrot.slane %v7495_v53, 2 }
  0x8f   : > { %v7832_v16 = vsel %vm778_vm3, %v844_v38, %v845_v59  ;;  %v854_v38 = vrot.slane %v7521_v14, 2 }
  0x90   : > { %889 = vrot.lane.b32.xlu1 %v7774_v4, %s7124_s29  ;;  %11938 = vst [vmem:[#allocation49_spill] sm:$0xff] %v7832_v16 }
  0x91   : > { %895 = vrot.lane.b32.xlu0 %v7780_v11, %s7124_s29  ;;  %v7813_v11 = vsel %vm778_vm3, %v830_v28, %v832_v29  ;;  %v842_v28 = vrot.slane %v7604_v26, 2  ;;  %v849_v29 = vrot.slane %v7509_v6, 2  ;;  %v847_v26 = vrot.slane %v7619_v15, 2 }
  0x92   : > { %11936 = vst [vmem:[#allocation47_spill] sm:$0xff] %v7813_v11  ;;  %v852_v15 = vrot.slane %v7635_v20, 2  ;;  %v857_v20 = vrot.slane %v7651_v27, 2 }
  0x94   : > { %893 = vrot.lane.b32.xlu1 %v7787_v22, %s7124_s29 }
  0x95   : > { %899 = vrot.lane.b32.xlu0 %v7793_v23, %s7124_s29  ;;  %v7826_v23 = vsel %vm778_vm3, %v835_v10, %v837_v8  ;;  %v7840_v10 = vsel %vm778_vm3, %v840_v58, %v842_v28  ;;  %v7846_v8 = vsel %vm778_vm3, %v849_v29, %v850_v0 }
  0x96   : > { %11939 = vst [vmem:[#allocation50_spill] sm:$0xff] %v7840_v10  ;;  %11940 = vst [vmem:[#allocation51_spill] sm:$0xff] %v7846_v8 }
  0x98   : > { %897 = vrot.lane.b32.xlu1 %v7800_v33, %s7124_s29 }
  0x99   : > { %903 = vrot.lane.b32.xlu0 %v7806_v60, %s7124_s29  ;;  %v650_v60 = vpop.permute.xlu0 %649 }
  0x9a   : > { %746 = vst.msk [vmem:[#allocation3] sm:$0xff] %vm745_vm4, %v650_v60  ;;  %v7854_v60 = vsel %vm778_vm3, %v845_v59, %v847_v26 }
  0x9b   : > { %11941 = vst [vmem:[#allocation52_spill] sm:$0xff] %v7854_v60 }
  0x9c   : > { %901 = vrot.lane.b32.xlu1 %v7813_v11, %s7124_s29 }
  0x9d   : > { %907 = vrot.lane.b32.xlu0 %v7819_v24, %s7124_s29  ;;  %v855_v24 = vrot.slane %v7530_v19, 2  ;;  %v652_v11 = vpop.permute.xlu0 %651 }
  0x9e   : > { %747 = vst.msk [vmem:[#allocation3 + $0x8] sm:$0xff] %vm745_vm4, %v652_v11  ;;  %v7867_v11 = vsel %vm778_vm3, %v850_v0, %v852_v15 }
  0x9f   : > { %v7861_v28 = vsel %vm778_vm3, %v854_v38, %v855_v24  ;;  %11943 = vst [vmem:[#allocation54_spill] sm:$0xff] %v7867_v11  ;;  %v7877_v38 = vsel %vm778_vm3, %v855_v24, %v857_v20 }
  0xa0   : > { %905 = vrot.lane.b32.xlu1 %v7826_v23, %s7124_s29  ;;  %11942 = vst [vmem:[#allocation53_spill] sm:$0xff] %v7861_v28  ;;  %11944 = vst [vmem:[#allocation55_spill] sm:$0xff] %v7877_v38 }
  0xa1   : > { %911 = vrot.lane.b32.xlu0 %v7832_v16, %s7124_s29 }
  0xa4   : > { %909 = vrot.lane.b32.xlu1 %v7840_v10, %s7124_s29 }
  0xa5   : > { %915 = vrot.lane.b32.xlu0 %v7846_v8, %s7124_s29 }
  0xa6   : > { %v654_v58 = vpop.permute.xlu1 %653 }
  0xa7   : > { %748 = vst.msk [vmem:[#allocation3 + $0x10] sm:$0xff] %vm745_vm4, %v654_v58  ;;  %v658_v29 = vpop.permute.xlu0 %657 }
  0xa8   : > { %913 = vrot.lane.b32.xlu1 %v7854_v60, %s7124_s29  ;;  %750 = vst.msk [vmem:[#allocation3 + $0x20] sm:$0xff] %vm745_vm4, %v658_v29 }
  0xa9   : > { %919 = vrot.lane.b32.xlu0 %v7861_v28, %s7124_s29 }
  0xaa   : > { %v656_v59 = vpop.permute.xlu1 %655 }
  0xab   : > { %749 = vst.msk [vmem:[#allocation3 + $0x18] sm:$0xff] %vm745_vm4, %v656_v59  ;;  %v662_v26 = vpop.permute.xlu0 %661 }
  0xac   : > { %917 = vrot.lane.b32.xlu1 %v7867_v11, %s7124_s29  ;;  %752 = vst.msk [vmem:[#allocation3 + $0x30] sm:$0xff] %vm745_vm4, %v662_v26 }
  0xad   : > { %990 = vrot.lane.b32.xlu0 %v7302_v30, %s7125_s30 }
  0xae   : > { %v660_v27 = vpop.permute.xlu1 %659 }
  0xaf   : > { %751 = vst.msk [vmem:[#allocation3 + $0x28] sm:$0xff] %vm745_vm4, %v660_v27  ;;  %v666_v0 = vpop.permute.xlu0 %665 }
  0xb0   : > { %921 = vrot.lane.b32.xlu1 %v7877_v38, %s7124_s29  ;;  %754 = vst.msk [vmem:[#allocation3 + $0x40] sm:$0xff] %vm745_vm4, %v666_v0 }
  0xb1   : > { %994 = vrot.lane.b32.xlu0 %v7306_v32, %s7125_s30 }
  0xb2   : > { %v664_v15 = vpop.permute.xlu1 %663 }
  0xb3   : > { %753 = vst.msk [vmem:[#allocation3 + $0x38] sm:$0xff] %vm745_vm4, %v664_v15  ;;  %v670_v24 = vpop.permute.xlu0 %669 }
  0xb4   : > { %992 = vrot.lane.b32.xlu1 %v7304_v31, %s7125_s30  ;;  %756 = vst.msk [vmem:[#allocation3 + $0x50] sm:$0xff] %vm745_vm4, %v670_v24 }
  0xb5   : > { %998 = vrot.lane.b32.xlu0 %v7329_v40, %s7125_s30 }
  0xb6   : > { %v668_v30 = vpop.permute.xlu1 %667 }
  0xb7   : > { %755 = vst.msk [vmem:[#allocation3 + $0x48] sm:$0xff] %vm745_vm4, %v668_v30  ;;  %v674_v58 = vpop.permute.xlu0 %673 }
  0xb8   : > { %996 = vrot.lane.b32.xlu1 %v7317_v35, %s7125_s30  ;;  %758 = vst.msk [vmem:[#allocation3 + $0x60] sm:$0xff] %vm745_vm4, %v674_v58 }
  0xb9   : > { %1002 = vrot.lane.b32.xlu0 %v7344_v46, %s7125_s30 }
  0xba   : > { %v672_v29 = vpop.permute.xlu1 %671 }
  0xbb   : > { %757 = vst.msk [vmem:[#allocation3 + $0x58] sm:$0xff] %vm745_vm4, %v672_v29  ;;  %v678_v31 = vpop.permute.xlu0 %677 }
  0xbc   : > { %1000 = vrot.lane.b32.xlu1 %v7331_v41, %s7125_s30  ;;  %760 = vst.msk [vmem:[#allocation3 + $0x70] sm:$0xff] %vm745_vm4, %v678_v31 }
  0xbd   : > { %1006 = vrot.lane.b32.xlu0 %v7348_v48, %s7125_s30 }
  0xbe   : > { %v676_v20 = vpop.permute.xlu1 %675 }
  0xbf   : > { %759 = vst.msk [vmem:[#allocation3 + $0x68] sm:$0xff] %vm745_vm4, %v676_v20  ;;  %v682_v59 = vpop.permute.xlu0 %681 }
  0xc0   : > { %1004 = vrot.lane.b32.xlu1 %v7346_v47, %s7125_s30  ;;  %762 = vst.msk [vmem:[#allocation3 + $0x80] sm:$0xff] %vm745_vm4, %v682_v59 }
  0xc1   : > { %1010 = vrot.lane.b32.xlu0 %v7363_v51, %s7125_s30 }
  0xc2   : > { %v680_v26 = vpop.permute.xlu1 %679 }
  0xc3   : > { %761 = vst.msk [vmem:[#allocation3 + $0x78] sm:$0xff] %vm745_vm4, %v680_v26  ;;  %v686_v27 = vpop.permute.xlu0 %685 }
  0xc4   : > { %1008 = vrot.lane.b32.xlu1 %v7359_v50, %s7125_s30  ;;  %764 = vst.msk [vmem:[#allocation3 + $0x90] sm:$0xff] %vm745_vm4, %v686_v27 }
  0xc5   : > { %1014 = vrot.lane.b32.xlu0 %v7375_v55, %s7125_s30 }
  0xc6   : > { %v684_v0 = vpop.permute.xlu1 %683 }
  0xc7   : > { %763 = vst.msk [vmem:[#allocation3 + $0x88] sm:$0xff] %vm745_vm4, %v684_v0  ;;  %v690_v15 = vpop.permute.xlu0 %689 }
  0xc8   : > { %1012 = vrot.lane.b32.xlu1 %v7371_v54, %s7125_s30  ;;  %766 = vst.msk [vmem:[#allocation3 + $0xa0] sm:$0xff] %vm745_vm4, %v690_v15 }
  0xc9   : > { %1018 = vrot.lane.b32.xlu0 %v7394_v61, %s7125_s30 }
  0xca   : > { %v688_v24 = vpop.permute.xlu1 %687 }
  0xcb   : > { %765 = vst.msk [vmem:[#allocation3 + $0x98] sm:$0xff] %vm745_vm4, %v688_v24  ;;  %v694_v30 = vpop.permute.xlu0 %693 }
  0xcc   : > { %1016 = vrot.lane.b32.xlu1 %v7383_v57, %s7125_s30  ;;  %768 = vst.msk [vmem:[#allocation3 + $0xb0] sm:$0xff] %vm745_vm4, %v694_v30 }
  0xcd   : > { %1022 = vrot.lane.b32.xlu0 %v7402_v63, %s7125_s30 }
  0xce   : > { %v692_v58 = vpop.permute.xlu1 %691 }
  0xcf   : > { %767 = vst.msk [vmem:[#allocation3 + $0xa8] sm:$0xff] %vm745_vm4, %v692_v58  ;;  %v698_v29 = vpop.permute.xlu0 %697 }
  0xd0   : > { %1020 = vrot.lane.b32.xlu1 %v7398_v62, %s7125_s30  ;;  %770 = vst.msk [vmem:[#allocation3 + $0xc0] sm:$0xff] %vm745_vm4, %v698_v29 }
  0xd1   : > { %1026 = vrot.lane.b32.xlu0 %v7414_v3, %s7125_s30 }
  0xd2   : > { %v696_v31 = vpop.permute.xlu1 %695 }
  0xd3   : > { %769 = vst.msk [vmem:[#allocation3 + $0xb8] sm:$0xff] %vm745_vm4, %v696_v31  ;;  %v702_v20 = vpop.permute.xlu0 %701  ;;  %v7966_v31 = vld [vmem:[#allocation2 + $0x180] sm:$0xff] }
  0xd4   : > { %1024 = vrot.lane.b32.xlu1 %v7410_v2, %s7125_s30  ;;  %772 = vst.msk [vmem:[#allocation3 + $0xd0] sm:$0xff] %vm745_vm4, %v702_v20 }
  0xd5   : > { %1030 = vrot.lane.b32.xlu0 %v7435_v13, %s7125_s30 }
  0xd6   : > { %v700_v59 = vpop.permute.xlu1 %699 }
  0xd7   : > { %771 = vst.msk [vmem:[#allocation3 + $0xc8] sm:$0xff] %vm745_vm4, %v700_v59  ;;  %v706_v26 = vpop.permute.xlu0 %705 }
  0xd8   : > { %1028 = vrot.lane.b32.xlu1 %v7422_v5, %s7125_s30  ;;  %774 = vst.msk [vmem:[#allocation3 + $0xe0] sm:$0xff] %vm745_vm4, %v706_v26 }
  0xd9   : > { %1034 = vrot.lane.b32.xlu0 %v7491_v44, %s7125_s30  ;;  %v11966_v44 = vld [vmem:[#allocation34_spill] sm:$0xff] }
  0xda   : > { %v704_v27 = vpop.permute.xlu1 %703 }
  0xdb   : > { %773 = vst.msk [vmem:[#allocation3 + $0xd8] sm:$0xff] %vm745_vm4, %v704_v27  ;;  %v710_v0 = vpop.permute.xlu0 %709  ;;  %v7977_v27 = vld [vmem:[#allocation2 + $0x188] sm:$0xff] }
  0xdc   : > { %1032 = vrot.lane.b32.xlu1 %v7480_v34, %s7125_s30  ;;  %776 = vst.msk [vmem:[#allocation3 + $0xf0] sm:$0xff] %vm745_vm4, %v710_v0 }
  0xdd   : > { %1038 = vrot.lane.b32.xlu0 %v7495_v53, %s7125_s30 }
  0xde   : > { %v708_v15 = vpop.permute.xlu1 %707 }
  0xdf   : > { %775 = vst.msk [vmem:[#allocation3 + $0xe8] sm:$0xff] %vm745_vm4, %v708_v15  ;;  %v860_v24 = vpop.permute.xlu0 %859 }
  0xe0   : > { %1036 = vrot.lane.b32.xlu1 %v7493_v45, %s7125_s30  ;;  %956 = vst.msk [vmem:[#allocation3] sm:$0xff] %vm955_vm5, %v860_v24 }
  0xe1   : > { %1042 = vrot.lane.b32.xlu0 %v7509_v6, %s7125_s30 }
  0xe2   : > { %v712_v30 = vpop.permute.xlu1 %711 }
  0xe3   : > { %777 = vst.msk [vmem:[#allocation3 + $0xf8] sm:$0xff] %vm745_vm4, %v712_v30  ;;  %v864_v58 = vpop.permute.xlu0 %863 }
  0xe4   : > { %1040 = vrot.lane.b32.xlu1 %v7505_v1, %s7125_s30  ;;  %958 = vst.msk [vmem:[#allocation3 + $0x10] sm:$0xff] %vm955_vm5, %v864_v58 }
  0xe5   : > { %1046 = vrot.lane.b32.xlu0 %v7521_v14, %s7125_s30 }
  0xe6   : > { %v862_v29 = vpop.permute.xlu1 %861 }
  0xe7   : > { %957 = vst.msk [vmem:[#allocation3 + $0x8] sm:$0xff] %vm955_vm5, %v862_v29  ;;  %v868_v20 = vpop.permute.xlu0 %867 }
  0xe8   : > { %1044 = vrot.lane.b32.xlu1 %v7517_v12, %s7125_s30  ;;  %960 = vst.msk [vmem:[#allocation3 + $0x20] sm:$0xff] %vm955_vm5, %v868_v20  ;;  %v11946_v20 = vld [vmem:[#allocation5_spill] sm:$0xff] }
  0xe9   : > { %1050 = vrot.lane.b32.xlu0 %v7966_v31, %s7125_s30 }
  0xea   : > { %v866_v59 = vpop.permute.xlu1 %865 }
  0xeb   : > { %959 = vst.msk [vmem:[#allocation3 + $0x18] sm:$0xff] %vm955_vm5, %v866_v59  ;;  %v872_v26 = vpop.permute.xlu0 %871  ;;  %v11947_v59 = vld [vmem:[#allocation6_spill] sm:$0xff] }
  0xec   : > { %1048 = vrot.lane.b32.xlu1 %v7530_v19, %s7125_s30  ;;  %962 = vst.msk [vmem:[#allocation3 + $0x30] sm:$0xff] %vm955_vm5, %v872_v26 }
  0xed   : > { %1125 = vrot.lane.b32.xlu0 %v7336_v43, %s7126_s7  ;;  %v11945_v43 = vld [vmem:[#allocation4_spill] sm:$0xff] }
  0xee   : > { %v870_v0 = vpop.permute.xlu1 %869 }
  0xef   : > { %961 = vst.msk [vmem:[#allocation3 + $0x28] sm:$0xff] %vm955_vm5, %v870_v0  ;;  %v876_v15 = vpop.permute.xlu0 %875  ;;  %v11948_v0 = vld [vmem:[#allocation7_spill] sm:$0xff] }
  0xf0   : > { %1052 = vrot.lane.b32.xlu1 %v7977_v27, %s7125_s30  ;;  %964 = vst.msk [vmem:[#allocation3 + $0x40] sm:$0xff] %vm955_vm5, %v876_v15  ;;  %v11949_v15 = vld [vmem:[#allocation8_spill] sm:$0xff] }
  0xf1   : > { %1129 = vrot.lane.b32.xlu0 %v7353_v49, %s7126_s7 }
  0xf2   : > { %v874_v24 = vpop.permute.xlu1 %873 }
  0xf3   : > { %963 = vst.msk [vmem:[#allocation3 + $0x38] sm:$0xff] %vm955_vm5, %v874_v24  ;;  %v880_v30 = vpop.permute.xlu0 %879 }
  0xf4   : > { %1127 = vrot.lane.b32.xlu1 %v7366_v52, %s7126_s7  ;;  %966 = vst.msk [vmem:[#allocation3 + $0x50] sm:$0xff] %vm955_vm5, %v880_v30 }
  0xf5   : > { %1133 = vrot.lane.b32.xlu0 %v11945_v43, %s7126_s7 }
  0xf6   : > { %v878_v58 = vpop.permute.xlu1 %877 }
  0xf7   : > { %965 = vst.msk [vmem:[#allocation3 + $0x48] sm:$0xff] %vm955_vm5, %v878_v58  ;;  %v884_v29 = vpop.permute.xlu0 %883  ;;  %v11950_v58 = vld [vmem:[#allocation9_spill] sm:$0xff] }
  0xf8   : > { %1131 = vrot.lane.b32.xlu1 %v11946_v20, %s7126_s7  ;;  %968 = vst.msk [vmem:[#allocation3 + $0x60] sm:$0xff] %vm955_vm5, %v884_v29  ;;  %v11951_v29 = vld [vmem:[#allocation10_spill] sm:$0xff] }
  0xf9   : > { %1137 = vrot.lane.b32.xlu0 %v11947_v59, %s7126_s7 }
  0xfa   : > { %v882_v26 = vpop.permute.xlu1 %881 }
  0xfb   : > { %967 = vst.msk [vmem:[#allocation3 + $0x58] sm:$0xff] %vm955_vm5, %v882_v26  ;;  %v888_v52 = vpop.permute.xlu0 %887 }
  0xfc   : > { %1135 = vrot.lane.b32.xlu1 %v11948_v0, %s7126_s7  ;;  %970 = vst.msk [vmem:[#allocation3 + $0x70] sm:$0xff] %vm955_vm5, %v888_v52  ;;  %v11952_v52 = vld [vmem:[#allocation14_spill] sm:$0xff] }
  0xfd   : > { %1141 = vrot.lane.b32.xlu0 %v11949_v15, %s7126_s7 }
  0xfe   : > { %v886_v24 = vpop.permute.xlu1 %885 }
  0xff   : > { %969 = vst.msk [vmem:[#allocation3 + $0x68] sm:$0xff] %vm955_vm5, %v886_v24  ;;  %v892_v30 = vpop.permute.xlu0 %891  ;;  %v11953_v24 = vld [vmem:[#allocation19_spill] sm:$0xff] }
 0x100   : > { %1139 = vrot.lane.b32.xlu1 %v11950_v58, %s7126_s7  ;;  %972 = vst.msk [vmem:[#allocation3 + $0x80] sm:$0xff] %vm955_vm5, %v892_v30  ;;  %v11954_v30 = vld [vmem:[#allocation21_spill] sm:$0xff] }
 0x101   : > { %1145 = vrot.lane.b32.xlu0 %v11951_v29, %s7126_s7 }
 0x102   : > { %v890_v26 = vpop.permute.xlu1 %889 }
 0x103   : > { %971 = vst.msk [vmem:[#allocation3 + $0x78] sm:$0xff] %vm955_vm5, %v890_v26  ;;  %v896_v38 = vpop.permute.xlu0 %895  ;;  %v11955_v26 = vld [vmem:[#allocation22_spill] sm:$0xff] }
 0x104   : > { %1143 = vrot.lane.b32.xlu1 %v11952_v52, %s7126_s7  ;;  %974 = vst.msk [vmem:[#allocation3 + $0x90] sm:$0xff] %vm955_vm5, %v896_v38  ;;  %v11956_v38 = vld [vmem:[#allocation23_spill] sm:$0xff] }
 0x105   : > { %1149 = vrot.lane.b32.xlu0 %v11953_v24, %s7126_s7 }
 0x106   : > { %v894_v28 = vpop.permute.xlu1 %893 }
 0x107   : > { %973 = vst.msk [vmem:[#allocation3 + $0x88] sm:$0xff] %vm955_vm5, %v894_v28  ;;  %v900_v19 = vpop.permute.xlu0 %899  ;;  %v11957_v28 = vld [vmem:[#allocation24_spill] sm:$0xff] }
 0x108   : > { %1147 = vrot.lane.b32.xlu1 %v11954_v30, %s7126_s7  ;;  %976 = vst.msk [vmem:[#allocation3 + $0xa0] sm:$0xff] %vm955_vm5, %v900_v19  ;;  %v11958_v19 = vld [vmem:[#allocation25_spill] sm:$0xff] }
 0x109   : > { %1153 = vrot.lane.b32.xlu0 %v11955_v26, %s7126_s7 }
 0x10a   : > { %v898_v14 = vpop.permute.xlu1 %897 }
 0x10b   : > { %975 = vst.msk [vmem:[#allocation3 + $0x98] sm:$0xff] %vm955_vm5, %v898_v14  ;;  %v904_v11 = vpop.permute.xlu0 %903  ;;  %v11959_v14 = vld [vmem:[#allocation26_spill] sm:$0xff] }
 0x10c   : > { %1151 = vrot.lane.b32.xlu1 %v11956_v38, %s7126_s7  ;;  %978 = vst.msk [vmem:[#allocation3 + $0xb0] sm:$0xff] %vm955_vm5, %v904_v11  ;;  %v11960_v11 = vld [vmem:[#allocation27_spill] sm:$0xff] }
 0x10d   : > { %1157 = vrot.lane.b32.xlu0 %v11957_v28, %s7126_s7 }
 0x10e   : > { %v902_v8 = vpop.permute.xlu1 %901 }
 0x10f   : > { %977 = vst.msk [vmem:[#allocation3 + $0xa8] sm:$0xff] %vm955_vm5, %v902_v8  ;;  %v908_v12 = vpop.permute.xlu0 %907  ;;  %v11961_v8 = vld [vmem:[#allocation28_spill] sm:$0xff] }
 0x110   : > { %1155 = vrot.lane.b32.xlu1 %v11958_v19, %s7126_s7  ;;  %980 = vst.msk [vmem:[#allocation3 + $0xc0] sm:$0xff] %vm955_vm5, %v908_v12  ;;  %v11962_v12 = vld [vmem:[#allocation29_spill] sm:$0xff] }
 0x111   : > { %1161 = vrot.lane.b32.xlu0 %v11959_v14, %s7126_s7 }
 0x112   : > { %v906_v6 = vpop.permute.xlu1 %905 }
 0x113   : > { %979 = vst.msk [vmem:[#allocation3 + $0xb8] sm:$0xff] %vm955_vm5, %v906_v6  ;;  %v912_v60 = vpop.permute.xlu0 %911  ;;  %v11963_v6 = vld [vmem:[#allocation30_spill] sm:$0xff] }
 0x114   : > { %1159 = vrot.lane.b32.xlu1 %v11960_v11, %s7126_s7  ;;  %982 = vst.msk [vmem:[#allocation3 + $0xd0] sm:$0xff] %vm955_vm5, %v912_v60  ;;  %v11964_v60 = vld [vmem:[#allocation31_spill] sm:$0xff] }
 0x115   : > { %1165 = vrot.lane.b32.xlu0 %v11961_v8, %s7126_s7 }
 0x116   : > { %v910_v16 = vpop.permute.xlu1 %909 }
 0x117   : > { %981 = vst.msk [vmem:[#allocation3 + $0xc8] sm:$0xff] %vm955_vm5, %v910_v16  ;;  %v916_v1 = vpop.permute.xlu0 %915  ;;  %v11965_v16 = vld [vmem:[#allocation32_spill] sm:$0xff] }
 0x118   : > { %1163 = vrot.lane.b32.xlu1 %v11962_v12, %s7126_s7  ;;  %984 = vst.msk [vmem:[#allocation3 + $0xe0] sm:$0xff] %vm955_vm5, %v916_v1 }
 0x119   : > { %1169 = vrot.lane.b32.xlu0 %v11963_v6, %s7126_s7 }
 0x11a   : > { %v914_v53 = vpop.permute.xlu1 %913 }
 0x11b   : > { %983 = vst.msk [vmem:[#allocation3 + $0xd8] sm:$0xff] %vm955_vm5, %v914_v53  ;;  %v920_v10 = vpop.permute.xlu0 %919 }
 0x11c   : > { %1167 = vrot.lane.b32.xlu1 %v11964_v60, %s7126_s7  ;;  %986 = vst.msk [vmem:[#allocation3 + $0xf0] sm:$0xff] %vm955_vm5, %v920_v10  ;;  %v1120_v10 = vrot.slane %v7966_v31, 1 }
 0x11d   : > { %1173 = vrot.lane.b32.xlu0 %v11965_v16, %s7126_s7  ;;  %v1121_v16 = vrot.slane %v7977_v27, 1  ;;  %v11968_v27 = vld [vmem:[#allocation36_spill] sm:$0xff] }
 0x11e   : > { %v918_v45 = vpop.permute.xlu1 %917 }
 0x11f   : > { %985 = vst.msk [vmem:[#allocation3 + $0xe8] sm:$0xff] %vm955_vm5, %v918_v45  ;;  %v991_v1 = vpop.permute.xlu0 %990 }
 0x120   : > { %1171 = vrot.lane.b32.xlu1 %v7629_v36, %s7126_s7  ;;  %1087 = vst.msk [vmem:[#allocation3] sm:$0xff] %vm1086_vm6, %v991_v1  ;;  %v8067_v1 = vld [vmem:[#allocation2 + $0x190] sm:$0x3] }
 0x121   : > { %1177 = vrot.lane.b32.xlu0 %v7639_v39, %s7126_s7  ;;  %11967 = vst [vmem:[#allocation4_spill] sm:$0xff] %v8067_v1  ;;  %v1123_v39 = vrot.slane %v8067_v1, 1 }
 0x122   : > { %v922_v53 = vpop.permute.xlu1 %921 }
 0x123   : > { %987 = vst.msk [vmem:[#allocation3 + $0xf8] sm:$0xff] %vm955_vm5, %v922_v53  ;;  %v995_v6 = vpop.permute.xlu0 %994  ;;  %v8071_v53 = vsel %vm568_vm2, %v1120_v10, %v1121_v16  ;;  %v8084_v10 = vsel %vm568_vm2, %v1121_v16, %v1123_v39  ;;  %v425_v39 = vld [vmem:[%s11739_s2] sm:$0xff] }
 0x124   : > { %1175 = vrot.lane.b32.xlu1 %v11966_v44, %s7126_s7  ;;  %1089 = vst.msk [vmem:[#allocation3 + $0x10] sm:$0xff] %vm1086_vm6, %v995_v6  ;;  %11970 = vst [vmem:[#allocation5_spill] sm:$0xff] %v8084_v10 }
 0x125   : > { %1181 = vrot.lane.b32.xlu0 %v7654_v18, %s7126_s7 }
 0x126   : > { %v993_v45 = vpop.permute.xlu1 %992 }
 0x127   : > { %1088 = vst.msk [vmem:[#allocation3 + $0x8] sm:$0xff] %vm1086_vm6, %v993_v45  ;;  %v999_v31 = vpop.permute.xlu0 %998  ;;  %v11969_v45 = vld [vmem:[#allocation37_spill] sm:$0xff] }
 0x128   : > { %1179 = vrot.lane.b32.xlu1 %v11968_v27, %s7126_s7  ;;  %1091 = vst.msk [vmem:[#allocation3 + $0x20] sm:$0xff] %vm1086_vm6, %v999_v31 }
 0x129   : > { %1185 = vrot.lane.b32.xlu0 %v8071_v53, %s7126_s7 }
 0x12a   : > { %v997_v6 = vpop.permute.xlu1 %996 }
 0x12b   : > { %1090 = vst.msk [vmem:[#allocation3 + $0x18] sm:$0xff] %vm1086_vm6, %v997_v6  ;;  %v1003_v18 = vpop.permute.xlu0 %1002 }
 0x12c   : > { %1183 = vrot.lane.b32.xlu1 %v11969_v45, %s7126_s7  ;;  %1093 = vst.msk [vmem:[#allocation3 + $0x30] sm:$0xff] %vm1086_vm6, %v1003_v18 }
 0x12d   : > { %1259 = vrot.lane.b32.xlu0 %v7679_v17, %s7127_s8  ;;  %v426_v17 = vld [vmem:[%s11739_s2 + $0x8] sm:$0xff] }
 0x12e   : > { %v1001_v31 = vpop.permute.xlu1 %1000  ;;  %v7024_v16 = vpack.c.bf16 %v426_v17, %v425_v39  ;;  %v11971_v17 = vld [vmem:[#allocation38_spill] sm:$0xff] }
 0x12f   : > { %1092 = vst.msk [vmem:[#allocation3 + $0x28] sm:$0xff] %vm1086_vm6, %v1001_v31  ;;  %v1007_v1 = vpop.permute.xlu0 %1006  ;;  %v427_v31 = vld [vmem:[%s11739_s2 + $0x10] sm:$0xff] }
 0x130   : > { %1187 = vrot.lane.b32.xlu1 %v8084_v10, %s7126_s7  ;;  %1095 = vst.msk [vmem:[#allocation3 + $0x40] sm:$0xff] %vm1086_vm6, %v1007_v1  ;;  %7025 = vmatprep.subr.bf16.mxu0 %v7024_v16  ;;  %v429_v10 = vld [vmem:[%s11739_s2 + $0x20] sm:$0xff] }
 0x131   : > { %1263 = vrot.lane.b32.xlu0 %v7690_v9, %s7127_s8  ;;  %7072 = vmatprep.subr.bf16.mxu1 %v7024_v16 }
 0x132   : > { %v1005_v18 = vpop.permute.xlu1 %1004  ;;  %7027 = vmatpush3.bf16.msra.mxu0 %v7024_v16  ;;  %7077 = vmatpush3.bf16.msra.mxu1 %v7024_v16  ;;  %v430_v16 = vld [vmem:[%s11739_s2 + $0x28] sm:$0xff] }
 0x133   : > { %1094 = vst.msk [vmem:[#allocation3 + $0x38] sm:$0xff] %vm1086_vm6, %v1005_v18  ;;  %v1011_v6 = vpop.permute.xlu0 %1010  ;;  %v428_v18 = vld [vmem:[%s11739_s2 + $0x18] sm:$0xff] }
 0x134   : > { %1261 = vrot.lane.b32.xlu1 %v7696_v7, %s7127_s8  ;;  %1097 = vst.msk [vmem:[#allocation3 + $0x50] sm:$0xff] %vm1086_vm6, %v1011_v6  ;;  %v7028_v7 = vpack.c.bf16 %v428_v18, %v427_v31  ;;  %v11972_v18 = vld [vmem:[#allocation39_spill] sm:$0xff] }
 0x135   : > { %1267 = vrot.lane.b32.xlu0 %v7702_v37, %s7127_s8 }
 0x136   : > { %v1009_v1 = vpop.permute.xlu1 %1008  ;;  %7029 = vmatprep.subr.bf16.mxu0 %v7028_v7  ;;  %7073 = vmatprep.subr.bf16.mxu1 %v7028_v7 }
 0x137   : > { %1096 = vst.msk [vmem:[#allocation3 + $0x48] sm:$0xff] %vm1086_vm6, %v1009_v1  ;;  %v1015_v39 = vpop.permute.xlu0 %1014  ;;  %7031 = vmatpush3.bf16.msra.mxu0 %v7028_v7  ;;  %v7032_v1 = vpack.c.bf16 %v430_v16, %v429_v10  ;;  %7078 = vmatpush3.bf16.msra.mxu1 %v7028_v7  ;;  %v432_v10 = vld [vmem:[%s11739_s2 + $0x38] sm:$0xff] }
 0x138   : > { %1265 = vrot.lane.b32.xlu1 %v11971_v17, %s7127_s8  ;;  %1099 = vst.msk [vmem:[#allocation3 + $0x60] sm:$0xff] %vm1086_vm6, %v1015_v39 }
 0x139   : > { %1271 = vrot.lane.b32.xlu0 %v7715_v42, %s7127_s8  ;;  %7033 = vmatprep.subr.bf16.mxu0 %v7032_v1 }
 0x13a   : > { %v1013_v6 = vpop.permute.xlu1 %1012  ;;  %7074 = vmatprep.subr.bf16.mxu1 %v7032_v1 }
 0x13b   : > { %1098 = vst.msk [vmem:[#allocation3 + $0x58] sm:$0xff] %vm1086_vm6, %v1013_v6  ;;  %v1019_v31 = vpop.permute.xlu0 %1018  ;;  %7035 = vmatpush3.bf16.msra.mxu0 %v7032_v1  ;;  %v431_v6 = vld [vmem:[%s11739_s2 + $0x30] sm:$0xff]  ;;  %7079 = vmatpush3.bf16.msra.mxu1 %v7032_v1  ;;  %v433_v1 = vld [vmem:[%s11739_s2 + $0x40] sm:$0xff] }
 0x13c   : > { %1269 = vrot.lane.b32.xlu1 %v11972_v18, %s7127_s8  ;;  %1101 = vst.msk [vmem:[#allocation3 + $0x70] sm:$0xff] %vm1086_vm6, %v1019_v31  ;;  %v7036_v7 = vpack.c.bf16 %v432_v10, %v431_v6 }
 0x13d   : > { %1390 = vrot.lane.b32.xlu0 %v7306_v32, %s7128_s22 }
 0x13e   : > { %v1017_v39 = vpop.permute.xlu1 %1016  ;;  %7037 = vmatprep.subr.bf16.mxu0 %v7036_v7  ;;  %7075 = vmatprep.subr.bf16.mxu1 %v7036_v7 }
 0x13f   : > { %1100 = vst.msk [vmem:[#allocation3 + $0x68] sm:$0xff] %vm1086_vm6, %v1017_v39  ;;  %v1023_v16 = vpop.permute.xlu0 %1022  ;;  %7039 = vmatpush3.bf16.msra.mxu0 %v7036_v7  ;;  %7080 = vmatpush3.bf16.msra.mxu1 %v7036_v7 }
 0x140   : > { %1273 = vrot.lane.b32.xlu1 %v7735_v25, %s7127_s8  ;;  %1103 = vst.msk [vmem:[#allocation3 + $0x80] sm:$0xff] %vm1086_vm6, %v1023_v16  ;;  %6842 = vmatprep.subr.mxu0 %v433_v1 }
 0x141   : > { %1525 = vrot.lane.b32.xlu0 %v7353_v49, %s7129_s9  ;;  %7076 = vmatprep.subr.mxu1 %v433_v1 }
 0x142   : > { %v1021_v32 = vpop.permute.xlu1 %1020 }
 0x143   : > { %1102 = vst.msk [vmem:[#allocation3 + $0x78] sm:$0xff] %vm1086_vm6, %v1021_v32  ;;  %v1027_v31 = vpop.permute.xlu0 %1026  ;;  %6843 = vmatpush3.msra.mxu0 %v433_v1  ;;  %7081 = vmatpush3.msra.mxu1 %v433_v1 }
 0x144   : > { %1392 = vrot.lane.b32.xlu1 %v7317_v35, %s7128_s22  ;;  %1105 = vst.msk [vmem:[#allocation3 + $0x90] sm:$0xff] %vm1086_vm6, %v1027_v31 }
 0x145   : > { %1659 = vrot.lane.b32.xlu0 %v7690_v9, %s7130_s12 }
 0x146   : > { %v1025_v49 = vpop.permute.xlu1 %1024 }
 0x147   : > { %1104 = vst.msk [vmem:[#allocation3 + $0x88] sm:$0xff] %vm1086_vm6, %v1025_v49  ;;  %v1031_v39 = vpop.permute.xlu0 %1030 }
 0x148   : > { %1527 = vrot.lane.b32.xlu1 %v11946_v20, %s7129_s9  ;;  %1107 = vst.msk [vmem:[#allocation3 + $0xa0] sm:$0xff] %vm1086_vm6, %v1031_v39 }
 0x149   : > { %1394 = vrot.lane.b32.xlu0 %v7329_v40, %s7128_s22 }
 0x14a   : > { %v1029_v35 = vpop.permute.xlu1 %1028 }
 0x14b   : > { %1106 = vst.msk [vmem:[#allocation3 + $0x98] sm:$0xff] %vm1086_vm6, %v1029_v35  ;;  %v1035_v6 = vpop.permute.xlu0 %1034 }
 0x14c   : > { %1661 = vrot.lane.b32.xlu1 %v11971_v17, %s7130_s12  ;;  %1109 = vst.msk [vmem:[#allocation3 + $0xb0] sm:$0xff] %vm1086_vm6, %v1035_v6 }
 0x14d   : > { %1529 = vrot.lane.b32.xlu0 %v11945_v43, %s7129_s9 }
 0x14e   : > { %v1033_v9 = vpop.permute.xlu1 %1032 }
 0x14f   : > { %1108 = vst.msk [vmem:[#allocation3 + $0xa8] sm:$0xff] %vm1086_vm6, %v1033_v9  ;;  %v1039_v20 = vpop.permute.xlu0 %1038 }
 0x150   : > { %1396 = vrot.lane.b32.xlu1 %v7331_v41, %s7128_s22  ;;  %1111 = vst.msk [vmem:[#allocation3 + $0xc0] sm:$0xff] %vm1086_vm6, %v1039_v20 }
 0x151   : > { %1663 = vrot.lane.b32.xlu0 %v7702_v37, %s7130_s12 }
 0x152   : > { %v1037_v40 = vpop.permute.xlu1 %1036 }
 0x153   : > { %1110 = vst.msk [vmem:[#allocation3 + $0xb8] sm:$0xff] %vm1086_vm6, %v1037_v40  ;;  %v1043_v17 = vpop.permute.xlu0 %1042 }
 0x154   : > { %1531 = vrot.lane.b32.xlu1 %v11948_v0, %s7129_s9  ;;  %1113 = vst.msk [vmem:[#allocation3 + $0xd0] sm:$0xff] %vm1086_vm6, %v1043_v17 }
 0x155   : > { %1398 = vrot.lane.b32.xlu0 %v7344_v46, %s7128_s22 }
 0x156   : > { %v1041_v43 = vpop.permute.xlu1 %1040 }
 0x157   : > { %1112 = vst.msk [vmem:[#allocation3 + $0xc8] sm:$0xff] %vm1086_vm6, %v1041_v43  ;;  %v1047_v41 = vpop.permute.xlu0 %1046 }
 0x158   : > { %1665 = vrot.lane.b32.xlu1 %v11972_v18, %s7130_s12  ;;  %1115 = vst.msk [vmem:[#allocation3 + $0xe0] sm:$0xff] %vm1086_vm6, %v1047_v41 }
 0x159   : > { %1533 = vrot.lane.b32.xlu0 %v11947_v59, %s7129_s9 }
 0x15a   : > { %v1045_v37 = vpop.permute.xlu1 %1044 }
 0x15b   : > { %1114 = vst.msk [vmem:[#allocation3 + $0xd8] sm:$0xff] %vm1086_vm6, %v1045_v37  ;;  %v1051_v0 = vpop.permute.xlu0 %1050 }
 0x15c   : > { %1400 = vrot.lane.b32.xlu1 %v7346_v47, %s7128_s22  ;;  %1117 = vst.msk [vmem:[#allocation3 + $0xf0] sm:$0xff] %vm1086_vm6, %v1051_v0 }
 0x15d   : > { %1667 = vrot.lane.b32.xlu0 %v7715_v42, %s7130_s12 }
 0x15e   : > { %v1049_v46 = vpop.permute.xlu1 %1048 }
 0x15f   : > { %1116 = vst.msk [vmem:[#allocation3 + $0xe8] sm:$0xff] %vm1086_vm6, %v1049_v46  ;;  %v1126_v18 = vpop.permute.xlu0 %1125 }
 0x160   : > { %1535 = vrot.lane.b32.xlu1 %v11950_v58, %s7129_s9  ;;  %1222 = vst.msk [vmem:[#allocation3] sm:$0xff] %vm1221_vm7, %v1126_v18 }
 0x161   : > { %1402 = vrot.lane.b32.xlu0 %v7348_v48, %s7128_s22  ;;  %v11973_v48 = vld [vmem:[#allocation40_spill] sm:$0xff] }
 0x162   : > { %v1053_v59 = vpop.permute.xlu1 %1052 }
 0x163   : > { %1118 = vst.msk [vmem:[#allocation3 + $0xf8] sm:$0xff] %vm1086_vm6, %v1053_v59  ;;  %v1130_v47 = vpop.permute.xlu0 %1129 }
 0x164   : > { %1669 = vrot.lane.b32.xlu1 %v7735_v25, %s7130_s12  ;;  %1224 = vst.msk [vmem:[#allocation3 + $0x10] sm:$0xff] %vm1221_vm7, %v1130_v47 }
 0x165   : > { %1537 = vrot.lane.b32.xlu0 %v11949_v15, %s7129_s9 }
 0x166   : > { %v1128_v42 = vpop.permute.xlu1 %1127 }
 0x167   : > { %1223 = vst.msk [vmem:[#allocation3 + $0x8] sm:$0xff] %vm1221_vm7, %v1128_v42  ;;  %v1134_v58 = vpop.permute.xlu0 %1133 }
 0x168   : > { %1404 = vrot.lane.b32.xlu1 %v7359_v50, %s7128_s22  ;;  %1226 = vst.msk [vmem:[#allocation3 + $0x20] sm:$0xff] %vm1221_vm7, %v1134_v58 }
 0x169   : > { %1671 = vrot.lane.b32.xlu0 %v11973_v48, %s7130_s12 }
 0x16a   : > { %v1132_v10 = vpop.permute.xlu1 %1131 }
 0x16b   : > { %1225 = vst.msk [vmem:[#allocation3 + $0x18] sm:$0xff] %vm1221_vm7, %v1132_v10  ;;  %v1138_v25 = vpop.permute.xlu0 %1137 }
 0x16c   : > { %1539 = vrot.lane.b32.xlu1 %v11952_v52, %s7129_s9  ;;  %1228 = vst.msk [vmem:[#allocation3 + $0x30] sm:$0xff] %vm1221_vm7, %v1138_v25 }
 0x16d   : > { %1673 = vrot.lane.b32.xlu0 %v7748_v21, %s7130_s12 }
 0x16e   : > { %v1136_v15 = vpop.permute.xlu1 %1135 }
 0x16f   : > { %1227 = vst.msk [vmem:[#allocation3 + $0x28] sm:$0xff] %vm1221_vm7, %v1136_v15  ;;  %v1142_v50 = vpop.permute.xlu0 %1141 }
 0x170   : > { %1275 = vrot.lane.b32.xlu1 %v11973_v48, %s7127_s8  ;;  %1230 = vst.msk [vmem:[#allocation3 + $0x40] sm:$0xff] %vm1221_vm7, %v1142_v50 }
 0x171   : > { %1406 = vrot.lane.b32.xlu0 %v7363_v51, %s7128_s22  ;;  %v11974_v51 = vld [vmem:[#allocation41_spill] sm:$0xff] }
 0x172   : > { %v1140_v7 = vpop.permute.xlu1 %1139 }
 0x173   : > { %1229 = vst.msk [vmem:[#allocation3 + $0x38] sm:$0xff] %vm1221_vm7, %v1140_v7  ;;  %v1146_v52 = vpop.permute.xlu0 %1145 }
 0x174   : > { %1277 = vrot.lane.b32.xlu1 %v7748_v21, %s7127_s8  ;;  %1232 = vst.msk [vmem:[#allocation3 + $0x50] sm:$0xff] %vm1221_vm7, %v1146_v52  ;;  %v11981_v52 = vld [vmem:[#allocation11_spill] sm:$0xff] }
 0x175   : > { %1541 = vrot.lane.b32.xlu0 %v11951_v29, %s7129_s9 }
 0x176   : > { %v1144_v16 = vpop.permute.xlu1 %1143 }
 0x177   : > { %1231 = vst.msk [vmem:[#allocation3 + $0x48] sm:$0xff] %vm1221_vm7, %v1144_v16  ;;  %v1150_v32 = vpop.permute.xlu0 %1149 }
 0x178   : > { %1408 = vrot.lane.b32.xlu1 %v7371_v54, %s7128_s22  ;;  %1234 = vst.msk [vmem:[#allocation3 + $0x60] sm:$0xff] %vm1221_vm7, %v1150_v32 }
 0x179   : > { %1675 = vrot.lane.b32.xlu0 %v11974_v51, %s7130_s12 }
 0x17a   : > { %v1148_v31 = vpop.permute.xlu1 %1147 }
 0x17b   : > { %1233 = vst.msk [vmem:[#allocation3 + $0x58] sm:$0xff] %vm1221_vm7, %v1148_v31  ;;  %v1154_v21 = vpop.permute.xlu0 %1153 }
 0x17c   : > { %1543 = vrot.lane.b32.xlu1 %v11954_v30, %s7129_s9  ;;  %1236 = vst.msk [vmem:[#allocation3 + $0x70] sm:$0xff] %vm1221_vm7, %v1154_v21 }
 0x17d   : > { %1677 = vrot.lane.b32.xlu0 %v7761_v56, %s7130_s12 }
 0x17e   : > { %v1152_v29 = vpop.permute.xlu1 %1151 }
 0x17f   : > { %1235 = vst.msk [vmem:[#allocation3 + $0x68] sm:$0xff] %vm1221_vm7, %v1152_v29  ;;  %v1158_v54 = vpop.permute.xlu0 %1157  ;;  %v11983_v29 = vld [vmem:[#allocation12_spill] sm:$0xff] }
 0x180   : > { %1279 = vrot.lane.b32.xlu1 %v11974_v51, %s7127_s8  ;;  %1238 = vst.msk [vmem:[#allocation3 + $0x80] sm:$0xff] %vm1221_vm7, %v1158_v54  ;;  %v11982_v51 = vld [vmem:[#allocation30_spill] sm:$0xff] }
 0x181   : > { %1410 = vrot.lane.b32.xlu0 %v7375_v55, %s7128_s22  ;;  %v11975_v55 = vld [vmem:[#allocation42_spill] sm:$0xff] }
 0x182   : > { %v1156_v1 = vpop.permute.xlu1 %1155 }
 0x183   : > { %1237 = vst.msk [vmem:[#allocation3 + $0x78] sm:$0xff] %vm1221_vm7, %v1156_v1  ;;  %v1162_v30 = vpop.permute.xlu0 %1161  ;;  %v11984_v1 = vld [vmem:[#allocation48_spill] sm:$0xff] }
 0x184   : > { %1281 = vrot.lane.b32.xlu1 %v7761_v56, %s7127_s8  ;;  %1240 = vst.msk [vmem:[#allocation3 + $0x90] sm:$0xff] %vm1221_vm7, %v1162_v30 }
 0x185   : > { %1545 = vrot.lane.b32.xlu0 %v11953_v24, %s7129_s9 }
 0x186   : > { %v1160_v49 = vpop.permute.xlu1 %1159 }
 0x187   : > { %1239 = vst.msk [vmem:[#allocation3 + $0x88] sm:$0xff] %vm1221_vm7, %v1160_v49  ;;  %v1166_v39 = vpop.permute.xlu0 %1165  ;;  %v11985_v49 = vld [vmem:[#allocation50_spill] sm:$0xff] }
 0x188   : > { %1412 = vrot.lane.b32.xlu1 %v7383_v57, %s7128_s22  ;;  %1242 = vst.msk [vmem:[#allocation3 + $0xa0] sm:$0xff] %vm1221_vm7, %v1166_v39 }
 0x189   : > { %1679 = vrot.lane.b32.xlu0 %v11975_v55, %s7130_s12 }
 0x18a   : > { %v1164_v35 = vpop.permute.xlu1 %1163 }
 0x18b   : > { %1241 = vst.msk [vmem:[#allocation3 + $0x98] sm:$0xff] %vm1221_vm7, %v1164_v35  ;;  %v1170_v56 = vpop.permute.xlu0 %1169 }
 0x18c   : > { %1547 = vrot.lane.b32.xlu1 %v11956_v38, %s7129_s9  ;;  %1244 = vst.msk [vmem:[#allocation3 + $0xb0] sm:$0xff] %vm1221_vm7, %v1170_v56  ;;  %v11986_v56 = vld [vmem:[#allocation13_spill] sm:$0xff] }
 0x18d   : > { %1681 = vrot.lane.b32.xlu0 %v7774_v4, %s7130_s12 }
 0x18e   : > { %v1168_v24 = vpop.permute.xlu1 %1167 }
 0x18f   : > { %1243 = vst.msk [vmem:[#allocation3 + $0xa8] sm:$0xff] %vm1221_vm7, %v1168_v24  ;;  %v1174_v57 = vpop.permute.xlu0 %1173 }
 0x190   : > { %1283 = vrot.lane.b32.xlu1 %v11975_v55, %s7127_s8  ;;  %1246 = vst.msk [vmem:[#allocation3 + $0xc0] sm:$0xff] %vm1221_vm7, %v1174_v57 }
 0x191   : > { %1414 = vrot.lane.b32.xlu0 %v7394_v61, %s7128_s22  ;;  %v11976_v61 = vld [vmem:[#allocation43_spill] sm:$0xff] }
 0x192   : > { %v1172_v6 = vpop.permute.xlu1 %1171 }
 0x193   : > { %1245 = vst.msk [vmem:[#allocation3 + $0xb8] sm:$0xff] %vm1221_vm7, %v1172_v6  ;;  %v1178_v38 = vpop.permute.xlu0 %1177  ;;  %v11987_v6 = vld [vmem:[#allocation32_spill] sm:$0xff] }
 0x194   : > { %1285 = vrot.lane.b32.xlu1 %v7774_v4, %s7127_s8  ;;  %1248 = vst.msk [vmem:[#allocation3 + $0xd0] sm:$0xff] %vm1221_vm7, %v1178_v38 }
 0x195   : > { %1549 = vrot.lane.b32.xlu0 %v11955_v26, %s7129_s9 }
 0x196   : > { %v1176_v9 = vpop.permute.xlu1 %1175 }
 0x197   : > { %1247 = vst.msk [vmem:[#allocation3 + $0xc8] sm:$0xff] %vm1221_vm7, %v1176_v9  ;;  %v1182_v20 = vpop.permute.xlu0 %1181 }
 0x198   : > { %1416 = vrot.lane.b32.xlu1 %v7398_v62, %s7128_s22  ;;  %1250 = vst.msk [vmem:[#allocation3 + $0xe0] sm:$0xff] %vm1221_vm7, %v1182_v20  ;;  %v11988_v20 = vld [vmem:[#allocation15_spill] sm:$0xff] }
 0x199   : > { %1683 = vrot.lane.b32.xlu0 %v11976_v61, %s7130_s12 }
 0x19a   : > { %v1180_v40 = vpop.permute.xlu1 %1179 }
 0x19b   : > { %1249 = vst.msk [vmem:[#allocation3 + $0xd8] sm:$0xff] %vm1221_vm7, %v1180_v40  ;;  %v1186_v4 = vpop.permute.xlu0 %1185  ;;  %v11989_v40 = vld [vmem:[#allocation49_spill] sm:$0xff] }
 0x19c   : > { %1551 = vrot.lane.b32.xlu1 %v11958_v19, %s7129_s9  ;;  %1252 = vst.msk [vmem:[#allocation3 + $0xf0] sm:$0xff] %vm1221_vm7, %v1186_v4 }
 0x19d   : > { %1685 = vrot.lane.b32.xlu0 %v7787_v22, %s7130_s12 }
 0x19e   : > { %v1184_v26 = vpop.permute.xlu1 %1183 }
 0x19f   : > { %1251 = vst.msk [vmem:[#allocation3 + $0xe8] sm:$0xff] %vm1221_vm7, %v1184_v26  ;;  %v1260_v62 = vpop.permute.xlu0 %1259 }
 0x1a0   : > { %1287 = vrot.lane.b32.xlu1 %v11976_v61, %s7127_s8  ;;  %1356 = vst.msk [vmem:[#allocation3] sm:$0xff] %vm1355_vm8, %v1260_v62  ;;  %v11990_v62 = vld [vmem:[#allocation52_spill] sm:$0xff] }
 0x1a1   : > { %1418 = vrot.lane.b32.xlu0 %v7402_v63, %s7128_s22  ;;  %v11977_v63 = vld [vmem:[#allocation44_spill] sm:$0xff] }
 0x1a2   : > { %v1188_v17 = vpop.permute.xlu1 %1187 }
 0x1a3   : > { %1253 = vst.msk [vmem:[#allocation3 + $0xf8] sm:$0xff] %vm1221_vm7, %v1188_v17  ;;  %v1264_v19 = vpop.permute.xlu0 %1263 }
 0x1a4   : > { %1289 = vrot.lane.b32.xlu1 %v7787_v22, %s7127_s8  ;;  %1358 = vst.msk [vmem:[#allocation3 + $0x10] sm:$0xff] %vm1355_vm8, %v1264_v19 }
 0x1a5   : > { %1553 = vrot.lane.b32.xlu0 %v11957_v28, %s7129_s9 }
 0x1a6   : > { %v1262_v43 = vpop.permute.xlu1 %1261 }
 0x1a7   : > { %1357 = vst.msk [vmem:[#allocation3 + $0x8] sm:$0xff] %vm1355_vm8, %v1262_v43  ;;  %v1268_v41 = vpop.permute.xlu0 %1267  ;;  %v11991_v43 = vld [vmem:[#allocation16_spill] sm:$0xff] }
 0x1a8   : > { %1420 = vrot.lane.b32.xlu1 %v7410_v2, %s7128_s22  ;;  %1360 = vst.msk [vmem:[#allocation3 + $0x20] sm:$0xff] %vm1355_vm8, %v1268_v41 }
 0x1a9   : > { %1687 = vrot.lane.b32.xlu0 %v11977_v63, %s7130_s12 }
 0x1aa   : > { %v1266_v37 = vpop.permute.xlu1 %1265 }
 0x1ab   : > { %1359 = vst.msk [vmem:[#allocation3 + $0x18] sm:$0xff] %vm1355_vm8, %v1266_v37  ;;  %v1272_v22 = vpop.permute.xlu0 %1271  ;;  %v11992_v37 = vld [vmem:[#allocation33_spill] sm:$0xff] }
 0x1ac   : > { %1555 = vrot.lane.b32.xlu1 %v11960_v11, %s7129_s9  ;;  %1362 = vst.msk [vmem:[#allocation3 + $0x30] sm:$0xff] %vm1355_vm8, %v1272_v22 }
 0x1ad   : > { %1689 = vrot.lane.b32.xlu0 %v7800_v33, %s7130_s12 }
 0x1ae   : > { %v1270_v28 = vpop.permute.xlu1 %1269 }
 0x1af   : > { %1361 = vst.msk [vmem:[#allocation3 + $0x28] sm:$0xff] %vm1355_vm8, %v1270_v28  ;;  %v1391_v2 = vpop.permute.xlu0 %1390 }
 0x1b0   : > { %1291 = vrot.lane.b32.xlu1 %v11977_v63, %s7127_s8  ;;  %1487 = vst.msk [vmem:[#allocation3] sm:$0xff] %vm1486_vm9, %v1391_v2  ;;  %v11993_v2 = vld [vmem:[#allocation17_spill] sm:$0xff] }
 0x1b1   : > { %1422 = vrot.lane.b32.xlu0 %v7414_v3, %s7128_s22  ;;  %v11978_v3 = vld [vmem:[#allocation45_spill] sm:$0xff] }
 0x1b2   : > { %v1274_v0 = vpop.permute.xlu1 %1273 }
 0x1b3   : > { %1363 = vst.msk [vmem:[#allocation3 + $0x38] sm:$0xff] %vm1355_vm8, %v1274_v0  ;;  %v1526_v11 = vpop.permute.xlu0 %1525 }
 0x1b4   : > { %1293 = vrot.lane.b32.xlu1 %v7800_v33, %s7127_s8  ;;  %1622 = vst.msk [vmem:[#allocation3] sm:$0xff] %vm1621_vm10, %v1526_v11  ;;  %v11994_v11 = vld [vmem:[#allocation51_spill] sm:$0xff] }
 0x1b5   : > { %1557 = vrot.lane.b32.xlu0 %v11959_v14, %s7129_s9  ;;  %v11979_v14 = vld [vmem:[#allocation47_spill] sm:$0xff] }
 0x1b6   : > { %v1393_v46 = vpop.permute.xlu1 %1392 }
 0x1b7   : > { %1488 = vst.msk [vmem:[#allocation3 + $0x8] sm:$0xff] %vm1486_vm9, %v1393_v46  ;;  %v1660_v18 = vpop.permute.xlu0 %1659 }
 0x1b8   : > { %1424 = vrot.lane.b32.xlu1 %v7422_v5, %s7128_s22  ;;  %1756 = vst.msk [vmem:[#allocation3] sm:$0xff] %vm1755_vm11, %v1660_v18 }
 0x1b9   : > { %1691 = vrot.lane.b32.xlu0 %v11978_v3, %s7130_s12 }
 0x1ba   : > { %v1528_v59 = vpop.permute.xlu1 %1527 }
 0x1bb   : > { %1623 = vst.msk [vmem:[#allocation3 + $0x8] sm:$0xff] %vm1621_vm10, %v1528_v59  ;;  %v1395_v33 = vpop.permute.xlu0 %1394 }
 0x1bc   : > { %1559 = vrot.lane.b32.xlu1 %v11962_v12, %s7129_s9  ;;  %1489 = vst.msk [vmem:[#allocation3 + $0x10] sm:$0xff] %vm1486_vm9, %v1395_v33 }
 0x1bd   : > { %1693 = vrot.lane.b32.xlu0 %v11979_v14, %s7130_s12 }
 0x1be   : > { %v1662_v47 = vpop.permute.xlu1 %1661 }
 0x1bf   : > { %1757 = vst.msk [vmem:[#allocation3 + $0x8] sm:$0xff] %vm1755_vm11, %v1662_v47  ;;  %v1530_v5 = vpop.permute.xlu0 %1529  ;;  %v1788_v42 = vld [vmem:[#allocation3] sm:$0xff] }
 0x1c0   : > { %1295 = vrot.lane.b32.xlu1 %v11978_v3, %s7127_s8  ;;  %1624 = vst.msk [vmem:[#allocation3 + $0x10] sm:$0xff] %vm1621_vm10, %v1530_v5  ;;  %6844 = vmatprep.mubr.msk.f32.mxu0 %vm1827_vm12, %v1788_v42  ;;  %v11995_v3 = vld [vmem:[#allocation54_spill] sm:$0xff]  ;;  %v11997_v42 = vld [vmem:[#allocation35_spill] sm:$0xff] }
 0x1c1   : > { %1426 = vrot.lane.b32.xlu0 %v7435_v13, %s7128_s22  ;;  %v11980_v13 = vld [vmem:[#allocation46_spill] sm:$0xff] }
 0x1c2   : > { %v1397_v12 = vpop.permute.xlu1 %1396 }
 0x1c3   : > { %1490 = vst.msk [vmem:[#allocation3 + $0x18] sm:$0xff] %vm1486_vm9, %v1397_v12  ;;  %v1664_v58 = vpop.permute.xlu0 %1663 }
 0x1c4   : > { %1297 = vrot.lane.b32.xlu1 %v11979_v14, %s7127_s8  ;;  %1758 = vst.msk [vmem:[#allocation3 + $0x10] sm:$0xff] %vm1755_vm11, %v1664_v58  ;;  %v11996_v14 = vld [vmem:[#allocation18_spill] sm:$0xff] }
 0x1c5   : > { %1561 = vrot.lane.b32.xlu0 %v11961_v8, %s7129_s9 }
 0x1c6   : > { %v1532_v48 = vpop.permute.xlu1 %1531  ;;  %v1789_v10 = vld [vmem:[#allocation3 + $0x8] sm:$0xff] }
 0x1c7   : > { %1625 = vst.msk [vmem:[#allocation3 + $0x18] sm:$0xff] %vm1621_vm10, %v1532_v48  ;;  %6845 = vmatmul.mubr.msk.f32.vlgmr.msra.gmra.mrb[0].mxu0 %vm1827_vm12, %v1789_v10  ;;  %v1399_v25 = vpop.permute.xlu0 %1398  ;;  %v11998_v48 = vld [vmem:[#allocation20_spill] sm:$0xff] }
 0x1c8   : > { %1428 = vrot.lane.b32.xlu1 %v7480_v34, %s7128_s22  ;;  %1491 = vst.msk [vmem:[#allocation3 + $0x20] sm:$0xff] %vm1486_vm9, %v1399_v25  ;;  %v11999_v25 = vld [vmem:[#allocation53_spill] sm:$0xff] }
 0x1c9   : > { %1695 = vrot.lane.b32.xlu0 %v11980_v13, %s7130_s12 }
 0x1ca   : > { %v1666_v15 = vpop.permute.xlu1 %1665 }
 0x1cb   : > { %1759 = vst.msk [vmem:[#allocation3 + $0x18] sm:$0xff] %vm1755_vm11, %v1666_v15  ;;  %v1534_v50 = vpop.permute.xlu0 %1533  ;;  %v1790_v8 = vld [vmem:[#allocation3 + $0x10] sm:$0xff] }
 0x1cc   : > { %1563 = vrot.lane.b32.xlu1 %v11964_v60, %s7129_s9  ;;  %1626 = vst.msk [vmem:[#allocation3 + $0x20] sm:$0xff] %vm1621_vm10, %v1534_v50  ;;  %6847 = vmatprep.mubr.msk.f32.mxu0 %vm1827_vm12, %v1790_v8  ;;  %v12000_v50 = vld [vmem:[#allocation55_spill] sm:$0xff] }
 0x1cd   : > { %1697 = vrot.lane.b32.xlu0 %v7826_v23, %s7130_s12 }
 0x1ce   : > { %v1401_v34 = vpop.permute.xlu1 %1400 }
 0x1cf   : > { %1492 = vst.msk [vmem:[#allocation3 + $0x28] sm:$0xff] %vm1486_vm9, %v1401_v34  ;;  %v1668_v7 = vpop.permute.xlu0 %1667 }
 0x1d0   : > { %1299 = vrot.lane.b32.xlu1 %v11980_v13, %s7127_s8  ;;  %1760 = vst.msk [vmem:[#allocation3 + $0x20] sm:$0xff] %vm1755_vm11, %v1668_v7  ;;  %v7104_v7 = vld [vmem:[#allocation2 + $0x180] sm:$0xff] }
 0x1d1   : > { %1430 = vrot.lane.b32.xlu0 %v11981_v52, %s7128_s22 }
 0x1d2   : > { %v1536_v60 = vpop.permute.xlu1 %1535  ;;  %v1791_v16 = vld [vmem:[#allocation3 + $0x18] sm:$0xff] }
 0x1d3   : > { %1627 = vst.msk [vmem:[#allocation3 + $0x28] sm:$0xff] %vm1621_vm10, %v1536_v60  ;;  %6848 = vmatmul.mubr.msk.f32.gmra.mrb[2].mxu0 %vm1827_vm12, %v1791_v16  ;;  %v1403_v32 = vpop.permute.xlu0 %1402  ;;  %v7105_v60 = vld [vmem:[#allocation2 + $0x188] sm:$0xff] }
 0x1d4   : > { %1301 = vrot.lane.b32.xlu1 %v7826_v23, %s7127_s8  ;;  %1493 = vst.msk [vmem:[#allocation3 + $0x30] sm:$0xff] %vm1486_vm9, %v1403_v32  ;;  %v1255_v16 = vrot.slane %v7105_v60, 2 }
 0x1d5   : > { %1565 = vrot.lane.b32.xlu0 %v11982_v51, %s7129_s9 }
 0x1d6   : > { %v1670_v31 = vpop.permute.xlu1 %1669 }
 0x1d7   : > { %1761 = vst.msk [vmem:[#allocation3 + $0x28] sm:$0xff] %vm1755_vm11, %v1670_v31  ;;  %v1538_v21 = vpop.permute.xlu0 %1537  ;;  %v1792_v54 = vld [vmem:[#allocation3 + $0x20] sm:$0xff] }
 0x1d8   : > { %1432 = vrot.lane.b32.xlu1 %v11983_v29, %s7128_s22  ;;  %1628 = vst.msk [vmem:[#allocation3 + $0x30] sm:$0xff] %vm1621_vm10, %v1538_v21  ;;  %6850 = vmatprep.mubr.msk.f32.mxu0 %vm1827_vm12, %v1792_v54  ;;  %v12001_v29 = vld [vmem:[#allocation4_spill] sm:$0xff] }
 0x1d9   : > { %1699 = vrot.lane.b32.xlu0 %v11984_v1, %s7130_s12  ;;  %v1257_v54 = vrot.slane %v12001_v29, 2 }
 0x1da   : > { %v1405_v23 = vpop.permute.xlu1 %1404 }
 0x1db   : > { %1494 = vst.msk [vmem:[#allocation3 + $0x38] sm:$0xff] %vm1486_vm9, %v1405_v23  ;;  %v1672_v30 = vpop.permute.xlu0 %1671 }
 0x1dc   : > { %1567 = vrot.lane.b32.xlu1 %v7629_v36, %s7129_s9  ;;  %1762 = vst.msk [vmem:[#allocation3 + $0x30] sm:$0xff] %vm1755_vm11, %v1672_v30 }
 0x1dd   : > { %1701 = vrot.lane.b32.xlu0 %v11985_v49, %s7130_s12 }
 0x1de   : > { %v1540_v39 = vpop.permute.xlu1 %1539  ;;  %v1793_v55 = vld [vmem:[#allocation3 + $0x28] sm:$0xff] }
 0x1df   : > { %1629 = vst.msk [vmem:[#allocation3 + $0x38] sm:$0xff] %vm1621_vm10, %v1540_v39  ;;  %6851 = vmatmul.mubr.msk.f32.gmra.mrb[4].mxu0 %vm1827_vm12, %v1793_v55  ;;  %v1674_v35 = vpop.permute.xlu0 %1673  ;;  %v12002_v39 = vld [vmem:[#allocation5_spill] sm:$0xff] }
 0x1e0   : > { %1303 = vrot.lane.b32.xlu1 %v11984_v1, %s7127_s8  ;;  %1763 = vst.msk [vmem:[#allocation3 + $0x38] sm:$0xff] %vm1755_vm11, %v1674_v35  ;;  %v485_v55 = vld [vmem:[#allocation2 + $0x198] sm:$0xff]  ;;  %v486_v35 = vld [vmem:[#allocation2 + $0x1a0] sm:$0xff] }
 0x1e1   : > { %1434 = vrot.lane.b32.xlu0 %v11986_v56, %s7128_s22 }
 0x1e2   : > { %v1276_v36 = vpop.permute.xlu1 %1275 }
 0x1e3   : > { %1364 = vst.msk [vmem:[#allocation3 + $0x40] sm:$0xff] %vm1355_vm8, %v1276_v36  ;;  %v1407_v24 = vpop.permute.xlu0 %1406  ;;  %v1794_v57 = vld [vmem:[#allocation3 + $0x30] sm:$0xff]  ;;  %v1520_v36 = vrot.slane %v485_v55, 1 }
 0x1e4   : > { %1305 = vrot.lane.b32.xlu1 %v11985_v49, %s7127_s8  ;;  %1495 = vst.msk [vmem:[#allocation3 + $0x40] sm:$0xff] %vm1486_vm9, %v1407_v24  ;;  %6853 = vmatprep.mubr.msk.f32.mxu0 %vm1827_vm12, %v1794_v57  ;;  %v1521_v24 = vrot.slane %v486_v35, 1 }
 0x1e5   : > { %1569 = vrot.lane.b32.xlu0 %v11987_v6, %s7129_s9 }
 0x1e6   : > { %v1278_v38 = vpop.permute.xlu1 %1277 }
 0x1e7   : > { %1365 = vst.msk [vmem:[#allocation3 + $0x48] sm:$0xff] %vm1355_vm8, %v1278_v38  ;;  %v1542_v9 = vpop.permute.xlu0 %1541  ;;  %v1795_v61 = vld [vmem:[#allocation3 + $0x38] sm:$0xff] }
 0x1e8   : > { %1436 = vrot.lane.b32.xlu1 %v11988_v20, %s7128_s22  ;;  %1630 = vst.msk [vmem:[#allocation3 + $0x40] sm:$0xff] %vm1621_vm10, %v1542_v9  ;;  %6854 = vmatmul.mubr.msk.f32.gmra.mrb[6].mxu0 %vm1827_vm12, %v1795_v61  ;;  %v487_v38 = vld [vmem:[#allocation2 + $0x1a8] sm:$0x3]  ;;  %v1522_v9 = vsel %vm568_vm2, %v1520_v36, %v1521_v24  ;;  %v1654_v20 = vrot.slane %v485_v55, 2  ;;  %v1655_v61 = vrot.slane %v486_v35, 2 }
 0x1e9   : > { %1703 = vrot.lane.b32.xlu0 %v11989_v40, %s7130_s12 }
 0x1ea   : > { %v1409_v4 = vpop.permute.xlu1 %1408 }
 0x1eb   : > { %1496 = vst.msk [vmem:[#allocation3 + $0x48] sm:$0xff] %vm1486_vm9, %v1409_v4  ;;  %v1676_v26 = vpop.permute.xlu0 %1675 }
 0x1ec   : > { %1571 = vrot.lane.b32.xlu1 %v11966_v44, %s7129_s9  ;;  %1764 = vst.msk [vmem:[#allocation3 + $0x40] sm:$0xff] %vm1755_vm11, %v1676_v26  ;;  %v1523_v26 = vrot.slane %v487_v38, 1 }
 0x1ed   : > { %1705 = vrot.lane.b32.xlu0 %v11990_v62, %s7130_s12 }
 0x1ee   : > { %v1544_v17 = vpop.permute.xlu1 %1543 }
 0x1ef   : > { %1631 = vst.msk [vmem:[#allocation3 + $0x48] sm:$0xff] %vm1621_vm10, %v1544_v17  ;;  %v1678_v19 = vpop.permute.xlu0 %1677  ;;  %v1656_v17 = vsel %vm778_vm3, %v1654_v20, %v1655_v61 }
 0x1f0   : > { %1307 = vrot.lane.b32.xlu1 %v11989_v40, %s7127_s8  ;;  %1765 = vst.msk [vmem:[#allocation3 + $0x48] sm:$0xff] %vm1755_vm11, %v1678_v19 }
 0x1f1   : > { %1438 = vrot.lane.b32.xlu0 %v11991_v43, %s7128_s22 }
 0x1f2   : > { %v1280_v41 = vpop.permute.xlu1 %1279 }
 0x1f3   : > { %1366 = vst.msk [vmem:[#allocation3 + $0x50] sm:$0xff] %vm1355_vm8, %v1280_v41  ;;  %v1411_v44 = vpop.permute.xlu0 %1410  ;;  %v1796_v63 = vld [vmem:[#allocation3 + $0x40] sm:$0xff]  ;;  %v1524_v41 = vsel %vm568_vm2, %v1521_v24, %v1523_v26 }
 0x1f4   : > { %1309 = vrot.lane.b32.xlu1 %v11990_v62, %s7127_s8  ;;  %1497 = vst.msk [vmem:[#allocation3 + $0x50] sm:$0xff] %vm1486_vm9, %v1411_v44  ;;  %6856 = vmatprep.mubr.msk.f32.mxu0 %vm1827_vm12, %v1796_v63  ;;  %v1657_v44 = vrot.slane %v487_v38, 2 }
 0x1f5   : > { %1573 = vrot.lane.b32.xlu0 %v11992_v37, %s7129_s9 }
 0x1f6   : > { %v1282_v22 = vpop.permute.xlu1 %1281 }
 0x1f7   : > { %1367 = vst.msk [vmem:[#allocation3 + $0x58] sm:$0xff] %vm1355_vm8, %v1282_v22  ;;  %v1546_v28 = vpop.permute.xlu0 %1545  ;;  %v1797_v0 = vld [vmem:[#allocation3 + $0x48] sm:$0xff]  ;;  %v1658_v22 = vsel %vm778_vm3, %v1655_v61, %v1657_v44 }
 0x1f8   : > { %1440 = vrot.lane.b32.xlu1 %v11993_v2, %s7128_s22  ;;  %1632 = vst.msk [vmem:[#allocation3 + $0x50] sm:$0xff] %vm1621_vm10, %v1546_v28  ;;  %6857 = vmatmul.mubr.msk.f32.gmra.mrb[8].mxu0 %vm1827_vm12, %v1797_v0 }
 0x1f9   : > { %1707 = vrot.lane.b32.xlu0 %v11994_v11, %s7130_s12 }
 0x1fa   : > { %v1413_v46 = vpop.permute.xlu1 %1412 }
 0x1fb   : > { %1498 = vst.msk [vmem:[#allocation3 + $0x58] sm:$0xff] %vm1486_vm9, %v1413_v46  ;;  %v1680_v18 = vpop.permute.xlu0 %1679 }
 0x1fc   : > { %1575 = vrot.lane.b32.xlu1 %v11968_v27, %s7129_s9  ;;  %1766 = vst.msk [vmem:[#allocation3 + $0x50] sm:$0xff] %vm1755_vm11, %v1680_v18 }
 0x1fd   : > { %1709 = vrot.lane.b32.xlu0 %v11995_v3, %s7130_s12 }
 0x1fe   : > { %v1548_v59 = vpop.permute.xlu1 %1547 }
 0x1ff   : > { %1633 = vst.msk [vmem:[#allocation3 + $0x58] sm:$0xff] %vm1621_vm10, %v1548_v59  ;;  %v1682_v33 = vpop.permute.xlu0 %1681 }
 0x200   : > { %1311 = vrot.lane.b32.xlu1 %v11994_v11, %s7127_s8  ;;  %1767 = vst.msk [vmem:[#allocation3 + $0x58] sm:$0xff] %vm1755_vm11, %v1682_v33 }
 0x201   : > { %1442 = vrot.lane.b32.xlu0 %v11996_v14, %s7128_s22 }
 0x202   : > { %v1284_v47 = vpop.permute.xlu1 %1283 }
 0x203   : > { %1368 = vst.msk [vmem:[#allocation3 + $0x60] sm:$0xff] %vm1355_vm8, %v1284_v47  ;;  %v1415_v27 = vpop.permute.xlu0 %1414  ;;  %v1798_v5 = vld [vmem:[#allocation3 + $0x50] sm:$0xff] }
 0x204   : > { %1313 = vrot.lane.b32.xlu1 %v11995_v3, %s7127_s8  ;;  %1499 = vst.msk [vmem:[#allocation3 + $0x60] sm:$0xff] %vm1486_vm9, %v1415_v27  ;;  %6859 = vmatprep.mubr.msk.f32.mxu0 %vm1827_vm12, %v1798_v5 }
 0x205   : > { %1577 = vrot.lane.b32.xlu0 %v11997_v42, %s7129_s9 }
 0x206   : > { %v1286_v12 = vpop.permute.xlu1 %1285 }
 0x207   : > { %1369 = vst.msk [vmem:[#allocation3 + $0x68] sm:$0xff] %vm1355_vm8, %v1286_v12  ;;  %v1550_v58 = vpop.permute.xlu0 %1549  ;;  %v1799_v10 = vld [vmem:[#allocation3 + $0x58] sm:$0xff] }
 0x208   : > { %1444 = vrot.lane.b32.xlu1 %v11998_v48, %s7128_s22  ;;  %1634 = vst.msk [vmem:[#allocation3 + $0x60] sm:$0xff] %vm1621_vm10, %v1550_v58  ;;  %6860 = vmatmul.mubr.msk.f32.gmra.mrb[10].mxu0 %vm1827_vm12, %v1799_v10 }
 0x209   : > { %1711 = vrot.lane.b32.xlu0 %v11999_v25, %s7130_s12 }
 0x20a   : > { %v1417_v13 = vpop.permute.xlu1 %1416 }
 0x20b   : > { %1500 = vst.msk [vmem:[#allocation3 + $0x68] sm:$0xff] %vm1486_vm9, %v1417_v13  ;;  %v1684_v15 = vpop.permute.xlu0 %1683 }
 0x20c   : > { %1579 = vrot.lane.b32.xlu1 %v11969_v45, %s7129_s9  ;;  %1768 = vst.msk [vmem:[#allocation3 + $0x60] sm:$0xff] %vm1755_vm11, %v1684_v15  ;;  %v1254_v45 = vrot.slane %v7104_v7, 2 }
 0x20d   : > { %1713 = vrot.lane.b32.xlu0 %v12000_v50, %s7130_s12 }
 0x20e   : > { %v1552_v8 = vpop.permute.xlu1 %1551  ;;  %v1256_v21 = vsel %vm778_vm3, %v1254_v45, %v1255_v16 }
 0x20f   : > { %1635 = vst.msk [vmem:[#allocation3 + $0x68] sm:$0xff] %vm1621_vm10, %v1552_v8  ;;  %v1686_v34 = vpop.permute.xlu0 %1685 }
 0x210   : > { %1315 = vrot.lane.b32.xlu1 %v11999_v25, %s7127_s8  ;;  %1769 = vst.msk [vmem:[#allocation3 + $0x68] sm:$0xff] %vm1755_vm11, %v1686_v34 }
 0x211   : > { %1446 = vrot.lane.b32.xlu0 %v7104_v7, %s7128_s22 }
 0x212   : > { %v1288_v52 = vpop.permute.xlu1 %1287 }
 0x213   : > { %1370 = vst.msk [vmem:[#allocation3 + $0x70] sm:$0xff] %vm1355_vm8, %v1288_v52  ;;  %v1419_v32 = vpop.permute.xlu0 %1418  ;;  %v1800_v51 = vld [vmem:[#allocation3 + $0x60] sm:$0xff] }
 0x214   : > { %1317 = vrot.lane.b32.xlu1 %v12000_v50, %s7127_s8  ;;  %1501 = vst.msk [vmem:[#allocation3 + $0x70] sm:$0xff] %vm1486_vm9, %v1419_v32  ;;  %6862 = vmatprep.mubr.msk.f32.mxu0 %vm1827_vm12, %v1800_v51 }
 0x215   : > { %1581 = vrot.lane.b32.xlu0 %v8071_v53, %s7129_s9  ;;  %v1258_v53 = vsel %vm778_vm3, %v1255_v16, %v1257_v54 }
 0x216   : > { %v1290_v31 = vpop.permute.xlu1 %1289 }
 0x217   : > { %1371 = vst.msk [vmem:[#allocation3 + $0x78] sm:$0xff] %vm1355_vm8, %v1290_v31  ;;  %v1554_v1 = vpop.permute.xlu0 %1553  ;;  %v1801_v23 = vld [vmem:[#allocation3 + $0x68] sm:$0xff] }
 0x218   : > { %1448 = vrot.lane.b32.xlu1 %v7105_v60, %s7128_s22  ;;  %1636 = vst.msk [vmem:[#allocation3 + $0x70] sm:$0xff] %vm1621_vm10, %v1554_v1  ;;  %6863 = vmatmul.mubr.msk.f32.gmra.mrb[12].mxu0 %vm1827_vm12, %v1801_v23 }
 0x219   : > { %1715 = vrot.lane.b32.xlu0 %v1256_v21, %s7130_s12 }
 0x21a   : > { %v1421_v30 = vpop.permute.xlu1 %1420 }
 0x21b   : > { %1502 = vst.msk [vmem:[#allocation3 + $0x78] sm:$0xff] %vm1486_vm9, %v1421_v30  ;;  %v1688_v49 = vpop.permute.xlu0 %1687 }
 0x21c   : > { %1583 = vrot.lane.b32.xlu1 %v12002_v39, %s7129_s9  ;;  %1770 = vst.msk [vmem:[#allocation3 + $0x70] sm:$0xff] %vm1755_vm11, %v1688_v49 }
 0x21d   : > { %1717 = vrot.lane.b32.xlu0 %v1258_v53, %s7130_s12 }
 0x21e   : > { %v1556_v56 = vpop.permute.xlu1 %1555 }
 0x21f   : > { %1637 = vst.msk [vmem:[#allocation3 + $0x78] sm:$0xff] %vm1621_vm10, %v1556_v56  ;;  %v1690_v57 = vpop.permute.xlu0 %1689 }
 0x220   : > { %1319 = vrot.lane.b32.xlu1 %v1256_v21, %s7127_s8  ;;  %1771 = vst.msk [vmem:[#allocation3 + $0x78] sm:$0xff] %vm1755_vm11, %v1690_v57 }
 0x221   : > { %1450 = vrot.lane.b32.xlu0 %v485_v55, %s7128_s22 }
 0x222   : > { %v1292_v6 = vpop.permute.xlu1 %1291 }
 0x223   : > { %1372 = vst.msk [vmem:[#allocation3 + $0x80] sm:$0xff] %vm1355_vm8, %v1292_v6  ;;  %v1423_v40 = vpop.permute.xlu0 %1422  ;;  %v1802_v4 = vld [vmem:[#allocation3 + $0x70] sm:$0xff] }
 0x224   : > { %1321 = vrot.lane.b32.xlu1 %v1258_v53, %s7127_s8  ;;  %1503 = vst.msk [vmem:[#allocation3 + $0x80] sm:$0xff] %vm1486_vm9, %v1423_v40  ;;  %6865 = vmatprep.mubr.msk.f32.mxu0 %vm1827_vm12, %v1802_v4 }
 0x225   : > { %1585 = vrot.lane.b32.xlu0 %v1522_v9, %s7129_s9 }
 0x226   : > { %v1294_v62 = vpop.permute.xlu1 %1293 }
 0x227   : > { %1373 = vst.msk [vmem:[#allocation3 + $0x88] sm:$0xff] %vm1355_vm8, %v1294_v62  ;;  %v1558_v19 = vpop.permute.xlu0 %1557  ;;  %v1803_v43 = vld [vmem:[#allocation3 + $0x78] sm:$0xff] }
 0x228   : > { %1452 = vrot.lane.b32.xlu1 %v486_v35, %s7128_s22  ;;  %1638 = vst.msk [vmem:[#allocation3 + $0x80] sm:$0xff] %vm1621_vm10, %v1558_v19  ;;  %6866 = vmatmul.mubr.msk.f32.gmra.mrb[14].mxu0 %vm1827_vm12, %v1803_v43 }
 0x229   : > { %1719 = vrot.lane.b32.xlu0 %v1656_v17, %s7130_s12 }
 0x22a   : > { %v1425_v63 = vpop.permute.xlu1 %1424 }
 0x22b   : > { %1504 = vst.msk [vmem:[#allocation3 + $0x88] sm:$0xff] %vm1486_vm9, %v1425_v63  ;;  %v1692_v37 = vpop.permute.xlu0 %1691 }
 0x22c   : > { %1587 = vrot.lane.b32.xlu1 %v1524_v41, %s7129_s9  ;;  %1772 = vst.msk [vmem:[#allocation3 + $0x80] sm:$0xff] %vm1755_vm11, %v1692_v37  ;;  %v273_v37 = vld [vmem:[%s8575_s15 + $0x8] sm:$0xff] }
 0x22d   : > { %2183 = vst.msk [vmem:[#allocation2 + $0x21] sm:$0xff] %vm2181_vm13, %v273_v37 }
 0x22e   : > { %v1560_v28 = vpop.permute.xlu1 %1559 }
 0x22f   : > { %1639 = vst.msk [vmem:[#allocation3 + $0x88] sm:$0xff] %vm1621_vm10, %v1560_v28  ;;  %v1694_v2 = vpop.permute.xlu0 %1693 }
 0x230   : > { %1721 = vrot.lane.b32.xlu1 %v1658_v22, %s7130_s12  ;;  %1773 = vst.msk [vmem:[#allocation3 + $0x88] sm:$0xff] %vm1755_vm11, %v1694_v2  ;;  %v272_v22 = vld [vmem:[%s8575_s15] sm:$0xff] }
 0x231   : > { %2182 = vst.msk [vmem:[#allocation2 + $0x19] sm:$0xff] %vm2181_vm13, %v272_v22 }
 0x232   : > { %v1296_v0 = vpop.permute.xlu1 %1295 }
 0x233   : > { %1374 = vst.msk [vmem:[#allocation3 + $0x90] sm:$0xff] %vm1355_vm8, %v1296_v0  ;;  %v1427_v11 = vpop.permute.xlu0 %1426  ;;  %v1804_v46 = vld [vmem:[#allocation3 + $0x80] sm:$0xff] }
 0x234   : > { %1505 = vst.msk [vmem:[#allocation3 + $0x90] sm:$0xff] %vm1486_vm9, %v1427_v11  ;;  %6868 = vmatprep.mubr.msk.f32.mxu1 %vm1827_vm12, %v1804_v46 }
 0x236   : > { %v1298_v18 = vpop.permute.xlu1 %1297 }
 0x237   : > { %1375 = vst.msk [vmem:[#allocation3 + $0x98] sm:$0xff] %vm1355_vm8, %v1298_v18  ;;  %v1562_v3 = vpop.permute.xlu0 %1561  ;;  %v1805_v59 = vld [vmem:[#allocation3 + $0x88] sm:$0xff]  ;;  %v8589_v18 = vld [vmem:[%s11740_s3] ss:$0 sm:$0xff] }
 0x238   : > { %1640 = vst.msk [vmem:[#allocation3 + $0x90] sm:$0xff] %vm1621_vm10, %v1562_v3  ;;  %6869 = vmatmul.mubr.msk.f32.vlgmr.msra.gmra.mrb[0].mxu1 %vm1827_vm12, %v1805_v59 }
 0x23a   : > { %v1429_v33 = vpop.permute.xlu1 %1428 }
 0x23b   : > { %1506 = vst.msk [vmem:[#allocation3 + $0x98] sm:$0xff] %vm1486_vm9, %v1429_v33  ;;  %v1696_v14 = vpop.permute.xlu0 %1695 }
 0x23c   : > { %1774 = vst.msk [vmem:[#allocation3 + $0x90] sm:$0xff] %vm1755_vm11, %v1696_v14 }
 0x23e   : > { %v1564_v47 = vpop.permute.xlu1 %1563 }
 0x23f   : > { %1641 = vst.msk [vmem:[#allocation3 + $0x98] sm:$0xff] %vm1621_vm10, %v1564_v47  ;;  %v1698_v27 = vpop.permute.xlu0 %1697 }
 0x240   : > { %1775 = vst.msk [vmem:[#allocation3 + $0x98] sm:$0xff] %vm1755_vm11, %v1698_v27 }
 0x242   : > { %v1300_v5 = vpop.permute.xlu1 %1299 }
 0x243   : > { %1376 = vst.msk [vmem:[#allocation3 + $0xa0] sm:$0xff] %vm1355_vm8, %v1300_v5  ;;  %v1431_v42 = vpop.permute.xlu0 %1430  ;;  %v1806_v12 = vld [vmem:[#allocation3 + $0x90] sm:$0xff] }
 0x244   : > { %1507 = vst.msk [vmem:[#allocation3 + $0xa0] sm:$0xff] %vm1486_vm9, %v1431_v42  ;;  %6871 = vmatprep.mubr.msk.f32.mxu1 %vm1827_vm12, %v1806_v12  ;;  %v275_v42 = vld [vmem:[%s8575_s15 + $0x18] sm:$0xff] }
 0x245   : > { %2185 = vst.msk [vmem:[#allocation2 + $0x39] sm:$0xff] %vm2181_vm13, %v275_v42  ;;  %v288_v42 = vld [vmem:[%s8575_s15 + $0x80] sm:$0xff] }
 0x246   : > { %v1302_v58 = vpop.permute.xlu1 %1301  ;;  %2198 = vst.msk [vmem:[#allocation2 + $0xd9] sm:$0xff] %vm2181_vm13, %v288_v42 }
 0x247   : > { %1377 = vst.msk [vmem:[#allocation3 + $0xa8] sm:$0xff] %vm1355_vm8, %v1302_v58  ;;  %v1566_v48 = vpop.permute.xlu0 %1565  ;;  %v1807_v10 = vld [vmem:[#allocation3 + $0x98] sm:$0xff]  ;;  %v274_v58 = vld [vmem:[%s8575_s15 + $0x10] sm:$0xff] }
 0x248   : > { %1642 = vst.msk [vmem:[#allocation3 + $0xa0] sm:$0xff] %vm1621_vm10, %v1566_v48  ;;  %6872 = vmatmul.mubr.msk.f32.gmra.mrb[2].mxu1 %vm1827_vm12, %v1807_v10 }
 0x249   : > { %2184 = vst.msk [vmem:[#allocation2 + $0x31] sm:$0xff] %vm2181_vm13, %v274_v58 }
 0x24a   : > { %v1433_v25 = vpop.permute.xlu1 %1432 }
 0x24b   : > { %1508 = vst.msk [vmem:[#allocation3 + $0xa8] sm:$0xff] %vm1486_vm9, %v1433_v25  ;;  %v1700_v13 = vpop.permute.xlu0 %1699 }
 0x24c   : > { %1776 = vst.msk [vmem:[#allocation3 + $0xa0] sm:$0xff] %vm1755_vm11, %v1700_v13 }
 0x24e   : > { %v1568_v15 = vpop.permute.xlu1 %1567 }
 0x24f   : > { %1643 = vst.msk [vmem:[#allocation3 + $0xa8] sm:$0xff] %vm1621_vm10, %v1568_v15  ;;  %v1702_v50 = vpop.permute.xlu0 %1701 }
 0x250   : > { %1777 = vst.msk [vmem:[#allocation3 + $0xa8] sm:$0xff] %vm1755_vm11, %v1702_v50 }
 0x252   : > { %v1304_v8 = vpop.permute.xlu1 %1303 }
 0x253   : > { %1378 = vst.msk [vmem:[#allocation3 + $0xb0] sm:$0xff] %vm1355_vm8, %v1304_v8  ;;  %v1435_v34 = vpop.permute.xlu0 %1434  ;;  %v1808_v7 = vld [vmem:[#allocation3 + $0xa0] sm:$0xff] }
 0x254   : > { %1509 = vst.msk [vmem:[#allocation3 + $0xb0] sm:$0xff] %vm1486_vm9, %v1435_v34  ;;  %6874 = vmatprep.mubr.msk.f32.mxu1 %vm1827_vm12, %v1808_v7  ;;  %v277_v7 = vld [vmem:[%s8575_s15 + $0x28] sm:$0xff] }
 0x255   : > { %2187 = vst.msk [vmem:[#allocation2 + $0x51] sm:$0xff] %vm2181_vm13, %v277_v7 }
 0x256   : > { %v1306_v52 = vpop.permute.xlu1 %1305 }
 0x257   : > { %1379 = vst.msk [vmem:[#allocation3 + $0xb8] sm:$0xff] %vm1355_vm8, %v1306_v52  ;;  %v1570_v45 = vpop.permute.xlu0 %1569  ;;  %v1809_v60 = vld [vmem:[#allocation3 + $0xa8] sm:$0xff] }
 0x258   : > { %1644 = vst.msk [vmem:[#allocation3 + $0xb0] sm:$0xff] %vm1621_vm10, %v1570_v45  ;;  %6875 = vmatmul.mubr.msk.f32.gmra.mrb[4].mxu1 %vm1827_vm12, %v1809_v60  ;;  %v276_v45 = vld [vmem:[%s8575_s15 + $0x20] sm:$0xff] }
 0x259   : > { %2186 = vst.msk [vmem:[#allocation2 + $0x49] sm:$0xff] %vm2181_vm13, %v276_v45 }
 0x25a   : > { %v1437_v16 = vpop.permute.xlu1 %1436 }
 0x25b   : > { %1510 = vst.msk [vmem:[#allocation3 + $0xb8] sm:$0xff] %vm1486_vm9, %v1437_v16  ;;  %v1704_v32 = vpop.permute.xlu0 %1703 }
 0x25c   : > { %1778 = vst.msk [vmem:[#allocation3 + $0xb0] sm:$0xff] %vm1755_vm11, %v1704_v32 }
 0x25e   : > { %v1572_v51 = vpop.permute.xlu1 %1571 }
 0x25f   : > { %1645 = vst.msk [vmem:[#allocation3 + $0xb8] sm:$0xff] %vm1621_vm10, %v1572_v51  ;;  %v1706_v31 = vpop.permute.xlu0 %1705  ;;  %v279_v51 = vld [vmem:[%s8575_s15 + $0x38] sm:$0xff] }
 0x260   : > { %1779 = vst.msk [vmem:[#allocation3 + $0xb8] sm:$0xff] %vm1755_vm11, %v1706_v31 }
 0x261   : > { %2189 = vst.msk [vmem:[#allocation2 + $0x69] sm:$0xff] %vm2181_vm13, %v279_v51 }
 0x262   : > { %v1308_v21 = vpop.permute.xlu1 %1307 }
 0x263   : > { %1380 = vst.msk [vmem:[#allocation3 + $0xc0] sm:$0xff] %vm1355_vm8, %v1308_v21  ;;  %v1439_v29 = vpop.permute.xlu0 %1438  ;;  %v1810_v54 = vld [vmem:[#allocation3 + $0xb0] sm:$0xff] }
 0x264   : > { %1511 = vst.msk [vmem:[#allocation3 + $0xc0] sm:$0xff] %vm1486_vm9, %v1439_v29  ;;  %6877 = vmatprep.mubr.msk.f32.mxu1 %vm1827_vm12, %v1810_v54  ;;  %v278_v29 = vld [vmem:[%s8575_s15 + $0x30] sm:$0xff] }
 0x265   : > { %2188 = vst.msk [vmem:[#allocation2 + $0x61] sm:$0xff] %vm2181_vm13, %v278_v29 }
 0x266   : > { %v1310_v1 = vpop.permute.xlu1 %1309 }
 0x267   : > { %1381 = vst.msk [vmem:[#allocation3 + $0xc8] sm:$0xff] %vm1355_vm8, %v1310_v1  ;;  %v1574_v23 = vpop.permute.xlu0 %1573  ;;  %v1811_v30 = vld [vmem:[#allocation3 + $0xb8] sm:$0xff] }
 0x268   : > { %1646 = vst.msk [vmem:[#allocation3 + $0xc0] sm:$0xff] %vm1621_vm10, %v1574_v23  ;;  %6878 = vmatmul.mubr.msk.f32.gmra.mrb[6].mxu1 %vm1827_vm12, %v1811_v30 }
 0x26a   : > { %v1441_v53 = vpop.permute.xlu1 %1440 }
 0x26b   : > { %1512 = vst.msk [vmem:[#allocation3 + $0xc8] sm:$0xff] %vm1486_vm9, %v1441_v53  ;;  %v1708_v49 = vpop.permute.xlu0 %1707 }
 0x26c   : > { %1780 = vst.msk [vmem:[#allocation3 + $0xc0] sm:$0xff] %vm1755_vm11, %v1708_v49 }
 0x26e   : > { %v1576_v39 = vpop.permute.xlu1 %1575 }
 0x26f   : > { %1647 = vst.msk [vmem:[#allocation3 + $0xc8] sm:$0xff] %vm1621_vm10, %v1576_v39  ;;  %v1710_v55 = vpop.permute.xlu0 %1709 }
 0x270   : > { %1781 = vst.msk [vmem:[#allocation3 + $0xc8] sm:$0xff] %vm1755_vm11, %v1710_v55 }
 0x272   : > { %v1312_v35 = vpop.permute.xlu1 %1311 }
 0x273   : > { %1382 = vst.msk [vmem:[#allocation3 + $0xd0] sm:$0xff] %vm1355_vm8, %v1312_v35  ;;  %v1443_v56 = vpop.permute.xlu0 %1442  ;;  %v1812_v36 = vld [vmem:[#allocation3 + $0xc0] sm:$0xff] }
 0x274   : > { %1513 = vst.msk [vmem:[#allocation3 + $0xd0] sm:$0xff] %vm1486_vm9, %v1443_v56  ;;  %6880 = vmatprep.mubr.msk.f32.mxu1 %vm1827_vm12, %v1812_v36  ;;  %v281_v56 = vld [vmem:[%s8575_s15 + $0x48] sm:$0xff]  ;;  %v280_v36 = vld [vmem:[%s8575_s15 + $0x40] sm:$0xff] }
 0x275   : > { %2191 = vst.msk [vmem:[#allocation2 + $0x81] sm:$0xff] %vm2181_vm13, %v281_v56  ;;  %2190 = vst.msk [vmem:[#allocation2 + $0x79] sm:$0xff] %vm2181_vm13, %v280_v36 }
 0x276   : > { %v1314_v24 = vpop.permute.xlu1 %1313 }
 0x277   : > { %1383 = vst.msk [vmem:[#allocation3 + $0xd8] sm:$0xff] %vm1355_vm8, %v1314_v24  ;;  %v1578_v57 = vpop.permute.xlu0 %1577  ;;  %v1813_v6 = vld [vmem:[#allocation3 + $0xc8] sm:$0xff] }
 0x278   : > { %1648 = vst.msk [vmem:[#allocation3 + $0xd0] sm:$0xff] %vm1621_vm10, %v1578_v57  ;;  %6881 = vmatmul.mubr.msk.f32.gmra.mrb[8].mxu1 %vm1827_vm12, %v1813_v6 }
 0x27a   : > { %v1445_v38 = vpop.permute.xlu1 %1444 }
 0x27b   : > { %1514 = vst.msk [vmem:[#allocation3 + $0xd8] sm:$0xff] %vm1486_vm9, %v1445_v38  ;;  %v1712_v9 = vpop.permute.xlu0 %1711 }
 0x27c   : > { %1782 = vst.msk [vmem:[#allocation3 + $0xd0] sm:$0xff] %vm1755_vm11, %v1712_v9 }
 0x27e   : > { %v1580_v20 = vpop.permute.xlu1 %1579 }
 0x27f   : > { %1649 = vst.msk [vmem:[#allocation3 + $0xd8] sm:$0xff] %vm1621_vm10, %v1580_v20  ;;  %v1714_v61 = vpop.permute.xlu0 %1713 }
 0x280   : > { %1783 = vst.msk [vmem:[#allocation3 + $0xd8] sm:$0xff] %vm1755_vm11, %v1714_v61  ;;  %v283_v61 = vld [vmem:[%s8575_s15 + $0x58] sm:$0xff] }
 0x281   : > { %2193 = vst.msk [vmem:[#allocation2 + $0x99] sm:$0xff] %vm2181_vm13, %v283_v61 }
 0x282   : > { %v1316_v40 = vpop.permute.xlu1 %1315 }
 0x283   : > { %1384 = vst.msk [vmem:[#allocation3 + $0xe0] sm:$0xff] %vm1355_vm8, %v1316_v40  ;;  %v1447_v4 = vpop.permute.xlu0 %1446  ;;  %v1814_v26 = vld [vmem:[#allocation3 + $0xd0] sm:$0xff]  ;;  %v282_v40 = vld [vmem:[%s8575_s15 + $0x50] sm:$0xff] }
 0x284   : > { %1515 = vst.msk [vmem:[#allocation3 + $0xe0] sm:$0xff] %vm1486_vm9, %v1447_v4  ;;  %6883 = vmatprep.mubr.msk.f32.mxu1 %vm1827_vm12, %v1814_v26 }
 0x285   : > { %2192 = vst.msk [vmem:[#allocation2 + $0x91] sm:$0xff] %vm2181_vm13, %v282_v40 }
 0x286   : > { %v1318_v62 = vpop.permute.xlu1 %1317 }
 0x287   : > { %1385 = vst.msk [vmem:[#allocation3 + $0xe8] sm:$0xff] %vm1355_vm8, %v1318_v62  ;;  %v1582_v17 = vpop.permute.xlu0 %1581  ;;  %v1815_v19 = vld [vmem:[#allocation3 + $0xd8] sm:$0xff] }
 0x288   : > { %1650 = vst.msk [vmem:[#allocation3 + $0xe0] sm:$0xff] %vm1621_vm10, %v1582_v17  ;;  %6884 = vmatmul.mubr.msk.f32.gmra.mrb[10].mxu1 %vm1827_vm12, %v1815_v19 }
 0x28a   : > { %v1449_v43 = vpop.permute.xlu1 %1448 }
 0x28b   : > { %1516 = vst.msk [vmem:[#allocation3 + $0xe8] sm:$0xff] %vm1486_vm9, %v1449_v43  ;;  %v1716_v41 = vpop.permute.xlu0 %1715 }
 0x28c   : > { %1784 = vst.msk [vmem:[#allocation3 + $0xe0] sm:$0xff] %vm1755_vm11, %v1716_v41  ;;  %v285_v41 = vld [vmem:[%s8575_s15 + $0x68] sm:$0xff] }
 0x28d   : > { %2195 = vst.msk [vmem:[#allocation2 + $0xb1] sm:$0xff] %vm2181_vm13, %v285_v41 }
 0x28e   : > { %v1584_v44 = vpop.permute.xlu1 %1583 }
 0x28f   : > { %1651 = vst.msk [vmem:[#allocation3 + $0xe8] sm:$0xff] %vm1621_vm10, %v1584_v44  ;;  %v1718_v63 = vpop.permute.xlu0 %1717  ;;  %v284_v44 = vld [vmem:[%s8575_s15 + $0x60] sm:$0xff] }
 0x290   : > { %1785 = vst.msk [vmem:[#allocation3 + $0xe8] sm:$0xff] %vm1755_vm11, %v1718_v63 }
 0x291   : > { %2194 = vst.msk [vmem:[#allocation2 + $0xa9] sm:$0xff] %vm2181_vm13, %v284_v44  ;;  %v294_v44 = vld [vmem:[%s8575_s15 + $0xb0] sm:$0xff] }
 0x292   : > { %v1320_v28 = vpop.permute.xlu1 %1319  ;;  %2204 = vst.msk [vmem:[#allocation2 + $0x121] sm:$0xff] %vm2181_vm13, %v294_v44 }
 0x293   : > { %1386 = vst.msk [vmem:[#allocation3 + $0xf0] sm:$0xff] %vm1355_vm8, %v1320_v28  ;;  %v1816_v2 = vld [vmem:[#allocation3 + $0xe0] sm:$0xff]  ;;  %v1451_v0 = vpop.permute.xlu0 %1450 }
 0x294   : > { %6886 = vmatprep.mubr.msk.f32.mxu1 %vm1827_vm12, %v1816_v2  ;;  %1517 = vst.msk [vmem:[#allocation3 + $0xf0] sm:$0xff] %vm1486_vm9, %v1451_v0 }
 0x296   : > { %v1322_v11 = vpop.permute.xlu1 %1321 }
 0x297   : > { %1387 = vst.msk [vmem:[#allocation3 + $0xf8] sm:$0xff] %vm1355_vm8, %v1322_v11  ;;  %v1817_v46 = vld [vmem:[#allocation3 + $0xe8] sm:$0xff]  ;;  %v1586_v3 = vpop.permute.xlu0 %1585 }
 0x298   : > { %6887 = vmatmul.mubr.msk.f32.gmra.mrb[12].mxu1 %vm1827_vm12, %v1817_v46  ;;  %1652 = vst.msk [vmem:[#allocation3 + $0xf0] sm:$0xff] %vm1621_vm10, %v1586_v3  ;;  %v287_v11 = vld [vmem:[%s8575_s15 + $0x78] sm:$0xff]  ;;  %v286_v46 = vld [vmem:[%s8575_s15 + $0x70] sm:$0xff] }
 0x299   : > { %2197 = vst.msk [vmem:[#allocation2 + $0xc9] sm:$0xff] %vm2181_vm13, %v287_v11  ;;  %2196 = vst.msk [vmem:[#allocation2 + $0xc1] sm:$0xff] %vm2181_vm13, %v286_v46 }
 0x29a   : > { %v6846_v59 = vpop.f32.mrb[0].mxu0  ;;  %v1453_v33 = vpop.permute.xlu1 %1452 }
 0x29b   : > { %v1996_v14 = vadd.f32 %v6846_v59, %v8589_v18  ;;  %1518 = vst.msk [vmem:[#allocation3 + $0xf8] sm:$0xff] %vm1486_vm9, %v1453_v33  ;;  %v1990_v47 = vpop.f32.mrb[1].mxu0  ;;  %v1720_v5 = vpop.permute.xlu0 %1719 }
 0x29c   : > { %v1991_v27 = vadd.f32 %v8589_v18, %v1990_v47  ;;  %1786 = vst.msk [vmem:[#allocation3 + $0xf0] sm:$0xff] %vm1755_vm11, %v1720_v5  ;;  %v289_v5 = vld [vmem:[%s8575_s15 + $0x88] sm:$0xff] }
 0x29d   : > { %v2150_v12 = vmax.f32 %v1996_v14, 0.0  ;;  %2199 = vst.msk [vmem:[#allocation2 + $0xe1] sm:$0xff] %vm2181_vm13, %v289_v5  ;;  %v296_v5 = vld [vmem:[%s8575_s15 + $0xc0] sm:$0xff] }
 0x29e   : > { %v2149_v48 = vmax.f32 %v1991_v27, 0.0  ;;  %v1588_v10 = vpop.permute.xlu1 %1587  ;;  %2206 = vst.msk [vmem:[#allocation2 + $0x139] sm:$0xff] %vm2181_vm13, %v296_v5 }
 0x29f   : > { %1653 = vst.msk [vmem:[#allocation3 + $0xf8] sm:$0xff] %vm1621_vm10, %v1588_v10  ;;  %2248 = vrot.lane.b32.xlu1 %v2150_v12, %s7131_s18 }
 0x2a0   : > { %2246 = vrot.lane.b32.xlu0 %v2149_v48, %s7131_s18 }
 0x2a2   : > { %v1722_v25 = vpop.permute.xlu1 %1721 }
 0x2a3   : > { %1787 = vst.msk [vmem:[#allocation3 + $0xf8] sm:$0xff] %vm1755_vm11, %v1722_v25  ;;  %v1818_v13 = vld [vmem:[#allocation3 + $0xf0] sm:$0xff] }
 0x2a4   : > { %6889 = vmatprep.mubr.msk.f32.mxu1 %vm1827_vm12, %v1818_v13 }
 0x2a6   : > { %v6849_v15 = vpop.f32.mrb[2].mxu0 }
 0x2a7   : > { %v2006_v50 = vadd.f32 %v6849_v15, %v8589_v18  ;;  %v2000_v8 = vpop.f32.mrb[3].mxu0 }
 0x2a8   : > { %v2001_v34 = vadd.f32 %v8589_v18, %v2000_v8  ;;  %v291_v8 = vld [vmem:[%s8575_s15 + $0x98] sm:$0xff] }
 0x2a9   : > { %v2152_v52 = vmax.f32 %v2006_v50, 0.0  ;;  %2201 = vst.msk [vmem:[#allocation2 + $0xf9] sm:$0xff] %vm2181_vm13, %v291_v8 }
 0x2aa   : > { %v2151_v60 = vmax.f32 %v2001_v34, 0.0  ;;  %v1819_v16 = vld [vmem:[#allocation3 + $0xf8] sm:$0xff]  ;;  %v290_v34 = vld [vmem:[%s8575_s15 + $0x90] sm:$0xff] }
 0x2ab   : > { %6890 = vmatmul.mubr.msk.f32.gmra.mrb[14].mxu1 %vm1827_vm12, %v1819_v16  ;;  %2252 = vrot.lane.b32.xlu1 %v2152_v52, %s7131_s18  ;;  %2200 = vst.msk [vmem:[#allocation2 + $0xf1] sm:$0xff] %vm2181_vm13, %v290_v34 }
 0x2ac   : > { %2250 = vrot.lane.b32.xlu0 %v2151_v60, %s7131_s18 }
 0x2b2   : > { %v6852_v32 = vpop.f32.mrb[4].mxu0 }
 0x2b3   : > { %v2016_v31 = vadd.f32 %v6852_v32, %v8589_v18  ;;  %v2010_v21 = vpop.f32.mrb[5].mxu0 }
 0x2b4   : > { %v2011_v54 = vadd.f32 %v8589_v18, %v2010_v21 }
 0x2b5   : > { %v2154_v1 = vmax.f32 %v2016_v31, 0.0 }
 0x2b6   : > { %v2153_v23 = vmax.f32 %v2011_v54, 0.0 }
 0x2b7   : > { %2256 = vrot.lane.b32.xlu1 %v2154_v1, %s7131_s18 }
 0x2b8   : > { %2254 = vrot.lane.b32.xlu0 %v2153_v23, %s7131_s18  ;;  %v293_v23 = vld [vmem:[%s8575_s15 + $0xa8] sm:$0xff] }
 0x2b9   : > { %2203 = vst.msk [vmem:[#allocation2 + $0x111] sm:$0xff] %vm2181_vm13, %v293_v23 }
 0x2bb   : > { %v6855_v30 = vpop.f32.mrb[6].mxu0 }
 0x2bc   : > { %v2026_v53 = vadd.f32 %v6855_v30, %v8589_v18  ;;  %v2020_v49 = vpop.f32.mrb[7].mxu0  ;;  %v292_v30 = vld [vmem:[%s8575_s15 + $0xa0] sm:$0xff] }
 0x2bd   : > { %v2021_v39 = vadd.f32 %v8589_v18, %v2020_v49  ;;  %2202 = vst.msk [vmem:[#allocation2 + $0x109] sm:$0xff] %vm2181_vm13, %v292_v30 }
 0x2be   : > { %v2156_v55 = vmax.f32 %v2026_v53, 0.0 }
 0x2bf   : > { %v2155_v35 = vmax.f32 %v2021_v39, 0.0 }
 0x2c0   : > { %2260 = vrot.lane.b32.xlu1 %v2156_v55, %s7131_s18 }
 0x2c1   : > { %2258 = vrot.lane.b32.xlu0 %v2155_v35, %s7131_s18 }
 0x2cb   : > { %v6858_v24 = vpop.f32.mrb[8].mxu0 }
 0x2cc   : > { %v2036_v57 = vadd.f32 %v6858_v24, %v8589_v18  ;;  %v2030_v6 = vpop.f32.mrb[9].mxu0 }
 0x2cd   : > { %v2031_v38 = vadd.f32 %v8589_v18, %v2030_v6 }
 0x2ce   : > { %v2158_v9 = vmax.f32 %v2036_v57, 0.0 }
 0x2cf   : > { %v2157_v20 = vmax.f32 %v2031_v38, 0.0 }
 0x2d0   : > { %2264 = vrot.lane.b32.xlu1 %v2158_v9, %s7131_s18 }
 0x2d1   : > { %2262 = vrot.lane.b32.xlu0 %v2157_v20, %s7131_s18 }
 0x2db   : > { %v6861_v4 = vpop.f32.mrb[10].mxu0 }
 0x2dc   : > { %v2046_v26 = vadd.f32 %v6861_v4, %v8589_v18  ;;  %v2040_v62 = vpop.f32.mrb[11].mxu0 }
 0x2dd   : > { %v2041_v17 = vadd.f32 %v8589_v18, %v2040_v62 }
 0x2de   : > { %v2160_v19 = vmax.f32 %v2046_v26, 0.0 }
 0x2df   : > { %v2159_v43 = vmax.f32 %v2041_v17, 0.0 }
 0x2e0   : > { %2268 = vrot.lane.b32.xlu1 %v2160_v19, %s7131_s18 }
 0x2e1   : > { %2266 = vrot.lane.b32.xlu0 %v2159_v43, %s7131_s18  ;;  %v295_v43 = vld [vmem:[%s8575_s15 + $0xb8] sm:$0xff] }
 0x2e2   : > { %2205 = vst.msk [vmem:[#allocation2 + $0x129] sm:$0xff] %vm2181_vm13, %v295_v43 }
 0x2eb   : > { %v6864_v63 = vpop.f32.mrb[12].mxu0 }
 0x2ec   : > { %v2056_v37 = vadd.f32 %v6864_v63, %v8589_v18  ;;  %v2050_v22 = vpop.f32.mrb[13].mxu0 }
 0x2ed   : > { %v2051_v28 = vadd.f32 %v8589_v18, %v2050_v22 }
 0x2ee   : > { %v2162_v2 = vmax.f32 %v2056_v37, 0.0 }
 0x2ef   : > { %v2161_v0 = vmax.f32 %v2051_v28, 0.0 }
 0x2f0   : > { %2272 = vrot.lane.b32.xlu1 %v2162_v2, %s7131_s18 }
 0x2f1   : > { %2270 = vrot.lane.b32.xlu0 %v2161_v0, %s7131_s18 }
 0x2fb   : > { %v6867_v3 = vpop.f32.mrb[14].mxu0 }
 0x2fc   : > { %v2066_v59 = vadd.f32 %v6867_v3, %v8589_v18  ;;  %v2060_v33 = vpop.f32.mrb[15].mxu0 }
 0x2fd   : > { %v2061_v14 = vadd.f32 %v8589_v18, %v2060_v33 }
 0x2fe   : > { %v2164_v47 = vmax.f32 %v2066_v59, 0.0 }
 0x2ff   : > { %v2163_v27 = vmax.f32 %v2061_v14, 0.0 }
 0x300   : > { %2276 = vrot.lane.b32.xlu1 %v2164_v47, %s7131_s18  ;;  %v297_v47 = vld [vmem:[%s8575_s15 + $0xc8] sm:$0xff] }
 0x301   : > { %2274 = vrot.lane.b32.xlu0 %v2163_v27, %s7131_s18  ;;  %2207 = vst.msk [vmem:[#allocation2 + $0x141] sm:$0xff] %vm2181_vm13, %v297_v47 }
 0x30b   : > { %v6870_v12 = vpop.f32.mrb[0].mxu1 }
 0x30c   : > { %v2076_v58 = vadd.f32 %v6870_v12, %v8589_v18  ;;  %v2070_v48 = vpop.f32.mrb[1].mxu1 }
 0x30d   : > { %v2071_v10 = vadd.f32 %v8589_v18, %v2070_v48 }
 0x30e   : > { %v2166_v25 = vmax.f32 %v2076_v58, 0.0 }
 0x30f   : > { %v2165_v13 = vmax.f32 %v2071_v10, 0.0 }
 0x310   : > { %2280 = vrot.lane.b32.xlu1 %v2166_v25, %s7131_s18 }
 0x311   : > { %v2249_v15 = vpop.permute.xlu1 %2248  ;;  %2278 = vrot.lane.b32.xlu0 %v2165_v13, %s7131_s18 }
 0x312   : > { %2344 = vst.msk [vmem:[#allocation2 + $0x21] sm:$0xff] %vm2342_vm14, %v2249_v15  ;;  %v2247_v50 = vpop.permute.xlu0 %2246 }
 0x313   : > { %2343 = vst.msk [vmem:[#allocation2 + $0x19] sm:$0xff] %vm2342_vm14, %v2247_v50 }
 0x319   : > { %v2424_v7 = vld [vmem:[#allocation2 + $0x27] sm:$0x1] }
 0x31a   : > { %2442 = vst.msk [vmem:[#allocation2 + $0x29] sm:$0x1] %vm2404_vm15, %v2424_v7  ;;  %v2387_v52 = vld [vmem:[#allocation2 + $0x1a] sm:$0x1]  ;;  %v8674_v45 = vld [vmem:[#allocation2 + $0x20] sm:$0xff] }
 0x31b   : > { %2406 = vst.msk [vmem:[#allocation2 + $0x18] sm:$0x1] %vm2404_vm15, %v2387_v52  ;;  %v6873_v60 = vpop.f32.mrb[2].mxu1  ;;  %v299_v7 = vld [vmem:[%s8575_s15 + $0xd8] sm:$0xff] }
 0x31c   : > { %2525 = vst.msk [vmem:[#allocation3 + $0x18] sm:$0xff] %vm336_vm0, %v8674_v45  ;;  %v2086_v16 = vadd.f32 %v6873_v60, %v8589_v18  ;;  %v2080_v32 = vpop.f32.mrb[3].mxu1  ;;  %v298_v60 = vld [vmem:[%s8575_s15 + $0xd0] sm:$0xff] }
 0x31d   : > { %v2253_v51 = vpop.permute.xlu1 %2252  ;;  %v2081_v31 = vadd.f32 %v8589_v18, %v2080_v32  ;;  %2209 = vst.msk [vmem:[#allocation2 + $0x159] sm:$0xff] %vm2181_vm13, %v299_v7  ;;  %2208 = vst.msk [vmem:[#allocation2 + $0x151] sm:$0xff] %vm2181_vm13, %v298_v60  ;;  %v2608_v60 = vrot.slane %v8674_v45, 1 }
 0x31e   : > { %2346 = vst.msk [vmem:[#allocation2 + $0x39] sm:$0xff] %vm2342_vm14, %v2253_v51  ;;  %v2251_v21 = vpop.permute.xlu0 %2250  ;;  %v2168_v29 = vmax.f32 %v2086_v16, 0.0 }
 0x31f   : > { %2345 = vst.msk [vmem:[#allocation2 + $0x31] sm:$0xff] %vm2342_vm14, %v2251_v21  ;;  %v2167_v54 = vmax.f32 %v2081_v31, 0.0 }
 0x320   : > { %2284 = vrot.lane.b32.xlu1 %v2168_v29, %s7131_s18 }
 0x321   : > { %2282 = vrot.lane.b32.xlu0 %v2167_v54, %s7131_s18 }
 0x322   : > { %v8685_v1 = vld [vmem:[#allocation2 + $0x18] sm:$0xff] }
 0x323   : > { %2524 = vst.msk [vmem:[#allocation3 + $0x10] sm:$0xff] %vm336_vm0, %v8685_v1  ;;  %v2607_v7 = vrot.slane %v8685_v1, 1 }
 0x325   : > { %v2377_v53 = vld [vmem:[#allocation2 + $0x39] sm:$0xff] }
 0x326   : > { %v2425_v49 = vld [vmem:[#allocation2 + $0x3f] sm:$0x1]  ;;  %2379 = vst.msk [vmem:[#allocation2 + $0x9] sm:$0xff] %vm336_vm0, %v2377_v53  ;;  %v2376_v39 = vld [vmem:[#allocation2 + $0x31] sm:$0xff] }
 0x327   : > { %2443 = vst.msk [vmem:[#allocation2 + $0x41] sm:$0x1] %vm2404_vm15, %v2425_v49  ;;  %v2388_v55 = vld [vmem:[#allocation2 + $0x32] sm:$0x1]  ;;  %v8695_v35 = vld [vmem:[#allocation2 + $0x38] sm:$0xff] }
 0x328   : > { %2407 = vst.msk [vmem:[#allocation2 + $0x30] sm:$0x1] %vm2404_vm15, %v2388_v55 }
 0x329   : > { %2378 = vst.msk [vmem:[#allocation2 + $0x1] sm:$0xff] %vm336_vm0, %v2376_v39  ;;  %2527 = vst.msk [vmem:[#allocation3 + $0x28] sm:$0xff] %vm336_vm0, %v8695_v35  ;;  %v2257_v56 = vpop.permute.xlu1 %2256  ;;  %v301_v39 = vld [vmem:[%s8575_s15 + $0xe8] sm:$0xff] }
 0x32a   : > { %2348 = vst.msk [vmem:[#allocation2 + $0x51] sm:$0xff] %vm2342_vm14, %v2257_v56  ;;  %v2255_v36 = vpop.permute.xlu0 %2254  ;;  %v300_v56 = vld [vmem:[%s8575_s15 + $0xe0] sm:$0xff] }
 0x32b   : > { %2347 = vst.msk [vmem:[#allocation2 + $0x49] sm:$0xff] %vm2342_vm14, %v2255_v36  ;;  %v6876_v24 = vpop.f32.mrb[4].mxu1 }
 0x32c   : > { %v2096_v57 = vadd.f32 %v6876_v24, %v8589_v18  ;;  %v2090_v6 = vpop.f32.mrb[5].mxu1  ;;  %2211 = vst.msk [vmem:[#allocation2 + $0x171] sm:$0xff] %vm2181_vm13, %v301_v39  ;;  %2210 = vst.msk [vmem:[#allocation2 + $0x169] sm:$0xff] %vm2181_vm13, %v300_v56 }
 0x32d   : > { %v2423_v38 = vld [vmem:[#allocation2 + $0xf] sm:$0x1]  ;;  %v2091_v9 = vadd.f32 %v8589_v18, %v2090_v6 }
 0x32e   : > { %2441 = vst.msk [vmem:[#allocation2 + $0x11] sm:$0x1] %vm2404_vm15, %v2423_v38  ;;  %v2170_v4 = vmax.f32 %v2096_v57, 0.0 }
 0x32f   : > { %v8708_v40 = vld [vmem:[#allocation2 + $0x30] sm:$0xff]  ;;  %v2169_v26 = vmax.f32 %v2091_v9, 0.0 }
 0x330   : > { %v8706_v20 = vld [vmem:[#allocation2 + $0x8] sm:$0xff]  ;;  %v2386_v61 = vld [vmem:[#allocation2 + $0x2] sm:$0x1]  ;;  %2526 = vst.msk [vmem:[#allocation3 + $0x20] sm:$0xff] %vm336_vm0, %v8708_v40  ;;  %2288 = vrot.lane.b32.xlu1 %v2170_v4, %s7131_s18 }
 0x331   : > { %2523 = vst.msk [vmem:[#allocation3 + $0x8] sm:$0xff] %vm336_vm0, %v8706_v20  ;;  %v2426_v62 = vld [vmem:[#allocation2 + $0x57] sm:$0x1]  ;;  %2286 = vrot.lane.b32.xlu0 %v2169_v26, %s7131_s18 }
 0x332   : > { %2405 = vst.msk [vmem:[#allocation2] sm:$0x1] %vm2404_vm15, %v2386_v61  ;;  %2444 = vst.msk [vmem:[#allocation2 + $0x59] sm:$0x1] %vm2404_vm15, %v2426_v62  ;;  %v2389_v17 = vld [vmem:[#allocation2 + $0x4a] sm:$0x1]  ;;  %v2261_v41 = vpop.permute.xlu1 %2260 }
 0x333   : > { %v8718_v19 = vld [vmem:[#allocation2 + $0x50] sm:$0xff]  ;;  %2408 = vst.msk [vmem:[#allocation2 + $0x48] sm:$0x1] %vm2404_vm15, %v2389_v17  ;;  %v2259_v63 = vpop.permute.xlu0 %2258 }
 0x334   : > { %2529 = vst.msk [vmem:[#allocation3 + $0x38] sm:$0xff] %vm336_vm0, %v8718_v19 }
 0x335   : > { %2350 = vst.msk [vmem:[#allocation2 + $0x69] sm:$0xff] %vm2342_vm14, %v2261_v41  ;;  %2349 = vst.msk [vmem:[#allocation2 + $0x61] sm:$0xff] %vm2342_vm14, %v2259_v63  ;;  %v303_v63 = vld [vmem:[%s8575_s15 + $0xf8] sm:$0xff] }
 0x336   : > { %2213 = vst.msk [vmem:[#allocation2 + $0x189] sm:$0xff] %vm2181_vm13, %v303_v63 }
 0x339   : > { %v8729_v37 = vld [vmem:[#allocation2] sm:$0xff] }
 0x33a   : > { %2522 = vst.msk [vmem:[#allocation3] sm:$0xff] %vm336_vm0, %v8729_v37  ;;  %v8733_v22 = vld [vmem:[#allocation2 + $0x48] sm:$0xff] }
 0x33b   : > { %2528 = vst.msk [vmem:[#allocation3 + $0x30] sm:$0xff] %vm336_vm0, %v8733_v22  ;;  %v6879_v0 = vpop.f32.mrb[6].mxu1 }
 0x33c   : > { %v2427_v28 = vld [vmem:[#allocation2 + $0x6f] sm:$0x1]  ;;  %v2390_v2 = vld [vmem:[#allocation2 + $0x62] sm:$0x1]  ;;  %v2106_v46 = vadd.f32 %v6879_v0, %v8589_v18  ;;  %v2100_v3 = vpop.f32.mrb[7].mxu1 }
 0x33d   : > { %2445 = vst.msk [vmem:[#allocation2 + $0x71] sm:$0x1] %vm2404_vm15, %v2427_v28  ;;  %v8738_v11 = vld [vmem:[#allocation2 + $0x68] sm:$0xff]  ;;  %2409 = vst.msk [vmem:[#allocation2 + $0x60] sm:$0x1] %vm2404_vm15, %v2390_v2  ;;  %v2101_v59 = vadd.f32 %v8589_v18, %v2100_v3  ;;  %v302_v3 = vld [vmem:[%s8575_s15 + $0xf0] sm:$0xff] }
 0x33e   : > { %2531 = vst.msk [vmem:[#allocation3 + $0x48] sm:$0xff] %vm336_vm0, %v8738_v11  ;;  %v2172_v33 = vmax.f32 %v2106_v46, 0.0 }
 0x33f   : > { %v2171_v14 = vmax.f32 %v2101_v59, 0.0  ;;  %2212 = vst.msk [vmem:[#allocation2 + $0x181] sm:$0xff] %vm2181_vm13, %v302_v3 }
 0x340   : > { %2292 = vrot.lane.b32.xlu1 %v2172_v33, %s7131_s18 }
 0x341   : > { %2290 = vrot.lane.b32.xlu0 %v2171_v14, %s7131_s18  ;;  %v8823_v14 = vld [vmem:[#allocation2 + $0x10] sm:$0x3] }
 0x342   : > { %v2265_v27 = vpop.permute.xlu1 %2264 }
 0x343   : > { %2352 = vst.msk [vmem:[#allocation2 + $0x81] sm:$0xff] %vm2342_vm14, %v2265_v27  ;;  %v2263_v42 = vpop.permute.xlu0 %2262 }
 0x344   : > { %v8751_v12 = vld [vmem:[#allocation2 + $0x60] sm:$0xff]  ;;  %2351 = vst.msk [vmem:[#allocation2 + $0x79] sm:$0xff] %vm2342_vm14, %v2263_v42  ;;  %v2605_v42 = vrot.slane %v8823_v14, 1 }
 0x345   : > { %2530 = vst.msk [vmem:[#allocation3 + $0x40] sm:$0xff] %vm336_vm0, %v8751_v12 }
 0x34a   : > { %v2428_v58 = vld [vmem:[#allocation2 + $0x87] sm:$0x1] }
 0x34b   : > { %2446 = vst.msk [vmem:[#allocation2 + $0x89] sm:$0x1] %vm2404_vm15, %v2428_v58  ;;  %v2391_v48 = vld [vmem:[#allocation2 + $0x7a] sm:$0x1]  ;;  %v6882_v10 = vpop.f32.mrb[8].mxu1  ;;  %v8758_v25 = vld [vmem:[#allocation2 + $0x80] sm:$0xff] }
 0x34c   : > { %2410 = vst.msk [vmem:[#allocation2 + $0x78] sm:$0x1] %vm2404_vm15, %v2391_v48  ;;  %v2116_v13 = vadd.f32 %v6882_v10, %v8589_v18  ;;  %v2110_v15 = vpop.f32.mrb[9].mxu1  ;;  %v2602_v48 = vrot.slane %v8729_v37, 1  ;;  %v8830_v10 = vld [vmem:[#allocation2 + $0x28] sm:$0x3] }
 0x34d   : > { %2533 = vst.msk [vmem:[#allocation3 + $0x58] sm:$0xff] %vm336_vm0, %v8758_v25  ;;  %v2111_v50 = vadd.f32 %v8589_v18, %v2110_v15  ;;  %v2603_v15 = vrot.slane %v8706_v20, 1 }
 0x34e   : > { %v2174_v8 = vmax.f32 %v2116_v13, 0.0 }
 0x34f   : > { %v2173_v34 = vmax.f32 %v2111_v50, 0.0 }
 0x350   : > { %2296 = vrot.lane.b32.xlu1 %v2174_v8, %s7131_s18  ;;  %v2610_v8 = vrot.slane %v8830_v10, 1 }
 0x351   : > { %2294 = vrot.lane.b32.xlu0 %v2173_v34, %s7131_s18  ;;  %v2604_v34 = vsel %vm568_vm2, %v2602_v48, %v2603_v15 }
 0x352   : > { %v2269_v52 = vpop.permute.xlu1 %2268 }
 0x353   : > { %2354 = vst.msk [vmem:[#allocation2 + $0x99] sm:$0xff] %vm2342_vm14, %v2269_v52  ;;  %v2267_v16 = vpop.permute.xlu0 %2266  ;;  %v8771_v32 = vld [vmem:[#allocation2 + $0x78] sm:$0xff]  ;;  %v8845_v52 = vld [vmem:[#allocation2 + $0x40] sm:$0x3] }
 0x354   : > { %2353 = vst.msk [vmem:[#allocation2 + $0x91] sm:$0xff] %vm2342_vm14, %v2267_v16  ;;  %v8850_v16 = vsel %vm568_vm2, %v2608_v60, %v2610_v8  ;;  %v2627_v3 = vrot.slane %v8771_v32, 1 }
 0x355   : > { %2532 = vst.msk [vmem:[#allocation3 + $0x50] sm:$0xff] %vm336_vm0, %v8771_v32 }
 0x35a   : > { %v2429_v51 = vld [vmem:[#allocation2 + $0x9f] sm:$0x1] }
 0x35b   : > { %2447 = vst.msk [vmem:[#allocation2 + $0xa1] sm:$0x1] %vm2404_vm15, %v2429_v51  ;;  %v2392_v31 = vld [vmem:[#allocation2 + $0x92] sm:$0x1]  ;;  %v6885_v21 = vpop.f32.mrb[10].mxu1  ;;  %v8778_v29 = vld [vmem:[#allocation2 + $0x98] sm:$0xff] }
 0x35c   : > { %2411 = vst.msk [vmem:[#allocation2 + $0x90] sm:$0x1] %vm2404_vm15, %v2392_v31  ;;  %v2126_v54 = vadd.f32 %v6885_v21, %v8589_v18  ;;  %v2120_v23 = vpop.f32.mrb[11].mxu1  ;;  %v2615_v51 = vrot.slane %v8845_v52, 1  ;;  %v8856_v21 = vsel %vm568_vm2, %v2607_v7, %v2608_v60 }
 0x35d   : > { %2535 = vst.msk [vmem:[#allocation3 + $0x68] sm:$0xff] %vm336_vm0, %v8778_v29  ;;  %v2121_v30 = vadd.f32 %v8589_v18, %v2120_v23  ;;  %v8859_v23 = vld [vmem:[#allocation2 + $0x58] sm:$0x3] }
 0x35e   : > { %v2176_v53 = vmax.f32 %v2126_v54, 0.0  ;;  %v2612_v54 = vrot.slane %v8708_v40, 1 }
 0x35f   : > { %v2175_v49 = vmax.f32 %v2121_v30, 0.0 }
 0x360   : > { %2300 = vrot.lane.b32.xlu1 %v2176_v53, %s7131_s18  ;;  %v2613_v53 = vrot.slane %v8695_v35, 1 }
 0x361   : > { %2298 = vrot.lane.b32.xlu0 %v2175_v49, %s7131_s18 }
 0x362   : > { %v2273_v55 = vpop.permute.xlu1 %2272  ;;  %v8871_v39 = vsel %vm568_vm2, %v2613_v53, %v2615_v51  ;;  %v8877_v56 = vsel %vm568_vm2, %v2612_v54, %v2613_v53 }
 0x363   : > { %2356 = vst.msk [vmem:[#allocation2 + $0xb1] sm:$0xff] %vm2342_vm14, %v2273_v55  ;;  %v2271_v36 = vpop.permute.xlu0 %2270  ;;  %v8791_v24 = vld [vmem:[#allocation2 + $0x90] sm:$0xff]  ;;  %v2620_v55 = vrot.slane %v8859_v23, 1 }
 0x364   : > { %2355 = vst.msk [vmem:[#allocation2 + $0xa9] sm:$0xff] %vm2342_vm14, %v2271_v36  ;;  %v2617_v36 = vrot.slane %v8733_v22, 1 }
 0x365   : > { %2534 = vst.msk [vmem:[#allocation3 + $0x60] sm:$0xff] %vm336_vm0, %v8791_v24 }
 0x36a   : > { %v2430_v57 = vld [vmem:[#allocation2 + $0xb7] sm:$0x1] }
 0x36b   : > { %2448 = vst.msk [vmem:[#allocation2 + $0xb9] sm:$0x1] %vm2404_vm15, %v2430_v57  ;;  %v2393_v6 = vld [vmem:[#allocation2 + $0xaa] sm:$0x1]  ;;  %v6888_v38 = vpop.f32.mrb[12].mxu1  ;;  %v8798_v9 = vld [vmem:[#allocation2 + $0xb0] sm:$0xff] }
 0x36c   : > { %2412 = vst.msk [vmem:[#allocation2 + $0xa8] sm:$0x1] %vm2404_vm15, %v2393_v6  ;;  %v2136_v61 = vadd.f32 %v6888_v38, %v8589_v18  ;;  %v2130_v4 = vpop.f32.mrb[13].mxu1  ;;  %v8880_v57 = vld [vmem:[#allocation2 + $0x70] sm:$0x3]  ;;  %v2618_v6 = vrot.slane %v8718_v19, 1 }
 0x36d   : > { %2537 = vst.msk [vmem:[#allocation3 + $0x78] sm:$0xff] %vm336_vm0, %v8798_v9  ;;  %v2131_v26 = vadd.f32 %v8589_v18, %v2130_v4 }
 0x36e   : > { %v2178_v62 = vmax.f32 %v2136_v61, 0.0  ;;  %v8886_v38 = vsel %vm568_vm2, %v2618_v6, %v2620_v55  ;;  %v2625_v61 = vrot.slane %v8880_v57, 1 }
 0x36f   : > { %v2177_v17 = vmax.f32 %v2131_v26, 0.0  ;;  %v8892_v26 = vsel %vm568_vm2, %v2617_v36, %v2618_v6 }
 0x370   : > { %2304 = vrot.lane.b32.xlu1 %v2178_v62, %s7131_s18  ;;  %v2622_v62 = vrot.slane %v8751_v12, 1 }
 0x371   : > { %2302 = vrot.lane.b32.xlu0 %v2177_v17, %s7131_s18  ;;  %v8895_v17 = vld [vmem:[#allocation2 + $0x88] sm:$0x3] }
 0x372   : > { %v2277_v43 = vpop.permute.xlu1 %2276  ;;  %v8931_v48 = vld [vmem:[#allocation2 + $0xb8] sm:$0x3] }
 0x373   : > { %2358 = vst.msk [vmem:[#allocation2 + $0xc9] sm:$0xff] %vm2342_vm14, %v2277_v43  ;;  %v2275_v41 = vpop.permute.xlu0 %2274  ;;  %v8808_v44 = vld [vmem:[#allocation2 + $0xa8] sm:$0xff] }
 0x374   : > { %2357 = vst.msk [vmem:[#allocation2 + $0xc1] sm:$0xff] %vm2342_vm14, %v2275_v41  ;;  %v2623_v41 = vrot.slane %v8738_v11, 1  ;;  %v2637_v60 = vrot.slane %v8808_v44, 1 }
 0x375   : > { %2536 = vst.msk [vmem:[#allocation3 + $0x70] sm:$0xff] %vm336_vm0, %v8808_v44 }
 0x37a   : > { %v2431_v28 = vld [vmem:[#allocation2 + $0xcf] sm:$0x1] }
 0x37b   : > { %2449 = vst.msk [vmem:[#allocation2 + $0xd1] sm:$0x1] %vm2404_vm15, %v2431_v28  ;;  %v2394_v2 = vld [vmem:[#allocation2 + $0xc2] sm:$0x1]  ;;  %v8816_v0 = vld [vmem:[#allocation2 + $0xc8] sm:$0xff]  ;;  %v8907_v28 = vsel %vm568_vm2, %v2623_v41, %v2625_v61 }
 0x37c   : > { %2413 = vst.msk [vmem:[#allocation2 + $0xc0] sm:$0x1] %vm2404_vm15, %v2394_v2  ;;  %v2630_v2 = vrot.slane %v8895_v17, 1 }
 0x37d   : > { %2539 = vst.msk [vmem:[#allocation3 + $0x88] sm:$0xff] %vm336_vm0, %v8816_v0 }
 0x37e   : > { %v6891_v46 = vpop.f32.mrb[14].mxu1 }
 0x37f   : > { %v2146_v59 = vadd.f32 %v6891_v46, %v8589_v18  ;;  %v2140_v33 = vpop.f32.mrb[15].mxu1  ;;  %v8913_v46 = vsel %vm568_vm2, %v2622_v62, %v2623_v41 }
 0x380   : > { %v2141_v47 = vadd.f32 %v8589_v18, %v2140_v33  ;;  %v2606_v18 = vsel %vm568_vm2, %v2603_v15, %v2605_v42  ;;  %v2628_v33 = vrot.slane %v8758_v25, 1  ;;  %v2633_v15 = vrot.slane %v8778_v29, 1 }
 0x381   : > { %v2180_v27 = vmax.f32 %v2146_v59, 0.0  ;;  %v8916_v59 = vld [vmem:[#allocation2 + $0xa0] sm:$0x3] }
 0x382   : > { %v2179_v5 = vmax.f32 %v2141_v47, 0.0  ;;  %v2281_v58 = vpop.permute.xlu1 %2280  ;;  %v8922_v47 = vsel %vm568_vm2, %v2628_v33, %v2630_v2  ;;  %v8928_v42 = vsel %vm568_vm2, %v2627_v3, %v2628_v33  ;;  %v8952_v51 = vld [vmem:[#allocation2 + $0xd0] sm:$0x3] }
 0x383   : > { %2308 = vrot.lane.b32.xlu1 %v2180_v27, %s7131_s18  ;;  %2360 = vst.msk [vmem:[#allocation2 + $0xe1] sm:$0xff] %vm2342_vm14, %v2281_v58  ;;  %v2279_v13 = vpop.permute.xlu0 %2278  ;;  %v8835_v50 = vld [vmem:[#allocation2 + $0xc0] sm:$0xff]  ;;  %v2635_v27 = vrot.slane %v8916_v59, 1  ;;  %v2632_v58 = vrot.slane %v8791_v24, 1 }
 0x384   : > { %2306 = vrot.lane.b32.xlu0 %v2179_v5, %s7131_s18  ;;  %2359 = vst.msk [vmem:[#allocation2 + $0xd9] sm:$0xff] %vm2342_vm14, %v2279_v13  ;;  %v2642_v36 = vrot.slane %v8835_v50, 1 }
 0x385   : > { %2538 = vst.msk [vmem:[#allocation3 + $0x80] sm:$0xff] %vm336_vm0, %v8835_v50  ;;  %v8943_v8 = vsel %vm568_vm2, %v2633_v15, %v2635_v27  ;;  %v8949_v7 = vsel %vm568_vm2, %v2632_v58, %v2633_v15 }
 0x387   : > { %2684 = vrot.lane.b32.xlu1 %v2606_v18, %s7123_s28 }
 0x388   : > { %2682 = vrot.lane.b32.xlu0 %v2604_v34, %s7123_s28  ;;  %v2640_v34 = vrot.slane %v8931_v48, 1 }
 0x38a   : > { %v2432_v31 = vld [vmem:[#allocation2 + $0xe7] sm:$0x1] }
 0x38b   : > { %2688 = vrot.lane.b32.xlu1 %v8850_v16, %s7123_s28  ;;  %2450 = vst.msk [vmem:[#allocation2 + $0xe9] sm:$0x1] %vm2404_vm15, %v2432_v31  ;;  %v2395_v30 = vld [vmem:[#allocation2 + $0xda] sm:$0x1]  ;;  %v8865_v49 = vld [vmem:[#allocation2 + $0xe0] sm:$0xff]  ;;  %v2638_v31 = vrot.slane %v8798_v9, 1 }
 0x38c   : > { %2686 = vrot.lane.b32.xlu0 %v8856_v21, %s7123_s28  ;;  %2414 = vst.msk [vmem:[#allocation2 + $0xd8] sm:$0x1] %vm2404_vm15, %v2395_v30  ;;  %v2645_v30 = vrot.slane %v8952_v51, 1  ;;  %v2648_v27 = vrot.slane %v8865_v49, 1 }
 0x38d   : > { %2541 = vst.msk [vmem:[#allocation3 + $0x98] sm:$0xff] %vm336_vm0, %v8865_v49  ;;  %v8958_v54 = vsel %vm568_vm2, %v2638_v31, %v2640_v34  ;;  %v8964_v55 = vsel %vm568_vm2, %v2637_v60, %v2638_v31 }
 0x38f   : > { %2692 = vrot.lane.b32.xlu1 %v8871_v39, %s7123_s28 }
 0x390   : > { %2690 = vrot.lane.b32.xlu0 %v8877_v56, %s7123_s28 }
 0x392   : > { %v2285_v4 = vpop.permute.xlu1 %2284  ;;  %v2497_v6 = vld [vmem:[#allocation2 + $0xe8] sm:$0x3] }
 0x393   : > { %2696 = vrot.lane.b32.xlu1 %v8886_v38, %s7123_s28  ;;  %2362 = vst.msk [vmem:[#allocation2 + $0xf9] sm:$0xff] %vm2342_vm14, %v2285_v4  ;;  %v2283_v43 = vpop.permute.xlu0 %2282  ;;  %v8901_v63 = vld [vmem:[#allocation2 + $0xd8] sm:$0xff]  ;;  %v2643_v4 = vrot.slane %v8816_v0, 1  ;;  %v2650_v41 = vrot.slane %v2497_v6, 1 }
 0x394   : > { %2694 = vrot.lane.b32.xlu0 %v8892_v26, %s7123_s28  ;;  %2361 = vst.msk [vmem:[#allocation2 + $0xf1] sm:$0xff] %vm2342_vm14, %v2283_v43  ;;  %v2647_v3 = vrot.slane %v8901_v63, 1 }
 0x395   : > { %2540 = vst.msk [vmem:[#allocation3 + $0x90] sm:$0xff] %vm336_vm0, %v8901_v63  ;;  %v8977_v43 = vsel %vm568_vm2, %v2643_v4, %v2645_v30  ;;  %v8982_v2 = vsel %vm568_vm2, %v2642_v36, %v2643_v4 }
 0x396   : > { %v8994_v15 = vsel %vm568_vm2, %v2647_v3, %v2648_v27 }
 0x397   : > { %2700 = vrot.lane.b32.xlu1 %v8907_v28, %s7123_s28 }
 0x398   : > { %2698 = vrot.lane.b32.xlu0 %v8913_v46, %s7123_s28 }
 0x39a   : > { %v2433_v5 = vld [vmem:[#allocation2 + $0xff] sm:$0x1] }
 0x39b   : > { %2704 = vrot.lane.b32.xlu1 %v8922_v47, %s7123_s28  ;;  %2451 = vst.msk [vmem:[#allocation2 + $0x101] sm:$0x1] %vm2404_vm15, %v2433_v5  ;;  %v2396_v13 = vld [vmem:[#allocation2 + $0xf2] sm:$0x1]  ;;  %v8937_v18 = vld [vmem:[#allocation2 + $0xf8] sm:$0xff]  ;;  %v8989_v5 = vsel %vm568_vm2, %v2648_v27, %v2650_v41 }
 0x39c   : > { %2702 = vrot.lane.b32.xlu0 %v8928_v42, %s7123_s28  ;;  %2415 = vst.msk [vmem:[#allocation2 + $0xf0] sm:$0x1] %vm2404_vm15, %v2396_v13  ;;  %v2653_v31 = vrot.slane %v8937_v18, 1 }
 0x39d   : > { %2543 = vst.msk [vmem:[#allocation3 + $0xa8] sm:$0xff] %vm336_vm0, %v8937_v18 }
 0x39f   : > { %2708 = vrot.lane.b32.xlu1 %v8943_v8, %s7123_s28 }
 0x3a0   : > { %2706 = vrot.lane.b32.xlu0 %v8949_v7, %s7123_s28 }
 0x3a2   : > { %v2289_v53 = vpop.permute.xlu1 %2288  ;;  %v2500_v33 = vld [vmem:[#allocation2 + $0x100] sm:$0x3] }
 0x3a3   : > { %2712 = vrot.lane.b32.xlu1 %v8958_v54, %s7123_s28  ;;  %2364 = vst.msk [vmem:[#allocation2 + $0x111] sm:$0xff] %vm2342_vm14, %v2289_v53  ;;  %v2287_v61 = vpop.permute.xlu0 %2286  ;;  %v8971_v62 = vld [vmem:[#allocation2 + $0xf0] sm:$0xff]  ;;  %v2655_v58 = vrot.slane %v2500_v33, 1 }
 0x3a4   : > { %2710 = vrot.lane.b32.xlu0 %v8964_v55, %s7123_s28  ;;  %2363 = vst.msk [vmem:[#allocation2 + $0x109] sm:$0xff] %vm2342_vm14, %v2287_v61  ;;  %v2652_v34 = vrot.slane %v8971_v62, 1 }
 0x3a5   : > { %2542 = vst.msk [vmem:[#allocation3 + $0xa0] sm:$0xff] %vm336_vm0, %v8971_v62  ;;  %v9007_v53 = vsel %vm568_vm2, %v2653_v31, %v2655_v58 }
 0x3a6   : > { %v9012_v36 = vsel %vm568_vm2, %v2652_v34, %v2653_v31 }
 0x3a7   : > { %2716 = vrot.lane.b32.xlu1 %v8977_v43, %s7123_s28 }
 0x3a8   : > { %2714 = vrot.lane.b32.xlu0 %v8982_v2, %s7123_s28 }
 0x3aa   : > { %v2434_v13 = vld [vmem:[#allocation2 + $0x117] sm:$0x1] }
 0x3ab   : > { %2720 = vrot.lane.b32.xlu1 %v8989_v5, %s7123_s28  ;;  %2452 = vst.msk [vmem:[#allocation2 + $0x119] sm:$0x1] %vm2404_vm15, %v2434_v13  ;;  %v2397_v60 = vld [vmem:[#allocation2 + $0x10a] sm:$0x1]  ;;  %v9001_v30 = vld [vmem:[#allocation2 + $0x110] sm:$0xff] }
 0x3ac   : > { %2718 = vrot.lane.b32.xlu0 %v8994_v15, %s7123_s28  ;;  %12003 = vst [vmem:[#allocation6_spill] sm:$0xff] %v9001_v30  ;;  %2416 = vst.msk [vmem:[#allocation2 + $0x108] sm:$0x1] %vm2404_vm15, %v2397_v60  ;;  %v2658_v41 = vrot.slane %v9001_v30, 1 }
 0x3ad   : > { %2545 = vst.msk [vmem:[#allocation3 + $0xb8] sm:$0xff] %vm336_vm0, %v9001_v30 }
 0x3af   : > { %2724 = vrot.lane.b32.xlu1 %v9007_v53, %s7123_s28 }
 0x3b0   : > { %2722 = vrot.lane.b32.xlu0 %v9012_v36, %s7123_s28 }
 0x3b2   : > { %v2293_v6 = vpop.permute.xlu1 %2292  ;;  %v2503_v61 = vld [vmem:[#allocation2 + $0x118] sm:$0x3] }
 0x3b3   : > { %2366 = vst.msk [vmem:[#allocation2 + $0x129] sm:$0xff] %vm2342_vm14, %v2293_v6  ;;  %v2291_v4 = vpop.permute.xlu0 %2290  ;;  %v2660_v3 = vrot.slane %v2503_v61, 1  ;;  %v9018_v33 = vld [vmem:[#allocation2 + $0x108] sm:$0xff] }
 0x3b4   : > { %2365 = vst.msk [vmem:[#allocation2 + $0x121] sm:$0xff] %vm2342_vm14, %v2291_v4  ;;  %v2657_v27 = vrot.slane %v9018_v33, 1 }
 0x3b5   : > { %2544 = vst.msk [vmem:[#allocation3 + $0xb0] sm:$0xff] %vm336_vm0, %v9018_v33  ;;  %v9025_v58 = vsel %vm568_vm2, %v2658_v41, %v2660_v3 }
 0x3b6   : > { %12004 = vst [vmem:[#allocation7_spill] sm:$0xff] %v9025_v58  ;;  %2728 = vrot.lane.b32.xlu1 %v9025_v58, %s7123_s28  ;;  %v9030_v13 = vsel %vm568_vm2, %v2657_v27, %v2658_v41 }
 0x3b7   : > { %2726 = vrot.lane.b32.xlu0 %v9030_v13, %s7123_s28 }
 0x3ba   : > { %v2435_v34 = vld [vmem:[#allocation2 + $0x12f] sm:$0x1] }
 0x3bb   : > { %2453 = vst.msk [vmem:[#allocation2 + $0x131] sm:$0x1] %vm2404_vm15, %v2435_v34  ;;  %v2398_v60 = vld [vmem:[#allocation2 + $0x122] sm:$0x1]  ;;  %v9035_v31 = vld [vmem:[#allocation2 + $0x128] sm:$0xff] }
 0x3bc   : > { %12005 = vst [vmem:[#allocation8_spill] sm:$0xff] %v9035_v31  ;;  %2417 = vst.msk [vmem:[#allocation2 + $0x120] sm:$0x1] %vm2404_vm15, %v2398_v60  ;;  %v2663_v41 = vrot.slane %v9035_v31, 1 }
 0x3bd   : > { %2547 = vst.msk [vmem:[#allocation3 + $0xc8] sm:$0xff] %vm336_vm0, %v9035_v31 }
 0x3c2   : > { %v2297_v6 = vpop.permute.xlu1 %2296  ;;  %v2506_v61 = vld [vmem:[#allocation2 + $0x130] sm:$0x3] }
 0x3c3   : > { %2368 = vst.msk [vmem:[#allocation2 + $0x141] sm:$0xff] %vm2342_vm14, %v2297_v6  ;;  %v2295_v4 = vpop.permute.xlu0 %2294  ;;  %v2665_v3 = vrot.slane %v2506_v61, 1  ;;  %v9042_v27 = vld [vmem:[#allocation2 + $0x120] sm:$0xff] }
 0x3c4   : > { %12006 = vst [vmem:[#allocation9_spill] sm:$0xff] %v9042_v27  ;;  %2367 = vst.msk [vmem:[#allocation2 + $0x139] sm:$0xff] %vm2342_vm14, %v2295_v4  ;;  %v2662_v34 = vrot.slane %v9042_v27, 1 }
 0x3c5   : > { %2546 = vst.msk [vmem:[#allocation3 + $0xc0] sm:$0xff] %vm336_vm0, %v9042_v27  ;;  %v9049_v60 = vsel %vm568_vm2, %v2663_v41, %v2665_v3 }
 0x3c6   : > { %12007 = vst [vmem:[#allocation10_spill] sm:$0xff] %v9049_v60  ;;  %2732 = vrot.lane.b32.xlu1 %v9049_v60, %s7123_s28  ;;  %v9054_v6 = vsel %vm568_vm2, %v2662_v34, %v2663_v41 }
 0x3c7   : > { %12008 = vst [vmem:[#allocation14_spill] sm:$0xff] %v9054_v6  ;;  %2730 = vrot.lane.b32.xlu0 %v9054_v6, %s7123_s28 }
 0x3ca   : > { %v2436_v61 = vld [vmem:[#allocation2 + $0x147] sm:$0x1] }
 0x3cb   : > { %2454 = vst.msk [vmem:[#allocation2 + $0x149] sm:$0x1] %vm2404_vm15, %v2436_v61  ;;  %v2399_v4 = vld [vmem:[#allocation2 + $0x13a] sm:$0x1]  ;;  %v9059_v31 = vld [vmem:[#allocation2 + $0x140] sm:$0xff] }
 0x3cc   : > { %12009 = vst [vmem:[#allocation19_spill] sm:$0xff] %v9059_v31  ;;  %2418 = vst.msk [vmem:[#allocation2 + $0x138] sm:$0x1] %vm2404_vm15, %v2399_v4  ;;  %v2668_v34 = vrot.slane %v9059_v31, 1 }
 0x3cd   : > { %2549 = vst.msk [vmem:[#allocation3 + $0xd8] sm:$0xff] %vm336_vm0, %v9059_v31 }
 0x3d2   : > { %v2301_v3 = vpop.permute.xlu1 %2300  ;;  %v2509_v27 = vld [vmem:[#allocation2 + $0x148] sm:$0x3] }
 0x3d3   : > { %2370 = vst.msk [vmem:[#allocation2 + $0x159] sm:$0xff] %vm2342_vm14, %v2301_v3  ;;  %v2299_v41 = vpop.permute.xlu0 %2298  ;;  %v2670_v60 = vrot.slane %v2509_v27, 1  ;;  %v9066_v6 = vld [vmem:[#allocation2 + $0x138] sm:$0xff] }
 0x3d4   : > { %12010 = vst [vmem:[#allocation21_spill] sm:$0xff] %v9066_v6  ;;  %2369 = vst.msk [vmem:[#allocation2 + $0x151] sm:$0xff] %vm2342_vm14, %v2299_v41  ;;  %v2667_v61 = vrot.slane %v9066_v6, 1 }
 0x3d5   : > { %2548 = vst.msk [vmem:[#allocation3 + $0xd0] sm:$0xff] %vm336_vm0, %v9066_v6  ;;  %v9073_v4 = vsel %vm568_vm2, %v2668_v34, %v2670_v60 }
 0x3d6   : > { %12011 = vst [vmem:[#allocation22_spill] sm:$0xff] %v9073_v4  ;;  %2736 = vrot.lane.b32.xlu1 %v9073_v4, %s7123_s28  ;;  %v9078_v3 = vsel %vm568_vm2, %v2667_v61, %v2668_v34 }
 0x3d7   : > { %12012 = vst [vmem:[#allocation23_spill] sm:$0xff] %v9078_v3  ;;  %2734 = vrot.lane.b32.xlu0 %v9078_v3, %s7123_s28 }
 0x3da   : > { %v2437_v27 = vld [vmem:[#allocation2 + $0x15f] sm:$0x1] }
 0x3db   : > { %2455 = vst.msk [vmem:[#allocation2 + $0x161] sm:$0x1] %vm2404_vm15, %v2437_v27  ;;  %v2400_v41 = vld [vmem:[#allocation2 + $0x152] sm:$0x1]  ;;  %v9083_v31 = vld [vmem:[#allocation2 + $0x158] sm:$0xff] }
 0x3dc   : > { %12013 = vst [vmem:[#allocation24_spill] sm:$0xff] %v9083_v31  ;;  %2419 = vst.msk [vmem:[#allocation2 + $0x150] sm:$0x1] %vm2404_vm15, %v2400_v41  ;;  %v2673_v61 = vrot.slane %v9083_v31, 1 }
 0x3dd   : > { %2551 = vst.msk [vmem:[#allocation3 + $0xe8] sm:$0xff] %vm336_vm0, %v9083_v31 }
 0x3e2   : > { %v2305_v60 = vpop.permute.xlu1 %2304  ;;  %v2512_v6 = vld [vmem:[#allocation2 + $0x160] sm:$0x3] }
 0x3e3   : > { %2372 = vst.msk [vmem:[#allocation2 + $0x171] sm:$0xff] %vm2342_vm14, %v2305_v60  ;;  %v2303_v34 = vpop.permute.xlu0 %2302  ;;  %v2675_v4 = vrot.slane %v2512_v6, 1  ;;  %v9090_v3 = vld [vmem:[#allocation2 + $0x150] sm:$0xff] }
 0x3e4   : > { %12014 = vst [vmem:[#allocation25_spill] sm:$0xff] %v9090_v3  ;;  %2371 = vst.msk [vmem:[#allocation2 + $0x169] sm:$0xff] %vm2342_vm14, %v2303_v34  ;;  %v2672_v27 = vrot.slane %v9090_v3, 1 }
 0x3e5   : > { %2550 = vst.msk [vmem:[#allocation3 + $0xe0] sm:$0xff] %vm336_vm0, %v9090_v3  ;;  %v9097_v41 = vsel %vm568_vm2, %v2673_v61, %v2675_v4 }
 0x3e6   : > { %12015 = vst [vmem:[#allocation26_spill] sm:$0xff] %v9097_v41  ;;  %2740 = vrot.lane.b32.xlu1 %v9097_v41, %s7123_s28  ;;  %v9102_v60 = vsel %vm568_vm2, %v2672_v27, %v2673_v61 }
 0x3e7   : > { %12016 = vst [vmem:[#allocation27_spill] sm:$0xff] %v9102_v60  ;;  %2738 = vrot.lane.b32.xlu0 %v9102_v60, %s7123_s28 }
 0x3ea   : > { %v2382_v6 = vld [vmem:[#allocation2 + $0x171] sm:$0xff] }
 0x3eb   : > { %v2438_v31 = vld [vmem:[#allocation2 + $0x177] sm:$0x1]  ;;  %2385 = vst.msk [vmem:[#allocation2 + $0x1a1] sm:$0xff] %vm336_vm0, %v2382_v6  ;;  %v2381_v34 = vld [vmem:[#allocation2 + $0x169] sm:$0xff] }
 0x3ec   : > { %2456 = vst.msk [vmem:[#allocation2 + $0x179] sm:$0x1] %vm2404_vm15, %v2438_v31  ;;  %v2401_v3 = vld [vmem:[#allocation2 + $0x16a] sm:$0x1]  ;;  %v9108_v58 = vld [vmem:[#allocation2 + $0x170] sm:$0xff] }
 0x3ed   : > { %12017 = vst [vmem:[#allocation28_spill] sm:$0xff] %v9108_v58  ;;  %2420 = vst.msk [vmem:[#allocation2 + $0x168] sm:$0x1] %vm2404_vm15, %v2401_v3  ;;  %v2678_v27 = vrot.slane %v9108_v58, 1 }
 0x3ee   : > { %2384 = vst.msk [vmem:[#allocation2 + $0x199] sm:$0xff] %vm336_vm0, %v2381_v34  ;;  %2553 = vst.msk [vmem:[#allocation3 + $0xf8] sm:$0xff] %vm336_vm0, %v9108_v58  ;;  %v2810_v58 = vrot.slane %v8729_v37, 2  ;;  %v2815_v37 = vrot.slane %v8685_v1, 2 }
 0x3f2   : > { %v2440_v61 = vld [vmem:[#allocation2 + $0x1a7] sm:$0x1] }
 0x3f3   : > { %v2515_v4 = vld [vmem:[#allocation2 + $0x178] sm:$0x3]  ;;  %2458 = vst.msk [vmem:[#allocation2 + $0x1a9] sm:$0x1] %vm2404_vm15, %v2440_v61 }
 0x3f4   : > { %v2680_v41 = vrot.slane %v2515_v4, 1  ;;  %v9115_v60 = vld [vmem:[#allocation2 + $0x168] sm:$0xff]  ;;  %v2813_v4 = vrot.slane %v8823_v14, 2 }
 0x3f5   : > { %v2403_v31 = vld [vmem:[#allocation2 + $0x19a] sm:$0x1]  ;;  %v2309_v6 = vpop.permute.xlu1 %2308  ;;  %v2677_v30 = vrot.slane %v9115_v60, 1  ;;  %2552 = vst.msk [vmem:[#allocation3 + $0xf0] sm:$0xff] %vm336_vm0, %v9115_v60 }
 0x3f6   : > { %2422 = vst.msk [vmem:[#allocation2 + $0x198] sm:$0x1] %vm2404_vm15, %v2403_v31  ;;  %v2307_v3 = vpop.permute.xlu0 %2306  ;;  %v9124_v34 = vsel %vm568_vm2, %v2678_v27, %v2680_v41  ;;  %v2811_v31 = vrot.slane %v8706_v20, 2  ;;  %v2816_v20 = vrot.slane %v8674_v45, 2 }
 0x3f7   : > { %2374 = vst.msk [vmem:[#allocation2 + $0x189] sm:$0xff] %vm2342_vm14, %v2309_v6  ;;  %12018 = vst [vmem:[#allocation29_spill] sm:$0xff] %v9124_v34  ;;  %2744 = vrot.lane.b32.xlu1 %v9124_v34, %s7123_s28  ;;  %v9131_v61 = vsel %vm568_vm2, %v2677_v30, %v2678_v27 }
 0x3f8   : > { %2373 = vst.msk [vmem:[#allocation2 + $0x181] sm:$0xff] %vm2342_vm14, %v2307_v3  ;;  %2742 = vrot.lane.b32.xlu0 %v9131_v61, %s7123_s28  ;;  %v2814_v14 = vsel %vm778_vm3, %v2811_v31, %v2813_v4  ;;  %v2818_v3 = vrot.slane %v8830_v10, 2  ;;  %v2812_v30 = vsel %vm778_vm3, %v2810_v58, %v2811_v31  ;;  %v2817_v58 = vsel %vm778_vm3, %v2815_v37, %v2816_v20 }
 0x3f9   : > { %v2685_v6 = vpop.permute.xlu1 %2684  ;;  %v2820_v31 = vrot.slane %v8708_v40, 2 }
 0x3fa   : > { %2779 = vst.msk [vmem:[#allocation3 + $0x8] sm:$0xff] %vm745_vm4, %v2685_v6  ;;  %v2683_v41 = vpop.permute.xlu0 %2682  ;;  %v2819_v4 = vsel %vm778_vm3, %v2816_v20, %v2818_v3 }
 0x3fb   : > { %2778 = vst.msk [vmem:[#allocation3] sm:$0xff] %vm745_vm4, %v2683_v41  ;;  %2892 = vrot.lane.b32.xlu1 %v2814_v14, %s7124_s29  ;;  %v2821_v14 = vrot.slane %v8695_v35, 2 }
 0x3fc   : > { %2890 = vrot.lane.b32.xlu0 %v2812_v30, %s7124_s29 }
 0x3fd   : > { %v2689_v34 = vpop.permute.xlu1 %2688  ;;  %v9163_v3 = vsel %vm778_vm3, %v2820_v31, %v2821_v14  ;;  %v2461_v31 = vld [vmem:[%s11741_s4 + $0x10] sm:$0xff] }
 0x3fe   : > { %v2439_v27 = vld [vmem:[#allocation2 + $0x18f] sm:$0x1]  ;;  %2781 = vst.msk [vmem:[#allocation3 + $0x18] sm:$0xff] %vm745_vm4, %v2689_v34  ;;  %v2687_v10 = vpop.permute.xlu0 %2686 }
 0x3ff   : > { %2457 = vst.msk [vmem:[#allocation2 + $0x191] sm:$0x1] %vm2404_vm15, %v2439_v27  ;;  %v2402_v6 = vld [vmem:[#allocation2 + $0x182] sm:$0x1]  ;;  %2896 = vrot.lane.b32.xlu1 %v2819_v4, %s7124_s29 }
 0x400   : > { %2421 = vst.msk [vmem:[#allocation2 + $0x180] sm:$0x1] %vm2404_vm15, %v2402_v6  ;;  %2894 = vrot.lane.b32.xlu0 %v2817_v58, %s7124_s29  ;;  %v2459_v27 = vld [vmem:[%s11741_s4] sm:$0xff]  ;;  %v2460_v6 = vld [vmem:[%s11741_s4 + $0x8] sm:$0xff] }
 0x401   : > { %2780 = vst.msk [vmem:[#allocation3 + $0x10] sm:$0xff] %vm745_vm4, %v2687_v10  ;;  %v2693_v41 = vpop.permute.xlu1 %2692 }
 0x402   : > { %2783 = vst.msk [vmem:[#allocation3 + $0x28] sm:$0xff] %vm745_vm4, %v2693_v41  ;;  %v2691_v34 = vpop.permute.xlu0 %2690  ;;  %v2462_v41 = vld [vmem:[%s11741_s4 + $0x18] sm:$0xff] }
 0x403   : > { %2782 = vst.msk [vmem:[#allocation3 + $0x20] sm:$0xff] %vm745_vm4, %v2691_v34  ;;  %3020 = vrot.lane.b32.xlu1 %v8685_v1, %s7125_s30 }
 0x404   : > { %2898 = vrot.lane.b32.xlu0 %v9163_v3, %s7124_s29 }
 0x405   : > { %v2697_v30 = vpop.permute.xlu1 %2696 }
 0x406   : > { %2785 = vst.msk [vmem:[#allocation3 + $0x38] sm:$0xff] %vm745_vm4, %v2697_v30  ;;  %v2695_v37 = vpop.permute.xlu0 %2694  ;;  %v2463_v30 = vld [vmem:[%s11741_s4 + $0x20] sm:$0xff] }
 0x407   : > { %2784 = vst.msk [vmem:[#allocation3 + $0x30] sm:$0xff] %vm745_vm4, %v2695_v37  ;;  %3154 = vrot.lane.b32.xlu1 %v8856_v21, %s7126_s7  ;;  %v7040_v21 = vpack.c.bf16 %v2460_v6, %v2459_v27  ;;  %v2464_v37 = vld [vmem:[%s11741_s4 + $0x28] sm:$0xff]  ;;  %v2465_v27 = vld [vmem:[%s11741_s4 + $0x30] sm:$0xff]  ;;  %v2466_v6 = vld [vmem:[%s11741_s4 + $0x38] sm:$0xff] }
 0x408   : > { %3022 = vrot.lane.b32.xlu0 %v8674_v45, %s7125_s30 }
 0x409   : > { %v2701_v1 = vpop.permute.xlu1 %2700  ;;  %7041 = vmatprep.subr.bf16.mxu1 %v7040_v21 }
 0x40a   : > { %2787 = vst.msk [vmem:[#allocation3 + $0x48] sm:$0xff] %vm745_vm4, %v2701_v1  ;;  %v2699_v20 = vpop.permute.xlu0 %2698  ;;  %7043 = vmatpush3.bf16.msra.mxu1 %v7040_v21 }
 0x40b   : > { %2786 = vst.msk [vmem:[#allocation3 + $0x40] sm:$0xff] %vm745_vm4, %v2699_v20  ;;  %3287 = vrot.lane.b32.xlu1 %v2817_v58, %s7127_s8 }
 0x40c   : > { %3156 = vrot.lane.b32.xlu0 %v8850_v16, %s7126_s7  ;;  %v7044_v16 = vpack.c.bf16 %v2462_v41, %v2461_v31 }
 0x40d   : > { %v2705_v45 = vpop.permute.xlu1 %2704 }
 0x40e   : > { %2789 = vst.msk [vmem:[#allocation3 + $0x58] sm:$0xff] %vm745_vm4, %v2705_v45  ;;  %v2703_v10 = vpop.permute.xlu0 %2702  ;;  %7045 = vmatprep.subr.bf16.mxu1 %v7044_v16 }
 0x40f   : > { %2788 = vst.msk [vmem:[#allocation3 + $0x50] sm:$0xff] %vm745_vm4, %v2703_v10  ;;  %3417 = vrot.lane.b32.xlu1 %v8708_v40, %s7128_s22  ;;  %7047 = vmatpush3.bf16.msra.mxu1 %v7044_v16  ;;  %v2467_v10 = vld [vmem:[%s11741_s4 + $0x40] sm:$0xff]  ;;  %v2823_v16 = vrot.slane %v8845_v52, 2 }
 0x410   : > { %3289 = vrot.lane.b32.xlu0 %v2819_v4, %s7127_s8  ;;  %v7048_v4 = vpack.c.bf16 %v2464_v37, %v2463_v30 }
 0x411   : > { %v2709_v58 = vpop.permute.xlu1 %2708 }
 0x412   : > { %2791 = vst.msk [vmem:[#allocation3 + $0x68] sm:$0xff] %vm745_vm4, %v2709_v58  ;;  %v2707_v34 = vpop.permute.xlu0 %2706  ;;  %7049 = vmatprep.subr.bf16.mxu1 %v7048_v4 }
 0x413   : > { %2790 = vst.msk [vmem:[#allocation3 + $0x60] sm:$0xff] %vm745_vm4, %v2707_v34  ;;  %3419 = vrot.lane.b32.xlu1 %v8695_v35, %s7128_s22  ;;  %7051 = vmatpush3.bf16.msra.mxu1 %v7048_v4  ;;  %v2824_v34 = vsel %vm778_vm3, %v2821_v14, %v2823_v16  ;;  %v2826_v14 = vrot.slane %v8718_v19, 2  ;;  %v2831_v4 = vrot.slane %v8738_v11, 2 }
 0x414   : > { %3024 = vrot.lane.b32.xlu0 %v8708_v40, %s7125_s30  ;;  %v7052_v40 = vpack.c.bf16 %v2466_v6, %v2465_v27  ;;  %v2835_v27 = vrot.slane %v8771_v32, 2  ;;  %v2836_v6 = vrot.slane %v8758_v25, 2 }
 0x415   : > { %v2713_v1 = vpop.permute.xlu1 %2712 }
 0x416   : > { %2793 = vst.msk [vmem:[#allocation3 + $0x78] sm:$0xff] %vm745_vm4, %v2713_v1  ;;  %v2711_v20 = vpop.permute.xlu0 %2710  ;;  %7053 = vmatprep.subr.bf16.mxu1 %v7052_v40 }
 0x417   : > { %2792 = vst.msk [vmem:[#allocation3 + $0x70] sm:$0xff] %vm745_vm4, %v2711_v20  ;;  %3026 = vrot.lane.b32.xlu1 %v8695_v35, %s7125_s30  ;;  %7055 = vmatpush3.bf16.msra.mxu1 %v7052_v40  ;;  %v2825_v35 = vrot.slane %v8733_v22, 2  ;;  %v2833_v20 = vrot.slane %v8880_v57, 2 }
 0x418   : > { %3551 = vrot.lane.b32.xlu0 %v8877_v56, %s7129_s9  ;;  %6908 = vmatprep.subr.mxu1 %v2467_v10 }
 0x419   : > { %v2717_v21 = vpop.permute.xlu1 %2716 }
 0x41a   : > { %2795 = vst.msk [vmem:[#allocation3 + $0x88] sm:$0xff] %vm745_vm4, %v2717_v21  ;;  %v2715_v45 = vpop.permute.xlu0 %2714 }
 0x41b   : > { %2794 = vst.msk [vmem:[#allocation3 + $0x80] sm:$0xff] %vm745_vm4, %v2715_v45  ;;  %3553 = vrot.lane.b32.xlu1 %v8871_v39, %s7129_s9  ;;  %6909 = vmatpush3.msra.mxu1 %v2467_v10  ;;  %v2837_v45 = vsel %vm778_vm3, %v2835_v27, %v2836_v6 }
 0x41c   : > { %3158 = vrot.lane.b32.xlu0 %v8877_v56, %s7126_s7 }
 0x41d   : > { %v2721_v31 = vpop.permute.xlu1 %2720 }
 0x41e   : > { %2797 = vst.msk [vmem:[#allocation3 + $0x98] sm:$0xff] %vm745_vm4, %v2721_v31  ;;  %v2719_v41 = vpop.permute.xlu0 %2718 }
 0x41f   : > { %2796 = vst.msk [vmem:[#allocation3 + $0x90] sm:$0xff] %vm745_vm4, %v2719_v41  ;;  %3160 = vrot.lane.b32.xlu1 %v8871_v39, %s7126_s7 }
 0x420   : > { %3684 = vrot.lane.b32.xlu0 %v9163_v3, %s7130_s12 }
 0x421   : > { %v2725_v58 = vpop.permute.xlu1 %2724 }
 0x422   : > { %2799 = vst.msk [vmem:[#allocation3 + $0xa8] sm:$0xff] %vm745_vm4, %v2725_v58  ;;  %v2723_v56 = vpop.permute.xlu0 %2722 }
 0x423   : > { %2798 = vst.msk [vmem:[#allocation3 + $0xa0] sm:$0xff] %vm745_vm4, %v2723_v56  ;;  %3686 = vrot.lane.b32.xlu1 %v2824_v34, %s7130_s12 }
 0x424   : > { %3291 = vrot.lane.b32.xlu0 %v9163_v3, %s7127_s8  ;;  %v2827_v3 = vsel %vm778_vm3, %v2825_v35, %v2826_v14  ;;  %v2840_v35 = vrot.slane %v8791_v24, 2 }
 0x427   : > { %3421 = vrot.lane.b32.xlu1 %v8733_v22, %s7128_s22 }
 0x428   : > { %3293 = vrot.lane.b32.xlu0 %v2824_v34, %s7127_s8  ;;  %v2729_v52 = vpop.permute.xlu1 %2728 }
 0x429   : > { %2801 = vst.msk [vmem:[#allocation3 + $0xb8] sm:$0xff] %vm745_vm4, %v2729_v52  ;;  %v2727_v39 = vpop.permute.xlu0 %2726 }
 0x42a   : > { %2800 = vst.msk [vmem:[#allocation3 + $0xb0] sm:$0xff] %vm745_vm4, %v2727_v39 }
 0x42b   : > { %3028 = vrot.lane.b32.xlu1 %v8733_v22, %s7125_s30  ;;  %v2828_v22 = vrot.slane %v8859_v23, 2 }
 0x42c   : > { %2900 = vrot.lane.b32.xlu0 %v2824_v34, %s7124_s29 }
 0x42f   : > { %3555 = vrot.lane.b32.xlu1 %v8892_v26, %s7129_s9 }
 0x430   : > { %3423 = vrot.lane.b32.xlu0 %v8718_v19, %s7128_s22 }
 0x433   : > { %3162 = vrot.lane.b32.xlu1 %v8892_v26, %s7126_s7  ;;  %v2830_v26 = vrot.slane %v8751_v12, 2 }
 0x434   : > { %3030 = vrot.lane.b32.xlu0 %v8718_v19, %s7125_s30  ;;  %v2829_v19 = vsel %vm778_vm3, %v2826_v14, %v2828_v22  ;;  %v2841_v14 = vrot.slane %v8778_v29, 2 }
 0x435   : > { %v2832_v1 = vsel %vm778_vm3, %v2830_v26, %v2831_v4 }
 0x437   : > { %3688 = vrot.lane.b32.xlu1 %v2827_v3, %s7130_s12 }
 0x438   : > { %3557 = vrot.lane.b32.xlu0 %v8886_v38, %s7129_s9  ;;  %v2733_v30 = vpop.permute.xlu1 %2732 }
 0x439   : > { %2803 = vst.msk [vmem:[#allocation3 + $0xc8] sm:$0xff] %vm745_vm4, %v2733_v30  ;;  %v2731_v37 = vpop.permute.xlu0 %2730 }
 0x43a   : > { %2802 = vst.msk [vmem:[#allocation3 + $0xc0] sm:$0xff] %vm745_vm4, %v2731_v37  ;;  %v2842_v37 = vsel %vm778_vm3, %v2840_v35, %v2841_v14 }
 0x43b   : > { %3295 = vrot.lane.b32.xlu1 %v2827_v3, %s7127_s8 }
 0x43c   : > { %3164 = vrot.lane.b32.xlu0 %v8886_v38, %s7126_s7 }
 0x43f   : > { %2902 = vrot.lane.b32.xlu1 %v2827_v3, %s7124_s29 }
 0x440   : > { %3690 = vrot.lane.b32.xlu0 %v2829_v19, %s7130_s12 }
 0x443   : > { %3425 = vrot.lane.b32.xlu1 %v8751_v12, %s7128_s22 }
 0x444   : > { %3297 = vrot.lane.b32.xlu0 %v2829_v19, %s7127_s8 }
 0x447   : > { %3032 = vrot.lane.b32.xlu1 %v8751_v12, %s7125_s30 }
 0x448   : > { %2904 = vrot.lane.b32.xlu0 %v2829_v19, %s7124_s29  ;;  %v2737_v23 = vpop.permute.xlu1 %2736 }
 0x449   : > { %2805 = vst.msk [vmem:[#allocation3 + $0xd8] sm:$0xff] %vm745_vm4, %v2737_v23  ;;  %v2735_v38 = vpop.permute.xlu0 %2734 }
 0x44a   : > { %2804 = vst.msk [vmem:[#allocation3 + $0xd0] sm:$0xff] %vm745_vm4, %v2735_v38 }
 0x44b   : > { %3559 = vrot.lane.b32.xlu1 %v8913_v46, %s7129_s9 }
 0x44c   : > { %3427 = vrot.lane.b32.xlu0 %v8738_v11, %s7128_s22 }
 0x44f   : > { %3166 = vrot.lane.b32.xlu1 %v8913_v46, %s7126_s7 }
 0x450   : > { %3034 = vrot.lane.b32.xlu0 %v8738_v11, %s7125_s30  ;;  %v2834_v11 = vsel %vm778_vm3, %v2831_v4, %v2833_v20 }
 0x453   : > { %3692 = vrot.lane.b32.xlu1 %v2832_v1, %s7130_s12 }
 0x454   : > { %3561 = vrot.lane.b32.xlu0 %v8907_v28, %s7129_s9 }
 0x457   : > { %3299 = vrot.lane.b32.xlu1 %v2832_v1, %s7127_s8 }
 0x458   : > { %3168 = vrot.lane.b32.xlu0 %v8907_v28, %s7126_s7  ;;  %v2741_v12 = vpop.permute.xlu1 %2740 }
 0x459   : > { %2807 = vst.msk [vmem:[#allocation3 + $0xe8] sm:$0xff] %vm745_vm4, %v2741_v12  ;;  %v2739_v46 = vpop.permute.xlu0 %2738 }
 0x45a   : > { %2806 = vst.msk [vmem:[#allocation3 + $0xe0] sm:$0xff] %vm745_vm4, %v2739_v46 }
 0x45b   : > { %2906 = vrot.lane.b32.xlu1 %v2832_v1, %s7124_s29 }
 0x45c   : > { %3694 = vrot.lane.b32.xlu0 %v2834_v11, %s7130_s12 }
 0x45f   : > { %3429 = vrot.lane.b32.xlu1 %v8771_v32, %s7128_s22 }
 0x460   : > { %3301 = vrot.lane.b32.xlu0 %v2834_v11, %s7127_s8 }
 0x463   : > { %3036 = vrot.lane.b32.xlu1 %v8771_v32, %s7125_s30 }
 0x464   : > { %2908 = vrot.lane.b32.xlu0 %v2834_v11, %s7124_s29 }
 0x467   : > { %3563 = vrot.lane.b32.xlu1 %v8928_v42, %s7129_s9 }
 0x468   : > { %3431 = vrot.lane.b32.xlu0 %v8758_v25, %s7128_s22 }
 0x469   : > { %v2745_v57 = vpop.permute.xlu1 %2744 }
 0x46a   : > { %2809 = vst.msk [vmem:[#allocation3 + $0xf8] sm:$0xff] %vm745_vm4, %v2745_v57  ;;  %v2743_v28 = vpop.permute.xlu0 %2742  ;;  %v2845_v57 = vrot.slane %v8808_v44, 2 }
 0x46b   : > { %2808 = vst.msk [vmem:[#allocation3 + $0xf0] sm:$0xff] %vm745_vm4, %v2743_v28  ;;  %3170 = vrot.lane.b32.xlu1 %v8928_v42, %s7126_s7  ;;  %v2846_v28 = vrot.slane %v8798_v9, 2 }
 0x46c   : > { %3038 = vrot.lane.b32.xlu0 %v8758_v25, %s7125_s30  ;;  %v2838_v25 = vrot.slane %v8895_v17, 2 }
 0x46d   : > { %v2893_v40 = vpop.permute.xlu1 %2892 }
 0x46e   : > { %2987 = vst.msk [vmem:[#allocation3 + $0x8] sm:$0xff] %vm955_vm5, %v2893_v40  ;;  %v2891_v21 = vpop.permute.xlu0 %2890  ;;  %v2839_v41 = vsel %vm778_vm3, %v2836_v6, %v2838_v25  ;;  %v2847_v40 = vsel %vm778_vm3, %v2845_v57, %v2846_v28 }
 0x46f   : > { %2986 = vst.msk [vmem:[#allocation3] sm:$0xff] %vm955_vm5, %v2891_v21  ;;  %3696 = vrot.lane.b32.xlu1 %v2837_v45, %s7130_s12 }
 0x470   : > { %3565 = vrot.lane.b32.xlu0 %v8922_v47, %s7129_s9 }
 0x471   : > { %v2897_v32 = vpop.permute.xlu1 %2896 }
 0x472   : > { %2989 = vst.msk [vmem:[#allocation3 + $0x18] sm:$0xff] %vm955_vm5, %v2897_v32  ;;  %v2895_v42 = vpop.permute.xlu0 %2894 }
 0x473   : > { %2988 = vst.msk [vmem:[#allocation3 + $0x10] sm:$0xff] %vm955_vm5, %v2895_v42  ;;  %3303 = vrot.lane.b32.xlu1 %v2837_v45, %s7127_s8 }
 0x474   : > { %3172 = vrot.lane.b32.xlu0 %v8922_v47, %s7126_s7 }
 0x475   : > { %v3021_v10 = vpop.permute.xlu1 %3020 }
 0x476   : > { %3116 = vst.msk [vmem:[#allocation3] sm:$0xff] %vm1086_vm6, %v3021_v10  ;;  %v2899_v31 = vpop.permute.xlu0 %2898 }
 0x477   : > { %2990 = vst.msk [vmem:[#allocation3 + $0x20] sm:$0xff] %vm955_vm5, %v2899_v31  ;;  %2910 = vrot.lane.b32.xlu1 %v2837_v45, %s7124_s29 }
 0x478   : > { %3698 = vrot.lane.b32.xlu0 %v2839_v41, %s7130_s12 }
 0x479   : > { %v3155_v16 = vpop.permute.xlu1 %3154 }
 0x47a   : > { %3250 = vst.msk [vmem:[#allocation3] sm:$0xff] %vm1221_vm7, %v3155_v16  ;;  %v3023_v58 = vpop.permute.xlu0 %3022 }
 0x47b   : > { %3117 = vst.msk [vmem:[#allocation3 + $0x8] sm:$0xff] %vm1086_vm6, %v3023_v58  ;;  %3433 = vrot.lane.b32.xlu1 %v8791_v24, %s7128_s22 }
 0x47c   : > { %3305 = vrot.lane.b32.xlu0 %v2839_v41, %s7127_s8 }
 0x47d   : > { %v3288_v17 = vpop.permute.xlu1 %3287 }
 0x47e   : > { %3383 = vst.msk [vmem:[#allocation3] sm:$0xff] %vm1355_vm8, %v3288_v17  ;;  %v3157_v47 = vpop.permute.xlu0 %3156 }
 0x47f   : > { %3251 = vst.msk [vmem:[#allocation3 + $0x8] sm:$0xff] %vm1221_vm7, %v3157_v47  ;;  %3040 = vrot.lane.b32.xlu1 %v8791_v24, %s7125_s30  ;;  %v2850_v47 = vrot.slane %v8835_v50, 2 }
 0x480   : > { %2912 = vrot.lane.b32.xlu0 %v2839_v41, %s7124_s29 }
 0x481   : > { %v3418_v56 = vpop.permute.xlu1 %3417 }
 0x482   : > { %3513 = vst.msk [vmem:[#allocation3] sm:$0xff] %vm1486_vm9, %v3418_v56  ;;  %v3290_v34 = vpop.permute.xlu0 %3289  ;;  %v2851_v56 = vrot.slane %v8816_v0, 2 }
 0x483   : > { %3384 = vst.msk [vmem:[#allocation3 + $0x8] sm:$0xff] %vm1355_vm8, %v3290_v34  ;;  %3567 = vrot.lane.b32.xlu1 %v8949_v7, %s7129_s9 }
 0x484   : > { %3435 = vrot.lane.b32.xlu0 %v8778_v29, %s7128_s22 }
 0x485   : > { %v3420_v52 = vpop.permute.xlu1 %3419 }
 0x486   : > { %3514 = vst.msk [vmem:[#allocation3 + $0x8] sm:$0xff] %vm1486_vm9, %v3420_v52  ;;  %v3025_v39 = vpop.permute.xlu0 %3024 }
 0x487   : > { %3118 = vst.msk [vmem:[#allocation3 + $0x10] sm:$0xff] %vm1086_vm6, %v3025_v39  ;;  %3174 = vrot.lane.b32.xlu1 %v8949_v7, %s7126_s7  ;;  %v2852_v39 = vsel %vm778_vm3, %v2850_v47, %v2851_v56 }
 0x488   : > { %3042 = vrot.lane.b32.xlu0 %v8778_v29, %s7125_s30  ;;  %v2843_v29 = vrot.slane %v8916_v59, 2 }
 0x489   : > { %v3027_v3 = vpop.permute.xlu1 %3026 }
 0x48a   : > { %3119 = vst.msk [vmem:[#allocation3 + $0x18] sm:$0xff] %vm1086_vm6, %v3027_v3  ;;  %v3552_v30 = vpop.permute.xlu0 %3551  ;;  %v2844_v23 = vsel %vm778_vm3, %v2841_v14, %v2843_v29 }
 0x48b   : > { %3647 = vst.msk [vmem:[#allocation3] sm:$0xff] %vm1621_vm10, %v3552_v30  ;;  %3700 = vrot.lane.b32.xlu1 %v2842_v37, %s7130_s12 }
 0x48c   : > { %3569 = vrot.lane.b32.xlu0 %v8943_v8, %s7129_s9 }
 0x48d   : > { %v3554_v24 = vpop.permute.xlu1 %3553 }
 0x48e   : > { %3648 = vst.msk [vmem:[#allocation3 + $0x8] sm:$0xff] %vm1621_vm10, %v3554_v24  ;;  %v3159_v7 = vpop.permute.xlu0 %3158 }
 0x48f   : > { %3252 = vst.msk [vmem:[#allocation3 + $0x10] sm:$0xff] %vm1221_vm7, %v3159_v7  ;;  %3307 = vrot.lane.b32.xlu1 %v2842_v37, %s7127_s8 }
 0x490   : > { %3176 = vrot.lane.b32.xlu0 %v8943_v8, %s7126_s7 }
 0x491   : > { %v3161_v22 = vpop.permute.xlu1 %3160 }
 0x492   : > { %3253 = vst.msk [vmem:[#allocation3 + $0x18] sm:$0xff] %vm1221_vm7, %v3161_v22  ;;  %v3685_v19 = vpop.permute.xlu0 %3684 }
 0x493   : > { %3780 = vst.msk [vmem:[#allocation3] sm:$0xff] %vm1755_vm11, %v3685_v19  ;;  %2914 = vrot.lane.b32.xlu1 %v2842_v37, %s7124_s29 }
 0x494   : > { %3702 = vrot.lane.b32.xlu0 %v2844_v23, %s7130_s12 }
 0x495   : > { %v3687_v38 = vpop.permute.xlu1 %3686 }
 0x496   : > { %3781 = vst.msk [vmem:[#allocation3 + $0x8] sm:$0xff] %vm1755_vm11, %v3687_v38  ;;  %v3292_v26 = vpop.permute.xlu0 %3291  ;;  %v2855_v38 = vrot.slane %v8901_v63, 2 }
 0x497   : > { %3385 = vst.msk [vmem:[#allocation3 + $0x10] sm:$0xff] %vm1355_vm8, %v3292_v26  ;;  %3437 = vrot.lane.b32.xlu1 %v8808_v44, %s7128_s22  ;;  %v2856_v26 = vrot.slane %v8865_v49, 2 }
 0x498   : > { %3309 = vrot.lane.b32.xlu0 %v2844_v23, %s7127_s8 }
 0x499   : > { %v3422_v59 = vpop.permute.xlu1 %3421 }
 0x49a   : > { %3515 = vst.msk [vmem:[#allocation3 + $0x10] sm:$0xff] %vm1486_vm9, %v3422_v59  ;;  %v3294_v8 = vpop.permute.xlu0 %3293  ;;  %v3812_v4 = vld [vmem:[#allocation3] sm:$0xff] }
 0x49b   : > { %3386 = vst.msk [vmem:[#allocation3 + $0x18] sm:$0xff] %vm1355_vm8, %v3294_v8  ;;  %3044 = vrot.lane.b32.xlu1 %v8808_v44, %s7125_s30  ;;  %6910 = vmatprep.mubr.msk.f32.mxu1 %vm1827_vm12, %v3812_v4  ;;  %v2857_v4 = vsel %vm778_vm3, %v2855_v38, %v2856_v26 }
 0x49c   : > { %2916 = vrot.lane.b32.xlu0 %v2844_v23, %s7124_s29 }
 0x49d   : > { %v3029_v1 = vpop.permute.xlu1 %3028  ;;  %v3813_v20 = vld [vmem:[#allocation3 + $0x8] sm:$0xff] }
 0x49e   : > { %3120 = vst.msk [vmem:[#allocation3 + $0x20] sm:$0xff] %vm1086_vm6, %v3029_v1  ;;  %6911 = vmatmul.mubr.msk.f32.vlgmr.msra.gmra.mrb[16].mxu1 %vm1827_vm12, %v3813_v20  ;;  %v2901_v12 = vpop.permute.xlu0 %2900 }
 0x49f   : > { %2991 = vst.msk [vmem:[#allocation3 + $0x28] sm:$0xff] %vm955_vm5, %v2901_v12  ;;  %3571 = vrot.lane.b32.xlu1 %v8964_v55, %s7129_s9 }
 0x4a0   : > { %3439 = vrot.lane.b32.xlu0 %v8798_v9, %s7128_s22 }
 0x4a1   : > { %v3556_v46 = vpop.permute.xlu1 %3555 }
 0x4a2   : > { %3649 = vst.msk [vmem:[#allocation3 + $0x10] sm:$0xff] %vm1621_vm10, %v3556_v46  ;;  %v3424_v11 = vpop.permute.xlu0 %3423 }
 0x4a3   : > { %3516 = vst.msk [vmem:[#allocation3 + $0x18] sm:$0xff] %vm1486_vm9, %v3424_v11  ;;  %3178 = vrot.lane.b32.xlu1 %v8964_v55, %s7126_s7 }
 0x4a4   : > { %3046 = vrot.lane.b32.xlu0 %v8798_v9, %s7125_s30  ;;  %v2848_v9 = vrot.slane %v8931_v48, 2 }
 0x4a5   : > { %v3163_v27 = vpop.permute.xlu1 %3162 }
 0x4a6   : > { %3254 = vst.msk [vmem:[#allocation3 + $0x20] sm:$0xff] %vm1221_vm7, %v3163_v27  ;;  %v3031_v6 = vpop.permute.xlu0 %3030  ;;  %v2849_v32 = vsel %vm778_vm3, %v2846_v28, %v2848_v9 }
 0x4a7   : > { %3121 = vst.msk [vmem:[#allocation3 + $0x28] sm:$0xff] %vm1086_vm6, %v3031_v6  ;;  %3704 = vrot.lane.b32.xlu1 %v2847_v40, %s7130_s12 }
 0x4a8   : > { %3573 = vrot.lane.b32.xlu0 %v8958_v54, %s7129_s9 }
 0x4a9   : > { %v3689_v44 = vpop.permute.xlu1 %3688 }
 0x4aa   : > { %3782 = vst.msk [vmem:[#allocation3 + $0x10] sm:$0xff] %vm1755_vm11, %v3689_v44  ;;  %v3558_v55 = vpop.permute.xlu0 %3557 }
 0x4ab   : > { %3650 = vst.msk [vmem:[#allocation3 + $0x18] sm:$0xff] %vm1621_vm10, %v3558_v55  ;;  %3311 = vrot.lane.b32.xlu1 %v2847_v40, %s7127_s8 }
 0x4ac   : > { %3180 = vrot.lane.b32.xlu0 %v8958_v54, %s7126_s7 }
 0x4ad   : > { %v3296_v21 = vpop.permute.xlu1 %3295 }
 0x4ae   : > { %3387 = vst.msk [vmem:[#allocation3 + $0x20] sm:$0xff] %vm1355_vm8, %v3296_v21  ;;  %v3165_v45 = vpop.permute.xlu0 %3164  ;;  %v2860_v21 = vrot.slane %v8971_v62, 2 }
 0x4af   : > { %3255 = vst.msk [vmem:[#allocation3 + $0x28] sm:$0xff] %vm1221_vm7, %v3165_v45  ;;  %2918 = vrot.lane.b32.xlu1 %v2847_v40, %s7124_s29  ;;  %v2861_v45 = vrot.slane %v8937_v18, 2 }
 0x4b0   : > { %3706 = vrot.lane.b32.xlu0 %v2849_v32, %s7130_s12 }
 0x4b1   : > { %v2903_v42 = vpop.permute.xlu1 %2902  ;;  %v3814_v25 = vld [vmem:[#allocation3 + $0x10] sm:$0xff] }
 0x4b2   : > { %2992 = vst.msk [vmem:[#allocation3 + $0x30] sm:$0xff] %vm955_vm5, %v2903_v42  ;;  %v3691_v48 = vpop.permute.xlu0 %3690  ;;  %6913 = vmatprep.mubr.msk.f32.mxu1 %vm1827_vm12, %v3814_v25  ;;  %v2862_v25 = vsel %vm778_vm3, %v2860_v21, %v2861_v45 }
 0x4b3   : > { %3783 = vst.msk [vmem:[#allocation3 + $0x18] sm:$0xff] %vm1755_vm11, %v3691_v48  ;;  %3441 = vrot.lane.b32.xlu1 %v8835_v50, %s7128_s22 }
 0x4b4   : > { %3313 = vrot.lane.b32.xlu0 %v2849_v32, %s7127_s8 }
 0x4b5   : > { %v3426_v54 = vpop.permute.xlu1 %3425 }
 0x4b6   : > { %3517 = vst.msk [vmem:[#allocation3 + $0x20] sm:$0xff] %vm1486_vm9, %v3426_v54  ;;  %v3298_v10 = vpop.permute.xlu0 %3297 }
 0x4b7   : > { %3388 = vst.msk [vmem:[#allocation3 + $0x28] sm:$0xff] %vm1355_vm8, %v3298_v10  ;;  %3048 = vrot.lane.b32.xlu1 %v8835_v50, %s7125_s30 }
 0x4b8   : > { %2920 = vrot.lane.b32.xlu0 %v2849_v32, %s7124_s29 }
 0x4b9   : > { %v3033_v31 = vpop.permute.xlu1 %3032 }
 0x4ba   : > { %3122 = vst.msk [vmem:[#allocation3 + $0x30] sm:$0xff] %vm1086_vm6, %v3033_v31  ;;  %v2905_v41 = vpop.permute.xlu0 %2904  ;;  %v3815_v16 = vld [vmem:[#allocation3 + $0x18] sm:$0xff] }
 0x4bb   : > { %2993 = vst.msk [vmem:[#allocation3 + $0x38] sm:$0xff] %vm955_vm5, %v2905_v41  ;;  %3575 = vrot.lane.b32.xlu1 %v8982_v2, %s7129_s9  ;;  %6914 = vmatmul.mubr.msk.f32.gmra.mrb[18].mxu1 %vm1827_vm12, %v3815_v16 }
 0x4bc   : > { %3443 = vrot.lane.b32.xlu0 %v8816_v0, %s7128_s22 }
 0x4bd   : > { %v3560_v58 = vpop.permute.xlu1 %3559 }
 0x4be   : > { %3651 = vst.msk [vmem:[#allocation3 + $0x20] sm:$0xff] %vm1621_vm10, %v3560_v58  ;;  %v3428_v17 = vpop.permute.xlu0 %3427 }
 0x4bf   : > { %3518 = vst.msk [vmem:[#allocation3 + $0x28] sm:$0xff] %vm1486_vm9, %v3428_v17  ;;  %3182 = vrot.lane.b32.xlu1 %v8982_v2, %s7126_s7 }
 0x4c0   : > { %3050 = vrot.lane.b32.xlu0 %v8816_v0, %s7125_s30  ;;  %v2853_v0 = vrot.slane %v8952_v51, 2 }
 0x4c1   : > { %v3167_v34 = vpop.permute.xlu1 %3166 }
 0x4c2   : > { %3256 = vst.msk [vmem:[#allocation3 + $0x30] sm:$0xff] %vm1221_vm7, %v3167_v34  ;;  %v3035_v52 = vpop.permute.xlu0 %3034  ;;  %v2854_v3 = vsel %vm778_vm3, %v2851_v56, %v2853_v0 }
 0x4c3   : > { %3123 = vst.msk [vmem:[#allocation3 + $0x38] sm:$0xff] %vm1086_vm6, %v3035_v52  ;;  %3708 = vrot.lane.b32.xlu1 %v2852_v39, %s7130_s12  ;;  %v12019_v52 = vld [vmem:[#allocation6_spill] sm:$0xff] }
 0x4c4   : > { %3577 = vrot.lane.b32.xlu0 %v8977_v43, %s7129_s9  ;;  %v2866_v0 = vrot.slane %v12019_v52, 2 }
 0x4c5   : > { %v3693_v50 = vpop.permute.xlu1 %3692 }
 0x4c6   : > { %3784 = vst.msk [vmem:[#allocation3 + $0x20] sm:$0xff] %vm1755_vm11, %v3693_v50  ;;  %v3562_v2 = vpop.permute.xlu0 %3561 }
 0x4c7   : > { %3652 = vst.msk [vmem:[#allocation3 + $0x28] sm:$0xff] %vm1621_vm10, %v3562_v2  ;;  %3315 = vrot.lane.b32.xlu1 %v2852_v39, %s7127_s8  ;;  %v2865_v2 = vrot.slane %v9018_v33, 2 }
 0x4c8   : > { %3184 = vrot.lane.b32.xlu0 %v8977_v43, %s7126_s7 }
 0x4c9   : > { %v3300_v35 = vpop.permute.xlu1 %3299 }
 0x4ca   : > { %3389 = vst.msk [vmem:[#allocation3 + $0x30] sm:$0xff] %vm1355_vm8, %v3300_v35  ;;  %v3169_v14 = vpop.permute.xlu0 %3168 }
 0x4cb   : > { %3257 = vst.msk [vmem:[#allocation3 + $0x38] sm:$0xff] %vm1221_vm7, %v3169_v14  ;;  %2922 = vrot.lane.b32.xlu1 %v2852_v39, %s7124_s29 }
 0x4cc   : > { %3710 = vrot.lane.b32.xlu0 %v2854_v3, %s7130_s12 }
 0x4cd   : > { %v2907_v30 = vpop.permute.xlu1 %2906  ;;  %v3816_v37 = vld [vmem:[#allocation3 + $0x20] sm:$0xff] }
 0x4ce   : > { %2994 = vst.msk [vmem:[#allocation3 + $0x40] sm:$0xff] %vm955_vm5, %v2907_v30  ;;  %v3695_v51 = vpop.permute.xlu0 %3694  ;;  %6916 = vmatprep.mubr.msk.f32.mxu1 %vm1827_vm12, %v3816_v37  ;;  %v7108_v37 = vld [vmem:[#allocation2 + $0x118] sm:$0x3] }
 0x4cf   : > { %3785 = vst.msk [vmem:[#allocation3 + $0x28] sm:$0xff] %vm1755_vm11, %v3695_v51  ;;  %3445 = vrot.lane.b32.xlu1 %v8901_v63, %s7128_s22  ;;  %v2868_v51 = vrot.slane %v7108_v37, 2 }
 0x4d0   : > { %3317 = vrot.lane.b32.xlu0 %v2854_v3, %s7127_s8 }
 0x4d1   : > { %v3430_v43 = vpop.permute.xlu1 %3429 }
 0x4d2   : > { %3519 = vst.msk [vmem:[#allocation3 + $0x30] sm:$0xff] %vm1486_vm9, %v3430_v43  ;;  %v3302_v24 = vpop.permute.xlu0 %3301 }
 0x4d3   : > { %3390 = vst.msk [vmem:[#allocation3 + $0x38] sm:$0xff] %vm1355_vm8, %v3302_v24  ;;  %3052 = vrot.lane.b32.xlu1 %v8901_v63, %s7125_s30 }
 0x4d4   : > { %2924 = vrot.lane.b32.xlu0 %v2854_v3, %s7124_s29  ;;  %v2867_v3 = vsel %vm778_vm3, %v2865_v2, %v2866_v0 }
 0x4d5   : > { %v3037_v7 = vpop.permute.xlu1 %3036 }
 0x4d6   : > { %3124 = vst.msk [vmem:[#allocation3 + $0x40] sm:$0xff] %vm1086_vm6, %v3037_v7  ;;  %v2909_v29 = vpop.permute.xlu0 %2908  ;;  %v3817_v22 = vld [vmem:[#allocation3 + $0x28] sm:$0xff]  ;;  %v2869_v7 = vsel %vm778_vm3, %v2866_v0, %v2868_v51 }
 0x4d7   : > { %2995 = vst.msk [vmem:[#allocation3 + $0x48] sm:$0xff] %vm955_vm5, %v2909_v29  ;;  %3579 = vrot.lane.b32.xlu1 %v8994_v15, %s7129_s9  ;;  %6917 = vmatmul.mubr.msk.f32.gmra.mrb[20].mxu1 %vm1827_vm12, %v3817_v22 }
 0x4d8   : > { %3447 = vrot.lane.b32.xlu0 %v8865_v49, %s7128_s22 }
 0x4d9   : > { %v3564_v19 = vpop.permute.xlu1 %3563 }
 0x4da   : > { %3653 = vst.msk [vmem:[#allocation3 + $0x30] sm:$0xff] %vm1621_vm10, %v3564_v19  ;;  %v3432_v23 = vpop.permute.xlu0 %3431 }
 0x4db   : > { %3520 = vst.msk [vmem:[#allocation3 + $0x38] sm:$0xff] %vm1486_vm9, %v3432_v23  ;;  %3186 = vrot.lane.b32.xlu1 %v8994_v15, %s7126_s7  ;;  %v12021_v23 = vld [vmem:[#allocation9_spill] sm:$0xff] }
 0x4dc   : > { %3054 = vrot.lane.b32.xlu0 %v8865_v49, %s7125_s30  ;;  %v7106_v49 = vld [vmem:[#allocation2 + $0xe8] sm:$0x3] }
 0x4dd   : > { %v3171_v59 = vpop.permute.xlu1 %3170  ;;  %v2858_v1 = vrot.slane %v7106_v49, 2 }
 0x4de   : > { %3258 = vst.msk [vmem:[#allocation3 + $0x40] sm:$0xff] %vm1221_vm7, %v3171_v59  ;;  %v3039_v8 = vpop.permute.xlu0 %3038 }
 0x4df   : > { %3125 = vst.msk [vmem:[#allocation3 + $0x48] sm:$0xff] %vm1086_vm6, %v3039_v8  ;;  %3712 = vrot.lane.b32.xlu1 %v2857_v4, %s7130_s12  ;;  %v2859_v46 = vsel %vm778_vm3, %v2856_v26, %v2858_v1 }
 0x4e0   : > { %3581 = vrot.lane.b32.xlu0 %v8989_v5, %s7129_s9 }
 0x4e1   : > { %v3697_v63 = vpop.permute.xlu1 %3696 }
 0x4e2   : > { %3786 = vst.msk [vmem:[#allocation3 + $0x30] sm:$0xff] %vm1755_vm11, %v3697_v63  ;;  %v3566_v15 = vpop.permute.xlu0 %3565  ;;  %v12022_v63 = vld [vmem:[#allocation14_spill] sm:$0xff] }
 0x4e3   : > { %3654 = vst.msk [vmem:[#allocation3 + $0x38] sm:$0xff] %vm1621_vm10, %v3566_v15  ;;  %3319 = vrot.lane.b32.xlu1 %v2857_v4, %s7127_s8  ;;  %v12023_v15 = vld [vmem:[#allocation8_spill] sm:$0xff] }
 0x4e4   : > { %3188 = vrot.lane.b32.xlu0 %v8989_v5, %s7126_s7 }
 0x4e5   : > { %v3304_v20 = vpop.permute.xlu1 %3303 }
 0x4e6   : > { %3391 = vst.msk [vmem:[#allocation3 + $0x40] sm:$0xff] %vm1355_vm8, %v3304_v20  ;;  %v3173_v12 = vpop.permute.xlu0 %3172  ;;  %v2870_v20 = vrot.slane %v12021_v23, 2 }
 0x4e7   : > { %3259 = vst.msk [vmem:[#allocation3 + $0x48] sm:$0xff] %vm1221_vm7, %v3173_v12  ;;  %2926 = vrot.lane.b32.xlu1 %v2857_v4, %s7124_s29  ;;  %v2871_v12 = vrot.slane %v12023_v15, 2 }
 0x4e8   : > { %3714 = vrot.lane.b32.xlu0 %v2859_v46, %s7130_s12 }
 0x4e9   : > { %v2911_v11 = vpop.permute.xlu1 %2910  ;;  %v3818_v57 = vld [vmem:[#allocation3 + $0x30] sm:$0xff] }
 0x4ea   : > { %2996 = vst.msk [vmem:[#allocation3 + $0x50] sm:$0xff] %vm955_vm5, %v2911_v11  ;;  %v3699_v28 = vpop.permute.xlu0 %3698  ;;  %6919 = vmatprep.mubr.msk.f32.mxu1 %vm1827_vm12, %v3818_v57  ;;  %v2872_v57 = vsel %vm778_vm3, %v2870_v20, %v2871_v12 }
 0x4eb   : > { %3787 = vst.msk [vmem:[#allocation3 + $0x38] sm:$0xff] %vm1755_vm11, %v3699_v28  ;;  %3449 = vrot.lane.b32.xlu1 %v8971_v62, %s7128_s22  ;;  %v12024_v28 = vld [vmem:[#allocation10_spill] sm:$0xff] }
 0x4ec   : > { %3321 = vrot.lane.b32.xlu0 %v2859_v46, %s7127_s8 }
 0x4ed   : > { %v3434_v5 = vpop.permute.xlu1 %3433 }
 0x4ee   : > { %3521 = vst.msk [vmem:[#allocation3 + $0x40] sm:$0xff] %vm1486_vm9, %v3434_v5  ;;  %v3306_v27 = vpop.permute.xlu0 %3305 }
 0x4ef   : > { %3392 = vst.msk [vmem:[#allocation3 + $0x48] sm:$0xff] %vm1355_vm8, %v3306_v27  ;;  %3056 = vrot.lane.b32.xlu1 %v8971_v62, %s7125_s30 }
 0x4f0   : > { %2928 = vrot.lane.b32.xlu0 %v2859_v46, %s7124_s29 }
 0x4f1   : > { %v3041_v6 = vpop.permute.xlu1 %3040 }
 0x4f2   : > { %3126 = vst.msk [vmem:[#allocation3 + $0x50] sm:$0xff] %vm1086_vm6, %v3041_v6  ;;  %v2913_v40 = vpop.permute.xlu0 %2912  ;;  %v3819_v44 = vld [vmem:[#allocation3 + $0x38] sm:$0xff]  ;;  %v7109_v6 = vld [vmem:[#allocation2 + $0x130] sm:$0x3] }
 0x4f3   : > { %2997 = vst.msk [vmem:[#allocation3 + $0x58] sm:$0xff] %vm955_vm5, %v2913_v40  ;;  %3583 = vrot.lane.b32.xlu1 %v9012_v36, %s7129_s9  ;;  %6920 = vmatmul.mubr.msk.f32.gmra.mrb[22].mxu1 %vm1827_vm12, %v3819_v44  ;;  %v2873_v40 = vrot.slane %v7109_v6, 2 }
 0x4f4   : > { %3451 = vrot.lane.b32.xlu0 %v8937_v18, %s7128_s22 }
 0x4f5   : > { %v3568_v55 = vpop.permute.xlu1 %3567 }
 0x4f6   : > { %3655 = vst.msk [vmem:[#allocation3 + $0x40] sm:$0xff] %vm1621_vm10, %v3568_v55  ;;  %v3436_v9 = vpop.permute.xlu0 %3435 }
 0x4f7   : > { %3522 = vst.msk [vmem:[#allocation3 + $0x48] sm:$0xff] %vm1486_vm9, %v3436_v9  ;;  %3190 = vrot.lane.b32.xlu1 %v9012_v36, %s7126_s7  ;;  %v2874_v9 = vsel %vm778_vm3, %v2871_v12, %v2873_v40 }
 0x4f8   : > { %3058 = vrot.lane.b32.xlu0 %v8937_v18, %s7125_s30  ;;  %v7107_v18 = vld [vmem:[#allocation2 + $0x100] sm:$0x3] }
 0x4f9   : > { %v3175_v32 = vpop.permute.xlu1 %3174  ;;  %v2863_v48 = vrot.slane %v7107_v18, 2 }
 0x4fa   : > { %3260 = vst.msk [vmem:[#allocation3 + $0x50] sm:$0xff] %vm1221_vm7, %v3175_v32  ;;  %v3043_v42 = vpop.permute.xlu0 %3042 }
 0x4fb   : > { %3127 = vst.msk [vmem:[#allocation3 + $0x58] sm:$0xff] %vm1086_vm6, %v3043_v42  ;;  %3716 = vrot.lane.b32.xlu1 %v2862_v25, %s7130_s12  ;;  %v2864_v31 = vsel %vm778_vm3, %v2861_v45, %v2863_v48  ;;  %v12025_v42 = vld [vmem:[#allocation21_spill] sm:$0xff] }
 0x4fc   : > { %3585 = vrot.lane.b32.xlu0 %v9007_v53, %s7129_s9 }
 0x4fd   : > { %v3701_v62 = vpop.permute.xlu1 %3700 }
 0x4fe   : > { %3788 = vst.msk [vmem:[#allocation3 + $0x40] sm:$0xff] %vm1755_vm11, %v3701_v62  ;;  %v3570_v36 = vpop.permute.xlu0 %3569 }
 0x4ff   : > { %3656 = vst.msk [vmem:[#allocation3 + $0x48] sm:$0xff] %vm1621_vm10, %v3570_v36  ;;  %3323 = vrot.lane.b32.xlu1 %v2862_v25, %s7127_s8 }
 0x500   : > { %3192 = vrot.lane.b32.xlu0 %v9007_v53, %s7126_s7 }
 0x501   : > { %v3308_v54 = vpop.permute.xlu1 %3307 }
 0x502   : > { %3393 = vst.msk [vmem:[#allocation3 + $0x50] sm:$0xff] %vm1355_vm8, %v3308_v54  ;;  %v3177_v10 = vpop.permute.xlu0 %3176  ;;  %v12026_v54 = vld [vmem:[#allocation23_spill] sm:$0xff] }
 0x503   : > { %3261 = vst.msk [vmem:[#allocation3 + $0x58] sm:$0xff] %vm1221_vm7, %v3177_v10  ;;  %2930 = vrot.lane.b32.xlu1 %v2862_v25, %s7124_s29  ;;  %v12027_v10 = vld [vmem:[#allocation19_spill] sm:$0xff] }
 0x504   : > { %3718 = vrot.lane.b32.xlu0 %v2864_v31, %s7130_s12 }
 0x505   : > { %v2915_v41 = vpop.permute.xlu1 %2914  ;;  %v3820_v16 = vld [vmem:[#allocation3 + $0x40] sm:$0xff] }
 0x506   : > { %2998 = vst.msk [vmem:[#allocation3 + $0x60] sm:$0xff] %vm955_vm5, %v2915_v41  ;;  %v3703_v58 = vpop.permute.xlu0 %3702  ;;  %6922 = vmatprep.mubr.msk.f32.mxu1 %vm1827_vm12, %v3820_v16  ;;  %v2875_v16 = vrot.slane %v12025_v42, 2 }
 0x507   : > { %3789 = vst.msk [vmem:[#allocation3 + $0x48] sm:$0xff] %vm1755_vm11, %v3703_v58  ;;  %3453 = vrot.lane.b32.xlu1 %v9018_v33, %s7128_s22  ;;  %v2876_v58 = vrot.slane %v12027_v10, 2 }
 0x508   : > { %3325 = vrot.lane.b32.xlu0 %v2864_v31, %s7127_s8 }
 0x509   : > { %v3438_v53 = vpop.permute.xlu1 %3437 }
 0x50a   : > { %3523 = vst.msk [vmem:[#allocation3 + $0x50] sm:$0xff] %vm1486_vm9, %v3438_v53  ;;  %v3310_v17 = vpop.permute.xlu0 %3309 }
 0x50b   : > { %3394 = vst.msk [vmem:[#allocation3 + $0x58] sm:$0xff] %vm1355_vm8, %v3310_v17  ;;  %3060 = vrot.lane.b32.xlu1 %v9018_v33, %s7125_s30  ;;  %v12020_v33 = vld [vmem:[#allocation7_spill] sm:$0xff] }
 0x50c   : > { %2932 = vrot.lane.b32.xlu0 %v2864_v31, %s7124_s29 }
 0x50d   : > { %v3045_v47 = vpop.permute.xlu1 %3044 }
 0x50e   : > { %3128 = vst.msk [vmem:[#allocation3 + $0x60] sm:$0xff] %vm1086_vm6, %v3045_v47  ;;  %v2917_v56 = vpop.permute.xlu0 %2916  ;;  %v3821_v34 = vld [vmem:[#allocation3 + $0x48] sm:$0xff]  ;;  %v2877_v47 = vsel %vm778_vm3, %v2875_v16, %v2876_v58 }
 0x50f   : > { %2999 = vst.msk [vmem:[#allocation3 + $0x68] sm:$0xff] %vm955_vm5, %v2917_v56  ;;  %3587 = vrot.lane.b32.xlu1 %v9030_v13, %s7129_s9  ;;  %6923 = vmatmul.mubr.msk.f32.gmra.mrb[24].mxu1 %vm1827_vm12, %v3821_v34  ;;  %v12028_v56 = vld [vmem:[#allocation22_spill] sm:$0xff] }
 0x510   : > { %3455 = vrot.lane.b32.xlu0 %v12019_v52, %s7128_s22 }
 0x511   : > { %v3572_v39 = vpop.permute.xlu1 %3571 }
 0x512   : > { %3657 = vst.msk [vmem:[#allocation3 + $0x50] sm:$0xff] %vm1621_vm10, %v3572_v39  ;;  %v3440_v50 = vpop.permute.xlu0 %3439  ;;  %v7110_v39 = vld [vmem:[#allocation2 + $0x148] sm:$0x3] }
 0x513   : > { %3524 = vst.msk [vmem:[#allocation3 + $0x58] sm:$0xff] %vm1486_vm9, %v3440_v50  ;;  %3194 = vrot.lane.b32.xlu1 %v9030_v13, %s7126_s7  ;;  %v2878_v50 = vrot.slane %v7110_v39, 2 }
 0x514   : > { %3062 = vrot.lane.b32.xlu0 %v12019_v52, %s7125_s30 }
 0x515   : > { %v3179_v35 = vpop.permute.xlu1 %3178 }
 0x516   : > { %3262 = vst.msk [vmem:[#allocation3 + $0x60] sm:$0xff] %vm1221_vm7, %v3179_v35  ;;  %v3047_v14 = vpop.permute.xlu0 %3046  ;;  %v2879_v35 = vsel %vm778_vm3, %v2876_v58, %v2878_v50 }
 0x517   : > { %3129 = vst.msk [vmem:[#allocation3 + $0x68] sm:$0xff] %vm1086_vm6, %v3047_v14  ;;  %3720 = vrot.lane.b32.xlu1 %v2867_v3, %s7130_s12 }
 0x518   : > { %3589 = vrot.lane.b32.xlu0 %v12020_v33, %s7129_s9 }
 0x519   : > { %v3705_v30 = vpop.permute.xlu1 %3704 }
 0x51a   : > { %3790 = vst.msk [vmem:[#allocation3 + $0x50] sm:$0xff] %vm1755_vm11, %v3705_v30  ;;  %v3574_v13 = vpop.permute.xlu0 %3573  ;;  %v12029_v30 = vld [vmem:[#allocation25_spill] sm:$0xff] }
 0x51b   : > { %3658 = vst.msk [vmem:[#allocation3 + $0x58] sm:$0xff] %vm1621_vm10, %v3574_v13  ;;  %3327 = vrot.lane.b32.xlu1 %v2867_v3, %s7127_s8 }
 0x51c   : > { %3196 = vrot.lane.b32.xlu0 %v12020_v33, %s7126_s7 }
 0x51d   : > { %v3312_v43 = vpop.permute.xlu1 %3311 }
 0x51e   : > { %3395 = vst.msk [vmem:[#allocation3 + $0x60] sm:$0xff] %vm1355_vm8, %v3312_v43  ;;  %v3181_v24 = vpop.permute.xlu0 %3180 }
 0x51f   : > { %3263 = vst.msk [vmem:[#allocation3 + $0x68] sm:$0xff] %vm1221_vm7, %v3181_v24  ;;  %2934 = vrot.lane.b32.xlu1 %v2867_v3, %s7124_s29 }
 0x520   : > { %3722 = vrot.lane.b32.xlu0 %v2869_v7, %s7130_s12 }
 0x521   : > { %v2919_v29 = vpop.permute.xlu1 %2918  ;;  %v3822_v22 = vld [vmem:[#allocation3 + $0x50] sm:$0xff] }
 0x522   : > { %3000 = vst.msk [vmem:[#allocation3 + $0x70] sm:$0xff] %vm955_vm5, %v2919_v29  ;;  %v3707_v19 = vpop.permute.xlu0 %3706  ;;  %6925 = vmatprep.mubr.msk.f32.mxu1 %vm1827_vm12, %v3822_v22  ;;  %v12031_v29 = vld [vmem:[#allocation24_spill] sm:$0xff] }
 0x523   : > { %3791 = vst.msk [vmem:[#allocation3 + $0x58] sm:$0xff] %vm1755_vm11, %v3707_v19  ;;  %3457 = vrot.lane.b32.xlu1 %v12021_v23, %s7128_s22 }
 0x524   : > { %3329 = vrot.lane.b32.xlu0 %v2869_v7, %s7127_s8 }
 0x525   : > { %v3442_v38 = vpop.permute.xlu1 %3441 }
 0x526   : > { %3525 = vst.msk [vmem:[#allocation3 + $0x60] sm:$0xff] %vm1486_vm9, %v3442_v38  ;;  %v3314_v26 = vpop.permute.xlu0 %3313  ;;  %v2881_v38 = vrot.slane %v12031_v29, 2 }
 0x527   : > { %3396 = vst.msk [vmem:[#allocation3 + $0x68] sm:$0xff] %vm1355_vm8, %v3314_v26  ;;  %3064 = vrot.lane.b32.xlu1 %v12021_v23, %s7125_s30  ;;  %v2880_v23 = vrot.slane %v12029_v30, 2 }
 0x528   : > { %2936 = vrot.lane.b32.xlu0 %v2869_v7, %s7124_s29  ;;  %v12030_v7 = vld [vmem:[#allocation27_spill] sm:$0xff] }
 0x529   : > { %v3049_v59 = vpop.permute.xlu1 %3048 }
 0x52a   : > { %3130 = vst.msk [vmem:[#allocation3 + $0x70] sm:$0xff] %vm1086_vm6, %v3049_v59  ;;  %v2921_v8 = vpop.permute.xlu0 %2920  ;;  %v3823_v4 = vld [vmem:[#allocation3 + $0x58] sm:$0xff] }
 0x52b   : > { %3001 = vst.msk [vmem:[#allocation3 + $0x78] sm:$0xff] %vm955_vm5, %v2921_v8  ;;  %3591 = vrot.lane.b32.xlu1 %v12022_v63, %s7129_s9  ;;  %6926 = vmatmul.mubr.msk.f32.gmra.mrb[26].mxu1 %vm1827_vm12, %v3823_v4  ;;  %v2882_v8 = vsel %vm778_vm3, %v2880_v23, %v2881_v38  ;;  %v12032_v4 = vld [vmem:[#allocation26_spill] sm:$0xff] }
 0x52c   : > { %3459 = vrot.lane.b32.xlu0 %v12023_v15, %s7128_s22 }
 0x52d   : > { %v3576_v49 = vpop.permute.xlu1 %3575 }
 0x52e   : > { %3659 = vst.msk [vmem:[#allocation3 + $0x60] sm:$0xff] %vm1621_vm10, %v3576_v49  ;;  %v3444_v1 = vpop.permute.xlu0 %3443  ;;  %v7111_v49 = vld [vmem:[#allocation2 + $0x160] sm:$0x3] }
 0x52f   : > { %3526 = vst.msk [vmem:[#allocation3 + $0x68] sm:$0xff] %vm1486_vm9, %v3444_v1  ;;  %3198 = vrot.lane.b32.xlu1 %v12022_v63, %s7126_s7  ;;  %v2883_v1 = vrot.slane %v7111_v49, 2 }
 0x530   : > { %3066 = vrot.lane.b32.xlu0 %v12023_v15, %s7125_s30 }
 0x531   : > { %v3183_v46 = vpop.permute.xlu1 %3182 }
 0x532   : > { %3264 = vst.msk [vmem:[#allocation3 + $0x70] sm:$0xff] %vm1221_vm7, %v3183_v46  ;;  %v3051_v11 = vpop.permute.xlu0 %3050 }
 0x533   : > { %3131 = vst.msk [vmem:[#allocation3 + $0x78] sm:$0xff] %vm1086_vm6, %v3051_v11  ;;  %3724 = vrot.lane.b32.xlu1 %v2872_v57, %s7130_s12 }
 0x534   : > { %3593 = vrot.lane.b32.xlu0 %v12024_v28, %s7129_s9 }
 0x535   : > { %v3709_v5 = vpop.permute.xlu1 %3708 }
 0x536   : > { %3792 = vst.msk [vmem:[#allocation3 + $0x60] sm:$0xff] %vm1755_vm11, %v3709_v5  ;;  %v3578_v27 = vpop.permute.xlu0 %3577  ;;  %v2884_v5 = vsel %vm778_vm3, %v2881_v38, %v2883_v1 }
 0x537   : > { %3660 = vst.msk [vmem:[#allocation3 + $0x68] sm:$0xff] %vm1621_vm10, %v3578_v27  ;;  %3331 = vrot.lane.b32.xlu1 %v2872_v57, %s7127_s8 }
 0x538   : > { %3200 = vrot.lane.b32.xlu0 %v12024_v28, %s7126_s7 }
 0x539   : > { %v3316_v44 = vpop.permute.xlu1 %3315 }
 0x53a   : > { %3397 = vst.msk [vmem:[#allocation3 + $0x70] sm:$0xff] %vm1355_vm8, %v3316_v44  ;;  %v3185_v55 = vpop.permute.xlu0 %3184 }
 0x53b   : > { %3265 = vst.msk [vmem:[#allocation3 + $0x78] sm:$0xff] %vm1221_vm7, %v3185_v55  ;;  %2938 = vrot.lane.b32.xlu1 %v2872_v57, %s7124_s29 }
 0x53c   : > { %3726 = vrot.lane.b32.xlu0 %v2874_v9, %s7130_s12 }
 0x53d   : > { %v2923_v21 = vpop.permute.xlu1 %2922  ;;  %v3824_v45 = vld [vmem:[#allocation3 + $0x60] sm:$0xff] }
 0x53e   : > { %3002 = vst.msk [vmem:[#allocation3 + $0x80] sm:$0xff] %vm955_vm5, %v2923_v21  ;;  %v3711_v32 = vpop.permute.xlu0 %3710  ;;  %6928 = vmatprep.mubr.msk.f32.mxu1 %vm1827_vm12, %v3824_v45 }
 0x53f   : > { %3793 = vst.msk [vmem:[#allocation3 + $0x68] sm:$0xff] %vm1755_vm11, %v3711_v32  ;;  %3461 = vrot.lane.b32.xlu1 %v12025_v42, %s7128_s22 }
 0x540   : > { %3333 = vrot.lane.b32.xlu0 %v2874_v9, %s7127_s8 }
 0x541   : > { %v3446_v25 = vpop.permute.xlu1 %3445 }
 0x542   : > { %3527 = vst.msk [vmem:[#allocation3 + $0x70] sm:$0xff] %vm1486_vm9, %v3446_v25  ;;  %v3318_v62 = vpop.permute.xlu0 %3317 }
 0x543   : > { %3398 = vst.msk [vmem:[#allocation3 + $0x78] sm:$0xff] %vm1355_vm8, %v3318_v62  ;;  %3068 = vrot.lane.b32.xlu1 %v12025_v42, %s7125_s30  ;;  %v12033_v42 = vld [vmem:[#allocation28_spill] sm:$0xff] }
 0x544   : > { %2940 = vrot.lane.b32.xlu0 %v2874_v9, %s7124_s29 }
 0x545   : > { %v3053_v36 = vpop.permute.xlu1 %3052 }
 0x546   : > { %3132 = vst.msk [vmem:[#allocation3 + $0x80] sm:$0xff] %vm1086_vm6, %v3053_v36  ;;  %v2925_v18 = vpop.permute.xlu0 %2924  ;;  %v3825_v48 = vld [vmem:[#allocation3 + $0x68] sm:$0xff]  ;;  %v2885_v36 = vrot.slane %v9115_v60, 2 }
 0x547   : > { %3003 = vst.msk [vmem:[#allocation3 + $0x88] sm:$0xff] %vm955_vm5, %v2925_v18  ;;  %3595 = vrot.lane.b32.xlu1 %v12026_v54, %s7129_s9  ;;  %6929 = vmatmul.mubr.msk.f32.gmra.mrb[28].mxu1 %vm1827_vm12, %v3825_v48  ;;  %v2886_v18 = vrot.slane %v12033_v42, 2 }
 0x548   : > { %3463 = vrot.lane.b32.xlu0 %v12027_v10, %s7128_s22 }
 0x549   : > { %v3580_v31 = vpop.permute.xlu1 %3579 }
 0x54a   : > { %3661 = vst.msk [vmem:[#allocation3 + $0x70] sm:$0xff] %vm1621_vm10, %v3580_v31  ;;  %v3448_v41 = vpop.permute.xlu0 %3447 }
 0x54b   : > { %3528 = vst.msk [vmem:[#allocation3 + $0x78] sm:$0xff] %vm1486_vm9, %v3448_v41  ;;  %3202 = vrot.lane.b32.xlu1 %v12026_v54, %s7126_s7  ;;  %v7112_v41 = vld [vmem:[#allocation2 + $0x178] sm:$0x3] }
 0x54c   : > { %3070 = vrot.lane.b32.xlu0 %v12027_v10, %s7125_s30  ;;  %v2887_v10 = vsel %vm778_vm3, %v2885_v36, %v2886_v18  ;;  %v2888_v16 = vrot.slane %v7112_v41, 2 }
 0x54d   : > { %v3187_v53 = vpop.permute.xlu1 %3186 }
 0x54e   : > { %3266 = vst.msk [vmem:[#allocation3 + $0x80] sm:$0xff] %vm1221_vm7, %v3187_v53  ;;  %v3055_v17 = vpop.permute.xlu0 %3054 }
 0x54f   : > { %3133 = vst.msk [vmem:[#allocation3 + $0x88] sm:$0xff] %vm1086_vm6, %v3055_v17  ;;  %3728 = vrot.lane.b32.xlu1 %v2877_v47, %s7130_s12 }
 0x550   : > { %3597 = vrot.lane.b32.xlu0 %v12028_v56, %s7129_s9 }
 0x551   : > { %v3713_v34 = vpop.permute.xlu1 %3712 }
 0x552   : > { %3794 = vst.msk [vmem:[#allocation3 + $0x70] sm:$0xff] %vm1755_vm11, %v3713_v34  ;;  %v3582_v52 = vpop.permute.xlu0 %3581 }
 0x553   : > { %3662 = vst.msk [vmem:[#allocation3 + $0x78] sm:$0xff] %vm1621_vm10, %v3582_v52  ;;  %3335 = vrot.lane.b32.xlu1 %v2877_v47, %s7127_s8 }
 0x554   : > { %3204 = vrot.lane.b32.xlu0 %v12028_v56, %s7126_s7  ;;  %v2889_v56 = vsel %vm778_vm3, %v2886_v18, %v2888_v16 }
 0x555   : > { %v3320_v2 = vpop.permute.xlu1 %3319 }
 0x556   : > { %3399 = vst.msk [vmem:[#allocation3 + $0x80] sm:$0xff] %vm1355_vm8, %v3320_v2  ;;  %v3189_v0 = vpop.permute.xlu0 %3188 }
 0x557   : > { %3267 = vst.msk [vmem:[#allocation3 + $0x88] sm:$0xff] %vm1221_vm7, %v3189_v0  ;;  %2942 = vrot.lane.b32.xlu1 %v2877_v47, %s7124_s29 }
 0x558   : > { %3730 = vrot.lane.b32.xlu0 %v2879_v35, %s7130_s12 }
 0x559   : > { %v2927_v14 = vpop.permute.xlu1 %2926  ;;  %v3826_v3 = vld [vmem:[#allocation3 + $0x70] sm:$0xff] }
 0x55a   : > { %3004 = vst.msk [vmem:[#allocation3 + $0x90] sm:$0xff] %vm955_vm5, %v2927_v14  ;;  %v3715_v33 = vpop.permute.xlu0 %3714  ;;  %6931 = vmatprep.mubr.msk.f32.mxu1 %vm1827_vm12, %v3826_v3  ;;  %v2517_v14 = vld [vmem:[#allocation2 + $0x188] sm:$0xff] }
 0x55b   : > { %3795 = vst.msk [vmem:[#allocation3 + $0x78] sm:$0xff] %vm1755_vm11, %v3715_v33  ;;  %3465 = vrot.lane.b32.xlu1 %v12029_v30, %s7128_s22  ;;  %v3283_v38 = vrot.slane %v2517_v14, 2 }
 0x55c   : > { %3337 = vrot.lane.b32.xlu0 %v2879_v35, %s7127_s8 }
 0x55d   : > { %v3450_v13 = vpop.permute.xlu1 %3449 }
 0x55e   : > { %3529 = vst.msk [vmem:[#allocation3 + $0x80] sm:$0xff] %vm1486_vm9, %v3450_v13  ;;  %v3322_v37 = vpop.permute.xlu0 %3321 }
 0x55f   : > { %3400 = vst.msk [vmem:[#allocation3 + $0x88] sm:$0xff] %vm1355_vm8, %v3322_v37  ;;  %3072 = vrot.lane.b32.xlu1 %v12029_v30, %s7125_s30  ;;  %v3150_v37 = vrot.slane %v2517_v14, 1 }
 0x560   : > { %2944 = vrot.lane.b32.xlu0 %v2879_v35, %s7124_s29  ;;  %v2516_v35 = vld [vmem:[#allocation2 + $0x180] sm:$0xff] }
 0x561   : > { %v3057_v51 = vpop.permute.xlu1 %3056  ;;  %v3149_v13 = vrot.slane %v2516_v35, 1  ;;  %v3282_v23 = vrot.slane %v2516_v35, 2 }
 0x562   : > { %3134 = vst.msk [vmem:[#allocation3 + $0x90] sm:$0xff] %vm1086_vm6, %v3057_v51  ;;  %v2929_v43 = vpop.permute.xlu0 %2928  ;;  %v3827_v24 = vld [vmem:[#allocation3 + $0x78] sm:$0xff] }
 0x563   : > { %3005 = vst.msk [vmem:[#allocation3 + $0x98] sm:$0xff] %vm955_vm5, %v2929_v43  ;;  %3599 = vrot.lane.b32.xlu1 %v12030_v7, %s7129_s9  ;;  %6932 = vmatmul.mubr.msk.f32.gmra.mrb[30].mxu1 %vm1827_vm12, %v3827_v24  ;;  %v3151_v24 = vsel %vm568_vm2, %v3149_v13, %v3150_v37 }
 0x564   : > { %3467 = vrot.lane.b32.xlu0 %v12031_v29, %s7128_s22 }
 0x565   : > { %v3584_v22 = vpop.permute.xlu1 %3583 }
 0x566   : > { %3663 = vst.msk [vmem:[#allocation3 + $0x80] sm:$0xff] %vm1621_vm10, %v3584_v22  ;;  %v3452_v19 = vpop.permute.xlu0 %3451 }
 0x567   : > { %3530 = vst.msk [vmem:[#allocation3 + $0x88] sm:$0xff] %vm1486_vm9, %v3452_v19  ;;  %3206 = vrot.lane.b32.xlu1 %v12030_v7, %s7126_s7 }
 0x568   : > { %3074 = vrot.lane.b32.xlu0 %v12031_v29, %s7125_s30  ;;  %v2518_v29 = vld [vmem:[#allocation2 + $0x190] sm:$0x3] }
 0x569   : > { %v3191_v26 = vpop.permute.xlu1 %3190  ;;  %v3285_v1 = vrot.slane %v2518_v29, 2 }
 0x56a   : > { %3268 = vst.msk [vmem:[#allocation3 + $0x90] sm:$0xff] %vm1221_vm7, %v3191_v26  ;;  %v3059_v59 = vpop.permute.xlu0 %3058  ;;  %v3152_v26 = vrot.slane %v2518_v29, 1 }
 0x56b   : > { %3135 = vst.msk [vmem:[#allocation3 + $0x98] sm:$0xff] %vm1086_vm6, %v3059_v59  ;;  %3732 = vrot.lane.b32.xlu1 %v2882_v8, %s7130_s12 }
 0x56c   : > { %3601 = vrot.lane.b32.xlu0 %v12032_v4, %s7129_s9 }
 0x56d   : > { %v3717_v63 = vpop.permute.xlu1 %3716 }
 0x56e   : > { %3796 = vst.msk [vmem:[#allocation3 + $0x80] sm:$0xff] %vm1755_vm11, %v3717_v63  ;;  %v3586_v15 = vpop.permute.xlu0 %3585  ;;  %v3153_v63 = vsel %vm568_vm2, %v3150_v37, %v3152_v26 }
 0x56f   : > { %3664 = vst.msk [vmem:[#allocation3 + $0x88] sm:$0xff] %vm1621_vm10, %v3586_v15  ;;  %3339 = vrot.lane.b32.xlu1 %v2882_v8, %s7127_s8 }
 0x570   : > { %3208 = vrot.lane.b32.xlu0 %v12032_v4, %s7126_s7  ;;  %v3284_v4 = vsel %vm778_vm3, %v3282_v23, %v3283_v38 }
 0x571   : > { %v3324_v20 = vpop.permute.xlu1 %3323  ;;  %v9714_v12 = vpop.f32.mrb[16].mxu1 }
 0x572   : > { %3401 = vst.msk [vmem:[#allocation3 + $0x90] sm:$0xff] %vm1355_vm8, %v3324_v20  ;;  %v4166_v46 = vsel %vm336_vm0, %v9714_v12, 0.0  ;;  %v9719_v11 = vpop.f32.mrb[17].mxu1  ;;  %v3193_v57 = vpop.permute.xlu0 %3192 }
 0x573   : > { %v4165_v28 = vsel %vm336_vm0, %v9719_v11, 0.0  ;;  %3269 = vst.msk [vmem:[#allocation3 + $0x98] sm:$0xff] %vm1221_vm7, %v3193_v57  ;;  %2946 = vrot.lane.b32.xlu1 %v2882_v8, %s7124_s29 }
 0x574   : > { %v4167_v27 = vadd.f32 %v4166_v46, %v4165_v28  ;;  %3734 = vrot.lane.b32.xlu0 %v2884_v5, %s7130_s12  ;;  %v3286_v28 = vsel %vm778_vm3, %v3283_v38, %v3285_v1 }
 0x575   : > { %v2931_v6 = vpop.permute.xlu1 %2930  ;;  %v3828_v40 = vld [vmem:[#allocation3 + $0x80] sm:$0xff] }
 0x576   : > { %3006 = vst.msk [vmem:[#allocation3 + $0xa0] sm:$0xff] %vm955_vm5, %v2931_v6  ;;  %v3719_v44 = vpop.permute.xlu0 %3718  ;;  %6934 = vmatprep.mubr.msk.f32.mxu1 %vm1827_vm12, %v3828_v40  ;;  %v2519_v40 = vld [vmem:[#allocation2 + $0x198] sm:$0xff] }
 0x577   : > { %3797 = vst.msk [vmem:[#allocation3 + $0x88] sm:$0xff] %vm1755_vm11, %v3719_v44  ;;  %3469 = vrot.lane.b32.xlu1 %v9115_v60, %s7128_s22 }
 0x578   : > { %3341 = vrot.lane.b32.xlu0 %v2884_v5, %s7127_s8 }
 0x579   : > { %v3454_v55 = vpop.permute.xlu1 %3453 }
 0x57a   : > { %3531 = vst.msk [vmem:[#allocation3 + $0x90] sm:$0xff] %vm1486_vm9, %v3454_v55  ;;  %v3326_v9 = vpop.permute.xlu0 %3325 }
 0x57b   : > { %3402 = vst.msk [vmem:[#allocation3 + $0x98] sm:$0xff] %vm1355_vm8, %v3326_v9  ;;  %3076 = vrot.lane.b32.xlu1 %v9115_v60, %s7125_s30  ;;  %v12034_v60 = vld [vmem:[#allocation29_spill] sm:$0xff] }
 0x57c   : > { %2948 = vrot.lane.b32.xlu0 %v2884_v5, %s7124_s29 }
 0x57d   : > { %v3061_v21 = vpop.permute.xlu1 %3060 }
 0x57e   : > { %3136 = vst.msk [vmem:[#allocation3 + $0xa0] sm:$0xff] %vm1086_vm6, %v3061_v21  ;;  %v2933_v45 = vpop.permute.xlu0 %2932  ;;  %v3829_v32 = vld [vmem:[#allocation3 + $0x88] sm:$0xff]  ;;  %v2520_v21 = vld [vmem:[#allocation2 + $0x1a0] sm:$0xff] }
 0x57f   : > { %3007 = vst.msk [vmem:[#allocation3 + $0xa8] sm:$0xff] %vm955_vm5, %v2933_v45  ;;  %3603 = vrot.lane.b32.xlu1 %v9131_v61, %s7129_s9  ;;  %6935 = vmatmul.mubr.msk.f32.gmra.mrb[32].mxu1 %vm1827_vm12, %v3829_v32  ;;  %v3547_v36 = vrot.slane %v2520_v21, 1 }
 0x580   : > { %3471 = vrot.lane.b32.xlu0 %v12033_v42, %s7128_s22 }
 0x581   : > { %v3588_v25 = vpop.permute.xlu1 %3587 }
 0x582   : > { %3665 = vst.msk [vmem:[#allocation3 + $0x90] sm:$0xff] %vm1621_vm10, %v3588_v25  ;;  %v3456_v62 = vpop.permute.xlu0 %3455  ;;  %v3546_v25 = vrot.slane %v2519_v40, 1 }
 0x583   : > { %3532 = vst.msk [vmem:[#allocation3 + $0x98] sm:$0xff] %vm1486_vm9, %v3456_v62  ;;  %3210 = vrot.lane.b32.xlu1 %v9131_v61, %s7126_s7 }
 0x584   : > { %3078 = vrot.lane.b32.xlu0 %v12033_v42, %s7125_s30 }
 0x585   : > { %v3195_v48 = vpop.permute.xlu1 %3194 }
 0x586   : > { %3270 = vst.msk [vmem:[#allocation3 + $0xa0] sm:$0xff] %vm1221_vm7, %v3195_v48  ;;  %v3063_v54 = vpop.permute.xlu0 %3062 }
 0x587   : > { %3137 = vst.msk [vmem:[#allocation3 + $0xa8] sm:$0xff] %vm1086_vm6, %v3063_v54  ;;  %3736 = vrot.lane.b32.xlu1 %v2887_v10, %s7130_s12 }
 0x588   : > { %3605 = vrot.lane.b32.xlu0 %v12034_v60, %s7129_s9 }
 0x589   : > { %v3721_v31 = vpop.permute.xlu1 %3720 }
 0x58a   : > { %3798 = vst.msk [vmem:[#allocation3 + $0x90] sm:$0xff] %vm1755_vm11, %v3721_v31  ;;  %v3590_v61 = vpop.permute.xlu0 %3589  ;;  %v3679_v31 = vrot.slane %v2519_v40, 2 }
 0x58b   : > { %3666 = vst.msk [vmem:[#allocation3 + $0x98] sm:$0xff] %vm1621_vm10, %v3590_v61  ;;  %3343 = vrot.lane.b32.xlu1 %v2887_v10, %s7127_s8  ;;  %v3680_v61 = vrot.slane %v2520_v21, 2 }
 0x58c   : > { %3212 = vrot.lane.b32.xlu0 %v12034_v60, %s7126_s7  ;;  %v3548_v60 = vsel %vm568_vm2, %v3546_v25, %v3547_v36 }
 0x58d   : > { %v3328_v58 = vpop.permute.xlu1 %3327 }
 0x58e   : > { %3403 = vst.msk [vmem:[#allocation3 + $0xa0] sm:$0xff] %vm1355_vm8, %v3328_v58  ;;  %v3197_v53 = vpop.permute.xlu0 %3196  ;;  %v9765_v17 = vpop.f32.mrb[18].mxu1 }
 0x58f   : > { %3271 = vst.msk [vmem:[#allocation3 + $0xa8] sm:$0xff] %vm1221_vm7, %v3197_v53  ;;  %2950 = vrot.lane.b32.xlu1 %v2887_v10, %s7124_s29  ;;  %v9769_v47 = vpop.f32.mrb[19].mxu1  ;;  %v4170_v2 = vsel %vm336_vm0, %v9765_v17, 0.0 }
 0x590   : > { %v4168_v34 = vsel %vm336_vm0, %v9769_v47, 0.0  ;;  %3738 = vrot.lane.b32.xlu0 %v2889_v56, %s7130_s12 }
 0x591   : > { %v4169_v52 = vadd.f32 %v4168_v34, %v4167_v27  ;;  %v2935_v39 = vpop.permute.xlu1 %2934  ;;  %v3830_v50 = vld [vmem:[#allocation3 + $0x90] sm:$0xff]  ;;  %v2521_v27 = vld [vmem:[#allocation2 + $0x1a8] sm:$0x3] }
 0x592   : > { %3008 = vst.msk [vmem:[#allocation3 + $0xb0] sm:$0xff] %vm955_vm5, %v2935_v39  ;;  %v3723_v0 = vpop.permute.xlu0 %3722  ;;  %6937 = vmatprep.mubr.msk.f32.mxu1 %vm1827_vm12, %v3830_v50  ;;  %v3549_v42 = vrot.slane %v2521_v27, 1  ;;  %v3682_v10 = vrot.slane %v2521_v27, 2 }
 0x593   : > { %3799 = vst.msk [vmem:[#allocation3 + $0x98] sm:$0xff] %vm1755_vm11, %v3723_v0  ;;  %3473 = vrot.lane.b32.xlu1 %v2516_v35, %s7128_s22  ;;  %v4171_v3 = vadd.f32 %v4170_v2, %v4169_v52 }
 0x594   : > { %3345 = vrot.lane.b32.xlu0 %v2889_v56, %s7127_s8  ;;  %v3550_v54 = vsel %vm568_vm2, %v3547_v36, %v3549_v42  ;;  %v3683_v58 = vsel %vm778_vm3, %v3680_v61, %v3682_v10 }
 0x595   : > { %v3458_v33 = vpop.permute.xlu1 %3457 }
 0x596   : > { %3533 = vst.msk [vmem:[#allocation3 + $0xa0] sm:$0xff] %vm1486_vm9, %v3458_v33  ;;  %v3330_v30 = vpop.permute.xlu0 %3329 }
 0x597   : > { %3404 = vst.msk [vmem:[#allocation3 + $0xa8] sm:$0xff] %vm1355_vm8, %v3330_v30  ;;  %3080 = vrot.lane.b32.xlu1 %v2516_v35, %s7125_s30 }
 0x598   : > { %2952 = vrot.lane.b32.xlu0 %v2889_v56, %s7124_s29  ;;  %v3681_v56 = vsel %vm778_vm3, %v3679_v31, %v3680_v61 }
 0x599   : > { %v3065_v51 = vpop.permute.xlu1 %3064 }
 0x59a   : > { %3138 = vst.msk [vmem:[#allocation3 + $0xb0] sm:$0xff] %vm1086_vm6, %v3065_v51  ;;  %v2937_v43 = vpop.permute.xlu0 %2936  ;;  %v3831_v7 = vld [vmem:[#allocation3 + $0x98] sm:$0xff] }
 0x59b   : > { %3009 = vst.msk [vmem:[#allocation3 + $0xb8] sm:$0xff] %vm955_vm5, %v2937_v43  ;;  %3607 = vrot.lane.b32.xlu1 %v3151_v24, %s7129_s9  ;;  %6938 = vmatmul.mubr.msk.f32.gmra.mrb[34].mxu1 %vm1827_vm12, %v3831_v7 }
 0x59c   : > { %3475 = vrot.lane.b32.xlu0 %v2517_v14, %s7128_s22 }
 0x59d   : > { %v3592_v22 = vpop.permute.xlu1 %3591 }
 0x59e   : > { %3667 = vst.msk [vmem:[#allocation3 + $0xa0] sm:$0xff] %vm1621_vm10, %v3592_v22  ;;  %v3460_v19 = vpop.permute.xlu0 %3459 }
 0x59f   : > { %3534 = vst.msk [vmem:[#allocation3 + $0xa8] sm:$0xff] %vm1486_vm9, %v3460_v19  ;;  %3214 = vrot.lane.b32.xlu1 %v3151_v24, %s7126_s7 }
 0x5a0   : > { %3082 = vrot.lane.b32.xlu0 %v2517_v14, %s7125_s30 }
 0x5a1   : > { %v3199_v59 = vpop.permute.xlu1 %3198 }
 0x5a2   : > { %3272 = vst.msk [vmem:[#allocation3 + $0xb0] sm:$0xff] %vm1221_vm7, %v3199_v59  ;;  %v3067_v8 = vpop.permute.xlu0 %3066 }
 0x5a3   : > { %3139 = vst.msk [vmem:[#allocation3 + $0xb8] sm:$0xff] %vm1086_vm6, %v3067_v8  ;;  %3740 = vrot.lane.b32.xlu1 %v3284_v4, %s7130_s12 }
 0x5a4   : > { %3609 = vrot.lane.b32.xlu0 %v3153_v63, %s7129_s9 }
 0x5a5   : > { %v3725_v15 = vpop.permute.xlu1 %3724 }
 0x5a6   : > { %3800 = vst.msk [vmem:[#allocation3 + $0xa0] sm:$0xff] %vm1755_vm11, %v3725_v15  ;;  %v3594_v49 = vpop.permute.xlu0 %3593 }
 0x5a7   : > { %3668 = vst.msk [vmem:[#allocation3 + $0xa8] sm:$0xff] %vm1621_vm10, %v3594_v49  ;;  %3347 = vrot.lane.b32.xlu1 %v3284_v4, %s7127_s8 }
 0x5a8   : > { %3216 = vrot.lane.b32.xlu0 %v3153_v63, %s7126_s7 }
 0x5a9   : > { %v3332_v20 = vpop.permute.xlu1 %3331 }
 0x5aa   : > { %3405 = vst.msk [vmem:[#allocation3 + $0xb0] sm:$0xff] %vm1355_vm8, %v3332_v20  ;;  %v3201_v46 = vpop.permute.xlu0 %3200  ;;  %v9807_v57 = vpop.f32.mrb[20].mxu1 }
 0x5ab   : > { %3273 = vst.msk [vmem:[#allocation3 + $0xb8] sm:$0xff] %vm1221_vm7, %v3201_v46  ;;  %3349 = vrot.lane.b32.xlu1 %v3286_v28, %s7127_s8  ;;  %v9812_v5 = vpop.f32.mrb[21].mxu1  ;;  %v4174_v45 = vsel %vm336_vm0, %v9807_v57, 0.0 }
 0x5ac   : > { %v4172_v6 = vsel %vm336_vm0, %v9812_v5, 0.0  ;;  %3742 = vrot.lane.b32.xlu0 %v3286_v28, %s7130_s12 }
 0x5ad   : > { %v4173_v44 = vadd.f32 %v4172_v6, %v4171_v3  ;;  %v2939_v55 = vpop.permute.xlu1 %2938  ;;  %v3832_v9 = vld [vmem:[#allocation3 + $0xa0] sm:$0xff] }
 0x5ae   : > { %3010 = vst.msk [vmem:[#allocation3 + $0xc0] sm:$0xff] %vm955_vm5, %v2939_v55  ;;  %v3727_v32 = vpop.permute.xlu0 %3726  ;;  %6940 = vmatprep.mubr.msk.f32.mxu1 %vm1827_vm12, %v3832_v9 }
 0x5af   : > { %3801 = vst.msk [vmem:[#allocation3 + $0xa8] sm:$0xff] %vm1755_vm11, %v3727_v32  ;;  %3479 = vrot.lane.b32.xlu1 %v2520_v21, %s7128_s22  ;;  %v4175_v62 = vadd.f32 %v4174_v45, %v4173_v44 }
 0x5b0   : > { %3477 = vrot.lane.b32.xlu0 %v2519_v40, %s7128_s22 }
 0x5b1   : > { %v3462_v18 = vpop.permute.xlu1 %3461 }
 0x5b2   : > { %3535 = vst.msk [vmem:[#allocation3 + $0xb0] sm:$0xff] %vm1486_vm9, %v3462_v18  ;;  %v3334_v48 = vpop.permute.xlu0 %3333 }
 0x5b3   : > { %3406 = vst.msk [vmem:[#allocation3 + $0xb8] sm:$0xff] %vm1355_vm8, %v3334_v48  ;;  %3613 = vrot.lane.b32.xlu1 %v3550_v54, %s7129_s9 }
 0x5b4   : > { %3611 = vrot.lane.b32.xlu0 %v3548_v60, %s7129_s9 }
 0x5b5   : > { %v3069_v41 = vpop.permute.xlu1 %3068 }
 0x5b6   : > { %3140 = vst.msk [vmem:[#allocation3 + $0xc0] sm:$0xff] %vm1086_vm6, %v3069_v41  ;;  %v2941_v16 = vpop.permute.xlu0 %2940  ;;  %v3833_v53 = vld [vmem:[#allocation3 + $0xa8] sm:$0xff] }
 0x5b7   : > { %3011 = vst.msk [vmem:[#allocation3 + $0xc8] sm:$0xff] %vm955_vm5, %v2941_v16  ;;  %3746 = vrot.lane.b32.xlu1 %v3683_v58, %s7130_s12  ;;  %6941 = vmatmul.mubr.msk.f32.gmra.mrb[36].mxu1 %vm1827_vm12, %v3833_v53 }
 0x5b8   : > { %3744 = vrot.lane.b32.xlu0 %v3681_v56, %s7130_s12 }
 0x5b9   : > { %v3596_v34 = vpop.permute.xlu1 %3595 }
 0x5ba   : > { %3669 = vst.msk [vmem:[#allocation3 + $0xb0] sm:$0xff] %vm1621_vm10, %v3596_v34  ;;  %v3464_v52 = vpop.permute.xlu0 %3463 }
 0x5bb   : > { %3536 = vst.msk [vmem:[#allocation3 + $0xb8] sm:$0xff] %vm1486_vm9, %v3464_v52 }
 0x5bd   : > { %v3203_v39 = vpop.permute.xlu1 %3202 }
 0x5be   : > { %3274 = vst.msk [vmem:[#allocation3 + $0xc0] sm:$0xff] %vm1221_vm7, %v3203_v39  ;;  %v3071_v50 = vpop.permute.xlu0 %3070 }
 0x5bf   : > { %3141 = vst.msk [vmem:[#allocation3 + $0xc8] sm:$0xff] %vm1086_vm6, %v3071_v50 }
 0x5c1   : > { %v3729_v2 = vpop.permute.xlu1 %3728 }
 0x5c2   : > { %3802 = vst.msk [vmem:[#allocation3 + $0xb0] sm:$0xff] %vm1755_vm11, %v3729_v2  ;;  %v3598_v0 = vpop.permute.xlu0 %3597 }
 0x5c3   : > { %3670 = vst.msk [vmem:[#allocation3 + $0xb8] sm:$0xff] %vm1621_vm10, %v3598_v0 }
 0x5c5   : > { %v3336_v35 = vpop.permute.xlu1 %3335 }
 0x5c6   : > { %3407 = vst.msk [vmem:[#allocation3 + $0xc0] sm:$0xff] %vm1355_vm8, %v3336_v35  ;;  %v3205_v14 = vpop.permute.xlu0 %3204  ;;  %v9844_v3 = vpop.f32.mrb[22].mxu1 }
 0x5c7   : > { %3275 = vst.msk [vmem:[#allocation3 + $0xc8] sm:$0xff] %vm1221_vm7, %v3205_v14  ;;  %v9847_v33 = vpop.f32.mrb[23].mxu1  ;;  %v4178_v43 = vsel %vm336_vm0, %v9844_v3, 0.0 }
 0x5c8   : > { %v4176_v30 = vsel %vm336_vm0, %v9847_v33, 0.0 }
 0x5c9   : > { %v4177_v13 = vadd.f32 %v4176_v30, %v4175_v62  ;;  %v2943_v37 = vpop.permute.xlu1 %2942  ;;  %v3834_v51 = vld [vmem:[#allocation3 + $0xb0] sm:$0xff] }
 0x5ca   : > { %3012 = vst.msk [vmem:[#allocation3 + $0xd0] sm:$0xff] %vm955_vm5, %v2943_v37  ;;  %v3731_v24 = vpop.permute.xlu0 %3730  ;;  %6943 = vmatprep.mubr.msk.f32.mxu1 %vm1827_vm12, %v3834_v51 }
 0x5cb   : > { %3803 = vst.msk [vmem:[#allocation3 + $0xb8] sm:$0xff] %vm1755_vm11, %v3731_v24  ;;  %v4179_v7 = vadd.f32 %v4178_v43, %v4177_v13 }
 0x5cd   : > { %v3466_v29 = vpop.permute.xlu1 %3465 }
 0x5ce   : > { %3537 = vst.msk [vmem:[#allocation3 + $0xc0] sm:$0xff] %vm1486_vm9, %v3466_v29  ;;  %v3338_v22 = vpop.permute.xlu0 %3337 }
 0x5cf   : > { %3408 = vst.msk [vmem:[#allocation3 + $0xc8] sm:$0xff] %vm1355_vm8, %v3338_v22 }
 0x5d1   : > { %v3073_v19 = vpop.permute.xlu1 %3072 }
 0x5d2   : > { %3142 = vst.msk [vmem:[#allocation3 + $0xd0] sm:$0xff] %vm1086_vm6, %v3073_v19  ;;  %v2945_v23 = vpop.permute.xlu0 %2944  ;;  %v3835_v38 = vld [vmem:[#allocation3 + $0xb8] sm:$0xff] }
 0x5d3   : > { %3013 = vst.msk [vmem:[#allocation3 + $0xd8] sm:$0xff] %vm955_vm5, %v2945_v23  ;;  %6944 = vmatmul.mubr.msk.f32.gmra.mrb[38].mxu1 %vm1827_vm12, %v3835_v38 }
 0x5d5   : > { %v3600_v26 = vpop.permute.xlu1 %3599 }
 0x5d6   : > { %3671 = vst.msk [vmem:[#allocation3 + $0xc0] sm:$0xff] %vm1621_vm10, %v3600_v26  ;;  %v3468_v59 = vpop.permute.xlu0 %3467 }
 0x5d7   : > { %3538 = vst.msk [vmem:[#allocation3 + $0xc8] sm:$0xff] %vm1486_vm9, %v3468_v59 }
 0x5d9   : > { %v3207_v8 = vpop.permute.xlu1 %3206 }
 0x5da   : > { %3276 = vst.msk [vmem:[#allocation3 + $0xd0] sm:$0xff] %vm1221_vm7, %v3207_v8  ;;  %v3075_v4 = vpop.permute.xlu0 %3074 }
 0x5db   : > { %3143 = vst.msk [vmem:[#allocation3 + $0xd8] sm:$0xff] %vm1086_vm6, %v3075_v4 }
 0x5dd   : > { %v3733_v63 = vpop.permute.xlu1 %3732 }
 0x5de   : > { %3804 = vst.msk [vmem:[#allocation3 + $0xc0] sm:$0xff] %vm1755_vm11, %v3733_v63  ;;  %v3602_v15 = vpop.permute.xlu0 %3601 }
 0x5df   : > { %3672 = vst.msk [vmem:[#allocation3 + $0xc8] sm:$0xff] %vm1621_vm10, %v3602_v15 }
 0x5e1   : > { %v3340_v49 = vpop.permute.xlu1 %3339 }
 0x5e2   : > { %3409 = vst.msk [vmem:[#allocation3 + $0xd0] sm:$0xff] %vm1355_vm8, %v3340_v49  ;;  %v3209_v1 = vpop.permute.xlu0 %3208  ;;  %v9868_v20 = vpop.f32.mrb[24].mxu1 }
 0x5e3   : > { %3277 = vst.msk [vmem:[#allocation3 + $0xd8] sm:$0xff] %vm1221_vm7, %v3209_v1  ;;  %v9871_v46 = vpop.f32.mrb[25].mxu1  ;;  %v4182_v44 = vsel %vm336_vm0, %v9868_v20, 0.0 }
 0x5e4   : > { %v4180_v28 = vsel %vm336_vm0, %v9871_v46, 0.0 }
 0x5e5   : > { %v4181_v27 = vadd.f32 %v4180_v28, %v4179_v7  ;;  %v2947_v6 = vpop.permute.xlu1 %2946  ;;  %v3836_v40 = vld [vmem:[#allocation3 + $0xc0] sm:$0xff] }
 0x5e6   : > { %3014 = vst.msk [vmem:[#allocation3 + $0xe0] sm:$0xff] %vm955_vm5, %v2947_v6  ;;  %v3735_v55 = vpop.permute.xlu0 %3734  ;;  %6946 = vmatprep.mubr.msk.f32.mxu1 %vm1827_vm12, %v3836_v40 }
 0x5e7   : > { %3805 = vst.msk [vmem:[#allocation3 + $0xc8] sm:$0xff] %vm1755_vm11, %v3735_v55  ;;  %v4183_v9 = vadd.f32 %v4182_v44, %v4181_v27 }
 0x5e9   : > { %v3470_v21 = vpop.permute.xlu1 %3469 }
 0x5ea   : > { %3539 = vst.msk [vmem:[#allocation3 + $0xd0] sm:$0xff] %vm1486_vm9, %v3470_v21  ;;  %v3342_v45 = vpop.permute.xlu0 %3341 }
 0x5eb   : > { %3410 = vst.msk [vmem:[#allocation3 + $0xd8] sm:$0xff] %vm1355_vm8, %v3342_v45 }
 0x5ed   : > { %v3077_v32 = vpop.permute.xlu1 %3076 }
 0x5ee   : > { %3144 = vst.msk [vmem:[#allocation3 + $0xe0] sm:$0xff] %vm1086_vm6, %v3077_v32  ;;  %v2949_v42 = vpop.permute.xlu0 %2948  ;;  %v3837_v25 = vld [vmem:[#allocation3 + $0xc8] sm:$0xff] }
 0x5ef   : > { %3015 = vst.msk [vmem:[#allocation3 + $0xe8] sm:$0xff] %vm955_vm5, %v2949_v42  ;;  %6947 = vmatmul.mubr.msk.f32.gmra.mrb[40].mxu1 %vm1827_vm12, %v3837_v25 }
 0x5f1   : > { %v3604_v62 = vpop.permute.xlu1 %3603 }
 0x5f2   : > { %3673 = vst.msk [vmem:[#allocation3 + $0xd0] sm:$0xff] %vm1621_vm10, %v3604_v62  ;;  %v3472_v36 = vpop.permute.xlu0 %3471 }
 0x5f3   : > { %3540 = vst.msk [vmem:[#allocation3 + $0xd8] sm:$0xff] %vm1486_vm9, %v3472_v36 }
 0x5f5   : > { %v3211_v18 = vpop.permute.xlu1 %3210 }
 0x5f6   : > { %3278 = vst.msk [vmem:[#allocation3 + $0xe0] sm:$0xff] %vm1221_vm7, %v3211_v18  ;;  %v3079_v48 = vpop.permute.xlu0 %3078 }
 0x5f7   : > { %3145 = vst.msk [vmem:[#allocation3 + $0xe8] sm:$0xff] %vm1086_vm6, %v3079_v48 }
 0x5f9   : > { %v3737_v54 = vpop.permute.xlu1 %3736 }
 0x5fa   : > { %3806 = vst.msk [vmem:[#allocation3 + $0xd0] sm:$0xff] %vm1755_vm11, %v3737_v54  ;;  %v3606_v10 = vpop.permute.xlu0 %3605 }
 0x5fb   : > { %3674 = vst.msk [vmem:[#allocation3 + $0xd8] sm:$0xff] %vm1621_vm10, %v3606_v10 }
 0x5fd   : > { %v3344_v60 = vpop.permute.xlu1 %3343 }
 0x5fe   : > { %3411 = vst.msk [vmem:[#allocation3 + $0xe0] sm:$0xff] %vm1355_vm8, %v3344_v60  ;;  %v3213_v31 = vpop.permute.xlu0 %3212  ;;  %v9892_v61 = vpop.f32.mrb[26].mxu1 }
 0x5ff   : > { %3279 = vst.msk [vmem:[#allocation3 + $0xe8] sm:$0xff] %vm1221_vm7, %v3213_v31  ;;  %v9895_v41 = vpop.f32.mrb[27].mxu1  ;;  %v4186_v34 = vsel %vm336_vm0, %v9892_v61, 0.0 }
 0x600   : > { %v4184_v16 = vsel %vm336_vm0, %v9895_v41, 0.0 }
 0x601   : > { %v4185_v58 = vadd.f32 %v4184_v16, %v4183_v9  ;;  %v2951_v53 = vpop.permute.xlu1 %2950  ;;  %v3838_v56 = vld [vmem:[#allocation3 + $0xd0] sm:$0xff] }
 0x602   : > { %3016 = vst.msk [vmem:[#allocation3 + $0xf0] sm:$0xff] %vm955_vm5, %v2951_v53  ;;  %v3739_v52 = vpop.permute.xlu0 %3738  ;;  %6949 = vmatprep.mubr.msk.f32.mxu1 %vm1827_vm12, %v3838_v56 }
 0x603   : > { %3807 = vst.msk [vmem:[#allocation3 + $0xd8] sm:$0xff] %vm1755_vm11, %v3739_v52  ;;  %v4187_v39 = vadd.f32 %v4186_v34, %v4185_v58 }
 0x605   : > { %v3474_v50 = vpop.permute.xlu1 %3473 }
 0x606   : > { %3541 = vst.msk [vmem:[#allocation3 + $0xe0] sm:$0xff] %vm1486_vm9, %v3474_v50  ;;  %v3346_v2 = vpop.permute.xlu0 %3345 }
 0x607   : > { %3412 = vst.msk [vmem:[#allocation3 + $0xe8] sm:$0xff] %vm1355_vm8, %v3346_v2 }
 0x609   : > { %v3081_v0 = vpop.permute.xlu1 %3080 }
 0x60a   : > { %3146 = vst.msk [vmem:[#allocation3 + $0xf0] sm:$0xff] %vm1086_vm6, %v3081_v0  ;;  %v2953_v35 = vpop.permute.xlu0 %2952  ;;  %v3839_v14 = vld [vmem:[#allocation3 + $0xd8] sm:$0xff] }
 0x60b   : > { %3017 = vst.msk [vmem:[#allocation3 + $0xf8] sm:$0xff] %vm955_vm5, %v2953_v35  ;;  %6950 = vmatmul.mubr.msk.f32.gmra.mrb[42].mxu1 %vm1827_vm12, %v3839_v14 }
 0x60d   : > { %v3608_v30 = vpop.permute.xlu1 %3607 }
 0x60e   : > { %3675 = vst.msk [vmem:[#allocation3 + $0xe0] sm:$0xff] %vm1621_vm10, %v3608_v30  ;;  %v3476_v13 = vpop.permute.xlu0 %3475 }
 0x60f   : > { %3542 = vst.msk [vmem:[#allocation3 + $0xe8] sm:$0xff] %vm1486_vm9, %v3476_v13 }
 0x611   : > { %v3215_v37 = vpop.permute.xlu1 %3214 }
 0x612   : > { %3280 = vst.msk [vmem:[#allocation3 + $0xf0] sm:$0xff] %vm1221_vm7, %v3215_v37  ;;  %v3083_v51 = vpop.permute.xlu0 %3082 }
 0x613   : > { %3147 = vst.msk [vmem:[#allocation3 + $0xf8] sm:$0xff] %vm1086_vm6, %v3083_v51 }
 0x615   : > { %v3741_v43 = vpop.permute.xlu1 %3740 }
 0x616   : > { %3808 = vst.msk [vmem:[#allocation3 + $0xe0] sm:$0xff] %vm1755_vm11, %v3741_v43  ;;  %v3610_v24 = vpop.permute.xlu0 %3609 }
 0x617   : > { %3676 = vst.msk [vmem:[#allocation3 + $0xe8] sm:$0xff] %vm1621_vm10, %v3610_v24 }
 0x619   : > { %v3348_v7 = vpop.permute.xlu1 %3347 }
 0x61a   : > { %3413 = vst.msk [vmem:[#allocation3 + $0xf0] sm:$0xff] %vm1355_vm8, %v3348_v7  ;;  %v3217_v29 = vpop.permute.xlu0 %3216  ;;  %v9916_v22 = vpop.f32.mrb[28].mxu1 }
 0x61b   : > { %3281 = vst.msk [vmem:[#allocation3 + $0xf8] sm:$0xff] %vm1221_vm7, %v3217_v29  ;;  %v9919_v19 = vpop.f32.mrb[29].mxu1  ;;  %v4190_v8 = vsel %vm336_vm0, %v9916_v22, 0.0 }
 0x61c   : > { %v4188_v23 = vsel %vm336_vm0, %v9919_v19, 0.0 }
 0x61d   : > { %v4189_v38 = vadd.f32 %v4188_v23, %v4187_v39  ;;  %v3350_v26 = vpop.permute.xlu1 %3349  ;;  %v3840_v59 = vld [vmem:[#allocation3 + $0xe0] sm:$0xff] }
 0x61e   : > { %3414 = vst.msk [vmem:[#allocation3 + $0xf8] sm:$0xff] %vm1355_vm8, %v3350_v26  ;;  %v3743_v4 = vpop.permute.xlu0 %3742  ;;  %6952 = vmatprep.mubr.msk.f32.mxu1 %vm1827_vm12, %v3840_v59 }
 0x61f   : > { %3809 = vst.msk [vmem:[#allocation3 + $0xe8] sm:$0xff] %vm1755_vm11, %v3743_v4  ;;  %v4191_v63 = vadd.f32 %v4190_v8, %v4189_v38 }
 0x621   : > { %v3480_v15 = vpop.permute.xlu1 %3479 }
 0x622   : > { %3544 = vst.msk [vmem:[#allocation3 + $0xf8] sm:$0xff] %vm1486_vm9, %v3480_v15  ;;  %v3478_v49 = vpop.permute.xlu0 %3477 }
 0x623   : > { %3543 = vst.msk [vmem:[#allocation3 + $0xf0] sm:$0xff] %vm1486_vm9, %v3478_v49 }
 0x625   : > { %v3614_v1 = vpop.permute.xlu1 %3613 }
 0x626   : > { %3678 = vst.msk [vmem:[#allocation3 + $0xf8] sm:$0xff] %vm1621_vm10, %v3614_v1  ;;  %v3612_v28 = vpop.permute.xlu0 %3611  ;;  %v3841_v27 = vld [vmem:[#allocation3 + $0xe8] sm:$0xff] }
 0x627   : > { %3677 = vst.msk [vmem:[#allocation3 + $0xf0] sm:$0xff] %vm1621_vm10, %v3612_v28  ;;  %6953 = vmatmul.mubr.msk.f32.gmra.mrb[44].mxu1 %vm1827_vm12, %v3841_v27 }
 0x629   : > { %v3747_v6 = vpop.permute.xlu1 %3746 }
 0x62a   : > { %3811 = vst.msk [vmem:[#allocation3 + $0xf8] sm:$0xff] %vm1755_vm11, %v3747_v6  ;;  %v3745_v40 = vpop.permute.xlu0 %3744 }
 0x62b   : > { %3810 = vst.msk [vmem:[#allocation3 + $0xf0] sm:$0xff] %vm1755_vm11, %v3745_v40 }
 0x631   : > { %v3843_v55 = vld [vmem:[#allocation3 + $0xf8] sm:$0xff] }
 0x632   : > { %v3842_v44 = vld [vmem:[#allocation3 + $0xf0] sm:$0xff] }
 0x633   : > { %6955 = vmatprep.mubr.msk.f32.mxu1 %vm1827_vm12, %v3842_v44 }
 0x634   : > { %6956 = vmatmul.mubr.msk.f32.gmra.mrb[46].mxu1 %vm1827_vm12, %v3843_v55 }
 0x636   : > { %v9937_v9 = vpop.f32.mrb[30].mxu1 }
 0x637   : > { %v9939_v21 = vpop.f32.mrb[31].mxu1  ;;  %v4194_v42 = vsel %vm336_vm0, %v9937_v9, 0.0 }
 0x638   : > { %v4192_v45 = vsel %vm336_vm0, %v9939_v21, 0.0 }
 0x639   : > { %v4193_v32 = vadd.f32 %v4192_v45, %v4191_v63 }
 0x63b   : > { %v4195_v25 = vadd.f32 %v4194_v42, %v4193_v32 }
 0x652   : > { %v9945_v62 = vpop.f32.mrb[32].mxu1 }
 0x653   : > { %v9947_v36 = vpop.f32.mrb[33].mxu1  ;;  %v4198_v54 = vsel %vm336_vm0, %v9945_v62, 0.0 }
 0x654   : > { %v4196_v18 = vsel %vm336_vm0, %v9947_v36, 0.0 }
 0x655   : > { %v4197_v48 = vadd.f32 %v4196_v18, %v4195_v25 }
 0x657   : > { %v4199_v10 = vadd.f32 %v4198_v54, %v4197_v48 }
 0x66e   : > { %v9953_v60 = vpop.f32.mrb[34].mxu1 }
 0x66f   : > { %v9955_v31 = vpop.f32.mrb[35].mxu1  ;;  %v4202_v53 = vsel %vm336_vm0, %v9953_v60, 0.0 }
 0x670   : > { %v4200_v16 = vsel %vm336_vm0, %v9955_v31, 0.0 }
 0x671   : > { %v4201_v58 = vadd.f32 %v4200_v16, %v4199_v10 }
 0x673   : > { %v4203_v56 = vadd.f32 %v4202_v53, %v4201_v58 }
 0x68a   : > { %v9961_v34 = vpop.f32.mrb[36].mxu1 }
 0x68b   : > { %v4106_v52 = vpop.f32.mrb[37].mxu1  ;;  %v4206_v2 = vsel %vm336_vm0, %v9961_v34, 0.0 }
 0x68c   : > { %v4204_v39 = vsel %vm336_vm0, %v4106_v52, 0.0 }
 0x68d   : > { %v4205_v50 = vadd.f32 %v4204_v39, %v4203_v56 }
 0x68f   : > { %v4207_v0 = vadd.f32 %v4206_v2, %v4205_v50 }
 0x6a6   : > { %v6945_v35 = vpop.f32.mrb[38].mxu1 }
 0x6a7   : > { %v4116_v14 = vpop.f32.mrb[39].mxu1  ;;  %v4210_v37 = vsel %vm336_vm0, %v6945_v35, 0.0 }
 0x6a8   : > { %v4208_v30 = vsel %vm336_vm0, %v4116_v14, 0.0 }
 0x6a9   : > { %v4209_v13 = vadd.f32 %v4208_v30, %v4207_v0 }
 0x6ab   : > { %v4211_v51 = vadd.f32 %v4210_v37, %v4209_v13 }
 0x6c2   : > { %v6948_v43 = vpop.f32.mrb[40].mxu1 }
 0x6c3   : > { %v4126_v24 = vpop.f32.mrb[41].mxu1  ;;  %v4214_v23 = vsel %vm336_vm0, %v6948_v43, 0.0 }
 0x6c4   : > { %v4212_v7 = vsel %vm336_vm0, %v4126_v24, 0.0 }
 0x6c5   : > { %v4213_v29 = vadd.f32 %v4212_v7, %v4211_v51 }
 0x6c7   : > { %v4215_v38 = vadd.f32 %v4214_v23, %v4213_v29 }
 0x6de   : > { %v6951_v26 = vpop.f32.mrb[42].mxu1 }
 0x6df   : > { %v4136_v59 = vpop.f32.mrb[43].mxu1  ;;  %v4218_v63 = vsel %vm336_vm0, %v6951_v26, 0.0 }
 0x6e0   : > { %v4216_v8 = vsel %vm336_vm0, %v4136_v59, 0.0 }
 0x6e1   : > { %v4217_v4 = vadd.f32 %v4216_v8, %v4215_v38 }
 0x6e3   : > { %v4219_v15 = vadd.f32 %v4218_v63, %v4217_v4 }
 0x6fa   : > { %v6954_v49 = vpop.f32.mrb[44].mxu1 }
 0x6fb   : > { %v4146_v1 = vpop.f32.mrb[45].mxu1  ;;  %v4222_v6 = vsel %vm336_vm0, %v6954_v49, 0.0 }
 0x6fc   : > { %v4220_v28 = vsel %vm336_vm0, %v4146_v1, 0.0 }
 0x6fd   : > { %v4221_v27 = vadd.f32 %v4220_v28, %v4219_v15 }
 0x6ff   : > { %v4223_v40 = vadd.f32 %v4222_v6, %v4221_v27 }
 0x707   : > { %v6957_v44 = vpop.f32.mrb[46].mxu1 }
 0x708   : > { %v4156_v55 = vpop.f32.mrb[47].mxu1  ;;  %v4226_v42 = vsel %vm336_vm0, %v6957_v44, 0.0 }
 0x709   : > { %v4224_v45 = vsel %vm336_vm0, %v4156_v55, 0.0 }
 0x70a   : > { %v4225_v32 = vadd.f32 %v4224_v45, %v4223_v40 }
 0x70c   : > { %v4227_v25 = vadd.f32 %v4226_v42, %v4225_v32 }
 0x70e   : > { %v4228_v18 = vrot.slane %v4227_v25, 4 }
 0x710   : > { %v4229_v48 = vadd.f32 %v4228_v18, %v4227_v25 }
 0x712   : > { %v4230_v54 = vrot.slane %v4229_v48, 2 }
 0x714   : > { %v4231_v10 = vadd.f32 %v4230_v54, %v4229_v48 }
 0x716   : > { %v4232_v16 = vrot.slane %v4231_v10, 1 }
 0x718   : > { %v4233_v58 = vadd.f32 %v4232_v16, %v4231_v10 }
 0x71a   : > { %v4234_v53 = vmul.f32 0.00390625, %v4233_v58 }
 0x71c   : > { %v9977_v56 = vsub.f32 %v9719_v11, %v4234_v53  ;;  %v9980_v39 = vsub.f32 %v9714_v12, %v4234_v53  ;;  %v9983_v50 = vsub.f32 %v9769_v47, %v4234_v53  ;;  %v9986_v2 = vsub.f32 %v9765_v17, %v4234_v53 }
 0x71d   : > { %v9989_v0 = vsub.f32 %v9812_v5, %v4234_v53  ;;  %v9992_v30 = vsub.f32 %v9807_v57, %v4234_v53  ;;  %v9995_v13 = vsub.f32 %v9847_v33, %v4234_v53  ;;  %v9998_v11 = vsub.f32 %v9844_v3, %v4234_v53 }
 0x71e   : > { %v10001_v12 = vsub.f32 %v9871_v46, %v4234_v53  ;;  %v10004_v47 = vsub.f32 %v9868_v20, %v4234_v53  ;;  %v10007_v17 = vsub.f32 %v9895_v41, %v4234_v53  ;;  %v10010_v5 = vsub.f32 %v9892_v61, %v4234_v53 }
 0x71f   : > { %v10013_v57 = vsub.f32 %v9919_v19, %v4234_v53  ;;  %v10016_v33 = vsub.f32 %v9916_v22, %v4234_v53  ;;  %v10019_v3 = vsub.f32 %v9939_v21, %v4234_v53  ;;  %v10022_v46 = vsub.f32 %v9937_v9, %v4234_v53 }
 0x720   : > { %v10025_v20 = vsub.f32 %v9947_v36, %v4234_v53  ;;  %v10028_v41 = vsub.f32 %v9945_v62, %v4234_v53  ;;  %v10031_v61 = vsub.f32 %v9955_v31, %v4234_v53  ;;  %v10034_v19 = vsub.f32 %v9953_v60, %v4234_v53 }
 0x721   : > { %v10036_v22 = vsub.f32 %v4106_v52, %v4234_v53  ;;  %v10039_v21 = vsub.f32 %v9961_v34, %v4234_v53  ;;  %v10041_v37 = vsub.f32 %v4116_v14, %v4234_v53  ;;  %v10043_v9 = vsub.f32 %v6945_v35, %v4234_v53 }
 0x722   : > { %v10045_v36 = vsub.f32 %v4126_v24, %v4234_v53  ;;  %v10047_v51 = vsub.f32 %v6948_v43, %v4234_v53  ;;  %v10049_v62 = vsub.f32 %v4136_v59, %v4234_v53  ;;  %v10051_v31 = vsub.f32 %v6951_v26, %v4234_v53 }
 0x723   : > { %v10053_v7 = vsub.f32 %v4146_v1, %v4234_v53  ;;  %v10055_v60 = vsub.f32 %v6954_v49, %v4234_v53  ;;  %v10057_v52 = vsub.f32 %v4156_v55, %v4234_v53  ;;  %v10059_v34 = vsub.f32 %v6957_v44, %v4234_v53 }
 0x724   : > { %v4267_v35 = vmul.f32 %v9977_v56, %v9977_v56  ;;  %v4268_v14 = vmul.f32 %v9980_v39, %v9980_v39  ;;  %v4269_v43 = vmul.f32 %v9983_v50, %v9983_v50  ;;  %v4270_v24 = vmul.f32 %v9986_v2, %v9986_v2 }
 0x725   : > { %v4271_v26 = vmul.f32 %v9989_v0, %v9989_v0  ;;  %v4272_v4 = vmul.f32 %v9992_v30, %v9992_v30  ;;  %v4273_v49 = vmul.f32 %v9995_v13, %v9995_v13  ;;  %v4274_v27 = vmul.f32 %v9998_v11, %v9998_v11 }
 0x726   : > { %v4299_v29 = vsel %vm336_vm0, %v4267_v35, 0.0  ;;  %v4300_v23 = vsel %vm336_vm0, %v4268_v14, 0.0  ;;  %v4302_v59 = vsel %vm336_vm0, %v4269_v43, 0.0  ;;  %v4304_v63 = vsel %vm336_vm0, %v4270_v24, 0.0 }
 0x727   : > { %v4301_v38 = vadd.f32 %v4300_v23, %v4299_v29  ;;  %v4306_v1 = vsel %vm336_vm0, %v4271_v26, 0.0  ;;  %v4308_v6 = vsel %vm336_vm0, %v4272_v4, 0.0  ;;  %v4275_v44 = vmul.f32 %v10001_v12, %v10001_v12 }
 0x728   : > { %v4310_v55 = vsel %vm336_vm0, %v4273_v49, 0.0  ;;  %v4276_v32 = vmul.f32 %v10004_v47, %v10004_v47  ;;  %v4312_v42 = vsel %vm336_vm0, %v4274_v27, 0.0  ;;  %v4277_v18 = vmul.f32 %v10007_v17, %v10007_v17 }
 0x729   : > { %v4303_v8 = vadd.f32 %v4302_v59, %v4301_v38  ;;  %v4314_v48 = vsel %vm336_vm0, %v4275_v44, 0.0  ;;  %v4278_v10 = vmul.f32 %v10010_v5, %v10010_v5  ;;  %v4279_v53 = vmul.f32 %v10013_v57, %v10013_v57 }
 0x72a   : > { %v4316_v16 = vsel %vm336_vm0, %v4276_v32, 0.0  ;;  %v4318_v35 = vsel %vm336_vm0, %v4277_v18, 0.0  ;;  %v4280_v43 = vmul.f32 %v10016_v33, %v10016_v33  ;;  %v4281_v23 = vmul.f32 %v10019_v3, %v10019_v3 }
 0x72b   : > { %v4305_v15 = vadd.f32 %v4304_v63, %v4303_v8  ;;  %v4320_v24 = vsel %vm336_vm0, %v4278_v10, 0.0  ;;  %v4322_v38 = vsel %vm336_vm0, %v4279_v53, 0.0  ;;  %v4282_v59 = vmul.f32 %v10022_v46, %v10022_v46 }
 0x72c   : > { %v4324_v8 = vsel %vm336_vm0, %v4280_v43, 0.0  ;;  %v4283_v63 = vmul.f32 %v10025_v20, %v10025_v20 }
 0x72d   : > { %v4307_v28 = vadd.f32 %v4306_v1, %v4305_v15  ;;  %v4326_v15 = vsel %vm336_vm0, %v4281_v23, 0.0  ;;  %v4284_v1 = vmul.f32 %v10028_v41, %v10028_v41 }
 0x72f   : > { %v4309_v40 = vadd.f32 %v4308_v6, %v4307_v28  ;;  %v4328_v28 = vsel %vm336_vm0, %v4282_v59, 0.0  ;;  %v4285_v6 = vmul.f32 %v10031_v61, %v10031_v61 }
 0x731   : > { %v4311_v45 = vadd.f32 %v4310_v55, %v4309_v40  ;;  %v4330_v40 = vsel %vm336_vm0, %v4283_v63, 0.0  ;;  %v4286_v55 = vmul.f32 %v10034_v19, %v10034_v19 }
 0x733   : > { %v4313_v25 = vadd.f32 %v4312_v42, %v4311_v45  ;;  %v4332_v45 = vsel %vm336_vm0, %v4284_v1, 0.0  ;;  %v4287_v42 = vmul.f32 %v10036_v22, %v10036_v22 }
 0x735   : > { %v4315_v54 = vadd.f32 %v4314_v48, %v4313_v25  ;;  %v4334_v25 = vsel %vm336_vm0, %v4285_v6, 0.0  ;;  %v4288_v48 = vmul.f32 %v10039_v21, %v10039_v21 }
 0x737   : > { %v4317_v58 = vadd.f32 %v4316_v16, %v4315_v54  ;;  %v4336_v54 = vsel %vm336_vm0, %v4286_v55, 0.0  ;;  %v4289_v16 = vmul.f32 %v10041_v37, %v10041_v37 }
 0x739   : > { %v4319_v14 = vadd.f32 %v4318_v35, %v4317_v58  ;;  %v4338_v58 = vsel %vm336_vm0, %v4287_v42, 0.0  ;;  %v4290_v35 = vmul.f32 %v10043_v9, %v10043_v9 }
 0x73b   : > { %v4321_v29 = vadd.f32 %v4320_v24, %v4319_v14  ;;  %v4340_v14 = vsel %vm336_vm0, %v4288_v48, 0.0  ;;  %v4291_v24 = vmul.f32 %v10045_v36, %v10045_v36 }
 0x73d   : > { %v4323_v26 = vadd.f32 %v4322_v38, %v4321_v29  ;;  %v4342_v29 = vsel %vm336_vm0, %v4289_v16, 0.0  ;;  %v4292_v38 = vmul.f32 %v10047_v51, %v10047_v51 }
 0x73f   : > { %v4325_v4 = vadd.f32 %v4324_v8, %v4323_v26  ;;  %v4344_v26 = vsel %vm336_vm0, %v4290_v35, 0.0  ;;  %v4293_v8 = vmul.f32 %v10049_v62, %v10049_v62 }
 0x741   : > { %v4327_v49 = vadd.f32 %v4326_v15, %v4325_v4  ;;  %v4346_v4 = vsel %vm336_vm0, %v4291_v24, 0.0  ;;  %v4294_v15 = vmul.f32 %v10051_v31, %v10051_v31 }
 0x743   : > { %v4329_v27 = vadd.f32 %v4328_v28, %v4327_v49  ;;  %v4348_v49 = vsel %vm336_vm0, %v4292_v38, 0.0  ;;  %v4295_v28 = vmul.f32 %v10053_v7, %v10053_v7 }
 0x745   : > { %v4331_v44 = vadd.f32 %v4330_v40, %v4329_v27  ;;  %v4350_v27 = vsel %vm336_vm0, %v4293_v8, 0.0  ;;  %v4296_v40 = vmul.f32 %v10055_v60, %v10055_v60 }
 0x747   : > { %v4333_v32 = vadd.f32 %v4332_v45, %v4331_v44  ;;  %v4352_v44 = vsel %vm336_vm0, %v4294_v15, 0.0  ;;  %v4297_v45 = vmul.f32 %v10057_v52, %v10057_v52 }
 0x749   : > { %v4335_v18 = vadd.f32 %v4334_v25, %v4333_v32  ;;  %v4354_v32 = vsel %vm336_vm0, %v4295_v28, 0.0  ;;  %v4298_v25 = vmul.f32 %v10059_v34, %v10059_v34 }
 0x74b   : > { %v4337_v10 = vadd.f32 %v4336_v54, %v4335_v18  ;;  %v4356_v18 = vsel %vm336_vm0, %v4296_v40, 0.0  ;;  %v4358_v54 = vsel %vm336_vm0, %v4297_v45, 0.0  ;;  %v4360_v16 = vsel %vm336_vm0, %v4298_v25, 0.0 }
 0x74d   : > { %v4339_v53 = vadd.f32 %v4338_v58, %v4337_v10 }
 0x74f   : > { %v4341_v43 = vadd.f32 %v4340_v14, %v4339_v53 }
 0x751   : > { %v4343_v23 = vadd.f32 %v4342_v29, %v4341_v43 }
 0x753   : > { %v4345_v59 = vadd.f32 %v4344_v26, %v4343_v23 }
 0x755   : > { %v4347_v63 = vadd.f32 %v4346_v4, %v4345_v59 }
 0x757   : > { %v4349_v1 = vadd.f32 %v4348_v49, %v4347_v63 }
 0x759   : > { %v4351_v6 = vadd.f32 %v4350_v27, %v4349_v1 }
 0x75b   : > { %v4353_v55 = vadd.f32 %v4352_v44, %v4351_v6 }
 0x75d   : > { %v4355_v42 = vadd.f32 %v4354_v32, %v4353_v55 }
 0x75f   : > { %v4357_v48 = vadd.f32 %v4356_v18, %v4355_v42 }
 0x761   : > { %v4359_v10 = vadd.f32 %v4358_v54, %v4357_v48 }
 0x763   : > { %v4361_v58 = vadd.f32 %v4360_v16, %v4359_v10 }
 0x765   : > { %v4362_v53 = vrot.slane %v4361_v58, 4 }
 0x767   : > { %v4363_v35 = vadd.f32 %v4362_v53, %v4361_v58 }
 0x769   : > { %v4364_v14 = vrot.slane %v4363_v35, 2 }
 0x76b   : > { %v4365_v43 = vadd.f32 %v4364_v14, %v4363_v35 }
 0x76d   : > { %v4366_v24 = vrot.slane %v4365_v43, 1 }
 0x76f   : > { %v4367_v29 = vadd.f32 %v4366_v24, %v4365_v43 }
 0x771   : > { %v4368_v23 = vmul.f32 0.00390625, %v4367_v29 }
 0x773   : > { %v4369_v38 = vadd.f32 1e-05, %v4368_v23 }
 0x775   : > { %7100 = vrsqrt.f32 %v4369_v38 }
 0x77f   : > { %v7101_v26 = vpop.eup %7100 }
 0x780   : > { %v4401_v59 = vmul.f32 %v7101_v26, %v10057_v52  ;;  %v4371_v8 = vmul.f32 %v7101_v26, %v9977_v56  ;;  %v4372_v4 = vmul.f32 %v7101_v26, %v9980_v39  ;;  %v4373_v63 = vmul.f32 %v7101_v26, %v9983_v50 }
 0x781   : > { %v4374_v15 = vmul.f32 %v7101_v26, %v9986_v2  ;;  %v4375_v49 = vmul.f32 %v7101_v26, %v9989_v0  ;;  %v4376_v1 = vmul.f32 %v7101_v26, %v9992_v30  ;;  %v4377_v28 = vmul.f32 %v7101_v26, %v9995_v13 }
 0x782   : > { %v4433_v27 = vmax.f32 %v4401_v59, 0.0  ;;  %v4378_v6 = vmul.f32 %v7101_v26, %v9998_v11  ;;  %v4379_v40 = vmul.f32 %v7101_v26, %v10001_v12  ;;  %v4380_v52 = vmul.f32 %v7101_v26, %v10004_v47 }
 0x783   : > { %v4381_v56 = vmul.f32 %v7101_v26, %v10007_v17  ;;  %v4382_v39 = vmul.f32 %v7101_v26, %v10010_v5  ;;  %v4383_v50 = vmul.f32 %v7101_v26, %v10013_v57  ;;  %v4384_v2 = vmul.f32 %v7101_v26, %v10016_v33 }
 0x784   : > { %4465 = vst.msk [vmem:[#allocation2 + $0x181] sm:$0xff] %vm336_vm0, %v4433_v27  ;;  %v4385_v0 = vmul.f32 %v7101_v26, %v10019_v3  ;;  %v4386_v30 = vmul.f32 %v7101_v26, %v10022_v46  ;;  %v4387_v13 = vmul.f32 %v7101_v26, %v10025_v20  ;;  %v4388_v11 = vmul.f32 %v7101_v26, %v10028_v41 }
 0x785   : > { %v4389_v12 = vmul.f32 %v7101_v26, %v10031_v61  ;;  %v10179_v47 = vmul.f32 %v7101_v26, %v10034_v19  ;;  %v10182_v17 = vmul.f32 %v7101_v26, %v10036_v22  ;;  %v10185_v5 = vmul.f32 %v7101_v26, %v10039_v21 }
 0x786   : > { %v10188_v57 = vmul.f32 %v7101_v26, %v10041_v37  ;;  %v10191_v33 = vmul.f32 %v7101_v26, %v10043_v9  ;;  %v10194_v3 = vmul.f32 %v7101_v26, %v10045_v36  ;;  %v10197_v46 = vmul.f32 %v7101_v26, %v10047_v51 }
 0x787   : > { %v10200_v20 = vmul.f32 %v7101_v26, %v10049_v62  ;;  %v10203_v41 = vmul.f32 %v7101_v26, %v10051_v31  ;;  %v10206_v61 = vmul.f32 %v7101_v26, %v10053_v7  ;;  %v10209_v19 = vmul.f32 %v7101_v26, %v10055_v60 }
 0x788   : > { %v10212_v22 = vmul.f32 %v7101_v26, %v10059_v34  ;;  %v4405_v21 = vmax.f32 %v4373_v63, 0.0  ;;  %v4406_v37 = vmax.f32 %v4374_v15, 0.0  ;;  %v4403_v9 = vmax.f32 %v4371_v8, 0.0 }
 0x789   : > { %v4404_v36 = vmax.f32 %v4372_v4, 0.0  ;;  %v4407_v51 = vmax.f32 %v4375_v49, 0.0  ;;  %v4408_v44 = vmax.f32 %v4376_v1, 0.0  ;;  %v4409_v62 = vmax.f32 %v4377_v28, 0.0 }
 0x78a   : > { %4437 = vst.msk [vmem:[#allocation2 + $0x31] sm:$0xff] %vm336_vm0, %v4405_v21  ;;  %4438 = vst.msk [vmem:[#allocation2 + $0x39] sm:$0xff] %vm336_vm0, %v4406_v37  ;;  %v4410_v31 = vmax.f32 %v4378_v6, 0.0  ;;  %v4411_v7 = vmax.f32 %v4379_v40, 0.0  ;;  %v4412_v55 = vmax.f32 %v4380_v52, 0.0  ;;  %v4413_v45 = vmax.f32 %v4381_v56, 0.0 }
 0x78b   : > { %4435 = vst.msk [vmem:[#allocation2 + $0x19] sm:$0xff] %vm336_vm0, %v4403_v9  ;;  %v4414_v60 = vmax.f32 %v4382_v39, 0.0  ;;  %v4415_v34 = vmax.f32 %v4383_v50, 0.0  ;;  %v4416_v32 = vmax.f32 %v4384_v2, 0.0  ;;  %v4417_v42 = vmax.f32 %v4385_v0, 0.0  ;;  %4436 = vst.msk [vmem:[#allocation2 + $0x21] sm:$0xff] %vm336_vm0, %v4404_v36 }
 0x78c   : > { %4439 = vst.msk [vmem:[#allocation2 + $0x49] sm:$0xff] %vm336_vm0, %v4407_v51  ;;  %4440 = vst.msk [vmem:[#allocation2 + $0x51] sm:$0xff] %vm336_vm0, %v4408_v44  ;;  %v4491_v25 = vld [vmem:[#allocation2 + $0x182] sm:$0x1]  ;;  %v4418_v18 = vmax.f32 %v4386_v30, 0.0  ;;  %v4419_v48 = vmax.f32 %v4387_v13, 0.0 }
 0x78d   : > { %4441 = vst.msk [vmem:[#allocation2 + $0x61] sm:$0xff] %vm336_vm0, %v4409_v62  ;;  %v4420_v54 = vmax.f32 %v4388_v11, 0.0  ;;  %v4421_v10 = vmax.f32 %v4389_v12, 0.0  ;;  %4442 = vst.msk [vmem:[#allocation2 + $0x69] sm:$0xff] %vm336_vm0, %v4410_v31  ;;  %v4422_v16 = vmax.f32 %v10179_v47, 0.0  ;;  %v4423_v58 = vmax.f32 %v10182_v17, 0.0 }
 0x78e   : > { %4443 = vst.msk [vmem:[#allocation2 + $0x79] sm:$0xff] %vm336_vm0, %v4411_v7  ;;  %4444 = vst.msk [vmem:[#allocation2 + $0x81] sm:$0xff] %vm336_vm0, %v4412_v55  ;;  %v4424_v53 = vmax.f32 %v10185_v5, 0.0  ;;  %v4425_v35 = vmax.f32 %v10188_v57, 0.0  ;;  %v4426_v14 = vmax.f32 %v10191_v33, 0.0  ;;  %v4427_v43 = vmax.f32 %v10194_v3, 0.0 }
 0x78f   : > { %4445 = vst.msk [vmem:[#allocation2 + $0x91] sm:$0xff] %vm336_vm0, %v4413_v45  ;;  %4446 = vst.msk [vmem:[#allocation2 + $0x99] sm:$0xff] %vm336_vm0, %v4414_v60  ;;  %v4428_v24 = vmax.f32 %v10197_v46, 0.0  ;;  %v4429_v29 = vmax.f32 %v10200_v20, 0.0  ;;  %v4430_v23 = vmax.f32 %v10203_v41, 0.0  ;;  %v4431_v38 = vmax.f32 %v10206_v61, 0.0 }
 0x790   : > { %4509 = vst.msk [vmem:[#allocation2 + $0x180] sm:$0x1] %vm2404_vm15, %v4491_v25  ;;  %v4432_v26 = vmax.f32 %v10209_v19, 0.0  ;;  %v4434_v59 = vmax.f32 %v10212_v22, 0.0 }
 0x791   : > { %4447 = vst.msk [vmem:[#allocation2 + $0xa9] sm:$0xff] %vm336_vm0, %v4415_v34  ;;  %4448 = vst.msk [vmem:[#allocation2 + $0xb1] sm:$0xff] %vm336_vm0, %v4416_v32  ;;  %v4467_v8 = vld [vmem:[#allocation2 + $0x31] sm:$0xff]  ;;  %v4468_v4 = vld [vmem:[#allocation2 + $0x39] sm:$0xff] }
 0x792   : > { %4449 = vst.msk [vmem:[#allocation2 + $0xc1] sm:$0xff] %vm336_vm0, %v4417_v42  ;;  %4450 = vst.msk [vmem:[#allocation2 + $0xc9] sm:$0xff] %vm336_vm0, %v4418_v18  ;;  %v4476_v63 = vld [vmem:[#allocation2 + $0x1a] sm:$0x1]  ;;  %v4512_v15 = vld [vmem:[#allocation2 + $0x27] sm:$0x1] }
 0x793   : > { %4451 = vst.msk [vmem:[#allocation2 + $0xd9] sm:$0xff] %vm336_vm0, %v4419_v48  ;;  %4452 = vst.msk [vmem:[#allocation2 + $0xe1] sm:$0xff] %vm336_vm0, %v4420_v54  ;;  %v10260_v49 = vld [vmem:[#allocation2 + $0x20] sm:$0xff]  ;;  %v4513_v1 = vld [vmem:[#allocation2 + $0x3f] sm:$0x1] }
 0x794   : > { %4453 = vst.msk [vmem:[#allocation2 + $0xf1] sm:$0xff] %vm336_vm0, %v4421_v10  ;;  %4454 = vst.msk [vmem:[#allocation2 + $0xf9] sm:$0xff] %vm336_vm0, %v4422_v16  ;;  %v10267_v28 = vld [vmem:[#allocation2 + $0x38] sm:$0xff]  ;;  %v4477_v27 = vld [vmem:[#allocation2 + $0x32] sm:$0x1] }
 0x795   : > { %4455 = vst.msk [vmem:[#allocation2 + $0x109] sm:$0xff] %vm336_vm0, %v4423_v58  ;;  %4456 = vst.msk [vmem:[#allocation2 + $0x111] sm:$0xff] %vm336_vm0, %v4424_v53  ;;  %v4514_v6 = vld [vmem:[#allocation2 + $0x57] sm:$0x1]  ;;  %v4478_v52 = vld [vmem:[#allocation2 + $0x4a] sm:$0x1] }
 0x796   : > { %4457 = vst.msk [vmem:[#allocation2 + $0x121] sm:$0xff] %vm336_vm0, %v4425_v35  ;;  %4458 = vst.msk [vmem:[#allocation2 + $0x129] sm:$0xff] %vm336_vm0, %v4426_v14  ;;  %v10273_v40 = vld [vmem:[#allocation2 + $0x50] sm:$0xff]  ;;  %v4515_v56 = vld [vmem:[#allocation2 + $0x6f] sm:$0x1] }
 0x797   : > { %4459 = vst.msk [vmem:[#allocation2 + $0x139] sm:$0xff] %vm336_vm0, %v4427_v43  ;;  %4460 = vst.msk [vmem:[#allocation2 + $0x141] sm:$0xff] %vm336_vm0, %v4428_v24  ;;  %v10279_v39 = vld [vmem:[#allocation2 + $0x68] sm:$0xff]  ;;  %v4479_v50 = vld [vmem:[#allocation2 + $0x62] sm:$0x1] }
 0x798   : > { %4461 = vst.msk [vmem:[#allocation2 + $0x151] sm:$0xff] %vm336_vm0, %v4429_v29  ;;  %4462 = vst.msk [vmem:[#allocation2 + $0x159] sm:$0xff] %vm336_vm0, %v4430_v23  ;;  %v4516_v2 = vld [vmem:[#allocation2 + $0x87] sm:$0x1]  ;;  %v4480_v30 = vld [vmem:[#allocation2 + $0x7a] sm:$0x1] }
 0x799   : > { %4463 = vst.msk [vmem:[#allocation2 + $0x169] sm:$0xff] %vm336_vm0, %v4431_v38  ;;  %4464 = vst.msk [vmem:[#allocation2 + $0x171] sm:$0xff] %vm336_vm0, %v4432_v26  ;;  %v10285_v0 = vld [vmem:[#allocation2 + $0x80] sm:$0xff]  ;;  %v4517_v13 = vld [vmem:[#allocation2 + $0x9f] sm:$0x1]  ;;  %v4696_v29 = vrot.slane %v10260_v49, 1 }
 0x79a   : > { %4466 = vst.msk [vmem:[#allocation2 + $0x189] sm:$0xff] %vm336_vm0, %v4434_v59  ;;  %4469 = vst.msk [vmem:[#allocation2 + $0x1] sm:$0xff] %vm336_vm0, %v4467_v8  ;;  %v10291_v11 = vld [vmem:[#allocation2 + $0x98] sm:$0xff]  ;;  %v4481_v12 = vld [vmem:[#allocation2 + $0x92] sm:$0x1] }
 0x79b   : > { %4470 = vst.msk [vmem:[#allocation2 + $0x9] sm:$0xff] %vm336_vm0, %v4468_v4  ;;  %4613 = vst.msk [vmem:[#allocation3 + $0x18] sm:$0xff] %vm336_vm0, %v10260_v49  ;;  %v4518_v47 = vld [vmem:[#allocation2 + $0xb7] sm:$0x1]  ;;  %v4482_v5 = vld [vmem:[#allocation2 + $0xaa] sm:$0x1] }
 0x79c   : > { %4494 = vst.msk [vmem:[#allocation2 + $0x18] sm:$0x1] %vm2404_vm15, %v4476_v63  ;;  %4530 = vst.msk [vmem:[#allocation2 + $0x29] sm:$0x1] %vm2404_vm15, %v4512_v15  ;;  %v10297_v17 = vld [vmem:[#allocation2 + $0xb0] sm:$0xff]  ;;  %v10319_v19 = vld [vmem:[#allocation2 + $0xc8] sm:$0xff] }
 0x79d   : > { %4531 = vst.msk [vmem:[#allocation2 + $0x41] sm:$0x1] %vm2404_vm15, %v4513_v1  ;;  %4495 = vst.msk [vmem:[#allocation2 + $0x30] sm:$0x1] %vm2404_vm15, %v4477_v27  ;;  %v4519_v57 = vld [vmem:[#allocation2 + $0xcf] sm:$0x1] }
 0x79e   : > { %4615 = vst.msk [vmem:[#allocation3 + $0x28] sm:$0xff] %vm336_vm0, %v10267_v28  ;;  %4617 = vst.msk [vmem:[#allocation3 + $0x38] sm:$0xff] %vm336_vm0, %v10273_v40  ;;  %v4483_v21 = vld [vmem:[#allocation2 + $0xc2] sm:$0x1]  ;;  %v10346_v62 = vld [vmem:[#allocation2 + $0xf8] sm:$0xff] }
 0x79f   : > { %4532 = vst.msk [vmem:[#allocation2 + $0x59] sm:$0x1] %vm2404_vm15, %v4514_v6  ;;  %4496 = vst.msk [vmem:[#allocation2 + $0x48] sm:$0x1] %vm2404_vm15, %v4478_v52  ;;  %v10332_v9 = vld [vmem:[#allocation2 + $0xe0] sm:$0xff]  ;;  %v10366_v48 = vld [vmem:[#allocation2 + $0x110] sm:$0xff] }
 0x7a0   : > { %4533 = vst.msk [vmem:[#allocation2 + $0x71] sm:$0x1] %vm2404_vm15, %v4515_v56  ;;  %4497 = vst.msk [vmem:[#allocation2 + $0x60] sm:$0x1] %vm2404_vm15, %v4479_v50  ;;  %v4520_v45 = vld [vmem:[#allocation2 + $0xe7] sm:$0x1] }
 0x7a1   : > { %4619 = vst.msk [vmem:[#allocation3 + $0x48] sm:$0xff] %vm336_vm0, %v10279_v39  ;;  %4621 = vst.msk [vmem:[#allocation3 + $0x58] sm:$0xff] %vm336_vm0, %v10285_v0  ;;  %v4475_v46 = vld [vmem:[#allocation2 + $0x2] sm:$0x1]  ;;  %v4484_v32 = vld [vmem:[#allocation2 + $0xda] sm:$0x1] }
 0x7a2   : > { %4534 = vst.msk [vmem:[#allocation2 + $0x89] sm:$0x1] %vm2404_vm15, %v4516_v2  ;;  %4498 = vst.msk [vmem:[#allocation2 + $0x78] sm:$0x1] %vm2404_vm15, %v4480_v30  ;;  %v4511_v33 = vld [vmem:[#allocation2 + $0xf] sm:$0x1] }
 0x7a3   : > { %4535 = vst.msk [vmem:[#allocation2 + $0xa1] sm:$0x1] %vm2404_vm15, %v4517_v13  ;;  %4499 = vst.msk [vmem:[#allocation2 + $0x90] sm:$0x1] %vm2404_vm15, %v4481_v12  ;;  %v10299_v3 = vld [vmem:[#allocation2 + $0x8] sm:$0xff]  ;;  %v10309_v20 = vld [vmem:[#allocation2 + $0x18] sm:$0xff] }
 0x7a4   : > { %4623 = vst.msk [vmem:[#allocation3 + $0x68] sm:$0xff] %vm336_vm0, %v10291_v11  ;;  %4625 = vst.msk [vmem:[#allocation3 + $0x78] sm:$0xff] %vm336_vm0, %v10297_v17  ;;  %v10313_v41 = vld [vmem:[#allocation2 + $0x30] sm:$0xff]  ;;  %v10340_v51 = vld [vmem:[#allocation2 + $0x28] sm:$0x3]  ;;  %v4691_v7 = vrot.slane %v10299_v3, 1 }
 0x7a5   : > { %4536 = vst.msk [vmem:[#allocation2 + $0xb9] sm:$0x1] %vm2404_vm15, %v4518_v47  ;;  %4500 = vst.msk [vmem:[#allocation2 + $0xa8] sm:$0x1] %vm2404_vm15, %v4482_v5  ;;  %v4521_v42 = vld [vmem:[#allocation2 + $0xff] sm:$0x1] }
 0x7a6   : > { %4537 = vst.msk [vmem:[#allocation2 + $0xd1] sm:$0x1] %vm2404_vm15, %v4519_v57  ;;  %4529 = vst.msk [vmem:[#allocation2 + $0x11] sm:$0x1] %vm2404_vm15, %v4511_v33  ;;  %v10317_v61 = vld [vmem:[#allocation2 + $0x48] sm:$0xff]  ;;  %v4698_v16 = vrot.slane %v10340_v51, 1 }
 0x7a7   : > { %4611 = vst.msk [vmem:[#allocation3 + $0x8] sm:$0xff] %vm336_vm0, %v10299_v3  ;;  %4612 = vst.msk [vmem:[#allocation3 + $0x10] sm:$0xff] %vm336_vm0, %v10309_v20  ;;  %v10323_v22 = vld [vmem:[#allocation2 + $0x60] sm:$0xff]  ;;  %v4485_v18 = vld [vmem:[#allocation2 + $0xf2] sm:$0x1]  ;;  %v4695_v58 = vrot.slane %v10309_v20, 1 }
 0x7a8   : > { %4493 = vst.msk [vmem:[#allocation2] sm:$0x1] %vm2404_vm15, %v4475_v46  ;;  %4501 = vst.msk [vmem:[#allocation2 + $0xc0] sm:$0x1] %vm2404_vm15, %v4483_v21  ;;  %v10362_v25 = vld [vmem:[#allocation2 + $0x40] sm:$0x3]  ;;  %v10393_v59 = vsel %vm568_vm2, %v4696_v29, %v4698_v16 }
 0x7a9   : > { %4614 = vst.msk [vmem:[#allocation3 + $0x20] sm:$0xff] %vm336_vm0, %v10313_v41  ;;  %4616 = vst.msk [vmem:[#allocation3 + $0x30] sm:$0xff] %vm336_vm0, %v10317_v61  ;;  %v10329_v37 = vld [vmem:[#allocation2 + $0x78] sm:$0xff]  ;;  %v4522_v53 = vld [vmem:[#allocation2 + $0x117] sm:$0x1]  ;;  %v10396_v8 = vsel %vm568_vm2, %v4695_v58, %v4696_v29  ;;  %v4703_v4 = vrot.slane %v10362_v25, 1 }
 0x7aa   : > { %4627 = vst.msk [vmem:[#allocation3 + $0x88] sm:$0xff] %vm336_vm0, %v10319_v19  ;;  %4618 = vst.msk [vmem:[#allocation3 + $0x40] sm:$0xff] %vm336_vm0, %v10323_v22  ;;  %v10336_v36 = vld [vmem:[#allocation2 + $0x90] sm:$0xff]  ;;  %v4486_v35 = vld [vmem:[#allocation2 + $0x10a] sm:$0x1]  ;;  %v4700_v63 = vrot.slane %v10313_v41, 1 }
 0x7ab   : > { %4620 = vst.msk [vmem:[#allocation3 + $0x50] sm:$0xff] %vm336_vm0, %v10329_v37  ;;  %4629 = vst.msk [vmem:[#allocation3 + $0x98] sm:$0xff] %vm336_vm0, %v10332_v9  ;;  %v4523_v43 = vld [vmem:[#allocation2 + $0x12f] sm:$0x1]  ;;  %v4487_v23 = vld [vmem:[#allocation2 + $0x122] sm:$0x1] }
 0x7ac   : > { %4622 = vst.msk [vmem:[#allocation3 + $0x60] sm:$0xff] %vm336_vm0, %v10336_v36  ;;  %v10344_v44 = vld [vmem:[#allocation2 + $0xa8] sm:$0xff]  ;;  %12035 = vst [vmem:[#allocation31_spill] sm:$0xff] %v10346_v62  ;;  %v4488_v38 = vld [vmem:[#allocation2 + $0x13a] sm:$0x1]  ;;  %v4701_v56 = vrot.slane %v10267_v28, 1 }
 0x7ad   : > { %v10348_v31 = vld [vmem:[#allocation2 + $0x10] sm:$0x3]  ;;  %4624 = vst.msk [vmem:[#allocation3 + $0x70] sm:$0xff] %vm336_vm0, %v10344_v44  ;;  %4631 = vst.msk [vmem:[#allocation3 + $0xa8] sm:$0xff] %vm336_vm0, %v10346_v62  ;;  %v10381_v24 = vld [vmem:[#allocation2 + $0x128] sm:$0xff]  ;;  %v4705_v5 = vrot.slane %v10317_v61, 1 }
 0x7ae   : > { %v4693_v60 = vrot.slane %v10348_v31, 1  ;;  %4538 = vst.msk [vmem:[#allocation2 + $0xe9] sm:$0x1] %vm2404_vm15, %v4520_v45  ;;  %4502 = vst.msk [vmem:[#allocation2 + $0xd8] sm:$0x1] %vm2404_vm15, %v4484_v32  ;;  %v10390_v26 = vld [vmem:[#allocation2 + $0x140] sm:$0xff]  ;;  %v10427_v13 = vsel %vm568_vm2, %v4701_v56, %v4703_v4  ;;  %v10430_v12 = vsel %vm568_vm2, %v4700_v63, %v4701_v56 }
 0x7af   : > { %v10351_v55 = vld [vmem:[#allocation2] sm:$0xff]  ;;  %4539 = vst.msk [vmem:[#allocation2 + $0x101] sm:$0x1] %vm2404_vm15, %v4521_v42  ;;  %4503 = vst.msk [vmem:[#allocation2 + $0xf0] sm:$0x1] %vm2404_vm15, %v4485_v18  ;;  %v10411_v6 = vld [vmem:[#allocation2 + $0x158] sm:$0xff] }
 0x7b0   : > { %v4690_v34 = vrot.slane %v10351_v55, 1  ;;  %4610 = vst.msk [vmem:[#allocation3] sm:$0xff] %vm336_vm0, %v10351_v55  ;;  %v4694_v54 = vsel %vm568_vm2, %v4691_v7, %v4693_v60  ;;  %4633 = vst.msk [vmem:[#allocation3 + $0xb8] sm:$0xff] %vm336_vm0, %v10366_v48  ;;  %v10377_v14 = vld [vmem:[#allocation2 + $0xc0] sm:$0xff]  ;;  %v4489_v1 = vld [vmem:[#allocation2 + $0x152] sm:$0x1] }
 0x7b1   : > { %4772 = vrot.lane.b32.xlu1 %v4694_v54, %s7123_s28  ;;  %4540 = vst.msk [vmem:[#allocation2 + $0x119] sm:$0x1] %vm2404_vm15, %v4522_v53  ;;  %4504 = vst.msk [vmem:[#allocation2 + $0x108] sm:$0x1] %vm2404_vm15, %v4486_v35  ;;  %v4524_v15 = vld [vmem:[#allocation2 + $0x147] sm:$0x1] }
 0x7b2   : > { %v4692_v10 = vsel %vm568_vm2, %v4690_v34, %v4691_v7  ;;  %12036 = vst [vmem:[#allocation34_spill] sm:$0xff] %v10381_v24  ;;  %4626 = vst.msk [vmem:[#allocation3 + $0x80] sm:$0xff] %vm336_vm0, %v10377_v14  ;;  %v10407_v27 = vld [vmem:[#allocation2 + $0x58] sm:$0x3]  ;;  %v10413_v52 = vld [vmem:[#allocation2 + $0x170] sm:$0xff]  ;;  %v4706_v21 = vrot.slane %v10273_v40, 1 }
 0x7b3   : > { %4770 = vrot.lane.b32.xlu0 %v4692_v10, %s7123_s28  ;;  %4541 = vst.msk [vmem:[#allocation2 + $0x131] sm:$0x1] %vm2404_vm15, %v4523_v43  ;;  %4505 = vst.msk [vmem:[#allocation2 + $0x120] sm:$0x1] %vm2404_vm15, %v4487_v23  ;;  %v4525_v30 = vld [vmem:[#allocation2 + $0x15f] sm:$0x1] }
 0x7b4   : > { %4635 = vst.msk [vmem:[#allocation3 + $0xc8] sm:$0xff] %vm336_vm0, %v10381_v24  ;;  %12037 = vst [vmem:[#allocation36_spill] sm:$0xff] %v10390_v26  ;;  %v4708_v47 = vrot.slane %v10407_v27, 1  ;;  %v10443_v33 = vld [vmem:[#allocation2 + $0x70] sm:$0x3]  ;;  %v10461_v54 = vsel %vm568_vm2, %v4705_v5, %v4706_v21  ;;  %v4710_v16 = vrot.slane %v10323_v22, 1 }
 0x7b5   : > { %4506 = vst.msk [vmem:[#allocation2 + $0x138] sm:$0x1] %vm2404_vm15, %v4488_v38  ;;  %4776 = vrot.lane.b32.xlu1 %v10393_v59, %s7123_s28  ;;  %4542 = vst.msk [vmem:[#allocation2 + $0x149] sm:$0x1] %vm2404_vm15, %v4524_v15  ;;  %v10416_v50 = vld [vmem:[#allocation2 + $0xd8] sm:$0xff]  ;;  %v4471_v60 = vld [vmem:[#allocation2 + $0x169] sm:$0xff] }
 0x7b6   : > { %4637 = vst.msk [vmem:[#allocation3 + $0xd8] sm:$0xff] %vm336_vm0, %v10390_v26  ;;  %12038 = vst [vmem:[#allocation37_spill] sm:$0xff] %v10411_v6  ;;  %v10424_v2 = vld [vmem:[#allocation2 + $0xf0] sm:$0xff]  ;;  %v4490_v46 = vld [vmem:[#allocation2 + $0x16a] sm:$0x1]  ;;  %v10458_v18 = vsel %vm568_vm2, %v4706_v21, %v4708_v47  ;;  %v4713_v10 = vrot.slane %v10443_v33, 1 }
 0x7b7   : > { %4774 = vrot.lane.b32.xlu0 %v10396_v8, %s7123_s28  ;;  %4507 = vst.msk [vmem:[#allocation2 + $0x150] sm:$0x1] %vm2404_vm15, %v4489_v1  ;;  %12039 = vst [vmem:[#allocation38_spill] sm:$0xff] %v10413_v52  ;;  %v4526_v45 = vld [vmem:[#allocation2 + $0x177] sm:$0x1]  ;;  %v4711_v35 = vrot.slane %v10279_v39, 1 }
 0x7b8   : > { %4639 = vst.msk [vmem:[#allocation3 + $0xe8] sm:$0xff] %vm336_vm0, %v10411_v6  ;;  %4641 = vst.msk [vmem:[#allocation3 + $0xf8] sm:$0xff] %vm336_vm0, %v10413_v52  ;;  %v10436_v57 = vld [vmem:[#allocation2 + $0x108] sm:$0xff]  ;;  %v4472_v42 = vld [vmem:[#allocation2 + $0x171] sm:$0xff]  ;;  %v4715_v38 = vrot.slane %v10329_v37, 1  ;;  %v4716_v15 = vrot.slane %v10285_v0, 1 }
 0x7b9   : > { %4628 = vst.msk [vmem:[#allocation3 + $0x90] sm:$0xff] %vm336_vm0, %v10416_v50  ;;  %4630 = vst.msk [vmem:[#allocation3 + $0xa0] sm:$0xff] %vm336_vm0, %v10424_v2  ;;  %4780 = vrot.lane.b32.xlu1 %v10427_v13, %s7123_s28  ;;  %v4527_v32 = vld [vmem:[#allocation2 + $0x18f] sm:$0x1]  ;;  %v10475_v53 = vld [vmem:[#allocation2 + $0x88] sm:$0x3]  ;;  %v10481_v43 = vsel %vm568_vm2, %v4711_v35, %v4713_v10  ;;  %v10484_v29 = vsel %vm568_vm2, %v4710_v16, %v4711_v35 }
 0x7ba   : > { %12040 = vst [vmem:[#allocation39_spill] sm:$0xff] %v10436_v57  ;;  %4543 = vst.msk [vmem:[#allocation2 + $0x161] sm:$0x1] %vm2404_vm15, %v4525_v30  ;;  %v10448_v7 = vld [vmem:[#allocation2 + $0x120] sm:$0xff]  ;;  %v4718_v23 = vrot.slane %v10475_v53, 1  ;;  %v10504_v30 = vsel %vm568_vm2, %v4715_v38, %v4716_v15  ;;  %v4720_v5 = vrot.slane %v10336_v36, 1 }
 0x7bb   : > { %4778 = vrot.lane.b32.xlu0 %v10430_v12, %s7123_s28  ;;  %4632 = vst.msk [vmem:[#allocation3 + $0xb0] sm:$0xff] %vm336_vm0, %v10436_v57  ;;  %4634 = vst.msk [vmem:[#allocation3 + $0xc0] sm:$0xff] %vm336_vm0, %v10448_v7  ;;  %v10492_v4 = vld [vmem:[#allocation2 + $0xa0] sm:$0x3]  ;;  %v10512_v21 = vld [vmem:[#allocation2 + $0xb8] sm:$0x3] }
 0x7bc   : > { %4508 = vst.msk [vmem:[#allocation2 + $0x168] sm:$0x1] %vm2404_vm15, %v4490_v46  ;;  %v10453_v34 = vld [vmem:[#allocation2 + $0x138] sm:$0xff]  ;;  %4544 = vst.msk [vmem:[#allocation2 + $0x179] sm:$0x1] %vm2404_vm15, %v4526_v45  ;;  %v10501_v56 = vsel %vm568_vm2, %v4716_v15, %v4718_v23  ;;  %v4723_v47 = vrot.slane %v10492_v4, 1 }
 0x7bd   : > { %12041 = vst [vmem:[#allocation40_spill] sm:$0xff] %v10453_v34  ;;  %4473 = vst.msk [vmem:[#allocation2 + $0x199] sm:$0xff] %vm336_vm0, %v4471_v60  ;;  %4784 = vrot.lane.b32.xlu1 %v10458_v18, %s7123_s28  ;;  %v4721_v45 = vrot.slane %v10291_v11, 1  ;;  %v4725_v10 = vrot.slane %v10344_v44, 1  ;;  %v10528_v16 = vld [vmem:[#allocation2 + $0xd0] sm:$0x3] }
 0x7be   : > { %4636 = vst.msk [vmem:[#allocation3 + $0xd0] sm:$0xff] %vm336_vm0, %v10453_v34  ;;  %v10467_v58 = vld [vmem:[#allocation2 + $0x150] sm:$0xff]  ;;  %4474 = vst.msk [vmem:[#allocation2 + $0x1a1] sm:$0xff] %vm336_vm0, %v4472_v42  ;;  %v4728_v42 = vrot.slane %v10512_v21, 1  ;;  %v4726_v35 = vrot.slane %v10297_v17, 1  ;;  %v4733_v15 = vrot.slane %v10528_v16, 1 }
 0x7bf   : > { %12042 = vst [vmem:[#allocation41_spill] sm:$0xff] %v10467_v58  ;;  %4545 = vst.msk [vmem:[#allocation2 + $0x191] sm:$0x1] %vm2404_vm15, %v4527_v32  ;;  %4782 = vrot.lane.b32.xlu0 %v10461_v54, %s7123_s28  ;;  %v10517_v60 = vsel %vm568_vm2, %v4721_v45, %v4723_v47  ;;  %v10520_v32 = vsel %vm568_vm2, %v4720_v5, %v4721_v45  ;;  %v10543_v47 = vld [vmem:[#allocation2 + $0xe8] sm:$0x3]  ;;  %v4731_v5 = vrot.slane %v10319_v19, 1 }
 0x7c0   : > { %4638 = vst.msk [vmem:[#allocation3 + $0xe0] sm:$0xff] %vm336_vm0, %v10467_v58  ;;  %v10532_v23 = vsel %vm568_vm2, %v4726_v35, %v4728_v42  ;;  %v10535_v38 = vsel %vm568_vm2, %v4725_v10, %v4726_v35  ;;  %v4738_v42 = vrot.slane %v10543_v47, 1  ;;  %v4735_v10 = vrot.slane %v10416_v50, 1  ;;  %v10558_v35 = vld [vmem:[#allocation2 + $0x100] sm:$0x3] }
 0x7c1   : > { %4788 = vrot.lane.b32.xlu1 %v10481_v43, %s7123_s28  ;;  %12044 = vst [vmem:[#allocation43_spill] sm:$0xff] %v10558_v35  ;;  %v4736_v52 = vrot.slane %v10332_v9, 1  ;;  %v10573_v6 = vld [vmem:[#allocation2 + $0x118] sm:$0x3]  ;;  %v4741_v58 = vrot.slane %v10346_v62, 1  ;;  %v4745_v26 = vrot.slane %v10436_v57, 1 }
 0x7c2   : > { %12045 = vst [vmem:[#allocation44_spill] sm:$0xff] %v10573_v6  ;;  %v4594_v34 = vld [vmem:[#allocation2 + $0x130] sm:$0x3] }
 0x7c3   : > { %4786 = vrot.lane.b32.xlu0 %v10484_v29, %s7123_s28  ;;  %v10494_v63 = vld [vmem:[#allocation2 + $0x168] sm:$0xff] }
 0x7c4   : > { %12043 = vst [vmem:[#allocation42_spill] sm:$0xff] %v10494_v63  ;;  %4640 = vst.msk [vmem:[#allocation3 + $0xf0] sm:$0xff] %vm336_vm0, %v10494_v63  ;;  %v4492_v1 = vld [vmem:[#allocation2 + $0x19a] sm:$0x1]  ;;  %v4740_v63 = vrot.slane %v10424_v2, 1 }
 0x7c5   : > { %4510 = vst.msk [vmem:[#allocation2 + $0x198] sm:$0x1] %vm2404_vm15, %v4492_v1  ;;  %v4528_v46 = vld [vmem:[#allocation2 + $0x1a7] sm:$0x1]  ;;  %4792 = vrot.lane.b32.xlu1 %v10501_v56, %s7123_s28  ;;  %v4730_v1 = vrot.slane %v10377_v14, 1 }
 0x7c6   : > { %4546 = vst.msk [vmem:[#allocation2 + $0x1a9] sm:$0x1] %vm2404_vm15, %v4528_v46  ;;  %v10547_v46 = vsel %vm568_vm2, %v4731_v5, %v4733_v15  ;;  %v10562_v15 = vsel %vm568_vm2, %v4736_v52, %v4738_v42 }
 0x7c7   : > { %4790 = vrot.lane.b32.xlu0 %v10504_v30, %s7123_s28  ;;  %v10550_v45 = vsel %vm568_vm2, %v4730_v1, %v4731_v5  ;;  %v10565_v1 = vsel %vm568_vm2, %v4735_v10, %v4736_v52  ;;  %v4743_v5 = vrot.slane %v10558_v35, 1  ;;  %v10580_v52 = vsel %vm568_vm2, %v4740_v63, %v4741_v58 }
 0x7c8   : > { %v4748_v10 = vrot.slane %v10573_v6, 1  ;;  %v4746_v35 = vrot.slane %v10366_v48, 1  ;;  %v4750_v63 = vrot.slane %v10448_v7, 1  ;;  %v4751_v6 = vrot.slane %v10381_v24, 1 }
 0x7c9   : > { %4796 = vrot.lane.b32.xlu1 %v10517_v60, %s7123_s28  ;;  %v10577_v42 = vsel %vm568_vm2, %v4741_v58, %v4743_v5  ;;  %v4753_v58 = vrot.slane %v4594_v34, 1  ;;  %v4898_v34 = vrot.slane %v10351_v55, 2 }
 0x7ca   : > { %v10590_v62 = vsel %vm568_vm2, %v4746_v35, %v4748_v10  ;;  %v10593_v5 = vsel %vm568_vm2, %v4745_v26, %v4746_v35  ;;  %v10605_v10 = vsel %vm568_vm2, %v4750_v63, %v4751_v6  ;;  %v4901_v26 = vrot.slane %v10348_v31, 2 }
 0x7cb   : > { %4794 = vrot.lane.b32.xlu0 %v10520_v32, %s7123_s28  ;;  %v10602_v57 = vsel %vm568_vm2, %v4751_v6, %v4753_v58  ;;  %v4899_v35 = vrot.slane %v10299_v3, 2  ;;  %v4903_v31 = vrot.slane %v10309_v20, 2  ;;  %v4904_v3 = vrot.slane %v10260_v49, 2 }
 0x7cd   : > { %4800 = vrot.lane.b32.xlu1 %v10532_v23, %s7123_s28  ;;  %v4902_v24 = vsel %vm778_vm3, %v4899_v35, %v4901_v26  ;;  %v4900_v58 = vsel %vm778_vm3, %v4898_v34, %v4899_v35  ;;  %v4905_v55 = vsel %vm778_vm3, %v4903_v31, %v4904_v3  ;;  %v4551_v26 = vld [vmem:[%s11742_s5 + $0x20] sm:$0xff]  ;;  %v4552_v34 = vld [vmem:[%s11742_s5 + $0x28] sm:$0xff]  ;;  %v4553_v31 = vld [vmem:[%s11742_s5 + $0x30] sm:$0xff] }
 0x7ce   : > { %v7064_v35 = vpack.c.bf16 %v4552_v34, %v4551_v26 }
 0x7cf   : > { %4798 = vrot.lane.b32.xlu0 %v10535_v38, %s7123_s28 }
 0x7d1   : > { %4804 = vrot.lane.b32.xlu1 %v10547_v46, %s7123_s28 }
 0x7d3   : > { %4802 = vrot.lane.b32.xlu0 %v10550_v45, %s7123_s28 }
 0x7d5   : > { %4808 = vrot.lane.b32.xlu1 %v10562_v15, %s7123_s28 }
 0x7d7   : > { %4806 = vrot.lane.b32.xlu0 %v10565_v1, %s7123_s28 }
 0x7d9   : > { %4812 = vrot.lane.b32.xlu1 %v10577_v42, %s7123_s28 }
 0x7db   : > { %4810 = vrot.lane.b32.xlu0 %v10580_v52, %s7123_s28 }
 0x7dd   : > { %4816 = vrot.lane.b32.xlu1 %v10590_v62, %s7123_s28 }
 0x7df   : > { %4814 = vrot.lane.b32.xlu0 %v10593_v5, %s7123_s28 }
 0x7e1   : > { %4820 = vrot.lane.b32.xlu1 %v10602_v57, %s7123_s28 }
 0x7e3   : > { %4818 = vrot.lane.b32.xlu0 %v10605_v10, %s7123_s28 }
 0x7e5   : > { %4980 = vrot.lane.b32.xlu1 %v4902_v24, %s7124_s29  ;;  %v4906_v24 = vrot.slane %v10340_v51, 2 }
 0x7e7   : > { %4978 = vrot.lane.b32.xlu0 %v4900_v58, %s7124_s29  ;;  %v4907_v6 = vsel %vm778_vm3, %v4904_v3, %v4906_v24  ;;  %v4908_v58 = vrot.slane %v10313_v41, 2  ;;  %v4554_v3 = vld [vmem:[%s11742_s5 + $0x38] sm:$0xff] }
 0x7e8   : > { %v7068_v24 = vpack.c.bf16 %v4554_v3, %v4553_v31  ;;  %v4918_v31 = vrot.slane %v10323_v22, 2  ;;  %v4919_v3 = vrot.slane %v10279_v39, 2 }
 0x7e9   : > { %5110 = vrot.lane.b32.xlu1 %v10260_v49, %s7125_s30  ;;  %v4548_v49 = vld [vmem:[%s11742_s5 + $0x8] sm:$0xff] }
 0x7eb   : > { %5108 = vrot.lane.b32.xlu0 %v10309_v20, %s7125_s30  ;;  %v4547_v20 = vld [vmem:[%s11742_s5] sm:$0xff] }
 0x7ec   : > { %v7056_v51 = vpack.c.bf16 %v4548_v49, %v4547_v20 }
 0x7ed   : > { %5244 = vrot.lane.b32.xlu1 %v10393_v59, %s7126_s7  ;;  %v4549_v59 = vld [vmem:[%s11742_s5 + $0x10] sm:$0xff] }
 0x7ee   : > { %7057 = vmatprep.subr.bf16.mxu0 %v7056_v51 }
 0x7ef   : > { %5242 = vrot.lane.b32.xlu0 %v10396_v8, %s7126_s7  ;;  %v4550_v8 = vld [vmem:[%s11742_s5 + $0x18] sm:$0xff]  ;;  %7059 = vmatpush3.bf16.msra.mxu0 %v7056_v51 }
 0x7f0   : > { %v7060_v63 = vpack.c.bf16 %v4550_v8, %v4549_v59 }
 0x7f1   : > { %4982 = vrot.lane.b32.xlu1 %v4905_v55, %s7124_s29 }
 0x7f2   : > { %7061 = vmatprep.subr.bf16.mxu0 %v7060_v63 }
 0x7f3   : > { %5375 = vrot.lane.b32.xlu0 %v4905_v55, %s7127_s8  ;;  %7063 = vmatpush3.bf16.msra.mxu0 %v7060_v63  ;;  %v4909_v55 = vrot.slane %v10267_v28, 2 }
 0x7f4   : > { %7065 = vmatprep.subr.bf16.mxu0 %v7064_v35 }
 0x7f5   : > { %5505 = vrot.lane.b32.xlu1 %v10313_v41, %s7128_s22 }
 0x7f7   : > { %5377 = vrot.lane.b32.xlu0 %v4907_v6, %s7127_s8  ;;  %7067 = vmatpush3.bf16.msra.mxu0 %v7064_v35 }
 0x7f8   : > { %7069 = vmatprep.subr.bf16.mxu0 %v7068_v24 }
 0x7f9   : > { %5112 = vrot.lane.b32.xlu1 %v10313_v41, %s7125_s30  ;;  %v4910_v41 = vsel %vm778_vm3, %v4908_v58, %v4909_v55 }
 0x7fb   : > { %4984 = vrot.lane.b32.xlu0 %v4907_v6, %s7124_s29  ;;  %7071 = vmatpush3.bf16.msra.mxu0 %v7068_v24  ;;  %v4911_v6 = vrot.slane %v10362_v25, 2  ;;  %v4913_v25 = vrot.slane %v10317_v61, 2 }
 0x7fd   : > { %5639 = vrot.lane.b32.xlu1 %v10430_v12, %s7129_s9 }
 0x7ff   : > { %5507 = vrot.lane.b32.xlu0 %v10267_v28, %s7128_s22 }
 0x801   : > { %5246 = vrot.lane.b32.xlu1 %v10430_v12, %s7126_s7  ;;  %v4555_v12 = vld [vmem:[%s11742_s5 + $0x40] sm:$0xff] }
 0x802   : > { %6974 = vmatprep.subr.mxu0 %v4555_v12 }
 0x803   : > { %5114 = vrot.lane.b32.xlu0 %v10267_v28, %s7125_s30  ;;  %6975 = vmatpush3.msra.mxu0 %v4555_v12  ;;  %v4912_v28 = vsel %vm778_vm3, %v4909_v55, %v4911_v6 }
 0x805   : > { %5772 = vrot.lane.b32.xlu1 %v4910_v41, %s7130_s12 }
 0x807   : > { %5641 = vrot.lane.b32.xlu0 %v10427_v13, %s7129_s9 }
 0x809   : > { %5379 = vrot.lane.b32.xlu1 %v4910_v41, %s7127_s8 }
 0x80b   : > { %5248 = vrot.lane.b32.xlu0 %v10427_v13, %s7126_s7  ;;  %v4914_v13 = vrot.slane %v10273_v40, 2 }
 0x80d   : > { %4986 = vrot.lane.b32.xlu1 %v4910_v41, %s7124_s29  ;;  %v4915_v20 = vsel %vm778_vm3, %v4913_v25, %v4914_v13  ;;  %v4920_v41 = vsel %vm778_vm3, %v4918_v31, %v4919_v3 }
 0x80f   : > { %5774 = vrot.lane.b32.xlu0 %v4912_v28, %s7130_s12 }
 0x811   : > { %5509 = vrot.lane.b32.xlu1 %v10317_v61, %s7128_s22 }
 0x813   : > { %5381 = vrot.lane.b32.xlu0 %v4912_v28, %s7127_s8 }
 0x815   : > { %5116 = vrot.lane.b32.xlu1 %v10317_v61, %s7125_s30  ;;  %v4916_v61 = vrot.slane %v10407_v27, 2 }
 0x817   : > { %4988 = vrot.lane.b32.xlu0 %v4912_v28, %s7124_s29  ;;  %v4917_v59 = vsel %vm778_vm3, %v4914_v13, %v4916_v61 }
 0x819   : > { %5643 = vrot.lane.b32.xlu1 %v10461_v54, %s7129_s9 }
 0x81b   : > { %5511 = vrot.lane.b32.xlu0 %v10273_v40, %s7128_s22 }
 0x81d   : > { %5250 = vrot.lane.b32.xlu1 %v10461_v54, %s7126_s7 }
 0x81f   : > { %5118 = vrot.lane.b32.xlu0 %v10273_v40, %s7125_s30 }
 0x821   : > { %5776 = vrot.lane.b32.xlu1 %v4915_v20, %s7130_s12 }
 0x823   : > { %5645 = vrot.lane.b32.xlu0 %v10458_v18, %s7129_s9  ;;  %v4773_v49 = vpop.permute.xlu1 %4772 }
 0x824   : > { %4867 = vst.msk [vmem:[#allocation3 + $0x8] sm:$0xff] %vm745_vm4, %v4773_v49 }
 0x825   : > { %v4771_v51 = vpop.permute.xlu0 %4770  ;;  %5383 = vrot.lane.b32.xlu1 %v4915_v20, %s7127_s8 }
 0x826   : > { %4866 = vst.msk [vmem:[#allocation3] sm:$0xff] %vm745_vm4, %v4771_v51 }
 0x827   : > { %5252 = vrot.lane.b32.xlu0 %v10458_v18, %s7126_s7  ;;  %v4777_v40 = vpop.permute.xlu1 %4776 }
 0x828   : > { %4869 = vst.msk [vmem:[#allocation3 + $0x18] sm:$0xff] %vm745_vm4, %v4777_v40  ;;  %v4923_v40 = vrot.slane %v10329_v37, 2 }
 0x829   : > { %v4775_v54 = vpop.permute.xlu0 %4774  ;;  %4990 = vrot.lane.b32.xlu1 %v4915_v20, %s7124_s29 }
 0x82a   : > { %4868 = vst.msk [vmem:[#allocation3 + $0x10] sm:$0xff] %vm745_vm4, %v4775_v54  ;;  %v4924_v54 = vrot.slane %v10285_v0, 2 }
 0x82b   : > { %5778 = vrot.lane.b32.xlu0 %v4917_v59, %s7130_s12  ;;  %v4781_v8 = vpop.permute.xlu1 %4780 }
 0x82c   : > { %4871 = vst.msk [vmem:[#allocation3 + $0x28] sm:$0xff] %vm745_vm4, %v4781_v8 }
 0x82d   : > { %v4779_v63 = vpop.permute.xlu0 %4778  ;;  %5513 = vrot.lane.b32.xlu1 %v10323_v22, %s7128_s22 }
 0x82e   : > { %4870 = vst.msk [vmem:[#allocation3 + $0x20] sm:$0xff] %vm745_vm4, %v4779_v63  ;;  %v4925_v63 = vsel %vm778_vm3, %v4923_v40, %v4924_v54  ;;  %v4933_v40 = vrot.slane %v10344_v44, 2 }
 0x82f   : > { %5385 = vrot.lane.b32.xlu0 %v4917_v59, %s7127_s8  ;;  %v4785_v27 = vpop.permute.xlu1 %4784 }
 0x830   : > { %4873 = vst.msk [vmem:[#allocation3 + $0x38] sm:$0xff] %vm745_vm4, %v4785_v27 }
 0x831   : > { %v4783_v18 = vpop.permute.xlu0 %4782  ;;  %5120 = vrot.lane.b32.xlu1 %v10323_v22, %s7125_s30 }
 0x832   : > { %4872 = vst.msk [vmem:[#allocation3 + $0x30] sm:$0xff] %vm745_vm4, %v4783_v18 }
 0x833   : > { %4992 = vrot.lane.b32.xlu0 %v4917_v59, %s7124_s29  ;;  %v4789_v26 = vpop.permute.xlu1 %4788 }
 0x834   : > { %4875 = vst.msk [vmem:[#allocation3 + $0x48] sm:$0xff] %vm745_vm4, %v4789_v26 }
 0x835   : > { %v4787_v34 = vpop.permute.xlu0 %4786  ;;  %5647 = vrot.lane.b32.xlu1 %v10484_v29, %s7129_s9 }
 0x836   : > { %4874 = vst.msk [vmem:[#allocation3 + $0x40] sm:$0xff] %vm745_vm4, %v4787_v34 }
 0x837   : > { %5515 = vrot.lane.b32.xlu0 %v10279_v39, %s7128_s22  ;;  %v4793_v35 = vpop.permute.xlu1 %4792 }
 0x838   : > { %4877 = vst.msk [vmem:[#allocation3 + $0x58] sm:$0xff] %vm745_vm4, %v4793_v35 }
 0x839   : > { %v4791_v58 = vpop.permute.xlu0 %4790  ;;  %5254 = vrot.lane.b32.xlu1 %v10484_v29, %s7126_s7 }
 0x83a   : > { %4876 = vst.msk [vmem:[#allocation3 + $0x50] sm:$0xff] %vm745_vm4, %v4791_v58 }
 0x83b   : > { %5122 = vrot.lane.b32.xlu0 %v10279_v39, %s7125_s30  ;;  %v4797_v55 = vpop.permute.xlu1 %4796  ;;  %v4921_v39 = vrot.slane %v10443_v33, 2 }
 0x83c   : > { %4879 = vst.msk [vmem:[#allocation3 + $0x68] sm:$0xff] %vm745_vm4, %v4797_v55 }
 0x83d   : > { %v4795_v24 = vpop.permute.xlu0 %4794  ;;  %5780 = vrot.lane.b32.xlu1 %v4920_v41, %s7130_s12  ;;  %v4922_v28 = vsel %vm778_vm3, %v4919_v3, %v4921_v39 }
 0x83e   : > { %4878 = vst.msk [vmem:[#allocation3 + $0x60] sm:$0xff] %vm745_vm4, %v4795_v24  ;;  %v4928_v24 = vrot.slane %v10336_v36, 2 }
 0x83f   : > { %5649 = vrot.lane.b32.xlu0 %v10481_v43, %s7129_s9  ;;  %v4801_v22 = vpop.permute.xlu1 %4800 }
 0x840   : > { %4881 = vst.msk [vmem:[#allocation3 + $0x78] sm:$0xff] %vm745_vm4, %v4801_v22 }
 0x841   : > { %v4799_v29 = vpop.permute.xlu0 %4798  ;;  %5387 = vrot.lane.b32.xlu1 %v4920_v41, %s7127_s8 }
 0x842   : > { %4880 = vst.msk [vmem:[#allocation3 + $0x70] sm:$0xff] %vm745_vm4, %v4799_v29 }
 0x843   : > { %5256 = vrot.lane.b32.xlu0 %v10481_v43, %s7126_s7  ;;  %v4805_v12 = vpop.permute.xlu1 %4804 }
 0x844   : > { %4883 = vst.msk [vmem:[#allocation3 + $0x88] sm:$0xff] %vm745_vm4, %v4805_v12 }
 0x845   : > { %v4803_v6 = vpop.permute.xlu0 %4802  ;;  %4994 = vrot.lane.b32.xlu1 %v4920_v41, %s7124_s29  ;;  %v4929_v41 = vrot.slane %v10291_v11, 2 }
 0x846   : > { %4882 = vst.msk [vmem:[#allocation3 + $0x80] sm:$0xff] %vm745_vm4, %v4803_v6 }
 0x847   : > { %5782 = vrot.lane.b32.xlu0 %v4922_v28, %s7130_s12  ;;  %v4809_v25 = vpop.permute.xlu1 %4808  ;;  %v4930_v39 = vsel %vm778_vm3, %v4928_v24, %v4929_v41 }
 0x848   : > { %4885 = vst.msk [vmem:[#allocation3 + $0x98] sm:$0xff] %vm745_vm4, %v4809_v25 }
 0x849   : > { %v4807_v13 = vpop.permute.xlu0 %4806  ;;  %5517 = vrot.lane.b32.xlu1 %v10329_v37, %s7128_s22 }
 0x84a   : > { %4884 = vst.msk [vmem:[#allocation3 + $0x90] sm:$0xff] %vm745_vm4, %v4807_v13 }
 0x84b   : > { %5389 = vrot.lane.b32.xlu0 %v4922_v28, %s7127_s8  ;;  %v4813_v33 = vpop.permute.xlu1 %4812 }
 0x84c   : > { %4887 = vst.msk [vmem:[#allocation3 + $0xa8] sm:$0xff] %vm745_vm4, %v4813_v33 }
 0x84d   : > { %v4811_v43 = vpop.permute.xlu0 %4810  ;;  %5124 = vrot.lane.b32.xlu1 %v10329_v37, %s7125_s30 }
 0x84e   : > { %4886 = vst.msk [vmem:[#allocation3 + $0xa0] sm:$0xff] %vm745_vm4, %v4811_v43 }
 0x84f   : > { %4996 = vrot.lane.b32.xlu0 %v4922_v28, %s7124_s29  ;;  %v4817_v20 = vpop.permute.xlu1 %4816 }
 0x850   : > { %4889 = vst.msk [vmem:[#allocation3 + $0xb8] sm:$0xff] %vm745_vm4, %v4817_v20 }
 0x851   : > { %v4815_v49 = vpop.permute.xlu0 %4814  ;;  %5651 = vrot.lane.b32.xlu1 %v10504_v30, %s7129_s9 }
 0x852   : > { %4888 = vst.msk [vmem:[#allocation3 + $0xb0] sm:$0xff] %vm745_vm4, %v4815_v49 }
 0x853   : > { %5519 = vrot.lane.b32.xlu0 %v10285_v0, %s7128_s22  ;;  %v4821_v51 = vpop.permute.xlu1 %4820 }
 0x854   : > { %4891 = vst.msk [vmem:[#allocation3 + $0xc8] sm:$0xff] %vm745_vm4, %v4821_v51 }
 0x855   : > { %v4819_v61 = vpop.permute.xlu0 %4818  ;;  %5258 = vrot.lane.b32.xlu1 %v10504_v30, %s7126_s7 }
 0x856   : > { %4890 = vst.msk [vmem:[#allocation3 + $0xc0] sm:$0xff] %vm745_vm4, %v4819_v61 }
 0x857   : > { %5126 = vrot.lane.b32.xlu0 %v10285_v0, %s7125_s30  ;;  %v4981_v59 = vpop.permute.xlu1 %4980  ;;  %v4926_v0 = vrot.slane %v10475_v53, 2 }
 0x858   : > { %5075 = vst.msk [vmem:[#allocation3 + $0x8] sm:$0xff] %vm955_vm5, %v4981_v59 }
 0x859   : > { %v4979_v8 = vpop.permute.xlu0 %4978  ;;  %5784 = vrot.lane.b32.xlu1 %v4925_v63, %s7130_s12  ;;  %v4927_v26 = vsel %vm778_vm3, %v4924_v54, %v4926_v0  ;;  %v4934_v54 = vrot.slane %v10297_v17, 2 }
 0x85a   : > { %5074 = vst.msk [vmem:[#allocation3] sm:$0xff] %vm955_vm5, %v4979_v8 }
 0x85b   : > { %5653 = vrot.lane.b32.xlu0 %v10501_v56, %s7129_s9  ;;  %v5111_v37 = vpop.permute.xlu1 %5110 }
 0x85c   : > { %5205 = vst.msk [vmem:[#allocation3 + $0x8] sm:$0xff] %vm1086_vm6, %v5111_v37 }
 0x85d   : > { %v5109_v30 = vpop.permute.xlu0 %5108  ;;  %5391 = vrot.lane.b32.xlu1 %v4925_v63, %s7127_s8 }
 0x85e   : > { %5204 = vst.msk [vmem:[#allocation3] sm:$0xff] %vm1086_vm6, %v5109_v30 }
 0x85f   : > { %5260 = vrot.lane.b32.xlu0 %v10501_v56, %s7126_s7  ;;  %v5245_v27 = vpop.permute.xlu1 %5244 }
 0x860   : > { %5339 = vst.msk [vmem:[#allocation3 + $0x8] sm:$0xff] %vm1221_vm7, %v5245_v27 }
 0x861   : > { %v5243_v18 = vpop.permute.xlu0 %5242  ;;  %4998 = vrot.lane.b32.xlu1 %v4925_v63, %s7124_s29  ;;  %v4935_v63 = vsel %vm778_vm3, %v4933_v40, %v4934_v54 }
 0x862   : > { %5338 = vst.msk [vmem:[#allocation3] sm:$0xff] %vm1221_vm7, %v5243_v18 }
 0x863   : > { %5786 = vrot.lane.b32.xlu0 %v4927_v26, %s7130_s12  ;;  %v4983_v34 = vpop.permute.xlu1 %4982 }
 0x864   : > { %5076 = vst.msk [vmem:[#allocation3 + $0x10] sm:$0xff] %vm955_vm5, %v4983_v34 }
 0x865   : > { %v5376_v35 = vpop.permute.xlu0 %5375  ;;  %5521 = vrot.lane.b32.xlu1 %v10336_v36, %s7128_s22 }
 0x866   : > { %5471 = vst.msk [vmem:[#allocation3] sm:$0xff] %vm1355_vm8, %v5376_v35 }
 0x867   : > { %5393 = vrot.lane.b32.xlu0 %v4927_v26, %s7127_s8  ;;  %v5506_v53 = vpop.permute.xlu1 %5505 }
 0x868   : > { %5601 = vst.msk [vmem:[#allocation3] sm:$0xff] %vm1486_vm9, %v5506_v53 }
 0x869   : > { %v5378_v56 = vpop.permute.xlu0 %5377  ;;  %5128 = vrot.lane.b32.xlu1 %v10336_v36, %s7125_s30 }
 0x86a   : > { %5472 = vst.msk [vmem:[#allocation3 + $0x8] sm:$0xff] %vm1355_vm8, %v5378_v56 }
 0x86b   : > { %5000 = vrot.lane.b32.xlu0 %v4927_v26, %s7124_s29  ;;  %v5113_v58 = vpop.permute.xlu1 %5112 }
 0x86c   : > { %5206 = vst.msk [vmem:[#allocation3 + $0x10] sm:$0xff] %vm1086_vm6, %v5113_v58 }
 0x86d   : > { %v4985_v31 = vpop.permute.xlu0 %4984  ;;  %5655 = vrot.lane.b32.xlu1 %v10520_v32, %s7129_s9 }
 0x86e   : > { %5077 = vst.msk [vmem:[#allocation3 + $0x18] sm:$0xff] %vm955_vm5, %v4985_v31  ;;  %v4938_v31 = vrot.slane %v10377_v14, 2 }
 0x86f   : > { %5523 = vrot.lane.b32.xlu0 %v10291_v11, %s7128_s22  ;;  %v5640_v3 = vpop.permute.xlu1 %5639 }
 0x870   : > { %5735 = vst.msk [vmem:[#allocation3] sm:$0xff] %vm1621_vm10, %v5640_v3  ;;  %v4939_v3 = vrot.slane %v10319_v19, 2 }
 0x871   : > { %v5508_v55 = vpop.permute.xlu0 %5507  ;;  %5262 = vrot.lane.b32.xlu1 %v10520_v32, %s7126_s7 }
 0x872   : > { %5602 = vst.msk [vmem:[#allocation3 + $0x8] sm:$0xff] %vm1486_vm9, %v5508_v55 }
 0x873   : > { %5130 = vrot.lane.b32.xlu0 %v10291_v11, %s7125_s30  ;;  %v5247_v22 = vpop.permute.xlu1 %5246  ;;  %v4931_v11 = vrot.slane %v10492_v4, 2 }
 0x874   : > { %5340 = vst.msk [vmem:[#allocation3 + $0x10] sm:$0xff] %vm1221_vm7, %v5247_v22 }
 0x875   : > { %v5115_v29 = vpop.permute.xlu0 %5114  ;;  %5788 = vrot.lane.b32.xlu1 %v4930_v39, %s7130_s12  ;;  %v4932_v28 = vsel %vm778_vm3, %v4929_v41, %v4931_v11  ;;  %v4940_v41 = vsel %vm778_vm3, %v4938_v31, %v4939_v3 }
 0x876   : > { %5207 = vst.msk [vmem:[#allocation3 + $0x18] sm:$0xff] %vm1086_vm6, %v5115_v29 }
 0x877   : > { %5657 = vrot.lane.b32.xlu0 %v10517_v60, %s7129_s9  ;;  %v5773_v36 = vpop.permute.xlu1 %5772 }
 0x878   : > { %5868 = vst.msk [vmem:[#allocation3] sm:$0xff] %vm1755_vm11, %v5773_v36 }
 0x879   : > { %v5642_v32 = vpop.permute.xlu0 %5641  ;;  %5395 = vrot.lane.b32.xlu1 %v4930_v39, %s7127_s8 }
 0x87a   : > { %5736 = vst.msk [vmem:[#allocation3 + $0x8] sm:$0xff] %vm1621_vm10, %v5642_v32 }
 0x87b   : > { %5264 = vrot.lane.b32.xlu0 %v10517_v60, %s7126_s7  ;;  %v5380_v12 = vpop.permute.xlu1 %5379 }
 0x87c   : > { %5473 = vst.msk [vmem:[#allocation3 + $0x10] sm:$0xff] %vm1355_vm8, %v5380_v12 }
 0x87d   : > { %v5249_v6 = vpop.permute.xlu0 %5248  ;;  %5002 = vrot.lane.b32.xlu1 %v4930_v39, %s7124_s29 }
 0x87e   : > { %5341 = vst.msk [vmem:[#allocation3 + $0x18] sm:$0xff] %vm1221_vm7, %v5249_v6 }
 0x87f   : > { %5790 = vrot.lane.b32.xlu0 %v4932_v28, %s7130_s12  ;;  %v4987_v25 = vpop.permute.xlu1 %4986  ;;  %v5900_v4 = vld [vmem:[#allocation3] sm:$0xff] }
 0x880   : > { %5078 = vst.msk [vmem:[#allocation3 + $0x20] sm:$0xff] %vm955_vm5, %v4987_v25  ;;  %6976 = vmatprep.mubr.msk.f32.mxu0 %vm1827_vm12, %v5900_v4  ;;  %v4943_v4 = vrot.slane %v10416_v50, 2 }
 0x881   : > { %v5775_v13 = vpop.permute.xlu0 %5774  ;;  %5525 = vrot.lane.b32.xlu1 %v10344_v44, %s7128_s22 }
 0x882   : > { %5869 = vst.msk [vmem:[#allocation3 + $0x8] sm:$0xff] %vm1755_vm11, %v5775_v13 }
 0x883   : > { %5397 = vrot.lane.b32.xlu0 %v4932_v28, %s7127_s8  ;;  %v5510_v60 = vpop.permute.xlu1 %5509 }
 0x884   : > { %5603 = vst.msk [vmem:[#allocation3 + $0x10] sm:$0xff] %vm1486_vm9, %v5510_v60  ;;  %v4944_v60 = vrot.slane %v10332_v9, 2 }
 0x885   : > { %v5382_v33 = vpop.permute.xlu0 %5381  ;;  %5132 = vrot.lane.b32.xlu1 %v10344_v44, %s7125_s30 }
 0x886   : > { %5474 = vst.msk [vmem:[#allocation3 + $0x18] sm:$0xff] %vm1355_vm8, %v5382_v33 }
 0x887   : > { %5004 = vrot.lane.b32.xlu0 %v4932_v28, %s7124_s29  ;;  %v5117_v43 = vpop.permute.xlu1 %5116 }
 0x888   : > { %5208 = vst.msk [vmem:[#allocation3 + $0x20] sm:$0xff] %vm1086_vm6, %v5117_v43 }
 0x889   : > { %v4989_v20 = vpop.permute.xlu0 %4988  ;;  %v5901_v49 = vld [vmem:[#allocation3 + $0x8] sm:$0xff]  ;;  %5659 = vrot.lane.b32.xlu1 %v10535_v38, %s7129_s9 }
 0x88a   : > { %5079 = vst.msk [vmem:[#allocation3 + $0x28] sm:$0xff] %vm955_vm5, %v4989_v20  ;;  %6977 = vmatmul.mubr.msk.f32.vlgmr.msra.gmra.mrb[16].mxu0 %vm1827_vm12, %v5901_v49  ;;  %v4945_v20 = vsel %vm778_vm3, %v4943_v4, %v4944_v60 }
 0x88b   : > { %5527 = vrot.lane.b32.xlu0 %v10297_v17, %s7128_s22  ;;  %v5644_v51 = vpop.permute.xlu1 %5643 }
 0x88c   : > { %5737 = vst.msk [vmem:[#allocation3 + $0x10] sm:$0xff] %vm1621_vm10, %v5644_v51 }
 0x88d   : > { %v5512_v61 = vpop.permute.xlu0 %5511  ;;  %5266 = vrot.lane.b32.xlu1 %v10535_v38, %s7126_s7 }
 0x88e   : > { %5604 = vst.msk [vmem:[#allocation3 + $0x18] sm:$0xff] %vm1486_vm9, %v5512_v61 }
 0x88f   : > { %5134 = vrot.lane.b32.xlu0 %v10297_v17, %s7125_s30  ;;  %v5251_v59 = vpop.permute.xlu1 %5250  ;;  %v4936_v17 = vrot.slane %v10512_v21, 2 }
 0x890   : > { %5342 = vst.msk [vmem:[#allocation3 + $0x20] sm:$0xff] %vm1221_vm7, %v5251_v59 }
 0x891   : > { %v5119_v8 = vpop.permute.xlu0 %5118  ;;  %5792 = vrot.lane.b32.xlu1 %v4935_v63, %s7130_s12  ;;  %v4937_v0 = vsel %vm778_vm3, %v4934_v54, %v4936_v17 }
 0x892   : > { %5209 = vst.msk [vmem:[#allocation3 + $0x28] sm:$0xff] %vm1086_vm6, %v5119_v8 }
 0x893   : > { %5661 = vrot.lane.b32.xlu0 %v10532_v23, %s7129_s9  ;;  %v5777_v44 = vpop.permute.xlu1 %5776 }
 0x894   : > { %5870 = vst.msk [vmem:[#allocation3 + $0x10] sm:$0xff] %vm1755_vm11, %v5777_v44 }
 0x895   : > { %v5646_v38 = vpop.permute.xlu0 %5645  ;;  %5399 = vrot.lane.b32.xlu1 %v4935_v63, %s7127_s8 }
 0x896   : > { %5738 = vst.msk [vmem:[#allocation3 + $0x18] sm:$0xff] %vm1621_vm10, %v5646_v38  ;;  %v12046_v38 = vld [vmem:[#allocation31_spill] sm:$0xff] }
 0x897   : > { %5268 = vrot.lane.b32.xlu0 %v10532_v23, %s7126_s7  ;;  %v5384_v37 = vpop.permute.xlu1 %5383 }
 0x898   : > { %5475 = vst.msk [vmem:[#allocation3 + $0x20] sm:$0xff] %vm1355_vm8, %v5384_v37 }
 0x899   : > { %v5253_v30 = vpop.permute.xlu0 %5252  ;;  %5006 = vrot.lane.b32.xlu1 %v4935_v63, %s7124_s29 }
 0x89a   : > { %5343 = vst.msk [vmem:[#allocation3 + $0x28] sm:$0xff] %vm1221_vm7, %v5253_v30  ;;  %v4948_v30 = vrot.slane %v10424_v2, 2 }
 0x89b   : > { %5794 = vrot.lane.b32.xlu0 %v4937_v0, %s7130_s12  ;;  %v4991_v27 = vpop.permute.xlu1 %4990  ;;  %v5902_v21 = vld [vmem:[#allocation3 + $0x10] sm:$0xff] }
 0x89c   : > { %5080 = vst.msk [vmem:[#allocation3 + $0x30] sm:$0xff] %vm955_vm5, %v4991_v27  ;;  %6979 = vmatprep.mubr.msk.f32.mxu0 %vm1827_vm12, %v5902_v21 }
 0x89d   : > { %v5779_v18 = vpop.permute.xlu0 %5778  ;;  %5529 = vrot.lane.b32.xlu1 %v10377_v14, %s7128_s22 }
 0x89e   : > { %5871 = vst.msk [vmem:[#allocation3 + $0x18] sm:$0xff] %vm1755_vm11, %v5779_v18 }
 0x89f   : > { %5401 = vrot.lane.b32.xlu0 %v4937_v0, %s7127_s8  ;;  %v5514_v23 = vpop.permute.xlu1 %5513 }
 0x8a0   : > { %5605 = vst.msk [vmem:[#allocation3 + $0x20] sm:$0xff] %vm1486_vm9, %v5514_v23  ;;  %v12047_v23 = vld [vmem:[#allocation43_spill] sm:$0xff] }
 0x8a1   : > { %v5386_v26 = vpop.permute.xlu0 %5385  ;;  %5136 = vrot.lane.b32.xlu1 %v10377_v14, %s7125_s30 }
 0x8a2   : > { %5476 = vst.msk [vmem:[#allocation3 + $0x28] sm:$0xff] %vm1355_vm8, %v5386_v26  ;;  %v4951_v26 = vrot.slane %v12047_v23, 2  ;;  %v4597_v23 = vld [vmem:[#allocation2 + $0x148] sm:$0x3] }
 0x8a3   : > { %5008 = vrot.lane.b32.xlu0 %v4937_v0, %s7124_s29  ;;  %v5121_v34 = vpop.permute.xlu1 %5120  ;;  %v4949_v0 = vrot.slane %v12046_v38, 2 }
 0x8a4   : > { %5210 = vst.msk [vmem:[#allocation3 + $0x30] sm:$0xff] %vm1086_vm6, %v5121_v34 }
 0x8a5   : > { %v4993_v35 = vpop.permute.xlu0 %4992  ;;  %v5903_v53 = vld [vmem:[#allocation3 + $0x18] sm:$0xff]  ;;  %5663 = vrot.lane.b32.xlu1 %v10550_v45, %s7129_s9  ;;  %v4950_v21 = vsel %vm778_vm3, %v4948_v30, %v4949_v0 }
 0x8a6   : > { %5081 = vst.msk [vmem:[#allocation3 + $0x38] sm:$0xff] %vm955_vm5, %v4993_v35  ;;  %6980 = vmatmul.mubr.msk.f32.gmra.mrb[18].mxu0 %vm1827_vm12, %v5903_v53  ;;  %v4952_v53 = vsel %vm778_vm3, %v4949_v0, %v4951_v26  ;;  %v12052_v0 = vld [vmem:[#allocation36_spill] sm:$0xff] }
 0x8a7   : > { %5531 = vrot.lane.b32.xlu0 %v10319_v19, %s7128_s22  ;;  %v5648_v56 = vpop.permute.xlu1 %5647 }
 0x8a8   : > { %5739 = vst.msk [vmem:[#allocation3 + $0x20] sm:$0xff] %vm1621_vm10, %v5648_v56 }
 0x8a9   : > { %v5516_v58 = vpop.permute.xlu0 %5515  ;;  %5270 = vrot.lane.b32.xlu1 %v10550_v45, %s7126_s7 }
 0x8aa   : > { %5606 = vst.msk [vmem:[#allocation3 + $0x28] sm:$0xff] %vm1486_vm9, %v5516_v58 }
 0x8ab   : > { %5138 = vrot.lane.b32.xlu0 %v10319_v19, %s7125_s30  ;;  %v5255_v55 = vpop.permute.xlu1 %5254  ;;  %v4941_v19 = vrot.slane %v10528_v16, 2 }
 0x8ac   : > { %5344 = vst.msk [vmem:[#allocation3 + $0x30] sm:$0xff] %vm1221_vm7, %v5255_v55 }
 0x8ad   : > { %v5123_v24 = vpop.permute.xlu0 %5122  ;;  %5796 = vrot.lane.b32.xlu1 %v4940_v41, %s7130_s12  ;;  %v4942_v39 = vsel %vm778_vm3, %v4939_v3, %v4941_v19 }
 0x8ae   : > { %5211 = vst.msk [vmem:[#allocation3 + $0x38] sm:$0xff] %vm1086_vm6, %v5123_v24 }
 0x8af   : > { %5665 = vrot.lane.b32.xlu0 %v10547_v46, %s7129_s9  ;;  %v5781_v14 = vpop.permute.xlu1 %5780 }
 0x8b0   : > { %5872 = vst.msk [vmem:[#allocation3 + $0x20] sm:$0xff] %vm1755_vm11, %v5781_v14 }
 0x8b1   : > { %v5650_v45 = vpop.permute.xlu0 %5649  ;;  %5403 = vrot.lane.b32.xlu1 %v4940_v41, %s7127_s8 }
 0x8b2   : > { %5740 = vst.msk [vmem:[#allocation3 + $0x28] sm:$0xff] %vm1621_vm10, %v5650_v45 }
 0x8b3   : > { %5272 = vrot.lane.b32.xlu0 %v10547_v46, %s7126_s7  ;;  %v5388_v22 = vpop.permute.xlu1 %5387 }
 0x8b4   : > { %5477 = vst.msk [vmem:[#allocation3 + $0x30] sm:$0xff] %vm1355_vm8, %v5388_v22 }
 0x8b5   : > { %v5257_v29 = vpop.permute.xlu0 %5256  ;;  %5010 = vrot.lane.b32.xlu1 %v4940_v41, %s7124_s29 }
 0x8b6   : > { %5345 = vst.msk [vmem:[#allocation3 + $0x38] sm:$0xff] %vm1221_vm7, %v5257_v29  ;;  %v4954_v29 = vrot.slane %v10366_v48, 2 }
 0x8b7   : > { %5798 = vrot.lane.b32.xlu0 %v4942_v39, %s7130_s12  ;;  %v4995_v36 = vpop.permute.xlu1 %4994  ;;  %v5904_v16 = vld [vmem:[#allocation3 + $0x20] sm:$0xff] }
 0x8b8   : > { %5082 = vst.msk [vmem:[#allocation3 + $0x40] sm:$0xff] %vm955_vm5, %v4995_v36  ;;  %6982 = vmatprep.mubr.msk.f32.mxu0 %vm1827_vm12, %v5904_v16 }
 0x8b9   : > { %v5783_v32 = vpop.permute.xlu0 %5782  ;;  %5533 = vrot.lane.b32.xlu1 %v10416_v50, %s7128_s22 }
 0x8ba   : > { %5873 = vst.msk [vmem:[#allocation3 + $0x28] sm:$0xff] %vm1755_vm11, %v5783_v32 }
 0x8bb   : > { %5405 = vrot.lane.b32.xlu0 %v4942_v39, %s7127_s8  ;;  %v5518_v46 = vpop.permute.xlu1 %5517 }
 0x8bc   : > { %5607 = vst.msk [vmem:[#allocation3 + $0x30] sm:$0xff] %vm1486_vm9, %v5518_v46 }
 0x8bd   : > { %v5390_v11 = vpop.permute.xlu0 %5389  ;;  %5140 = vrot.lane.b32.xlu1 %v10416_v50, %s7125_s30 }
 0x8be   : > { %5478 = vst.msk [vmem:[#allocation3 + $0x38] sm:$0xff] %vm1355_vm8, %v5390_v11 }
 0x8bf   : > { %5012 = vrot.lane.b32.xlu0 %v4942_v39, %s7124_s29  ;;  %v5125_v12 = vpop.permute.xlu1 %5124 }
 0x8c0   : > { %5212 = vst.msk [vmem:[#allocation3 + $0x40] sm:$0xff] %vm1086_vm6, %v5125_v12 }
 0x8c1   : > { %v4997_v6 = vpop.permute.xlu0 %4996  ;;  %v5905_v28 = vld [vmem:[#allocation3 + $0x28] sm:$0xff]  ;;  %5667 = vrot.lane.b32.xlu1 %v10565_v1, %s7129_s9 }
 0x8c2   : > { %5083 = vst.msk [vmem:[#allocation3 + $0x48] sm:$0xff] %vm955_vm5, %v4997_v6  ;;  %6983 = vmatmul.mubr.msk.f32.gmra.mrb[20].mxu0 %vm1827_vm12, %v5905_v28 }
 0x8c3   : > { %5535 = vrot.lane.b32.xlu0 %v10332_v9, %s7128_s22  ;;  %v5652_v25 = vpop.permute.xlu1 %5651 }
 0x8c4   : > { %5741 = vst.msk [vmem:[#allocation3 + $0x30] sm:$0xff] %vm1621_vm10, %v5652_v25 }
 0x8c5   : > { %v5520_v13 = vpop.permute.xlu0 %5519  ;;  %5274 = vrot.lane.b32.xlu1 %v10565_v1, %s7126_s7 }
 0x8c6   : > { %5608 = vst.msk [vmem:[#allocation3 + $0x38] sm:$0xff] %vm1486_vm9, %v5520_v13 }
 0x8c7   : > { %5142 = vrot.lane.b32.xlu0 %v10332_v9, %s7125_s30  ;;  %v5259_v33 = vpop.permute.xlu1 %5258  ;;  %v4946_v9 = vrot.slane %v10543_v47, 2 }
 0x8c8   : > { %5346 = vst.msk [vmem:[#allocation3 + $0x40] sm:$0xff] %vm1221_vm7, %v5259_v33 }
 0x8c9   : > { %v5127_v43 = vpop.permute.xlu0 %5126  ;;  %5800 = vrot.lane.b32.xlu1 %v4945_v20, %s7130_s12  ;;  %v4947_v61 = vsel %vm778_vm3, %v4944_v60, %v4946_v9  ;;  %v4958_v9 = vrot.slane %v10448_v7, 2 }
 0x8ca   : > { %5213 = vst.msk [vmem:[#allocation3 + $0x48] sm:$0xff] %vm1086_vm6, %v5127_v43 }
 0x8cb   : > { %5669 = vrot.lane.b32.xlu0 %v10562_v15, %s7129_s9  ;;  %v5785_v50 = vpop.permute.xlu1 %5784 }
 0x8cc   : > { %5874 = vst.msk [vmem:[#allocation3 + $0x30] sm:$0xff] %vm1755_vm11, %v5785_v50 }
 0x8cd   : > { %v5654_v1 = vpop.permute.xlu0 %5653  ;;  %5407 = vrot.lane.b32.xlu1 %v4945_v20, %s7127_s8 }
 0x8ce   : > { %5742 = vst.msk [vmem:[#allocation3 + $0x38] sm:$0xff] %vm1621_vm10, %v5654_v1 }
 0x8cf   : > { %5276 = vrot.lane.b32.xlu0 %v10562_v15, %s7126_s7  ;;  %v5392_v49 = vpop.permute.xlu1 %5391 }
 0x8d0   : > { %5479 = vst.msk [vmem:[#allocation3 + $0x40] sm:$0xff] %vm1355_vm8, %v5392_v49 }
 0x8d1   : > { %v5261_v51 = vpop.permute.xlu0 %5260  ;;  %5014 = vrot.lane.b32.xlu1 %v4945_v20, %s7124_s29  ;;  %v12050_v20 = vld [vmem:[#allocation34_spill] sm:$0xff] }
 0x8d2   : > { %5347 = vst.msk [vmem:[#allocation3 + $0x48] sm:$0xff] %vm1221_vm7, %v5261_v51  ;;  %v4959_v49 = vrot.slane %v12050_v20, 2 }
 0x8d3   : > { %5802 = vrot.lane.b32.xlu0 %v4947_v61, %s7130_s12  ;;  %v4999_v40 = vpop.permute.xlu1 %4998  ;;  %v5906_v47 = vld [vmem:[#allocation3 + $0x30] sm:$0xff] }
 0x8d4   : > { %5084 = vst.msk [vmem:[#allocation3 + $0x50] sm:$0xff] %vm955_vm5, %v4999_v40  ;;  %6985 = vmatprep.mubr.msk.f32.mxu0 %vm1827_vm12, %v5906_v47  ;;  %v4960_v40 = vsel %vm778_vm3, %v4958_v9, %v4959_v49 }
 0x8d5   : > { %v5787_v54 = vpop.permute.xlu0 %5786  ;;  %5537 = vrot.lane.b32.xlu1 %v10424_v2, %s7128_s22 }
 0x8d6   : > { %5875 = vst.msk [vmem:[#allocation3 + $0x38] sm:$0xff] %vm1755_vm11, %v5787_v54  ;;  %v7113_v54 = vld [vmem:[#allocation2 + $0x130] sm:$0x3] }
 0x8d7   : > { %5409 = vrot.lane.b32.xlu0 %v4947_v61, %s7127_s8  ;;  %v5522_v15 = vpop.permute.xlu1 %5521  ;;  %v4961_v47 = vrot.slane %v7113_v54, 2 }
 0x8d8   : > { %5609 = vst.msk [vmem:[#allocation3 + $0x40] sm:$0xff] %vm1486_vm9, %v5522_v15 }
 0x8d9   : > { %v5394_v59 = vpop.permute.xlu0 %5393  ;;  %5144 = vrot.lane.b32.xlu1 %v10424_v2, %s7125_s30 }
 0x8da   : > { %5480 = vst.msk [vmem:[#allocation3 + $0x48] sm:$0xff] %vm1355_vm8, %v5394_v59 }
 0x8db   : > { %5016 = vrot.lane.b32.xlu0 %v4947_v61, %s7124_s29  ;;  %v5129_v8 = vpop.permute.xlu1 %5128 }
 0x8dc   : > { %5214 = vst.msk [vmem:[#allocation3 + $0x50] sm:$0xff] %vm1086_vm6, %v5129_v8  ;;  %v4962_v8 = vsel %vm778_vm3, %v4959_v49, %v4961_v47 }
 0x8dd   : > { %v5001_v63 = vpop.permute.xlu0 %5000  ;;  %v5907_v44 = vld [vmem:[#allocation3 + $0x38] sm:$0xff]  ;;  %5671 = vrot.lane.b32.xlu1 %v10580_v52, %s7129_s9 }
 0x8de   : > { %5085 = vst.msk [vmem:[#allocation3 + $0x58] sm:$0xff] %vm955_vm5, %v5001_v63  ;;  %6986 = vmatmul.mubr.msk.f32.gmra.mrb[22].mxu0 %vm1827_vm12, %v5907_v44 }
 0x8df   : > { %5539 = vrot.lane.b32.xlu0 %v12046_v38, %s7128_s22  ;;  %v5656_v17 = vpop.permute.xlu1 %5655 }
 0x8e0   : > { %5743 = vst.msk [vmem:[#allocation3 + $0x40] sm:$0xff] %vm1621_vm10, %v5656_v17 }
 0x8e1   : > { %v5524_v37 = vpop.permute.xlu0 %5523  ;;  %5278 = vrot.lane.b32.xlu1 %v10580_v52, %s7126_s7 }
 0x8e2   : > { %5610 = vst.msk [vmem:[#allocation3 + $0x48] sm:$0xff] %vm1486_vm9, %v5524_v37 }
 0x8e3   : > { %5146 = vrot.lane.b32.xlu0 %v12046_v38, %s7125_s30  ;;  %v5263_v27 = vpop.permute.xlu1 %5262 }
 0x8e4   : > { %5348 = vst.msk [vmem:[#allocation3 + $0x50] sm:$0xff] %vm1221_vm7, %v5263_v27  ;;  %v4756_v27 = vrot.slane %v12052_v0, 1 }
 0x8e5   : > { %v5131_v18 = vpop.permute.xlu0 %5130  ;;  %5804 = vrot.lane.b32.xlu1 %v4950_v21, %s7130_s12 }
 0x8e6   : > { %5215 = vst.msk [vmem:[#allocation3 + $0x58] sm:$0xff] %vm1086_vm6, %v5131_v18 }
 0x8e7   : > { %5673 = vrot.lane.b32.xlu0 %v10577_v42, %s7129_s9  ;;  %v5789_v2 = vpop.permute.xlu1 %5788 }
 0x8e8   : > { %5876 = vst.msk [vmem:[#allocation3 + $0x40] sm:$0xff] %vm1755_vm11, %v5789_v2 }
 0x8e9   : > { %v5658_v52 = vpop.permute.xlu0 %5657  ;;  %5411 = vrot.lane.b32.xlu1 %v4950_v21, %s7127_s8 }
 0x8ea   : > { %5744 = vst.msk [vmem:[#allocation3 + $0x48] sm:$0xff] %vm1621_vm10, %v5658_v52 }
 0x8eb   : > { %5280 = vrot.lane.b32.xlu0 %v10577_v42, %s7126_s7  ;;  %v5396_v34 = vpop.permute.xlu1 %5395  ;;  %v12048_v42 = vld [vmem:[#allocation39_spill] sm:$0xff] }
 0x8ec   : > { %5481 = vst.msk [vmem:[#allocation3 + $0x50] sm:$0xff] %vm1355_vm8, %v5396_v34  ;;  %v4953_v22 = vrot.slane %v12048_v42, 2 }
 0x8ed   : > { %v5265_v35 = vpop.permute.xlu0 %5264  ;;  %5018 = vrot.lane.b32.xlu1 %v4950_v21, %s7124_s29 }
 0x8ee   : > { %5349 = vst.msk [vmem:[#allocation3 + $0x58] sm:$0xff] %vm1221_vm7, %v5265_v35  ;;  %v4955_v32 = vsel %vm778_vm3, %v4953_v22, %v4954_v29 }
 0x8ef   : > { %5806 = vrot.lane.b32.xlu0 %v4952_v53, %s7130_s12  ;;  %v5003_v56 = vpop.permute.xlu1 %5002  ;;  %v5908_v31 = vld [vmem:[#allocation3 + $0x40] sm:$0xff] }
 0x8f0   : > { %5086 = vst.msk [vmem:[#allocation3 + $0x60] sm:$0xff] %vm955_vm5, %v5003_v56  ;;  %6988 = vmatprep.mubr.msk.f32.mxu0 %vm1827_vm12, %v5908_v31  ;;  %v4964_v56 = vrot.slane %v12052_v0, 2 }
 0x8f1   : > { %v5791_v58 = vpop.permute.xlu0 %5790  ;;  %5541 = vrot.lane.b32.xlu1 %v12048_v42, %s7128_s22 }
 0x8f2   : > { %5877 = vst.msk [vmem:[#allocation3 + $0x48] sm:$0xff] %vm1755_vm11, %v5791_v58 }
 0x8f3   : > { %5413 = vrot.lane.b32.xlu0 %v4952_v53, %s7127_s8  ;;  %v5526_v3 = vpop.permute.xlu1 %5525 }
 0x8f4   : > { %5611 = vst.msk [vmem:[#allocation3 + $0x50] sm:$0xff] %vm1486_vm9, %v5526_v3 }
 0x8f5   : > { %v5398_v55 = vpop.permute.xlu0 %5397  ;;  %5148 = vrot.lane.b32.xlu1 %v12048_v42, %s7125_s30 }
 0x8f6   : > { %5482 = vst.msk [vmem:[#allocation3 + $0x58] sm:$0xff] %vm1355_vm8, %v5398_v55 }
 0x8f7   : > { %5020 = vrot.lane.b32.xlu0 %v4952_v53, %s7124_s29  ;;  %v5133_v24 = vpop.permute.xlu1 %5132  ;;  %v4758_v53 = vrot.slane %v4597_v23, 1 }
 0x8f8   : > { %5216 = vst.msk [vmem:[#allocation3 + $0x60] sm:$0xff] %vm1086_vm6, %v5133_v24 }
 0x8f9   : > { %v5005_v41 = vpop.permute.xlu0 %5004  ;;  %v5909_v14 = vld [vmem:[#allocation3 + $0x48] sm:$0xff]  ;;  %5675 = vrot.lane.b32.xlu1 %v10593_v5, %s7129_s9  ;;  %v4759_v3 = vsel %vm568_vm2, %v4756_v27, %v4758_v53 }
 0x8fa   : > { %5087 = vst.msk [vmem:[#allocation3 + $0x68] sm:$0xff] %vm955_vm5, %v5005_v41  ;;  %6989 = vmatmul.mubr.msk.f32.gmra.mrb[24].mxu0 %vm1827_vm12, %v5909_v14  ;;  %v4966_v41 = vrot.slane %v4597_v23, 2 }
 0x8fb   : > { %5543 = vrot.lane.b32.xlu0 %v10366_v48, %s7128_s22  ;;  %v5660_v45 = vpop.permute.xlu1 %5659 }
 0x8fc   : > { %5745 = vst.msk [vmem:[#allocation3 + $0x50] sm:$0xff] %vm1621_vm10, %v5660_v45 }
 0x8fd   : > { %v5528_v19 = vpop.permute.xlu0 %5527  ;;  %5282 = vrot.lane.b32.xlu1 %v10593_v5, %s7126_s7 }
 0x8fe   : > { %5612 = vst.msk [vmem:[#allocation3 + $0x58] sm:$0xff] %vm1486_vm9, %v5528_v19  ;;  %v4967_v19 = vsel %vm778_vm3, %v4964_v56, %v4966_v41 }
 0x8ff   : > { %5150 = vrot.lane.b32.xlu0 %v10366_v48, %s7125_s30  ;;  %v5267_v39 = vpop.permute.xlu1 %5266  ;;  %v12049_v48 = vld [vmem:[#allocation44_spill] sm:$0xff] }
 0x900   : > { %5350 = vst.msk [vmem:[#allocation3 + $0x60] sm:$0xff] %vm1221_vm7, %v5267_v39  ;;  %v4956_v46 = vrot.slane %v12049_v48, 2 }
 0x901   : > { %v5135_v36 = vpop.permute.xlu0 %5134  ;;  %5808 = vrot.lane.b32.xlu1 %v4955_v32, %s7130_s12 }
 0x902   : > { %5217 = vst.msk [vmem:[#allocation3 + $0x68] sm:$0xff] %vm1086_vm6, %v5135_v36  ;;  %v4957_v6 = vsel %vm778_vm3, %v4954_v29, %v4956_v46 }
 0x903   : > { %5677 = vrot.lane.b32.xlu0 %v10590_v62, %s7129_s9  ;;  %v5793_v16 = vpop.permute.xlu1 %5792 }
 0x904   : > { %5878 = vst.msk [vmem:[#allocation3 + $0x50] sm:$0xff] %vm1755_vm11, %v5793_v16  ;;  %v12053_v16 = vld [vmem:[#allocation41_spill] sm:$0xff] }
 0x905   : > { %v5662_v5 = vpop.permute.xlu0 %5661  ;;  %5415 = vrot.lane.b32.xlu1 %v4955_v32, %s7127_s8 }
 0x906   : > { %5746 = vst.msk [vmem:[#allocation3 + $0x58] sm:$0xff] %vm1621_vm10, %v5662_v5 }
 0x907   : > { %5284 = vrot.lane.b32.xlu0 %v10590_v62, %s7126_s7  ;;  %v5400_v11 = vpop.permute.xlu1 %5399 }
 0x908   : > { %5483 = vst.msk [vmem:[#allocation3 + $0x60] sm:$0xff] %vm1355_vm8, %v5400_v11  ;;  %v4760_v11 = vrot.slane %v12053_v16, 1 }
 0x909   : > { %v5269_v12 = vpop.permute.xlu0 %5268  ;;  %5022 = vrot.lane.b32.xlu1 %v4955_v32, %s7124_s29 }
 0x90a   : > { %5351 = vst.msk [vmem:[#allocation3 + $0x68] sm:$0xff] %vm1221_vm7, %v5269_v12  ;;  %v12054_v12 = vld [vmem:[#allocation37_spill] sm:$0xff] }
 0x90b   : > { %5810 = vrot.lane.b32.xlu0 %v4957_v6, %s7130_s12  ;;  %v5007_v28 = vpop.permute.xlu1 %5006  ;;  %v5910_v13 = vld [vmem:[#allocation3 + $0x50] sm:$0xff] }
 0x90c   : > { %5088 = vst.msk [vmem:[#allocation3 + $0x70] sm:$0xff] %vm955_vm5, %v5007_v28  ;;  %6991 = vmatprep.mubr.msk.f32.mxu0 %vm1827_vm12, %v5910_v13 }
 0x90d   : > { %v5795_v25 = vpop.permute.xlu0 %5794  ;;  %5545 = vrot.lane.b32.xlu1 %v10448_v7, %s7128_s22 }
 0x90e   : > { %5879 = vst.msk [vmem:[#allocation3 + $0x58] sm:$0xff] %vm1755_vm11, %v5795_v25 }
 0x90f   : > { %5417 = vrot.lane.b32.xlu0 %v4957_v6, %s7127_s8  ;;  %v5530_v62 = vpop.permute.xlu1 %5529 }
 0x910   : > { %5613 = vst.msk [vmem:[#allocation3 + $0x60] sm:$0xff] %vm1486_vm9, %v5530_v62  ;;  %v4600_v62 = vld [vmem:[#allocation2 + $0x160] sm:$0x3] }
 0x911   : > { %v5402_v4 = vpop.permute.xlu0 %5401  ;;  %5152 = vrot.lane.b32.xlu1 %v10448_v7, %s7125_s30  ;;  %v4971_v54 = vrot.slane %v4600_v62, 2 }
 0x912   : > { %5484 = vst.msk [vmem:[#allocation3 + $0x68] sm:$0xff] %vm1355_vm8, %v5402_v4 }
 0x913   : > { %5024 = vrot.lane.b32.xlu0 %v4957_v6, %s7124_s29  ;;  %v5137_v60 = vpop.permute.xlu1 %5136  ;;  %v4761_v6 = vrot.slane %v12054_v12, 1 }
 0x914   : > { %5218 = vst.msk [vmem:[#allocation3 + $0x70] sm:$0xff] %vm1086_vm6, %v5137_v60 }
 0x915   : > { %v5009_v33 = vpop.permute.xlu0 %5008  ;;  %v5911_v43 = vld [vmem:[#allocation3 + $0x58] sm:$0xff]  ;;  %5679 = vrot.lane.b32.xlu1 %v10605_v10, %s7129_s9  ;;  %v4762_v13 = vsel %vm568_vm2, %v4760_v11, %v4761_v6 }
 0x916   : > { %5089 = vst.msk [vmem:[#allocation3 + $0x78] sm:$0xff] %vm955_vm5, %v5009_v33  ;;  %6992 = vmatmul.mubr.msk.f32.gmra.mrb[26].mxu0 %vm1827_vm12, %v5911_v43  ;;  %v4968_v33 = vrot.slane %v12053_v16, 2  ;;  %v4763_v43 = vrot.slane %v4600_v62, 1  ;;  %v4604_v62 = vld [vmem:[#allocation2 + $0x180] sm:$0xff] }
 0x917   : > { %5547 = vrot.lane.b32.xlu0 %v12050_v20, %s7128_s22  ;;  %v5664_v50 = vpop.permute.xlu1 %5663 }
 0x918   : > { %5747 = vst.msk [vmem:[#allocation3 + $0x60] sm:$0xff] %vm1621_vm10, %v5664_v50  ;;  %v4764_v49 = vsel %vm568_vm2, %v4761_v6, %v4763_v43 }
 0x919   : > { %v5532_v1 = vpop.permute.xlu0 %5531  ;;  %5286 = vrot.lane.b32.xlu1 %v10605_v10, %s7126_s7 }
 0x91a   : > { %5614 = vst.msk [vmem:[#allocation3 + $0x68] sm:$0xff] %vm1486_vm9, %v5532_v1 }
 0x91b   : > { %5154 = vrot.lane.b32.xlu0 %v12050_v20, %s7125_s30  ;;  %v5271_v51 = vpop.permute.xlu1 %5270  ;;  %v4969_v20 = vrot.slane %v12054_v12, 2 }
 0x91c   : > { %5352 = vst.msk [vmem:[#allocation3 + $0x70] sm:$0xff] %vm1221_vm7, %v5271_v51 }
 0x91d   : > { %v5139_v61 = vpop.permute.xlu0 %5138  ;;  %5812 = vrot.lane.b32.xlu1 %v4960_v40, %s7130_s12  ;;  %v4970_v9 = vsel %vm778_vm3, %v4968_v33, %v4969_v20  ;;  %v5237_v33 = vrot.slane %v4604_v62, 1 }
 0x91e   : > { %5219 = vst.msk [vmem:[#allocation3 + $0x78] sm:$0xff] %vm1086_vm6, %v5139_v61 }
 0x91f   : > { %5681 = vrot.lane.b32.xlu0 %v10602_v57, %s7129_s9  ;;  %v5797_v7 = vpop.permute.xlu1 %5796 }
 0x920   : > { %5880 = vst.msk [vmem:[#allocation3 + $0x60] sm:$0xff] %vm1755_vm11, %v5797_v7 }
 0x921   : > { %v5666_v10 = vpop.permute.xlu0 %5665  ;;  %5419 = vrot.lane.b32.xlu1 %v4960_v40, %s7127_s8 }
 0x922   : > { %5748 = vst.msk [vmem:[#allocation3 + $0x68] sm:$0xff] %vm1621_vm10, %v5666_v10 }
 0x923   : > { %5288 = vrot.lane.b32.xlu0 %v10602_v57, %s7126_s7  ;;  %v5404_v15 = vpop.permute.xlu1 %5403  ;;  %v12051_v57 = vld [vmem:[#allocation40_spill] sm:$0xff] }
 0x924   : > { %5485 = vst.msk [vmem:[#allocation3 + $0x70] sm:$0xff] %vm1355_vm8, %v5404_v15  ;;  %v4755_v30 = vrot.slane %v12051_v57, 1  ;;  %v4963_v35 = vrot.slane %v12051_v57, 2 }
 0x925   : > { %v5273_v59 = vpop.permute.xlu0 %5272  ;;  %5026 = vrot.lane.b32.xlu1 %v4960_v40, %s7124_s29 }
 0x926   : > { %5353 = vst.msk [vmem:[#allocation3 + $0x78] sm:$0xff] %vm1221_vm7, %v5273_v59  ;;  %v4757_v52 = vsel %vm568_vm2, %v4755_v30, %v4756_v27  ;;  %v4965_v42 = vsel %vm778_vm3, %v4963_v35, %v4964_v56  ;;  %v4603_v35 = vld [vmem:[#allocation2 + $0x178] sm:$0x3] }
 0x927   : > { %5814 = vrot.lane.b32.xlu0 %v4962_v8, %s7130_s12  ;;  %v5011_v63 = vpop.permute.xlu1 %5010  ;;  %v5912_v38 = vld [vmem:[#allocation3 + $0x60] sm:$0xff] }
 0x928   : > { %5090 = vst.msk [vmem:[#allocation3 + $0x80] sm:$0xff] %vm955_vm5, %v5011_v63  ;;  %6994 = vmatprep.mubr.msk.f32.mxu0 %vm1827_vm12, %v5912_v38 }
 0x929   : > { %v5799_v44 = vpop.permute.xlu0 %5798  ;;  %5549 = vrot.lane.b32.xlu1 %v12051_v57, %s7128_s22 }
 0x92a   : > { %5881 = vst.msk [vmem:[#allocation3 + $0x68] sm:$0xff] %vm1755_vm11, %v5799_v44  ;;  %v4972_v44 = vsel %vm778_vm3, %v4969_v20, %v4971_v54 }
 0x92b   : > { %5421 = vrot.lane.b32.xlu0 %v4962_v8, %s7127_s8  ;;  %v5534_v17 = vpop.permute.xlu1 %5533 }
 0x92c   : > { %5615 = vst.msk [vmem:[#allocation3 + $0x70] sm:$0xff] %vm1486_vm9, %v5534_v17 }
 0x92d   : > { %v5406_v37 = vpop.permute.xlu0 %5405  ;;  %5156 = vrot.lane.b32.xlu1 %v12051_v57, %s7125_s30 }
 0x92e   : > { %5486 = vst.msk [vmem:[#allocation3 + $0x78] sm:$0xff] %vm1355_vm8, %v5406_v37 }
 0x92f   : > { %5028 = vrot.lane.b32.xlu0 %v4962_v8, %s7124_s29  ;;  %v5141_v18 = vpop.permute.xlu1 %5140 }
 0x930   : > { %5220 = vst.msk [vmem:[#allocation3 + $0x80] sm:$0xff] %vm1086_vm6, %v5141_v18 }
 0x931   : > { %v5013_v21 = vpop.permute.xlu0 %5012  ;;  %v5913_v2 = vld [vmem:[#allocation3 + $0x68] sm:$0xff]  ;;  %5683 = vrot.lane.b32.xlu1 %v4757_v52, %s7129_s9 }
 0x932   : > { %5091 = vst.msk [vmem:[#allocation3 + $0x88] sm:$0xff] %vm955_vm5, %v5013_v21  ;;  %6995 = vmatmul.mubr.msk.f32.gmra.mrb[28].mxu0 %vm1827_vm12, %v5913_v2  ;;  %v12056_v2 = vld [vmem:[#allocation38_spill] sm:$0xff] }
 0x933   : > { %5551 = vrot.lane.b32.xlu0 %v12052_v0, %s7128_s22  ;;  %v5668_v26 = vpop.permute.xlu1 %5667 }
 0x934   : > { %5749 = vst.msk [vmem:[#allocation3 + $0x70] sm:$0xff] %vm1621_vm10, %v5668_v26 }
 0x935   : > { %v5536_v34 = vpop.permute.xlu0 %5535  ;;  %5290 = vrot.lane.b32.xlu1 %v4757_v52, %s7126_s7 }
 0x936   : > { %5616 = vst.msk [vmem:[#allocation3 + $0x78] sm:$0xff] %vm1486_vm9, %v5536_v34 }
 0x937   : > { %5158 = vrot.lane.b32.xlu0 %v12052_v0, %s7125_s30  ;;  %v5275_v58 = vpop.permute.xlu1 %5274  ;;  %v12055_v0 = vld [vmem:[#allocation42_spill] sm:$0xff] }
 0x938   : > { %5354 = vst.msk [vmem:[#allocation3 + $0x80] sm:$0xff] %vm1221_vm7, %v5275_v58  ;;  %v4765_v21 = vrot.slane %v12055_v0, 1  ;;  %v4973_v58 = vrot.slane %v12055_v0, 2 }
 0x939   : > { %v5143_v31 = vpop.permute.xlu0 %5142  ;;  %5816 = vrot.lane.b32.xlu1 %v4965_v42, %s7130_s12 }
 0x93a   : > { %5221 = vst.msk [vmem:[#allocation3 + $0x88] sm:$0xff] %vm1086_vm6, %v5143_v31  ;;  %v4768_v31 = vrot.slane %v4603_v35, 1 }
 0x93b   : > { %5685 = vrot.lane.b32.xlu0 %v4759_v3, %s7129_s9  ;;  %v5801_v55 = vpop.permute.xlu1 %5800 }
 0x93c   : > { %5882 = vst.msk [vmem:[#allocation3 + $0x70] sm:$0xff] %vm1755_vm11, %v5801_v55 }
 0x93d   : > { %v5670_v24 = vpop.permute.xlu0 %5669  ;;  %5292 = vrot.lane.b32.xlu1 %v4759_v3, %s7126_s7 }
 0x93e   : > { %5750 = vst.msk [vmem:[#allocation3 + $0x78] sm:$0xff] %vm1621_vm10, %v5670_v24 }
 0x93f   : > { %4822 = vrot.lane.b32.xlu0 %v4757_v52, %s7123_s28  ;;  %v5408_v14 = vpop.permute.xlu1 %5407  ;;  %v4766_v52 = vrot.slane %v12056_v2, 1 }
 0x940   : > { %5487 = vst.msk [vmem:[#allocation3 + $0x80] sm:$0xff] %vm1355_vm8, %v5408_v14 }
 0x941   : > { %v5277_v45 = vpop.permute.xlu0 %5276  ;;  %5818 = vrot.lane.b32.xlu1 %v4967_v19, %s7130_s12  ;;  %v4767_v34 = vsel %vm568_vm2, %v4765_v21, %v4766_v52 }
 0x942   : > { %5355 = vst.msk [vmem:[#allocation3 + $0x88] sm:$0xff] %vm1221_vm7, %v5277_v45 }
 0x943   : > { %5423 = vrot.lane.b32.xlu0 %v4965_v42, %s7127_s8  ;;  %v5015_v22 = vpop.permute.xlu1 %5014  ;;  %v5914_v39 = vld [vmem:[#allocation3 + $0x70] sm:$0xff] }
 0x944   : > { %5092 = vst.msk [vmem:[#allocation3 + $0x90] sm:$0xff] %vm955_vm5, %v5015_v22  ;;  %6997 = vmatprep.mubr.msk.f32.mxu0 %vm1827_vm12, %v5914_v39 }
 0x945   : > { %v5803_v29 = vpop.permute.xlu0 %5802  ;;  %5030 = vrot.lane.b32.xlu1 %v4965_v42, %s7124_s29  ;;  %v4974_v42 = vrot.slane %v12056_v2, 2 }
 0x946   : > { %5883 = vst.msk [vmem:[#allocation3 + $0x78] sm:$0xff] %vm1755_vm11, %v5803_v29 }
 0x947   : > { %4824 = vrot.lane.b32.xlu0 %v4759_v3, %s7123_s28  ;;  %v5538_v36 = vpop.permute.xlu1 %5537  ;;  %v4975_v14 = vsel %vm778_vm3, %v4973_v58, %v4974_v42 }
 0x948   : > { %5617 = vst.msk [vmem:[#allocation3 + $0x80] sm:$0xff] %vm1486_vm9, %v5538_v36 }
 0x949   : > { %v5410_v32 = vpop.permute.xlu0 %5409  ;;  %5553 = vrot.lane.b32.xlu1 %v12053_v16, %s7128_s22 }
 0x94a   : > { %5488 = vst.msk [vmem:[#allocation3 + $0x88] sm:$0xff] %vm1355_vm8, %v5410_v32 }
 0x94b   : > { %5425 = vrot.lane.b32.xlu0 %v4967_v19, %s7127_s8  ;;  %v5145_v5 = vpop.permute.xlu1 %5144 }
 0x94c   : > { %5222 = vst.msk [vmem:[#allocation3 + $0x90] sm:$0xff] %vm1086_vm6, %v5145_v5 }
 0x94d   : > { %v5017_v48 = vpop.permute.xlu0 %5016  ;;  %v5915_v46 = vld [vmem:[#allocation3 + $0x78] sm:$0xff]  ;;  %5160 = vrot.lane.b32.xlu1 %v12053_v16, %s7125_s30  ;;  %v4976_v16 = vrot.slane %v4603_v35, 2  ;;  %v4607_v35 = vld [vmem:[#allocation2 + $0x198] sm:$0xff] }
 0x94e   : > { %5093 = vst.msk [vmem:[#allocation3 + $0x98] sm:$0xff] %vm955_vm5, %v5017_v48  ;;  %6998 = vmatmul.mubr.msk.f32.gmra.mrb[30].mxu0 %vm1827_vm12, %v5915_v46 }
 0x94f   : > { %5032 = vrot.lane.b32.xlu0 %v4967_v19, %s7124_s29  ;;  %v5672_v28 = vpop.permute.xlu1 %5671  ;;  %v4769_v19 = vsel %vm568_vm2, %v4766_v52, %v4768_v31  ;;  %v4977_v11 = vsel %vm778_vm3, %v4974_v42, %v4976_v16  ;;  %v5634_v42 = vrot.slane %v4607_v35, 1 }
 0x950   : > { %5751 = vst.msk [vmem:[#allocation3 + $0x80] sm:$0xff] %vm1621_vm10, %v5672_v28 }
 0x951   : > { %v5540_v25 = vpop.permute.xlu0 %5539  ;;  %5687 = vrot.lane.b32.xlu1 %v4762_v13, %s7129_s9 }
 0x952   : > { %5618 = vst.msk [vmem:[#allocation3 + $0x88] sm:$0xff] %vm1486_vm9, %v5540_v25 }
 0x953   : > { %5555 = vrot.lane.b32.xlu0 %v12054_v12, %s7128_s22  ;;  %v5279_v4 = vpop.permute.xlu1 %5278 }
 0x954   : > { %5356 = vst.msk [vmem:[#allocation3 + $0x90] sm:$0xff] %vm1221_vm7, %v5279_v4 }
 0x955   : > { %v5147_v60 = vpop.permute.xlu0 %5146  ;;  %5294 = vrot.lane.b32.xlu1 %v4762_v13, %s7126_s7 }
 0x956   : > { %5223 = vst.msk [vmem:[#allocation3 + $0x98] sm:$0xff] %vm1086_vm6, %v5147_v60  ;;  %v4605_v60 = vld [vmem:[#allocation2 + $0x188] sm:$0xff] }
 0x957   : > { %5162 = vrot.lane.b32.xlu0 %v12054_v12, %s7125_s30  ;;  %v5805_v50 = vpop.permute.xlu1 %5804  ;;  %v5238_v20 = vrot.slane %v4605_v60, 1 }
 0x958   : > { %5884 = vst.msk [vmem:[#allocation3 + $0x80] sm:$0xff] %vm1755_vm11, %v5805_v50 }
 0x959   : > { %v5674_v1 = vpop.permute.xlu0 %5673  ;;  %5820 = vrot.lane.b32.xlu1 %v4970_v9, %s7130_s12 }
 0x95a   : > { %5752 = vst.msk [vmem:[#allocation3 + $0x88] sm:$0xff] %vm1621_vm10, %v5674_v1 }
 0x95b   : > { %5689 = vrot.lane.b32.xlu0 %v4764_v49, %s7129_s9  ;;  %v5412_v51 = vpop.permute.xlu1 %5411 }
 0x95c   : > { %5489 = vst.msk [vmem:[#allocation3 + $0x90] sm:$0xff] %vm1355_vm8, %v5412_v51 }
 0x95d   : > { %v11177_v61 = vpop.f32.mrb[16].mxu0  ;;  %v5281_v7 = vpop.permute.xlu0 %5280  ;;  %5296 = vrot.lane.b32.xlu1 %v4764_v49, %s7126_s7 }
 0x95e   : > { %v6254_v40 = vsel %vm336_vm0, %v11177_v61, 0.0  ;;  %v11182_v10 = vpop.f32.mrb[17].mxu0  ;;  %5357 = vst.msk [vmem:[#allocation3 + $0x98] sm:$0xff] %vm1221_vm7, %v5281_v7  ;;  %v5370_v7 = vrot.slane %v4604_v62, 2 }
 0x95f   : > { %v6253_v47 = vsel %vm336_vm0, %v11182_v10, 0.0  ;;  %4826 = vrot.lane.b32.xlu0 %v4762_v13, %s7123_s28  ;;  %v5019_v59 = vpop.permute.xlu1 %5018  ;;  %v5916_v8 = vld [vmem:[#allocation3 + $0x80] sm:$0xff] }
 0x960   : > { %v6255_v15 = vadd.f32 %v6254_v40, %v6253_v47  ;;  %5094 = vst.msk [vmem:[#allocation3 + $0xa0] sm:$0xff] %vm955_vm5, %v5019_v59  ;;  %7000 = vmatprep.mubr.msk.f32.mxu0 %vm1827_vm12, %v5916_v8 }
 0x961   : > { %v5807_v63 = vpop.permute.xlu0 %5806  ;;  %5822 = vrot.lane.b32.xlu1 %v4972_v44, %s7130_s12 }
 0x962   : > { %5885 = vst.msk [vmem:[#allocation3 + $0x88] sm:$0xff] %vm1755_vm11, %v5807_v63  ;;  %v5371_v63 = vrot.slane %v4605_v60, 2 }
 0x963   : > { %5427 = vrot.lane.b32.xlu0 %v4970_v9, %s7127_s8  ;;  %v5542_v38 = vpop.permute.xlu1 %5541 }
 0x964   : > { %5619 = vst.msk [vmem:[#allocation3 + $0x90] sm:$0xff] %vm1486_vm9, %v5542_v38 }
 0x965   : > { %v5414_v57 = vpop.permute.xlu0 %5413  ;;  %5034 = vrot.lane.b32.xlu1 %v4970_v9, %s7124_s29  ;;  %v5239_v9 = vsel %vm568_vm2, %v5237_v33, %v5238_v20 }
 0x966   : > { %5490 = vst.msk [vmem:[#allocation3 + $0x98] sm:$0xff] %vm1355_vm8, %v5414_v57 }
 0x967   : > { %4828 = vrot.lane.b32.xlu0 %v4764_v49, %s7123_s28  ;;  %v5149_v17 = vpop.permute.xlu1 %5148  ;;  %v4606_v49 = vld [vmem:[#allocation2 + $0x190] sm:$0x3] }
 0x968   : > { %5224 = vst.msk [vmem:[#allocation3 + $0xa0] sm:$0xff] %vm1086_vm6, %v5149_v17  ;;  %v5240_v59 = vrot.slane %v4606_v49, 1  ;;  %v5373_v21 = vrot.slane %v4606_v49, 2 }
 0x969   : > { %v5021_v37 = vpop.permute.xlu0 %5020  ;;  %v5917_v30 = vld [vmem:[#allocation3 + $0x88] sm:$0xff]  ;;  %5557 = vrot.lane.b32.xlu1 %v12055_v0, %s7128_s22 }
 0x96a   : > { %5095 = vst.msk [vmem:[#allocation3 + $0xa8] sm:$0xff] %vm955_vm5, %v5021_v37  ;;  %7001 = vmatmul.mubr.msk.f32.gmra.mrb[32].mxu0 %vm1827_vm12, %v5917_v30  ;;  %v5372_v37 = vsel %vm778_vm3, %v5370_v7, %v5371_v63 }
 0x96b   : > { %5429 = vrot.lane.b32.xlu0 %v4972_v44, %s7127_s8  ;;  %v5676_v27 = vpop.permute.xlu1 %5675 }
 0x96c   : > { %5753 = vst.msk [vmem:[#allocation3 + $0x90] sm:$0xff] %vm1621_vm10, %v5676_v27 }
 0x96d   : > { %v5544_v18 = vpop.permute.xlu0 %5543  ;;  %5164 = vrot.lane.b32.xlu1 %v12055_v0, %s7125_s30  ;;  %v5241_v0 = vsel %vm568_vm2, %v5238_v20, %v5240_v59 }
 0x96e   : > { %5620 = vst.msk [vmem:[#allocation3 + $0x98] sm:$0xff] %vm1486_vm9, %v5544_v18 }
 0x96f   : > { %5036 = vrot.lane.b32.xlu0 %v4972_v44, %s7124_s29  ;;  %v5283_v23 = vpop.permute.xlu1 %5282 }
 0x970   : > { %5358 = vst.msk [vmem:[#allocation3 + $0xa0] sm:$0xff] %vm1221_vm7, %v5283_v23 }
 0x971   : > { %v5151_v26 = vpop.permute.xlu0 %5150  ;;  %5691 = vrot.lane.b32.xlu1 %v4767_v34, %s7129_s9 }
 0x972   : > { %5225 = vst.msk [vmem:[#allocation3 + $0xa8] sm:$0xff] %vm1086_vm6, %v5151_v26  ;;  %v5374_v26 = vsel %vm778_vm3, %v5371_v63, %v5373_v21 }
 0x973   : > { %5559 = vrot.lane.b32.xlu0 %v12056_v2, %s7128_s22  ;;  %v5809_v53 = vpop.permute.xlu1 %5808 }
 0x974   : > { %5886 = vst.msk [vmem:[#allocation3 + $0x90] sm:$0xff] %vm1755_vm11, %v5809_v53 }
 0x975   : > { %v5678_v56 = vpop.permute.xlu0 %5677  ;;  %5298 = vrot.lane.b32.xlu1 %v4767_v34, %s7126_s7 }
 0x976   : > { %5754 = vst.msk [vmem:[#allocation3 + $0x98] sm:$0xff] %vm1621_vm10, %v5678_v56  ;;  %v4608_v56 = vld [vmem:[#allocation2 + $0x1a0] sm:$0xff] }
 0x977   : > { %5166 = vrot.lane.b32.xlu0 %v12056_v2, %s7125_s30  ;;  %v5416_v3 = vpop.permute.xlu1 %5415 }
 0x978   : > { %5491 = vst.msk [vmem:[#allocation3 + $0xa0] sm:$0xff] %vm1355_vm8, %v5416_v3  ;;  %v5635_v3 = vrot.slane %v4608_v56, 1 }
 0x979   : > { %v11225_v55 = vpop.f32.mrb[18].mxu0  ;;  %v5285_v24 = vpop.permute.xlu0 %5284  ;;  %5824 = vrot.lane.b32.xlu1 %v4975_v14, %s7130_s12 }
 0x97a   : > { %v11228_v41 = vpop.f32.mrb[19].mxu0  ;;  %5359 = vst.msk [vmem:[#allocation3 + $0xa8] sm:$0xff] %vm1221_vm7, %v5285_v24  ;;  %v6258_v29 = vsel %vm336_vm0, %v11225_v55, 0.0 }
 0x97b   : > { %v6256_v45 = vsel %vm336_vm0, %v11228_v41, 0.0  ;;  %5693 = vrot.lane.b32.xlu0 %v4769_v19, %s7129_s9  ;;  %v5023_v39 = vpop.permute.xlu1 %5022  ;;  %v5918_v36 = vld [vmem:[#allocation3 + $0x90] sm:$0xff] }
 0x97c   : > { %v6257_v22 = vadd.f32 %v6256_v45, %v6255_v15  ;;  %5096 = vst.msk [vmem:[#allocation3 + $0xb0] sm:$0xff] %vm955_vm5, %v5023_v39  ;;  %7003 = vmatprep.mubr.msk.f32.mxu0 %vm1827_vm12, %v5918_v36  ;;  %v5768_v39 = vrot.slane %v4608_v56, 2 }
 0x97d   : > { %v5811_v32 = vpop.permute.xlu0 %5810  ;;  %5300 = vrot.lane.b32.xlu1 %v4769_v19, %s7126_s7 }
 0x97e   : > { %v6259_v5 = vadd.f32 %v6258_v29, %v6257_v22  ;;  %5887 = vst.msk [vmem:[#allocation3 + $0x98] sm:$0xff] %vm1755_vm11, %v5811_v32  ;;  %v5767_v22 = vrot.slane %v4607_v35, 2  ;;  %v5636_v29 = vsel %vm568_vm2, %v5634_v42, %v5635_v3 }
 0x97f   : > { %4830 = vrot.lane.b32.xlu0 %v4767_v34, %s7123_s28  ;;  %v5546_v48 = vpop.permute.xlu1 %5545  ;;  %v4609_v34 = vld [vmem:[#allocation2 + $0x1a8] sm:$0x3] }
 0x980   : > { %5621 = vst.msk [vmem:[#allocation3 + $0xa0] sm:$0xff] %vm1486_vm9, %v5546_v48  ;;  %v5637_v31 = vrot.slane %v4609_v34, 1 }
 0x981   : > { %v5418_v46 = vpop.permute.xlu0 %5417  ;;  %5826 = vrot.lane.b32.xlu1 %v4977_v11, %s7130_s12 }
 0x982   : > { %5492 = vst.msk [vmem:[#allocation3 + $0xa8] sm:$0xff] %vm1355_vm8, %v5418_v46  ;;  %v5638_v45 = vsel %vm568_vm2, %v5635_v3, %v5637_v31 }
 0x983   : > { %5431 = vrot.lane.b32.xlu0 %v4975_v14, %s7127_s8  ;;  %v5153_v12 = vpop.permute.xlu1 %5152 }
 0x984   : > { %5226 = vst.msk [vmem:[#allocation3 + $0xb0] sm:$0xff] %vm1086_vm6, %v5153_v12 }
 0x985   : > { %v5025_v6 = vpop.permute.xlu0 %5024  ;;  %v5919_v28 = vld [vmem:[#allocation3 + $0x98] sm:$0xff]  ;;  %5038 = vrot.lane.b32.xlu1 %v4975_v14, %s7124_s29 }
 0x986   : > { %5097 = vst.msk [vmem:[#allocation3 + $0xb8] sm:$0xff] %vm955_vm5, %v5025_v6  ;;  %7004 = vmatmul.mubr.msk.f32.gmra.mrb[34].mxu0 %vm1827_vm12, %v5919_v28 }
 0x987   : > { %4832 = vrot.lane.b32.xlu0 %v4769_v19, %s7123_s28  ;;  %v5680_v25 = vpop.permute.xlu1 %5679  ;;  %v5770_v19 = vrot.slane %v4609_v34, 2 }
 0x988   : > { %5755 = vst.msk [vmem:[#allocation3 + $0xa0] sm:$0xff] %vm1621_vm10, %v5680_v25 }
 0x989   : > { %v5548_v13 = vpop.permute.xlu0 %5547  ;;  %5561 = vrot.lane.b32.xlu1 %v4604_v62, %s7128_s22  ;;  %v5771_v16 = vsel %vm778_vm3, %v5768_v39, %v5770_v19 }
 0x98a   : > { %5622 = vst.msk [vmem:[#allocation3 + $0xa8] sm:$0xff] %vm1486_vm9, %v5548_v13 }
 0x98b   : > { %5433 = vrot.lane.b32.xlu0 %v4977_v11, %s7127_s8  ;;  %v5287_v4 = vpop.permute.xlu1 %5286 }
 0x98c   : > { %5360 = vst.msk [vmem:[#allocation3 + $0xb0] sm:$0xff] %vm1221_vm7, %v5287_v4 }
 0x98d   : > { %v5155_v43 = vpop.permute.xlu0 %5154  ;;  %5168 = vrot.lane.b32.xlu1 %v4604_v62, %s7125_s30 }
 0x98e   : > { %5227 = vst.msk [vmem:[#allocation3 + $0xb8] sm:$0xff] %vm1086_vm6, %v5155_v43 }
 0x98f   : > { %5040 = vrot.lane.b32.xlu0 %v4977_v11, %s7124_s29  ;;  %v5813_v50 = vpop.permute.xlu1 %5812 }
 0x990   : > { %5888 = vst.msk [vmem:[#allocation3 + $0xa0] sm:$0xff] %vm1755_vm11, %v5813_v50 }
 0x991   : > { %v5682_v1 = vpop.permute.xlu0 %5681  ;;  %5695 = vrot.lane.b32.xlu1 %v5239_v9, %s7129_s9 }
 0x992   : > { %5756 = vst.msk [vmem:[#allocation3 + $0xa8] sm:$0xff] %vm1621_vm10, %v5682_v1 }
 0x993   : > { %5563 = vrot.lane.b32.xlu0 %v4605_v60, %s7128_s22  ;;  %v5420_v51 = vpop.permute.xlu1 %5419 }
 0x994   : > { %5493 = vst.msk [vmem:[#allocation3 + $0xb0] sm:$0xff] %vm1355_vm8, %v5420_v51 }
 0x995   : > { %v11267_v40 = vpop.f32.mrb[20].mxu0  ;;  %v5289_v54 = vpop.permute.xlu0 %5288  ;;  %5302 = vrot.lane.b32.xlu1 %v5239_v9, %s7126_s7 }
 0x996   : > { %v11270_v47 = vpop.f32.mrb[21].mxu0  ;;  %5361 = vst.msk [vmem:[#allocation3 + $0xb8] sm:$0xff] %vm1221_vm7, %v5289_v54  ;;  %v6262_v44 = vsel %vm336_vm0, %v11267_v40, 0.0 }
 0x997   : > { %v6260_v15 = vsel %vm336_vm0, %v11270_v47, 0.0  ;;  %5170 = vrot.lane.b32.xlu0 %v4605_v60, %s7125_s30  ;;  %v5027_v38 = vpop.permute.xlu1 %5026  ;;  %v5920_v57 = vld [vmem:[#allocation3 + $0xa0] sm:$0xff]  ;;  %s11636_s30 = scalar_lea.vmem %s11743_s6, %s7239_s24 }
 0x998   : > { %v6261_v8 = vadd.f32 %v6260_v15, %v6259_v5  ;;  %5098 = vst.msk [vmem:[#allocation3 + $0xc0] sm:$0xff] %vm955_vm5, %v5027_v38  ;;  %7006 = vmatprep.mubr.msk.f32.mxu0 %vm1827_vm12, %v5920_v57  ;;  %v5769_v5 = vsel %vm778_vm3, %v5767_v22, %v5768_v39 }
 0x999   : > { %v5815_v17 = vpop.permute.xlu0 %5814  ;;  %5828 = vrot.lane.b32.xlu1 %v5372_v37, %s7130_s12 }
 0x99a   : > { %v6263_v30 = vadd.f32 %v6262_v44, %v6261_v8  ;;  %5889 = vst.msk [vmem:[#allocation3 + $0xa8] sm:$0xff] %vm1755_vm11, %v5815_v17 }
 0x99b   : > { %5697 = vrot.lane.b32.xlu0 %v5241_v0, %s7129_s9  ;;  %v5550_v27 = vpop.permute.xlu1 %5549 }
 0x99c   : > { %5623 = vst.msk [vmem:[#allocation3 + $0xb0] sm:$0xff] %vm1486_vm9, %v5550_v27 }
 0x99d   : > { %v5422_v18 = vpop.permute.xlu0 %5421  ;;  %5435 = vrot.lane.b32.xlu1 %v5372_v37, %s7127_s8 }
 0x99e   : > { %5494 = vst.msk [vmem:[#allocation3 + $0xb8] sm:$0xff] %vm1355_vm8, %v5422_v18 }
 0x99f   : > { %5304 = vrot.lane.b32.xlu0 %v5241_v0, %s7126_s7  ;;  %v5157_v2 = vpop.permute.xlu1 %5156 }
 0x9a0   : > { %5228 = vst.msk [vmem:[#allocation3 + $0xc0] sm:$0xff] %vm1086_vm6, %v5157_v2 }
 0x9a1   : > { %v5029_v52 = vpop.permute.xlu0 %5028  ;;  %v5921_v23 = vld [vmem:[#allocation3 + $0xa8] sm:$0xff]  ;;  %5437 = vrot.lane.b32.xlu1 %v5374_v26, %s7127_s8 }
 0x9a2   : > { %5099 = vst.msk [vmem:[#allocation3 + $0xc8] sm:$0xff] %vm955_vm5, %v5029_v52  ;;  %7007 = vmatmul.mubr.msk.f32.gmra.mrb[36].mxu0 %vm1827_vm12, %v5921_v23 }
 0x9a3   : > { %5830 = vrot.lane.b32.xlu0 %v5374_v26, %s7130_s12  ;;  %v5684_v53 = vpop.permute.xlu1 %5683 }
 0x9a4   : > { %5757 = vst.msk [vmem:[#allocation3 + $0xb0] sm:$0xff] %vm1621_vm10, %v5684_v53 }
 0x9a5   : > { %v5552_v58 = vpop.permute.xlu0 %5551  ;;  %5567 = vrot.lane.b32.xlu1 %v4608_v56, %s7128_s22 }
 0x9a6   : > { %5624 = vst.msk [vmem:[#allocation3 + $0xb8] sm:$0xff] %vm1486_vm9, %v5552_v58 }
 0x9a7   : > { %5565 = vrot.lane.b32.xlu0 %v4607_v35, %s7128_s22  ;;  %v5291_v24 = vpop.permute.xlu1 %5290 }
 0x9a8   : > { %5362 = vst.msk [vmem:[#allocation3 + $0xc0] sm:$0xff] %vm1221_vm7, %v5291_v24 }
 0x9a9   : > { %v5159_v14 = vpop.permute.xlu0 %5158  ;;  %5701 = vrot.lane.b32.xlu1 %v5638_v45, %s7129_s9 }
 0x9aa   : > { %5229 = vst.msk [vmem:[#allocation3 + $0xc8] sm:$0xff] %vm1086_vm6, %v5159_v14 }
 0x9ab   : > { %5699 = vrot.lane.b32.xlu0 %v5636_v29, %s7129_s9  ;;  %v5817_v36 = vpop.permute.xlu1 %5816 }
 0x9ac   : > { %5890 = vst.msk [vmem:[#allocation3 + $0xb0] sm:$0xff] %vm1755_vm11, %v5817_v36 }
 0x9ad   : > { %v5686_v32 = vpop.permute.xlu0 %5685  ;;  %5834 = vrot.lane.b32.xlu1 %v5771_v16, %s7130_s12 }
 0x9ae   : > { %5758 = vst.msk [vmem:[#allocation3 + $0xb8] sm:$0xff] %vm1621_vm10, %v5686_v32 }
 0x9af   : > { %5832 = vrot.lane.b32.xlu0 %v5769_v5, %s7130_s12  ;;  %v5293_v48 = vpop.permute.xlu1 %5292 }
 0x9b0   : > { %5363 = vst.msk [vmem:[#allocation3 + $0xc8] sm:$0xff] %vm1221_vm7, %v5293_v48 }
 0x9b1   : > { %v11312_v46 = vpop.f32.mrb[22].mxu0  ;;  %v4823_v11 = vpop.permute.xlu0 %4822 }
 0x9b2   : > { %v11315_v12 = vpop.f32.mrb[23].mxu0  ;;  %4892 = vst.msk [vmem:[#allocation3 + $0xd0] sm:$0xff] %vm745_vm4, %v4823_v11  ;;  %v6266_v25 = vsel %vm336_vm0, %v11312_v46, 0.0 }
 0x9b3   : > { %v6264_v6 = vsel %vm336_vm0, %v11315_v12, 0.0  ;;  %v5819_v13 = vpop.permute.xlu1 %5818  ;;  %v5922_v62 = vld [vmem:[#allocation3 + $0xb0] sm:$0xff] }
 0x9b4   : > { %v6265_v28 = vadd.f32 %v6264_v6, %v6263_v30  ;;  %5891 = vst.msk [vmem:[#allocation3 + $0xb8] sm:$0xff] %vm1755_vm11, %v5819_v13  ;;  %7009 = vmatprep.mubr.msk.f32.mxu0 %vm1827_vm12, %v5922_v62 }
 0x9b5   : > { %v5424_v4 = vpop.permute.xlu0 %5423 }
 0x9b6   : > { %v6267_v60 = vadd.f32 %v6266_v25, %v6265_v28  ;;  %5495 = vst.msk [vmem:[#allocation3 + $0xc0] sm:$0xff] %vm1355_vm8, %v5424_v4 }
 0x9b7   : > { %v5031_v33 = vpop.permute.xlu1 %5030 }
 0x9b8   : > { %5100 = vst.msk [vmem:[#allocation3 + $0xd0] sm:$0xff] %vm955_vm5, %v5031_v33 }
 0x9b9   : > { %v4825_v43 = vpop.permute.xlu0 %4824 }
 0x9ba   : > { %4893 = vst.msk [vmem:[#allocation3 + $0xd8] sm:$0xff] %vm745_vm4, %v4825_v43 }
 0x9bb   : > { %v5554_v20 = vpop.permute.xlu1 %5553  ;;  %v5923_v50 = vld [vmem:[#allocation3 + $0xb8] sm:$0xff] }
 0x9bc   : > { %5625 = vst.msk [vmem:[#allocation3 + $0xc0] sm:$0xff] %vm1486_vm9, %v5554_v20  ;;  %7010 = vmatmul.mubr.msk.f32.gmra.mrb[38].mxu0 %vm1827_vm12, %v5923_v50 }
 0x9bd   : > { %v5426_v1 = vpop.permute.xlu0 %5425 }
 0x9be   : > { %5496 = vst.msk [vmem:[#allocation3 + $0xc8] sm:$0xff] %vm1355_vm8, %v5426_v1 }
 0x9bf   : > { %v5161_v9 = vpop.permute.xlu1 %5160 }
 0x9c0   : > { %5230 = vst.msk [vmem:[#allocation3 + $0xd0] sm:$0xff] %vm1086_vm6, %v5161_v9 }
 0x9c1   : > { %v5033_v49 = vpop.permute.xlu0 %5032 }
 0x9c2   : > { %5101 = vst.msk [vmem:[#allocation3 + $0xd8] sm:$0xff] %vm955_vm5, %v5033_v49 }
 0x9c3   : > { %v5688_v51 = vpop.permute.xlu1 %5687 }
 0x9c4   : > { %5759 = vst.msk [vmem:[#allocation3 + $0xc0] sm:$0xff] %vm1621_vm10, %v5688_v51 }
 0x9c5   : > { %v5556_v7 = vpop.permute.xlu0 %5555 }
 0x9c6   : > { %5626 = vst.msk [vmem:[#allocation3 + $0xc8] sm:$0xff] %vm1486_vm9, %v5556_v7 }
 0x9c7   : > { %v5295_v54 = vpop.permute.xlu1 %5294 }
 0x9c8   : > { %5364 = vst.msk [vmem:[#allocation3 + $0xd0] sm:$0xff] %vm1221_vm7, %v5295_v54 }
 0x9c9   : > { %v5163_v15 = vpop.permute.xlu0 %5162 }
 0x9ca   : > { %5231 = vst.msk [vmem:[#allocation3 + $0xd8] sm:$0xff] %vm1086_vm6, %v5163_v15 }
 0x9cb   : > { %v5821_v59 = vpop.permute.xlu1 %5820 }
 0x9cc   : > { %5892 = vst.msk [vmem:[#allocation3 + $0xc0] sm:$0xff] %vm1755_vm11, %v5821_v59 }
 0x9cd   : > { %v11336_v8 = vpop.f32.mrb[24].mxu0  ;;  %v5690_v63 = vpop.permute.xlu0 %5689 }
 0x9ce   : > { %v11339_v44 = vpop.f32.mrb[25].mxu0  ;;  %5760 = vst.msk [vmem:[#allocation3 + $0xc8] sm:$0xff] %vm1621_vm10, %v5690_v63  ;;  %v6270_v17 = vsel %vm336_vm0, %v11336_v8, 0.0 }
 0x9cf   : > { %v6268_v38 = vsel %vm336_vm0, %v11339_v44, 0.0  ;;  %v5297_v37 = vpop.permute.xlu1 %5296 }
 0x9d0   : > { %v6269_v57 = vadd.f32 %v6268_v38, %v6267_v60  ;;  %5365 = vst.msk [vmem:[#allocation3 + $0xd8] sm:$0xff] %vm1221_vm7, %v5297_v37 }
 0x9d1   : > { %v4827_v30 = vpop.permute.xlu0 %4826 }
 0x9d2   : > { %v6271_v0 = vadd.f32 %v6270_v17, %v6269_v57  ;;  %4894 = vst.msk [vmem:[#allocation3 + $0xe0] sm:$0xff] %vm745_vm4, %v4827_v30 }
 0x9d3   : > { %v5823_v27 = vpop.permute.xlu1 %5822  ;;  %v5924_v18 = vld [vmem:[#allocation3 + $0xc0] sm:$0xff] }
 0x9d4   : > { %5893 = vst.msk [vmem:[#allocation3 + $0xc8] sm:$0xff] %vm1755_vm11, %v5823_v27  ;;  %7012 = vmatprep.mubr.msk.f32.mxu0 %vm1827_vm12, %v5924_v18 }
 0x9d5   : > { %v5428_v21 = vpop.permute.xlu0 %5427 }
 0x9d6   : > { %5497 = vst.msk [vmem:[#allocation3 + $0xd0] sm:$0xff] %vm1355_vm8, %v5428_v21 }
 0x9d7   : > { %v5035_v2 = vpop.permute.xlu1 %5034 }
 0x9d8   : > { %5102 = vst.msk [vmem:[#allocation3 + $0xe0] sm:$0xff] %vm955_vm5, %v5035_v2 }
 0x9d9   : > { %v4829_v52 = vpop.permute.xlu0 %4828 }
 0x9da   : > { %4895 = vst.msk [vmem:[#allocation3 + $0xe8] sm:$0xff] %vm745_vm4, %v4829_v52 }
 0x9db   : > { %v5558_v23 = vpop.permute.xlu1 %5557  ;;  %v5925_v26 = vld [vmem:[#allocation3 + $0xc8] sm:$0xff] }
 0x9dc   : > { %5627 = vst.msk [vmem:[#allocation3 + $0xd0] sm:$0xff] %vm1486_vm9, %v5558_v23  ;;  %7013 = vmatmul.mubr.msk.f32.gmra.mrb[40].mxu0 %vm1827_vm12, %v5925_v26 }
 0x9dd   : > { %v5430_v34 = vpop.permute.xlu0 %5429 }
 0x9de   : > { %5498 = vst.msk [vmem:[#allocation3 + $0xd8] sm:$0xff] %vm1355_vm8, %v5430_v34 }
 0x9df   : > { %v5165_v35 = vpop.permute.xlu1 %5164 }
 0x9e0   : > { %5232 = vst.msk [vmem:[#allocation3 + $0xe0] sm:$0xff] %vm1086_vm6, %v5165_v35 }
 0x9e1   : > { %v5037_v53 = vpop.permute.xlu0 %5036 }
 0x9e2   : > { %5103 = vst.msk [vmem:[#allocation3 + $0xe8] sm:$0xff] %vm955_vm5, %v5037_v53 }
 0x9e3   : > { %v5692_v56 = vpop.permute.xlu1 %5691 }
 0x9e4   : > { %5761 = vst.msk [vmem:[#allocation3 + $0xd0] sm:$0xff] %vm1621_vm10, %v5692_v56 }
 0x9e5   : > { %v5560_v58 = vpop.permute.xlu0 %5559 }
 0x9e6   : > { %5628 = vst.msk [vmem:[#allocation3 + $0xd8] sm:$0xff] %vm1486_vm9, %v5560_v58 }
 0x9e7   : > { %v5299_v31 = vpop.permute.xlu1 %5298 }
 0x9e8   : > { %5366 = vst.msk [vmem:[#allocation3 + $0xe0] sm:$0xff] %vm1221_vm7, %v5299_v31 }
 0x9e9   : > { %v11360_v42 = vpop.f32.mrb[26].mxu0  ;;  %v5167_v3 = vpop.permute.xlu0 %5166 }
 0x9ea   : > { %v11363_v24 = vpop.f32.mrb[27].mxu0  ;;  %5233 = vst.msk [vmem:[#allocation3 + $0xe8] sm:$0xff] %vm1086_vm6, %v5167_v3  ;;  %v6274_v19 = vsel %vm336_vm0, %v11360_v42, 0.0 }
 0x9eb   : > { %v6272_v14 = vsel %vm336_vm0, %v11363_v24, 0.0  ;;  %v5825_v22 = vpop.permute.xlu1 %5824 }
 0x9ec   : > { %v6273_v45 = vadd.f32 %v6272_v14, %v6271_v0  ;;  %5894 = vst.msk [vmem:[#allocation3 + $0xd0] sm:$0xff] %vm1755_vm11, %v5825_v22 }
 0x9ed   : > { %v5694_v29 = vpop.permute.xlu0 %5693 }
 0x9ee   : > { %v6275_v39 = vadd.f32 %v6274_v19, %v6273_v45  ;;  %5762 = vst.msk [vmem:[#allocation3 + $0xd8] sm:$0xff] %vm1621_vm10, %v5694_v29 }
 0x9ef   : > { %v5301_v36 = vpop.permute.xlu1 %5300 }
 0x9f0   : > { %5367 = vst.msk [vmem:[#allocation3 + $0xe8] sm:$0xff] %vm1221_vm7, %v5301_v36 }
 0x9f1   : > { %v4831_v32 = vpop.permute.xlu0 %4830 }
 0x9f2   : > { %4896 = vst.msk [vmem:[#allocation3 + $0xf0] sm:$0xff] %vm745_vm4, %v4831_v32 }
 0x9f3   : > { %v5827_v16 = vpop.permute.xlu1 %5826  ;;  %v5926_v5 = vld [vmem:[#allocation3 + $0xd0] sm:$0xff] }
 0x9f4   : > { %5895 = vst.msk [vmem:[#allocation3 + $0xd8] sm:$0xff] %vm1755_vm11, %v5827_v16  ;;  %7015 = vmatprep.mubr.msk.f32.mxu0 %vm1827_vm12, %v5926_v5 }
 0x9f5   : > { %v5432_v48 = vpop.permute.xlu0 %5431 }
 0x9f6   : > { %5499 = vst.msk [vmem:[#allocation3 + $0xe0] sm:$0xff] %vm1355_vm8, %v5432_v48 }
 0x9f7   : > { %v5039_v11 = vpop.permute.xlu1 %5038 }
 0x9f8   : > { %5104 = vst.msk [vmem:[#allocation3 + $0xf0] sm:$0xff] %vm955_vm5, %v5039_v11 }
 0x9f9   : > { %v4833_v6 = vpop.permute.xlu0 %4832 }
 0x9fa   : > { %4897 = vst.msk [vmem:[#allocation3 + $0xf8] sm:$0xff] %vm745_vm4, %v4833_v6 }
 0x9fb   : > { %v5562_v28 = vpop.permute.xlu1 %5561  ;;  %v5927_v25 = vld [vmem:[#allocation3 + $0xd8] sm:$0xff] }
 0x9fc   : > { %5629 = vst.msk [vmem:[#allocation3 + $0xe0] sm:$0xff] %vm1486_vm9, %v5562_v28  ;;  %7016 = vmatmul.mubr.msk.f32.gmra.mrb[42].mxu0 %vm1827_vm12, %v5927_v25 }
 0x9fd   : > { %v5434_v13 = vpop.permute.xlu0 %5433 }
 0x9fe   : > { %5500 = vst.msk [vmem:[#allocation3 + $0xe8] sm:$0xff] %vm1355_vm8, %v5434_v13 }
 0x9ff   : > { %v5169_v62 = vpop.permute.xlu1 %5168 }
 0xa00   : > { %5234 = vst.msk [vmem:[#allocation3 + $0xf0] sm:$0xff] %vm1086_vm6, %v5169_v62 }
 0xa01   : > { %v5041_v4 = vpop.permute.xlu0 %5040 }
 0xa02   : > { %5105 = vst.msk [vmem:[#allocation3 + $0xf8] sm:$0xff] %vm955_vm5, %v5041_v4 }
 0xa03   : > { %v5696_v60 = vpop.permute.xlu1 %5695 }
 0xa04   : > { %5763 = vst.msk [vmem:[#allocation3 + $0xe0] sm:$0xff] %vm1621_vm10, %v5696_v60 }
 0xa05   : > { %v11384_v33 = vpop.f32.mrb[28].mxu0  ;;  %v5564_v43 = vpop.permute.xlu0 %5563 }
 0xa06   : > { %v11387_v20 = vpop.f32.mrb[29].mxu0  ;;  %5630 = vst.msk [vmem:[#allocation3 + $0xe8] sm:$0xff] %vm1486_vm9, %v5564_v43  ;;  %v6278_v9 = vsel %vm336_vm0, %v11384_v33, 0.0 }
 0xa07   : > { %v6276_v50 = vsel %vm336_vm0, %v11387_v20, 0.0  ;;  %v5303_v49 = vpop.permute.xlu1 %5302 }
 0xa08   : > { %v6277_v1 = vadd.f32 %v6276_v50, %v6275_v39  ;;  %5368 = vst.msk [vmem:[#allocation3 + $0xf0] sm:$0xff] %vm1221_vm7, %v5303_v49 }
 0xa09   : > { %v5171_v51 = vpop.permute.xlu0 %5170 }
 0xa0a   : > { %v6279_v7 = vadd.f32 %v6278_v9, %v6277_v1  ;;  %5235 = vst.msk [vmem:[#allocation3 + $0xf8] sm:$0xff] %vm1086_vm6, %v5171_v51 }
 0xa0b   : > { %v5829_v54 = vpop.permute.xlu1 %5828 }
 0xa0c   : > { %5896 = vst.msk [vmem:[#allocation3 + $0xe0] sm:$0xff] %vm1755_vm11, %v5829_v54 }
 0xa0d   : > { %v5698_v15 = vpop.permute.xlu0 %5697 }
 0xa0e   : > { %5764 = vst.msk [vmem:[#allocation3 + $0xe8] sm:$0xff] %vm1621_vm10, %v5698_v15 }
 0xa0f   : > { %v5436_v59 = vpop.permute.xlu1 %5435 }
 0xa10   : > { %5501 = vst.msk [vmem:[#allocation3 + $0xf0] sm:$0xff] %vm1355_vm8, %v5436_v59 }
 0xa11   : > { %v5305_v63 = vpop.permute.xlu0 %5304 }
 0xa12   : > { %5369 = vst.msk [vmem:[#allocation3 + $0xf8] sm:$0xff] %vm1221_vm7, %v5305_v63 }
 0xa13   : > { %v5438_v38 = vpop.permute.xlu1 %5437  ;;  %v5928_v57 = vld [vmem:[#allocation3 + $0xe0] sm:$0xff] }
 0xa14   : > { %5502 = vst.msk [vmem:[#allocation3 + $0xf8] sm:$0xff] %vm1355_vm8, %v5438_v38  ;;  %7018 = vmatprep.mubr.msk.f32.mxu0 %vm1827_vm12, %v5928_v57 }
 0xa15   : > { %v5831_v17 = vpop.permute.xlu0 %5830 }
 0xa16   : > { %5897 = vst.msk [vmem:[#allocation3 + $0xe8] sm:$0xff] %vm1755_vm11, %v5831_v17 }
 0xa17   : > { %v5568_v37 = vpop.permute.xlu1 %5567 }
 0xa18   : > { %5632 = vst.msk [vmem:[#allocation3 + $0xf8] sm:$0xff] %vm1486_vm9, %v5568_v37 }
 0xa19   : > { %v5566_v30 = vpop.permute.xlu0 %5565 }
 0xa1a   : > { %5631 = vst.msk [vmem:[#allocation3 + $0xf0] sm:$0xff] %vm1486_vm9, %v5566_v30 }
 0xa1b   : > { %v5702_v0 = vpop.permute.xlu1 %5701 }
 0xa1c   : > { %5766 = vst.msk [vmem:[#allocation3 + $0xf8] sm:$0xff] %vm1621_vm10, %v5702_v0 }
 0xa1d   : > { %v5700_v27 = vpop.permute.xlu0 %5699  ;;  %v5929_v18 = vld [vmem:[#allocation3 + $0xe8] sm:$0xff] }
 0xa1e   : > { %5765 = vst.msk [vmem:[#allocation3 + $0xf0] sm:$0xff] %vm1621_vm10, %v5700_v27  ;;  %7019 = vmatmul.mubr.msk.f32.gmra.mrb[44].mxu0 %vm1827_vm12, %v5929_v18 }
 0xa1f   : > { %v5835_v21 = vpop.permute.xlu1 %5834 }
 0xa20   : > { %5899 = vst.msk [vmem:[#allocation3 + $0xf8] sm:$0xff] %vm1755_vm11, %v5835_v21 }
 0xa21   : > { %v11408_v2 = vpop.f32.mrb[30].mxu0  ;;  %v5833_v52 = vpop.permute.xlu0 %5832 }
 0xa22   : > { %v11411_v23 = vpop.f32.mrb[31].mxu0  ;;  %5898 = vst.msk [vmem:[#allocation3 + $0xf0] sm:$0xff] %vm1755_vm11, %v5833_v52  ;;  %v6282_v35 = vsel %vm336_vm0, %v11408_v2, 0.0 }
 0xa23   : > { %v6280_v26 = vsel %vm336_vm0, %v11411_v23, 0.0 }
 0xa24   : > { %v6281_v34 = vadd.f32 %v6280_v26, %v6279_v7 }
 0xa26   : > { %v6283_v53 = vadd.f32 %v6282_v35, %v6281_v34 }
 0xa27   : > { %v5931_v56 = vld [vmem:[#allocation3 + $0xf8] sm:$0xff] }
 0xa29   : > { %v5930_v58 = vld [vmem:[#allocation3 + $0xf0] sm:$0xff] }
 0xa2a   : > { %7021 = vmatprep.mubr.msk.f32.mxu0 %vm1827_vm12, %v5930_v58 }
 0xa2b   : > { %7022 = vmatmul.mubr.msk.f32.gmra.mrb[46].mxu0 %vm1827_vm12, %v5931_v56 }
 0xa3d   : > { %v11420_v31 = vpop.f32.mrb[32].mxu0 }
 0xa3e   : > { %v11422_v3 = vpop.f32.mrb[33].mxu0  ;;  %v6286_v19 = vsel %vm336_vm0, %v11420_v31, 0.0 }
 0xa3f   : > { %v6284_v14 = vsel %vm336_vm0, %v11422_v3, 0.0 }
 0xa40   : > { %v6285_v45 = vadd.f32 %v6284_v14, %v6283_v53 }
 0xa42   : > { %v6287_v22 = vadd.f32 %v6286_v19, %v6285_v45 }
 0xa59   : > { %v11428_v29 = vpop.f32.mrb[34].mxu0 }
 0xa5a   : > { %v11430_v39 = vpop.f32.mrb[35].mxu0  ;;  %v6290_v16 = vsel %vm336_vm0, %v11428_v29, 0.0 }
 0xa5b   : > { %v6288_v36 = vsel %vm336_vm0, %v11430_v39, 0.0 }
 0xa5c   : > { %v6289_v32 = vadd.f32 %v6288_v36, %v6287_v22 }
 0xa5e   : > { %v6291_v5 = vadd.f32 %v6290_v16, %v6289_v32 }
 0xa75   : > { %v11436_v48 = vpop.f32.mrb[36].mxu0 }
 0xa76   : > { %v6194_v11 = vpop.f32.mrb[37].mxu0  ;;  %v6294_v25 = vsel %vm336_vm0, %v11436_v48, 0.0 }
 0xa77   : > { %v6292_v6 = vsel %vm336_vm0, %v6194_v11, 0.0 }
 0xa78   : > { %v6293_v28 = vadd.f32 %v6292_v6, %v6291_v5 }
 0xa7a   : > { %v6295_v13 = vadd.f32 %v6294_v25, %v6293_v28 }
 0xa8f   : > { %v7011_v62 = vpop.f32.mrb[38].mxu0 }
 0xa90   : > { %v6204_v4 = vpop.f32.mrb[39].mxu0  ;;  %v6298_v50 = vsel %vm336_vm0, %v7011_v62, 0.0 }
 0xa91   : > { %v6296_v60 = vsel %vm336_vm0, %v6204_v4, 0.0 }
 0xa92   : > { %v6297_v43 = vadd.f32 %v6296_v60, %v6295_v13 }
 0xa94   : > { %v6299_v1 = vadd.f32 %v6298_v50, %v6297_v43 }
 0xaaf   : > { %v7014_v9 = vpop.f32.mrb[40].mxu0 }
 0xab0   : > { %v6214_v49 = vpop.f32.mrb[41].mxu0  ;;  %v6302_v54 = vsel %vm336_vm0, %v7014_v9, 0.0 }
 0xab1   : > { %v6300_v51 = vsel %vm336_vm0, %v6214_v49, 0.0 }
 0xab2   : > { %v6301_v7 = vadd.f32 %v6300_v51, %v6299_v1 }
 0xab4   : > { %v6303_v15 = vadd.f32 %v6302_v54, %v6301_v7 }
 0xacf   : > { %v7017_v59 = vpop.f32.mrb[42].mxu0 }
 0xad0   : > { %v6224_v63 = vpop.f32.mrb[43].mxu0  ;;  %v6306_v17 = vsel %vm336_vm0, %v7017_v59, 0.0 }
 0xad1   : > { %v6304_v38 = vsel %vm336_vm0, %v6224_v63, 0.0 }
 0xad2   : > { %v6305_v57 = vadd.f32 %v6304_v38, %v6303_v15 }
 0xad4   : > { %v6307_v37 = vadd.f32 %v6306_v17, %v6305_v57 }
 0xaf1   : > { %v7020_v30 = vpop.f32.mrb[44].mxu0 }
 0xaf2   : > { %v6234_v0 = vpop.f32.mrb[45].mxu0  ;;  %v6310_v21 = vsel %vm336_vm0, %v7020_v30, 0.0 }
 0xaf3   : > { %v6308_v27 = vsel %vm336_vm0, %v6234_v0, 0.0 }
 0xaf4   : > { %v6309_v18 = vadd.f32 %v6308_v27, %v6307_v37 }
 0xaf6   : > { %v6311_v52 = vadd.f32 %v6310_v21, %v6309_v18 }
 0xafe   : > { %v7023_v26 = vpop.f32.mrb[46].mxu0 }
 0xaff   : > { %v6244_v34 = vpop.f32.mrb[47].mxu0  ;;  %v6314_v56 = vsel %vm336_vm0, %v7023_v26, 0.0 }
 0xb00   : > { %v6312_v35 = vsel %vm336_vm0, %v6244_v34, 0.0 }
 0xb01   : > { %v6313_v53 = vadd.f32 %v6312_v35, %v6311_v52 }
 0xb03   : > { %v6315_v58 = vadd.f32 %v6314_v56, %v6313_v53 }
 0xb05   : > { %v6316_v14 = vrot.slane %v6315_v58, 4 }
 0xb07   : > { %v6317_v45 = vadd.f32 %v6316_v14, %v6315_v58 }
 0xb09   : > { %v6318_v19 = vrot.slane %v6317_v45, 2 }
 0xb0b   : > { %v6319_v22 = vadd.f32 %v6318_v19, %v6317_v45 }
 0xb0d   : > { %v6320_v36 = vrot.slane %v6319_v22, 1 }
 0xb0f   : > { %v6321_v32 = vadd.f32 %v6320_v36, %v6319_v22 }
 0xb11   : > { %v6322_v16 = vmul.f32 0.00390625, %v6321_v32 }
 0xb13   : > { %v11452_v5 = vsub.f32 %v11182_v10, %v6322_v16  ;;  %v11455_v6 = vsub.f32 %v11177_v61, %v6322_v16  ;;  %v11458_v28 = vsub.f32 %v11228_v41, %v6322_v16  ;;  %v11461_v25 = vsub.f32 %v11225_v55, %v6322_v16 }
 0xb14   : > { %v11464_v13 = vsub.f32 %v11270_v47, %v6322_v16  ;;  %v11467_v60 = vsub.f32 %v11267_v40, %v6322_v16  ;;  %v11470_v43 = vsub.f32 %v11315_v12, %v6322_v16  ;;  %v11473_v10 = vsub.f32 %v11312_v46, %v6322_v16 }
 0xb15   : > { %v11476_v61 = vsub.f32 %v11339_v44, %v6322_v16  ;;  %v11479_v41 = vsub.f32 %v11336_v8, %v6322_v16  ;;  %v11482_v55 = vsub.f32 %v11363_v24, %v6322_v16  ;;  %v11485_v47 = vsub.f32 %v11360_v42, %v6322_v16 }
 0xb16   : > { %v11488_v40 = vsub.f32 %v11387_v20, %v6322_v16  ;;  %v11491_v12 = vsub.f32 %v11384_v33, %v6322_v16  ;;  %v11494_v46 = vsub.f32 %v11411_v23, %v6322_v16  ;;  %v11497_v44 = vsub.f32 %v11408_v2, %v6322_v16 }
 0xb17   : > { %v11500_v8 = vsub.f32 %v11422_v3, %v6322_v16  ;;  %v11503_v24 = vsub.f32 %v11420_v31, %v6322_v16  ;;  %v11506_v42 = vsub.f32 %v11430_v39, %v6322_v16  ;;  %v11509_v20 = vsub.f32 %v11428_v29, %v6322_v16 }
 0xb18   : > { %v11511_v33 = vsub.f32 %v6194_v11, %v6322_v16  ;;  %v11514_v23 = vsub.f32 %v11436_v48, %v6322_v16  ;;  %v11516_v50 = vsub.f32 %v6204_v4, %v6322_v16  ;;  %v11518_v2 = vsub.f32 %v7011_v62, %v6322_v16 }
 0xb19   : > { %v11520_v3 = vsub.f32 %v6214_v49, %v6322_v16  ;;  %v11522_v1 = vsub.f32 %v7014_v9, %v6322_v16  ;;  %v11524_v31 = vsub.f32 %v6224_v63, %v6322_v16  ;;  %v11526_v39 = vsub.f32 %v7017_v59, %v6322_v16 }
 0xb1a   : > { %v11528_v51 = vsub.f32 %v6234_v0, %v6322_v16  ;;  %v11530_v29 = vsub.f32 %v7020_v30, %v6322_v16  ;;  %v11532_v11 = vsub.f32 %v6244_v34, %v6322_v16  ;;  %v11534_v48 = vsub.f32 %v7023_v26, %v6322_v16 }
 0xb1b   : > { %v6355_v62 = vmul.f32 %v11452_v5, %v11452_v5  ;;  %v6356_v4 = vmul.f32 %v11455_v6, %v11455_v6  ;;  %v6357_v9 = vmul.f32 %v11458_v28, %v11458_v28  ;;  %v6358_v49 = vmul.f32 %v11461_v25, %v11461_v25 }
 0xb1c   : > { %v6359_v59 = vmul.f32 %v11464_v13, %v11464_v13  ;;  %v6360_v57 = vmul.f32 %v11467_v60, %v11467_v60  ;;  %v6361_v30 = vmul.f32 %v11470_v43, %v11470_v43  ;;  %v6362_v18 = vmul.f32 %v11473_v10, %v11473_v10 }
 0xb1d   : > { %v6387_v7 = vsel %vm336_vm0, %v6355_v62, 0.0  ;;  %v6388_v54 = vsel %vm336_vm0, %v6356_v4, 0.0  ;;  %v6390_v63 = vsel %vm336_vm0, %v6357_v9, 0.0  ;;  %v6392_v17 = vsel %vm336_vm0, %v6358_v49, 0.0 }
 0xb1e   : > { %v6389_v15 = vadd.f32 %v6388_v54, %v6387_v7  ;;  %v6394_v0 = vsel %vm336_vm0, %v6359_v59, 0.0  ;;  %v6396_v21 = vsel %vm336_vm0, %v6360_v57, 0.0  ;;  %v6363_v26 = vmul.f32 %v11476_v61, %v11476_v61 }
 0xb1f   : > { %v6398_v34 = vsel %vm336_vm0, %v6361_v30, 0.0  ;;  %v6364_v53 = vmul.f32 %v11479_v41, %v11479_v41  ;;  %v6400_v56 = vsel %vm336_vm0, %v6362_v18, 0.0  ;;  %v6365_v14 = vmul.f32 %v11482_v55, %v11482_v55 }
 0xb20   : > { %v6391_v38 = vadd.f32 %v6390_v63, %v6389_v15  ;;  %v6402_v45 = vsel %vm336_vm0, %v6363_v26, 0.0  ;;  %v6366_v22 = vmul.f32 %v11485_v47, %v11485_v47  ;;  %v6367_v16 = vmul.f32 %v11488_v40, %v11488_v40 }
 0xb21   : > { %v6404_v36 = vsel %vm336_vm0, %v6364_v53, 0.0  ;;  %v6406_v62 = vsel %vm336_vm0, %v6365_v14, 0.0  ;;  %v6368_v9 = vmul.f32 %v11491_v12, %v11491_v12  ;;  %v6369_v54 = vmul.f32 %v11494_v46, %v11494_v46 }
 0xb22   : > { %v6393_v37 = vadd.f32 %v6392_v17, %v6391_v38  ;;  %v6408_v49 = vsel %vm336_vm0, %v6366_v22, 0.0  ;;  %v6410_v15 = vsel %vm336_vm0, %v6367_v16, 0.0  ;;  %v6370_v63 = vmul.f32 %v11497_v44, %v11497_v44 }
 0xb23   : > { %v6412_v38 = vsel %vm336_vm0, %v6368_v9, 0.0  ;;  %v6371_v17 = vmul.f32 %v11500_v8, %v11500_v8 }
 0xb24   : > { %v6395_v27 = vadd.f32 %v6394_v0, %v6393_v37  ;;  %v6414_v37 = vsel %vm336_vm0, %v6369_v54, 0.0  ;;  %v6372_v0 = vmul.f32 %v11503_v24, %v11503_v24 }
 0xb26   : > { %v6397_v52 = vadd.f32 %v6396_v21, %v6395_v27  ;;  %v6416_v27 = vsel %vm336_vm0, %v6370_v63, 0.0  ;;  %v6373_v21 = vmul.f32 %v11506_v42, %v11506_v42 }
 0xb28   : > { %v6399_v35 = vadd.f32 %v6398_v34, %v6397_v52  ;;  %v6418_v52 = vsel %vm336_vm0, %v6371_v17, 0.0  ;;  %v6374_v34 = vmul.f32 %v11509_v20, %v11509_v20 }
 0xb2a   : > { %v6401_v58 = vadd.f32 %v6400_v56, %v6399_v35  ;;  %v6420_v35 = vsel %vm336_vm0, %v6372_v0, 0.0  ;;  %v6375_v56 = vmul.f32 %v11511_v33, %v11511_v33 }
 0xb2c   : > { %v6403_v19 = vadd.f32 %v6402_v45, %v6401_v58  ;;  %v6422_v58 = vsel %vm336_vm0, %v6373_v21, 0.0  ;;  %v6376_v45 = vmul.f32 %v11514_v23, %v11514_v23 }
 0xb2e   : > { %v6405_v32 = vadd.f32 %v6404_v36, %v6403_v19  ;;  %v6424_v19 = vsel %vm336_vm0, %v6374_v34, 0.0  ;;  %v6377_v36 = vmul.f32 %v11516_v50, %v11516_v50 }
 0xb30   : > { %v6407_v4 = vadd.f32 %v6406_v62, %v6405_v32  ;;  %v6426_v32 = vsel %vm336_vm0, %v6375_v56, 0.0  ;;  %v6378_v62 = vmul.f32 %v11518_v2, %v11518_v2 }
 0xb32   : > { %v6409_v7 = vadd.f32 %v6408_v49, %v6407_v4  ;;  %v6428_v4 = vsel %vm336_vm0, %v6376_v45, 0.0  ;;  %v6379_v49 = vmul.f32 %v11520_v3, %v11520_v3 }
 0xb34   : > { %v6411_v59 = vadd.f32 %v6410_v15, %v6409_v7  ;;  %v6430_v7 = vsel %vm336_vm0, %v6377_v36, 0.0  ;;  %v6380_v15 = vmul.f32 %v11522_v1, %v11522_v1 }
 0xb36   : > { %v6413_v57 = vadd.f32 %v6412_v38, %v6411_v59  ;;  %v6432_v59 = vsel %vm336_vm0, %v6378_v62, 0.0  ;;  %v6381_v38 = vmul.f32 %v11524_v31, %v11524_v31 }
 0xb38   : > { %v6415_v30 = vadd.f32 %v6414_v37, %v6413_v57  ;;  %v6434_v57 = vsel %vm336_vm0, %v6379_v49, 0.0  ;;  %v6382_v37 = vmul.f32 %v11526_v39, %v11526_v39 }
 0xb3a   : > { %v6417_v18 = vadd.f32 %v6416_v27, %v6415_v30  ;;  %v6436_v30 = vsel %vm336_vm0, %v6380_v15, 0.0  ;;  %v6383_v27 = vmul.f32 %v11528_v51, %v11528_v51 }
 0xb3c   : > { %v6419_v26 = vadd.f32 %v6418_v52, %v6417_v18  ;;  %v6438_v18 = vsel %vm336_vm0, %v6381_v38, 0.0  ;;  %v6384_v52 = vmul.f32 %v11530_v29, %v11530_v29 }
 0xb3e   : > { %v6421_v53 = vadd.f32 %v6420_v35, %v6419_v26  ;;  %v6440_v26 = vsel %vm336_vm0, %v6382_v37, 0.0  ;;  %v6385_v35 = vmul.f32 %v11532_v11, %v11532_v11 }
 0xb40   : > { %v6423_v14 = vadd.f32 %v6422_v58, %v6421_v53  ;;  %v6442_v53 = vsel %vm336_vm0, %v6383_v27, 0.0  ;;  %v6386_v58 = vmul.f32 %v11534_v48, %v11534_v48 }
 0xb42   : > { %v6425_v22 = vadd.f32 %v6424_v19, %v6423_v14  ;;  %v6444_v14 = vsel %vm336_vm0, %v6384_v52, 0.0  ;;  %v6446_v19 = vsel %vm336_vm0, %v6385_v35, 0.0  ;;  %v6448_v36 = vsel %vm336_vm0, %v6386_v58, 0.0 }
 0xb44   : > { %v6427_v16 = vadd.f32 %v6426_v32, %v6425_v22 }
 0xb46   : > { %v6429_v9 = vadd.f32 %v6428_v4, %v6427_v16 }
 0xb48   : > { %v6431_v54 = vadd.f32 %v6430_v7, %v6429_v9 }
 0xb4a   : > { %v6433_v63 = vadd.f32 %v6432_v59, %v6431_v54 }
 0xb4c   : > { %v6435_v17 = vadd.f32 %v6434_v57, %v6433_v63 }
 0xb4e   : > { %v6437_v0 = vadd.f32 %v6436_v30, %v6435_v17 }
 0xb50   : > { %v6439_v21 = vadd.f32 %v6438_v18, %v6437_v0 }
 0xb52   : > { %v6441_v34 = vadd.f32 %v6440_v26, %v6439_v21 }
 0xb54   : > { %v6443_v56 = vadd.f32 %v6442_v53, %v6441_v34 }
 0xb56   : > { %v6445_v45 = vadd.f32 %v6444_v14, %v6443_v56 }
 0xb58   : > { %v6447_v22 = vadd.f32 %v6446_v19, %v6445_v45 }
 0xb5a   : > { %v6449_v32 = vadd.f32 %v6448_v36, %v6447_v22 }
 0xb5c   : > { %v6450_v16 = vrot.slane %v6449_v32, 4 }
 0xb5e   : > { %v6451_v62 = vadd.f32 %v6450_v16, %v6449_v32 }
 0xb60   : > { %v6452_v4 = vrot.slane %v6451_v62, 2 }
 0xb62   : > { %v6453_v9 = vadd.f32 %v6452_v4, %v6451_v62 }
 0xb64   : > { %v6454_v49 = vrot.slane %v6453_v9, 1 }
 0xb66   : > { %v6455_v7 = vadd.f32 %v6454_v49, %v6453_v9 }
 0xb68   : > { %v6456_v54 = vmul.f32 0.00390625, %v6455_v7 }
 0xb6a   : > { %v6457_v15 = vadd.f32 1e-05, %v6456_v54 }
 0xb6c   : > { %7102 = vrsqrt.f32 %v6457_v15 }
 0xb76   : > { %v7103_v59 = vpop.eup %7102 }
 0xb77   : > { %v6459_v63 = vmul.f32 %v7103_v59, %v11452_v5  ;;  %v6460_v38 = vmul.f32 %v7103_v59, %v11455_v6  ;;  %v6461_v57 = vmul.f32 %v7103_v59, %v11458_v28  ;;  %v6462_v17 = vmul.f32 %v7103_v59, %v11461_v25 }
 0xb78   : > { %v6463_v37 = vmul.f32 %v7103_v59, %v11464_v13  ;;  %v6464_v30 = vmul.f32 %v7103_v59, %v11467_v60  ;;  %v6465_v0 = vmul.f32 %v7103_v59, %v11470_v43  ;;  %v6466_v27 = vmul.f32 %v7103_v59, %v11473_v10 }
 0xb79   : > { %v6467_v5 = vmul.f32 %v7103_v59, %v11476_v61  ;;  %v6468_v6 = vmul.f32 %v7103_v59, %v11479_v41  ;;  %v6469_v28 = vmul.f32 %v7103_v59, %v11482_v55  ;;  %v6470_v25 = vmul.f32 %v7103_v59, %v11485_v47  ;;  %6491 = vst.msk [vmem:[%s11636_s30] sm:$0xff] %vm336_vm0, %v6459_v63 }
 0xb7a   : > { %6492 = vst.msk [vmem:[%s11636_s30 + $0x8] sm:$0xff] %vm336_vm0, %v6460_v38  ;;  %6493 = vst.msk [vmem:[%s11636_s30 + $0x10] sm:$0xff] %vm336_vm0, %v6461_v57  ;;  %v6471_v13 = vmul.f32 %v7103_v59, %v11488_v40  ;;  %v6472_v60 = vmul.f32 %v7103_v59, %v11491_v12  ;;  %v6473_v43 = vmul.f32 %v7103_v59, %v11494_v46 }
 0xb7b   : > { %6494 = vst.msk [vmem:[%s11636_s30 + $0x18] sm:$0xff] %vm336_vm0, %v6462_v17  ;;  %v6474_v10 = vmul.f32 %v7103_v59, %v11497_v44  ;;  %6495 = vst.msk [vmem:[%s11636_s30 + $0x20] sm:$0xff] %vm336_vm0, %v6463_v37  ;;  %v6475_v61 = vmul.f32 %v7103_v59, %v11500_v8  ;;  %v6476_v41 = vmul.f32 %v7103_v59, %v11503_v24 }
 0xb7c   : > { %6496 = vst.msk [vmem:[%s11636_s30 + $0x28] sm:$0xff] %vm336_vm0, %v6464_v30  ;;  %6497 = vst.msk [vmem:[%s11636_s30 + $0x30] sm:$0xff] %vm336_vm0, %v6465_v0  ;;  %v6477_v55 = vmul.f32 %v7103_v59, %v11506_v42  ;;  %v6478_v47 = vmul.f32 %v7103_v59, %v11509_v20  ;;  %v6479_v40 = vmul.f32 %v7103_v59, %v11511_v33 }
 0xb7d   : > { %6498 = vst.msk [vmem:[%s11636_s30 + $0x38] sm:$0xff] %vm336_vm0, %v6466_v27  ;;  %6499 = vst.msk [vmem:[%s11636_s30 + $0x40] sm:$0xff] %vm336_vm0, %v6467_v5  ;;  %v6480_v12 = vmul.f32 %v7103_v59, %v11514_v23  ;;  %v6481_v46 = vmul.f32 %v7103_v59, %v11516_v50  ;;  %v6482_v44 = vmul.f32 %v7103_v59, %v11518_v2 }
 0xb7e   : > { %6500 = vst.msk [vmem:[%s11636_s30 + $0x48] sm:$0xff] %vm336_vm0, %v6468_v6  ;;  %6501 = vst.msk [vmem:[%s11636_s30 + $0x50] sm:$0xff] %vm336_vm0, %v6469_v28  ;;  %v6483_v8 = vmul.f32 %v7103_v59, %v11520_v3  ;;  %v6484_v24 = vmul.f32 %v7103_v59, %v11522_v1  ;;  %v6485_v42 = vmul.f32 %v7103_v59, %v11524_v31 }
 0xb7f   : > { %6502 = vst.msk [vmem:[%s11636_s30 + $0x58] sm:$0xff] %vm336_vm0, %v6470_v25  ;;  %6503 = vst.msk [vmem:[%s11636_s30 + $0x60] sm:$0xff] %vm336_vm0, %v6471_v13  ;;  %v6486_v20 = vmul.f32 %v7103_v59, %v11526_v39  ;;  %v6487_v33 = vmul.f32 %v7103_v59, %v11528_v51  ;;  %v6488_v23 = vmul.f32 %v7103_v59, %v11530_v29 }
 0xb80   : > { %6504 = vst.msk [vmem:[%s11636_s30 + $0x68] sm:$0xff] %vm336_vm0, %v6472_v60  ;;  %6505 = vst.msk [vmem:[%s11636_s30 + $0x70] sm:$0xff] %vm336_vm0, %v6473_v43  ;;  %v6489_v50 = vmul.f32 %v7103_v59, %v11532_v11  ;;  %v6490_v2 = vmul.f32 %v7103_v59, %v11534_v48 }
 0xb81   : > { %6506 = vst.msk [vmem:[%s11636_s30 + $0x78] sm:$0xff] %vm336_vm0, %v6474_v10  ;;  %6507 = vst.msk [vmem:[%s11636_s30 + $0x80] sm:$0xff] %vm336_vm0, %v6475_v61 }
 0xb82   : > { %6508 = vst.msk [vmem:[%s11636_s30 + $0x88] sm:$0xff] %vm336_vm0, %v6476_v41  ;;  %6509 = vst.msk [vmem:[%s11636_s30 + $0x90] sm:$0xff] %vm336_vm0, %v6477_v55 }
 0xb83   : > { %6510 = vst.msk [vmem:[%s11636_s30 + $0x98] sm:$0xff] %vm336_vm0, %v6478_v47  ;;  %6511 = vst.msk [vmem:[%s11636_s30 + $0xa0] sm:$0xff] %vm336_vm0, %v6479_v40 }
 0xb84   : > { %6512 = vst.msk [vmem:[%s11636_s30 + $0xa8] sm:$0xff] %vm336_vm0, %v6480_v12  ;;  %6513 = vst.msk [vmem:[%s11636_s30 + $0xb0] sm:$0xff] %vm336_vm0, %v6481_v46 }
 0xb85   : > { %6514 = vst.msk [vmem:[%s11636_s30 + $0xb8] sm:$0xff] %vm336_vm0, %v6482_v44  ;;  %6515 = vst.msk [vmem:[%s11636_s30 + $0xc0] sm:$0xff] %vm336_vm0, %v6483_v8 }
 0xb86   : > { %6516 = vst.msk [vmem:[%s11636_s30 + $0xc8] sm:$0xff] %vm336_vm0, %v6484_v24  ;;  %6517 = vst.msk [vmem:[%s11636_s30 + $0xd0] sm:$0xff] %vm336_vm0, %v6485_v42 }
 0xb87   : > { %6518 = vst.msk [vmem:[%s11636_s30 + $0xd8] sm:$0xff] %vm336_vm0, %v6486_v20  ;;  %6519 = vst.msk [vmem:[%s11636_s30 + $0xe0] sm:$0xff] %vm336_vm0, %v6487_v33 }
 0xb88   : > { %6520 = vst.msk [vmem:[%s11636_s30 + $0xe8] sm:$0xff] %vm336_vm0, %v6488_v23  ;;  %6521 = vst.msk [vmem:[%s11636_s30 + $0xf0] sm:$0xff] %vm336_vm0, %v6489_v50 }
 0xb89   : > { %6522 = vst.msk [vmem:[%s11636_s30 + $0xf8] sm:$0xff] %vm336_vm0, %v6490_v2 }
 0xb8a PF: > { %s16_s21 = sadd.s32 1, %s7120_s21  }
 0xb8b   : > { %p13_p4 = scmp.ge.s32.totalorder %s16_s21, 4  }
 0xb8d   :  { %15 = sbr.rel (!%p13_p4) target bundleno = 1 (0x1), region = 81 }

</bundles_post_ra>
